<compile_context>
chip_gen: v6e
topology: v6e:2x2x1
jax: 0.10.0
libtpu: 0.0.40
codegen_flags: <defaults>
</compile_context>

<pallas_src>
import functools
import numpy as np

import jax
import jax.numpy as jnp
from jax.experimental import pallas as pl
from jax.experimental.pallas import tpu as pltpu


# ----------------------------------------------------------------------------
# Fused 3 x (conv3x3 + ReLU) Pallas kernel — one image per grid step
# ----------------------------------------------------------------------------
def _fused_conv3_kernel(x_ref, w0_ref, b0_ref, w1_ref, b1_ref, w2t_ref, b2t_ref,
                        o_ref, pad_a, pad_b, *, H, W):
    """Computes relu(conv(relu(conv(relu(conv(x)))))) for one NHWC image.

    x_ref  : (H, W, Cin)      bf16  unpadded input slab for image n
    w0_ref : (9*Cin, C)       bf16  HWIO weights flattened over (kh, kw, ci)
    w1_ref : (9*C,   C)       bf16
    w2t_ref: (C, 9*C)         bf16  layer-2 weights pre-transposed
    b0,b1  : (1, C)           f32
    b2t    : (C, 1)           f32
    o_ref  : (C, H*W)         f32   lane-dense output (reshaped to NCHW outside)
    pad_a  : VMEM (H+2, W+2, Cin) f32 scratch (padded layer-0 input)
    pad_b  : VMEM (H+2, W+2, C)   f32 scratch (padded layer-1/2 input)
    """

    def im2col_bf16(pad_ref):
        # 9 shifted (H, W, C) tap windows -> a single (H*W, 9*C) matmul operand,
        # so the whole layer is one MXU dot with K = 9*C instead of 9 tiny dots.
        C = pad_ref.shape[-1]
        taps = [pad_ref[kh:kh + H, kw:kw + W, :]
                for kh in range(3) for kw in range(3)]
        patches = jnp.concatenate(taps, axis=-1)          # (H, W, 9*C) f32
        return patches.reshape(H * W, 9 * C).astype(jnp.bfloat16)

    C_out = w0_ref.shape[-1]

    # ---- layer 0: zero-pad inside the kernel (no jnp.pad HBM round-trip) ----
    pad_a[...] = jnp.zeros_like(pad_a)
    pad_a[1:1 + H, 1:1 + W, :] = x_ref[...].astype(jnp.float32)
    act0 = jnp.maximum(
        jnp.dot(im2col_bf16(pad_a), w0_ref[...],
                preferred_element_type=jnp.float32) + b0_ref[...], 0.0)

    # ---- layer 1: intermediate feature map stays in VMEM ----
    pad_b[...] = jnp.zeros_like(pad_b)
    pad_b[1:1 + H, 1:1 + W, :] = act0.reshape(H, W, C_out)
    act1 = jnp.maximum(
        jnp.dot(im2col_bf16(pad_b), w1_ref[...],
                preferred_element_type=jnp.float32) + b1_ref[...], 0.0)

    # ---- layer 2: reuse pad_b (its border is still zero); lane-dense store ----
    pad_b[1:1 + H, 1:1 + W, :] = act1.reshape(H, W, C_out)
    # (C, 9C) x (H*W, 9C) contracted on the last dims -> (C, H*W): the store is
    # 256 lanes wide (unmasked vst) instead of Cout=8 masked lanes.
    acc2 = jax.lax.dot_general(
        w2t_ref[...], im2col_bf16(pad_b),
        dimension_numbers=(((1,), (1,)), ((), ())),
        preferred_element_type=jnp.float32)
    o_ref[...] = jnp.maximum(acc2 + b2t_ref[...], 0.0)


def fused_conv3_pallas(x_nhwc, params):
    """x_nhwc: (N, H, W, Cin) f32 -> (N, Cout, H, W) f32 (NCHW)."""
    N, H, W, Cin = x_nhwc.shape
    Cout = params["w0"].shape[-1]
    Hp, Wp = H + 2, W + 2

    # bf16 at the pallas_call boundary (half the HBM/DMA bytes, bf16 MXU path);
    # accumulation inside the kernel is f32.
    x_bf = x_nhwc.astype(jnp.bfloat16)
    w0 = params["w0"].astype(jnp.bfloat16).reshape(9 * Cin, Cout)
    w1 = params["w1"].astype(jnp.bfloat16).reshape(9 * Cout, Cout)
    w2t = params["w2"].astype(jnp.bfloat16).reshape(9 * Cout, Cout).T  # (Cout, 9*Cout)
    b0 = params["b0"].astype(jnp.float32).reshape(1, Cout)
    b1 = params["b1"].astype(jnp.float32).reshape(1, Cout)
    b2t = params["b2"].astype(jnp.float32).reshape(Cout, 1)

    kernel = functools.partial(_fused_conv3_kernel, H=H, W=W)
    out = pl.pallas_call(
        kernel,
        out_shape=jax.ShapeDtypeStruct((N, Cout, H * W), jnp.float32),
        grid=(N,),
        in_specs=[
            pl.BlockSpec((pl.Squeezed(), H, W, Cin), lambda n: (n, 0, 0, 0)),
            pl.BlockSpec((9 * Cin, Cout), lambda n: (0, 0)),   # constant index_map:
            pl.BlockSpec((1, Cout), lambda n: (0, 0)),         # weights/bias stay
            pl.BlockSpec((9 * Cout, Cout), lambda n: (0, 0)),  # resident across the
            pl.BlockSpec((1, Cout), lambda n: (0, 0)),         # batch grid steps.
            pl.BlockSpec((Cout, 9 * Cout), lambda n: (0, 0)),
            pl.BlockSpec((Cout, 1), lambda n: (0, 0)),
        ],
        out_specs=pl.BlockSpec((pl.Squeezed(), Cout, H * W), lambda n: (n, 0, 0)),
        scratch_shapes=[
            pltpu.VMEM((Hp, Wp, Cin), jnp.float32),
            pltpu.VMEM((Hp, Wp, Cout), jnp.float32),
        ],
        compiler_params=pltpu.CompilerParams(
            dimension_semantics=("parallel",),       # v7x: shard batch over 2 TCs
            vmem_limit_bytes=32 * 1024 * 1024,       # explicit budget, fits v7x VMEM
        ),
    )(x_bf, w0, b0, w1, b1, w2t, b2t)

    return out.reshape(N, Cout, H, W)                # NCHW, f32


# ----------------------------------------------------------------------------
# Attention branches — plain JAX (shared by the Pallas and reference paths).
# Per the perf review these shapes are pathological for the MXU, so they are
# intentionally NOT Pallas kernels.
# ----------------------------------------------------------------------------
def _channel_attention(fm, wc1, bc1, wc2, bc2):
    # fm: (N, C, H, W); mirrors cat([adaptive_avg_pool2d, adaptive_max_pool2d], dim=1)
    avg = jnp.mean(fm, axis=(2, 3))                          # (N, C)
    mx = jnp.max(fm, axis=(2, 3))                            # (N, C)
    pool = jnp.concatenate([avg, mx], axis=-1)               # (N, 2C)
    c_mid = wc1.shape[-1]
    a = jnp.maximum(pool @ wc1.reshape(-1, c_mid) + bc1, 0.0)    # 1x1 conv == matmul
    a = jax.nn.sigmoid(a @ wc2.reshape(c_mid, -1) + bc2)
    return fm * a[:, :, None, None]


def _spatial_attention(fm, ws, bs):
    # fm: (N, C, H, W); 7x7 conv with Cin=2, Cout=1 left to XLA.
    mean_c = jnp.mean(fm, axis=1, keepdims=True)
    max_c = jnp.max(fm, axis=1, keepdims=True)
    pool = jnp.concatenate([mean_c, max_c], axis=1)          # (N, 2, H, W)
    a = jax.lax.conv_general_dilated(
        pool, ws, window_strides=(1, 1), padding=((3, 3), (3, 3)),
        dimension_numbers=("NCHW", "HWIO", "NCHW"))
    a = jax.nn.sigmoid(a + bs.reshape(1, -1, 1, 1))
    return fm * a


# ----------------------------------------------------------------------------
# Basic.forward — Pallas conv stack + JAX attention glue
# ----------------------------------------------------------------------------
def basic_forward(x_nchw, params, *, channel_att=False, spatial_att=False):
    x_nhwc = jnp.transpose(x_nchw, (0, 2, 3, 1))             # NCHW -> NHWC
    fm = fused_conv3_pallas(x_nhwc, params)                  # (N, C, H, W)
    if channel_att:
        fm = _channel_attention(fm, params["wc1"], params["bc1"],
                                params["wc2"], params["bc2"])
    if spatial_att:
        fm = _spatial_attention(fm, params["ws"], params["bs"])
    return fm                                                # NCHW


# ----------------------------------------------------------------------------
# Pure-JAX reference mirroring the kernel arithmetic (bf16 in / f32 accumulate)
# ----------------------------------------------------------------------------
def _conv_stack_ref(x_nhwc, params):
    fm = x_nhwc.astype(jnp.bfloat16)
    for i in range(3):
        w = params[f"w{i}"].astype(jnp.bfloat16)
        out = jax.lax.conv_general_dilated(
            fm, w, window_strides=(1, 1), padding=((1, 1), (1, 1)),
            dimension_numbers=("NHWC", "HWIO", "NHWC"),
            preferred_element_type=jnp.float32)
        out = jnp.maximum(out + params[f"b{i}"].reshape(1, 1, 1, -1), 0.0)
        fm = out.astype(jnp.bfloat16) if i < 2 else out
    return jnp.transpose(fm, (0, 3, 1, 2))                   # NCHW, f32


def basic_forward_ref(x_nchw, params, *, channel_att=False, spatial_att=False):
    x_nhwc = jnp.transpose(x_nchw, (0, 2, 3, 1))
    fm = _conv_stack_ref(x_nhwc, params)
    if channel_att:
        fm = _channel_attention(fm, params["wc1"], params["bc1"],
                                params["wc2"], params["bc2"])
    if spatial_att:
        fm = _spatial_attention(fm, params["ws"], params["bs"])
    return fm


# ----------------------------------------------------------------------------
# Deterministic parameter init (shapes follow Basic.__init__)
# ----------------------------------------------------------------------------
def init_params(key, in_ch, out_ch, g=4, channel_att=False, spatial_att=False):
    def _conv_init(k, kh, kw, cin, cout):
        kw_, kb_ = jax.random.split(k)
        std = 1.0 / np.sqrt(kh * kw * cin)
        w = jax.random.normal(kw_, (kh, kw, cin, cout), jnp.float32) * std  # HWIO
        b = jax.random.normal(kb_, (cout,), jnp.float32) * 0.01
        return w, b

    keys = jax.random.split(key, 8)
    params = {}
    params["w0"], params["b0"] = _conv_init(keys[0], 3, 3, in_ch, out_ch)
    params["w1"], params["b1"] = _conv_init(keys[1], 3, 3, out_ch, out_ch)
    params["w2"], params["b2"] = _conv_init(keys[2], 3, 3, out_ch, out_ch)
    if channel_att:
        params["wc1"], params["bc1"] = _conv_init(keys[3], 1, 1, 2 * out_ch, out_ch // g)
        params["wc2"], params["bc2"] = _conv_init(keys[4], 1, 1, out_ch // g, out_ch)
    if spatial_att:
        params["ws"], params["bs"] = _conv_init(keys[5], 7, 7, 2, 1)
    return params


if __name__ == "__main__":
    # Small, module-consistent shapes: N=2, in_ch=4, out_ch=8, H=W=16, g=4.
    N, IN_CH, OUT_CH, H, W, G = 2, 4, 8, 16, 16, 4
    CHANNEL_ATT, SPATIAL_ATT = True, True   # exercise all branches of Basic.forward

    key = jax.random.PRNGKey(0)
    kx, kp = jax.random.split(key)
    x = jax.random.normal(kx, (N, IN_CH, H, W), jnp.float32)     # NCHW, like PyTorch
    params = init_params(kp, IN_CH, OUT_CH, g=G,
                         channel_att=CHANNEL_ATT, spatial_att=SPATIAL_ATT)

    fwd = jax.jit(functools.partial(basic_forward,
                                    channel_att=CHANNEL_ATT, spatial_att=SPATIAL_ATT))
    out = jax.block_until_ready(fwd(x, params))

    # Correctness check against a pure-JAX reference with matched arithmetic
    # (bf16 operands, f32 accumulation), so the tolerance can stay tight.
    ref = jax.block_until_ready(
        basic_forward_ref(x, params, channel_att=CHANNEL_ATT, spatial_att=SPATIAL_ATT))
    assert out.shape == (N, OUT_CH, H, W), out.shape
    max_diff = float(jnp.max(jnp.abs(out - ref)))
    assert max_diff < 1e-2, f"mismatch vs reference: {max_diff}"

    print("KERNEL_OK")
</pallas_src>

<mosaic_0001>
module attributes {stable_mosaic.version = 11 : i64} {
  func.func @_fused_conv3_kernel(%arg0: i32, %arg1: memref<1x16x16x4xbf16, #tpu.memory_space<vmem>>, %arg2: memref<36x8xbf16, #tpu.memory_space<vmem>>, %arg3: memref<1x8xf32, #tpu.memory_space<vmem>>, %arg4: memref<72x8xbf16, #tpu.memory_space<vmem>>, %arg5: memref<1x8xf32, #tpu.memory_space<vmem>>, %arg6: memref<8x72xbf16, #tpu.memory_space<vmem>>, %arg7: memref<8x1xf32, #tpu.memory_space<vmem>>, %arg8: memref<1x8x256xf32, #tpu.memory_space<vmem>>, %arg9: memref<18x18x4xf32, #tpu.memory_space<vmem>>, %arg10: memref<18x18x8xf32, #tpu.memory_space<vmem>>) attributes {dimension_semantics = [#tpu.dimension_semantics<parallel>], iteration_bounds = array<i64: 2>, scalar_prefetch = 0 : i64, scratch_operands = 2 : i64, tpu.core_type = #tpu.core_type<tc>, window_params = [{transform_indices = @transform_0, window_bounds = array<i64: 1, 16, 16, 4>}, {pipeline_mode = #tpu.pipeline_mode<synchronous>, transform_indices = @transform_1, window_bounds = array<i64: 36, 8>}, {pipeline_mode = #tpu.pipeline_mode<synchronous>, transform_indices = @transform_2, window_bounds = array<i64: 1, 8>}, {pipeline_mode = #tpu.pipeline_mode<synchronous>, transform_indices = @transform_3, window_bounds = array<i64: 72, 8>}, {pipeline_mode = #tpu.pipeline_mode<synchronous>, transform_indices = @transform_4, window_bounds = array<i64: 1, 8>}, {pipeline_mode = #tpu.pipeline_mode<synchronous>, transform_indices = @transform_5, window_bounds = array<i64: 8, 72>}, {pipeline_mode = #tpu.pipeline_mode<synchronous>, transform_indices = @transform_6, window_bounds = array<i64: 8, 1>}, {transform_indices = @transform_7, window_bounds = array<i64: 1, 8, 256>}]} {
    %cst = arith.constant 0.000000e+00 : f32
    %0 = vector.broadcast %cst : f32 to vector<18x18x4xf32>
    %c0 = arith.constant 0 : index
    %c0_0 = arith.constant 0 : index
    %c0_1 = arith.constant 0 : index
    %1 = vector.load %arg9[%c0, %c0_0, %c0_1] : memref<18x18x4xf32, #tpu.memory_space<vmem>>, vector<18x18x4xf32>
    tpu.vector_store %arg9[%c0, %c0_0, %c0_1], %0 {strides = array<i32>} : memref<18x18x4xf32, #tpu.memory_space<vmem>>, vector<18x18x4xf32>,
    %c0_2 = arith.constant 0 : index
    %c0_3 = arith.constant 0 : index
    %c0_4 = arith.constant 0 : index
    %c0_5 = arith.constant 0 : index
    %2 = vector.load %arg1[%c0_2, %c0_3, %c0_4, %c0_5] : memref<1x16x16x4xbf16, #tpu.memory_space<vmem>>, vector<1x16x16x4xbf16>
    %3 = vector.shape_cast %2 : vector<1x16x16x4xbf16> to vector<16x16x4xbf16>
    %4 = arith.extf %3 : vector<16x16x4xbf16> to vector<16x16x4xf32>
    %c1 = arith.constant 1 : index
    %c1_6 = arith.constant 1 : index
    %c0_7 = arith.constant 0 : index
    %5 = vector.load %arg9[%c1, %c1_6, %c0_7] : memref<18x18x4xf32, #tpu.memory_space<vmem>>, vector<16x16x4xf32>
    tpu.vector_store %arg9[%c1, %c1_6, %c0_7], %4 {strides = array<i32>} : memref<18x18x4xf32, #tpu.memory_space<vmem>>, vector<16x16x4xf32>,
    %c0_8 = arith.constant 0 : index
    %c0_9 = arith.constant 0 : index
    %c0_10 = arith.constant 0 : index
    %6 = vector.load %arg9[%c0_8, %c0_9, %c0_10] : memref<18x18x4xf32, #tpu.memory_space<vmem>>, vector<16x16x4xf32>
    %c0_11 = arith.constant 0 : index
    %c1_12 = arith.constant 1 : index
    %c0_13 = arith.constant 0 : index
    %7 = vector.load %arg9[%c0_11, %c1_12, %c0_13] : memref<18x18x4xf32, #tpu.memory_space<vmem>>, vector<16x16x4xf32>
    %c0_14 = arith.constant 0 : index
    %c2 = arith.constant 2 : index
    %c0_15 = arith.constant 0 : index
    %8 = vector.load %arg9[%c0_14, %c2, %c0_15] : memref<18x18x4xf32, #tpu.memory_space<vmem>>, vector<16x16x4xf32>
    %c1_16 = arith.constant 1 : index
    %c0_17 = arith.constant 0 : index
    %c0_18 = arith.constant 0 : index
    %9 = vector.load %arg9[%c1_16, %c0_17, %c0_18] : memref<18x18x4xf32, #tpu.memory_space<vmem>>, vector<16x16x4xf32>
    %c1_19 = arith.constant 1 : index
    %c1_20 = arith.constant 1 : index
    %c0_21 = arith.constant 0 : index
    %10 = vector.load %arg9[%c1_19, %c1_20, %c0_21] : memref<18x18x4xf32, #tpu.memory_space<vmem>>, vector<16x16x4xf32>
    %c1_22 = arith.constant 1 : index
    %c2_23 = arith.constant 2 : index
    %c0_24 = arith.constant 0 : index
    %11 = vector.load %arg9[%c1_22, %c2_23, %c0_24] : memref<18x18x4xf32, #tpu.memory_space<vmem>>, vector<16x16x4xf32>
    %c2_25 = arith.constant 2 : index
    %c0_26 = arith.constant 0 : index
    %c0_27 = arith.constant 0 : index
    %12 = vector.load %arg9[%c2_25, %c0_26, %c0_27] : memref<18x18x4xf32, #tpu.memory_space<vmem>>, vector<16x16x4xf32>
    %c2_28 = arith.constant 2 : index
    %c1_29 = arith.constant 1 : index
    %c0_30 = arith.constant 0 : index
    %13 = vector.load %arg9[%c2_28, %c1_29, %c0_30] : memref<18x18x4xf32, #tpu.memory_space<vmem>>, vector<16x16x4xf32>
    %c2_31 = arith.constant 2 : index
    %c2_32 = arith.constant 2 : index
    %c0_33 = arith.constant 0 : index
    %14 = vector.load %arg9[%c2_31, %c2_32, %c0_33] : memref<18x18x4xf32, #tpu.memory_space<vmem>>, vector<16x16x4xf32>
    %15 = tpu.concatenate %6, %7, %8, %9, %10, %11, %12, %13, %14 in 2 : vector<16x16x4xf32>, vector<16x16x4xf32>, vector<16x16x4xf32>, vector<16x16x4xf32>, vector<16x16x4xf32>, vector<16x16x4xf32>, vector<16x16x4xf32>, vector<16x16x4xf32>, vector<16x16x4xf32> -> vector<16x16x36xf32>
    %16 = vector.shape_cast %15 : vector<16x16x36xf32> to vector<256x36xf32>
    %17 = arith.truncf %16 : vector<256x36xf32> to vector<256x36xbf16>
    %c0_34 = arith.constant 0 : index
    %c0_35 = arith.constant 0 : index
    %18 = vector.load %arg2[%c0_34, %c0_35] : memref<36x8xbf16, #tpu.memory_space<vmem>>, vector<36x8xbf16>
    %cst_36 = arith.constant dense<0.000000e+00> : vector<256x8xf32>
    %19 = tpu.matmul %17, %18, %cst_36 {dimension_numbers = #tpu.dot_dimension_numbers<[1], [0], [0], [1], [0, 0, 1, 1], [], []>} : vector<256x36xbf16>, vector<36x8xbf16>, vector<256x8xf32> -> vector<256x8xf32>
    %c0_37 = arith.constant 0 : index
    %c0_38 = arith.constant 0 : index
    %20 = vector.load %arg3[%c0_37, %c0_38] : memref<1x8xf32, #tpu.memory_space<vmem>>, vector<1x8xf32>
    %21 = vector.broadcast %20 : vector<1x8xf32> to vector<256x8xf32>
    %22 = arith.addf %19, %21 : vector<256x8xf32>
    %cst_39 = arith.constant 0.000000e+00 : f32
    %23 = vector.broadcast %cst_39 : f32 to vector<256x8xf32>
    %24 = arith.maximumf %22, %23 : vector<256x8xf32>
    %cst_40 = arith.constant 0.000000e+00 : f32
    %25 = vector.broadcast %cst_40 : f32 to vector<18x18x8xf32>
    %c0_41 = arith.constant 0 : index
    %c0_42 = arith.constant 0 : index
    %c0_43 = arith.constant 0 : index
    %26 = vector.load %arg10[%c0_41, %c0_42, %c0_43] : memref<18x18x8xf32, #tpu.memory_space<vmem>>, vector<18x18x8xf32>
    tpu.vector_store %arg10[%c0_41, %c0_42, %c0_43], %25 {strides = array<i32>} : memref<18x18x8xf32, #tpu.memory_space<vmem>>, vector<18x18x8xf32>,
    %27 = vector.shape_cast %24 : vector<256x8xf32> to vector<16x16x8xf32>
    %c1_44 = arith.constant 1 : index
    %c1_45 = arith.constant 1 : index
    %c0_46 = arith.constant 0 : index
    %28 = vector.load %arg10[%c1_44, %c1_45, %c0_46] : memref<18x18x8xf32, #tpu.memory_space<vmem>>, vector<16x16x8xf32>
    tpu.vector_store %arg10[%c1_44, %c1_45, %c0_46], %27 {strides = array<i32>} : memref<18x18x8xf32, #tpu.memory_space<vmem>>, vector<16x16x8xf32>,
    %c0_47 = arith.constant 0 : index
    %c0_48 = arith.constant 0 : index
    %c0_49 = arith.constant 0 : index
    %29 = vector.load %arg10[%c0_47, %c0_48, %c0_49] : memref<18x18x8xf32, #tpu.memory_space<vmem>>, vector<16x16x8xf32>
    %c0_50 = arith.constant 0 : index
    %c1_51 = arith.constant 1 : index
    %c0_52 = arith.constant 0 : index
    %30 = vector.load %arg10[%c0_50, %c1_51, %c0_52] : memref<18x18x8xf32, #tpu.memory_space<vmem>>, vector<16x16x8xf32>
    %c0_53 = arith.constant 0 : index
    %c2_54 = arith.constant 2 : index
    %c0_55 = arith.constant 0 : index
    %31 = vector.load %arg10[%c0_53, %c2_54, %c0_55] : memref<18x18x8xf32, #tpu.memory_space<vmem>>, vector<16x16x8xf32>
    %c1_56 = arith.constant 1 : index
    %c0_57 = arith.constant 0 : index
    %c0_58 = arith.constant 0 : index
    %32 = vector.load %arg10[%c1_56, %c0_57, %c0_58] : memref<18x18x8xf32, #tpu.memory_space<vmem>>, vector<16x16x8xf32>
    %c1_59 = arith.constant 1 : index
    %c1_60 = arith.constant 1 : index
    %c0_61 = arith.constant 0 : index
    %33 = vector.load %arg10[%c1_59, %c1_60, %c0_61] : memref<18x18x8xf32, #tpu.memory_space<vmem>>, vector<16x16x8xf32>
    %c1_62 = arith.constant 1 : index
    %c2_63 = arith.constant 2 : index
    %c0_64 = arith.constant 0 : index
    %34 = vector.load %arg10[%c1_62, %c2_63, %c0_64] : memref<18x18x8xf32, #tpu.memory_space<vmem>>, vector<16x16x8xf32>
    %c2_65 = arith.constant 2 : index
    %c0_66 = arith.constant 0 : index
    %c0_67 = arith.constant 0 : index
    %35 = vector.load %arg10[%c2_65, %c0_66, %c0_67] : memref<18x18x8xf32, #tpu.memory_space<vmem>>, vector<16x16x8xf32>
    %c2_68 = arith.constant 2 : index
    %c1_69 = arith.constant 1 : index
    %c0_70 = arith.constant 0 : index
    %36 = vector.load %arg10[%c2_68, %c1_69, %c0_70] : memref<18x18x8xf32, #tpu.memory_space<vmem>>, vector<16x16x8xf32>
    %c2_71 = arith.constant 2 : index
    %c2_72 = arith.constant 2 : index
    %c0_73 = arith.constant 0 : index
    %37 = vector.load %arg10[%c2_71, %c2_72, %c0_73] : memref<18x18x8xf32, #tpu.memory_space<vmem>>, vector<16x16x8xf32>
    %38 = tpu.concatenate %29, %30, %31, %32, %33, %34, %35, %36, %37 in 2 : vector<16x16x8xf32>, vector<16x16x8xf32>, vector<16x16x8xf32>, vector<16x16x8xf32>, vector<16x16x8xf32>, vector<16x16x8xf32>, vector<16x16x8xf32>, vector<16x16x8xf32>, vector<16x16x8xf32> -> vector<16x16x72xf32>
    %39 = vector.shape_cast %38 : vector<16x16x72xf32> to vector<256x72xf32>
    %40 = arith.truncf %39 : vector<256x72xf32> to vector<256x72xbf16>
    %c0_74 = arith.constant 0 : index
    %c0_75 = arith.constant 0 : index
    %41 = vector.load %arg4[%c0_74, %c0_75] : memref<72x8xbf16, #tpu.memory_space<vmem>>, vector<72x8xbf16>
    %cst_76 = arith.constant dense<0.000000e+00> : vector<256x8xf32>
    %42 = tpu.matmul %40, %41, %cst_76 {dimension_numbers = #tpu.dot_dimension_numbers<[1], [0], [0], [1], [0, 0, 1, 1], [], []>} : vector<256x72xbf16>, vector<72x8xbf16>, vector<256x8xf32> -> vector<256x8xf32>
    %c0_77 = arith.constant 0 : index
    %c0_78 = arith.constant 0 : index
    %43 = vector.load %arg5[%c0_77, %c0_78] : memref<1x8xf32, #tpu.memory_space<vmem>>, vector<1x8xf32>
    %44 = vector.broadcast %43 : vector<1x8xf32> to vector<256x8xf32>
    %45 = arith.addf %42, %44 : vector<256x8xf32>
    %cst_79 = arith.constant 0.000000e+00 : f32
    %46 = vector.broadcast %cst_79 : f32 to vector<256x8xf32>
    %47 = arith.maximumf %45, %46 : vector<256x8xf32>
    %48 = vector.shape_cast %47 : vector<256x8xf32> to vector<16x16x8xf32>
    %c1_80 = arith.constant 1 : index
    %c1_81 = arith.constant 1 : index
    %c0_82 = arith.constant 0 : index
    %49 = vector.load %arg10[%c1_80, %c1_81, %c0_82] : memref<18x18x8xf32, #tpu.memory_space<vmem>>, vector<16x16x8xf32>
    tpu.vector_store %arg10[%c1_80, %c1_81, %c0_82], %48 {strides = array<i32>} : memref<18x18x8xf32, #tpu.memory_space<vmem>>, vector<16x16x8xf32>,
    %c0_83 = arith.constant 0 : index
    %c0_84 = arith.constant 0 : index
    %50 = vector.load %arg6[%c0_83, %c0_84] : memref<8x72xbf16, #tpu.memory_space<vmem>>, vector<8x72xbf16>
    %c0_85 = arith.constant 0 : index
    %c0_86 = arith.constant 0 : index
    %c0_87 = arith.constant 0 : index
    %51 = vector.load %arg10[%c0_85, %c0_86, %c0_87] : memref<18x18x8xf32, #tpu.memory_space<vmem>>, vector<16x16x8xf32>
    %c0_88 = arith.constant 0 : index
    %c1_89 = arith.constant 1 : index
    %c0_90 = arith.constant 0 : index
    %52 = vector.load %arg10[%c0_88, %c1_89, %c0_90] : memref<18x18x8xf32, #tpu.memory_space<vmem>>, vector<16x16x8xf32>
    %c0_91 = arith.constant 0 : index
    %c2_92 = arith.constant 2 : index
    %c0_93 = arith.constant 0 : index
    %53 = vector.load %arg10[%c0_91, %c2_92, %c0_93] : memref<18x18x8xf32, #tpu.memory_space<vmem>>, vector<16x16x8xf32>
    %c1_94 = arith.constant 1 : index
    %c0_95 = arith.constant 0 : index
    %c0_96 = arith.constant 0 : index
    %54 = vector.load %arg10[%c1_94, %c0_95, %c0_96] : memref<18x18x8xf32, #tpu.memory_space<vmem>>, vector<16x16x8xf32>
    %c1_97 = arith.constant 1 : index
    %c1_98 = arith.constant 1 : index
    %c0_99 = arith.constant 0 : index
    %55 = vector.load %arg10[%c1_97, %c1_98, %c0_99] : memref<18x18x8xf32, #tpu.memory_space<vmem>>, vector<16x16x8xf32>
    %c1_100 = arith.constant 1 : index
    %c2_101 = arith.constant 2 : index
    %c0_102 = arith.constant 0 : index
    %56 = vector.load %arg10[%c1_100, %c2_101, %c0_102] : memref<18x18x8xf32, #tpu.memory_space<vmem>>, vector<16x16x8xf32>
    %c2_103 = arith.constant 2 : index
    %c0_104 = arith.constant 0 : index
    %c0_105 = arith.constant 0 : index
    %57 = vector.load %arg10[%c2_103, %c0_104, %c0_105] : memref<18x18x8xf32, #tpu.memory_space<vmem>>, vector<16x16x8xf32>
    %c2_106 = arith.constant 2 : index
    %c1_107 = arith.constant 1 : index
    %c0_108 = arith.constant 0 : index
    %58 = vector.load %arg10[%c2_106, %c1_107, %c0_108] : memref<18x18x8xf32, #tpu.memory_space<vmem>>, vector<16x16x8xf32>
    %c2_109 = arith.constant 2 : index
    %c2_110 = arith.constant 2 : index
    %c0_111 = arith.constant 0 : index
    %59 = vector.load %arg10[%c2_109, %c2_110, %c0_111] : memref<18x18x8xf32, #tpu.memory_space<vmem>>, vector<16x16x8xf32>
    %60 = tpu.concatenate %51, %52, %53, %54, %55, %56, %57, %58, %59 in 2 : vector<16x16x8xf32>, vector<16x16x8xf32>, vector<16x16x8xf32>, vector<16x16x8xf32>, vector<16x16x8xf32>, vector<16x16x8xf32>, vector<16x16x8xf32>, vector<16x16x8xf32>, vector<16x16x8xf32> -> vector<16x16x72xf32>
    %61 = vector.shape_cast %60 : vector<16x16x72xf32> to vector<256x72xf32>
    %62 = arith.truncf %61 : vector<256x72xf32> to vector<256x72xbf16>
    %cst_112 = arith.constant dense<0.000000e+00> : vector<8x256xf32>
    %63 = tpu.matmul %50, %62, %cst_112 {dimension_numbers = #tpu.dot_dimension_numbers<[1], [1], [0], [0], [0, 0, 1, 0], [], []>} : vector<8x72xbf16>, vector<256x72xbf16>, vector<8x256xf32> -> vector<8x256xf32>
    %c0_113 = arith.constant 0 : index
    %c0_114 = arith.constant 0 : index
    %64 = vector.load %arg7[%c0_113, %c0_114] : memref<8x1xf32, #tpu.memory_space<vmem>>, vector<8x1xf32>
    %65 = vector.broadcast %64 : vector<8x1xf32> to vector<8x256xf32>
    %66 = arith.addf %63, %65 : vector<8x256xf32>
    %cst_115 = arith.constant 0.000000e+00 : f32
    %67 = vector.broadcast %cst_115 : f32 to vector<8x256xf32>
    %68 = arith.maximumf %66, %67 : vector<8x256xf32>
    %c0_116 = arith.constant 0 : index
    %c0_117 = arith.constant 0 : index
    %c0_118 = arith.constant 0 : index
    %69 = vector.load %arg8[%c0_116, %c0_117, %c0_118] : memref<1x8x256xf32, #tpu.memory_space<vmem>>, vector<1x8x256xf32>
    %70 = vector.shape_cast %69 : vector<1x8x256xf32> to vector<8x256xf32>
    %71 = vector.shape_cast %68 : vector<8x256xf32> to vector<1x8x256xf32>
    tpu.vector_store %arg8[%c0_116, %c0_117, %c0_118], %71 {strides = array<i32>} : memref<1x8x256xf32, #tpu.memory_space<vmem>>, vector<1x8x256xf32>,
    return
  }
  func.func @transform_0(%arg0: i32) -> (i32, i32, i32, i32) {
    %c0_i32 = arith.constant 0 : i32
    %c0_i32_0 = arith.constant 0 : i32
    %c0_i32_1 = arith.constant 0 : i32
    %c0_i32_2 = arith.constant 0 : i32
    return %arg0, %c0_i32, %c0_i32_0, %c0_i32_1 : i32, i32, i32, i32
  }
  func.func @transform_1(%arg0: i32) -> (i32, i32) {
    %c0_i32 = arith.constant 0 : i32
    %c0_i32_0 = arith.constant 0 : i32
    %c0_i32_1 = arith.constant 0 : i32
    return %c0_i32, %c0_i32_0 : i32, i32
  }
  func.func @transform_2(%arg0: i32) -> (i32, i32) {
    %c0_i32 = arith.constant 0 : i32
    %c0_i32_0 = arith.constant 0 : i32
    %c0_i32_1 = arith.constant 0 : i32
    return %c0_i32, %c0_i32_0 : i32, i32
  }
  func.func @transform_3(%arg0: i32) -> (i32, i32) {
    %c0_i32 = arith.constant 0 : i32
    %c0_i32_0 = arith.constant 0 : i32
    %c0_i32_1 = arith.constant 0 : i32
    return %c0_i32, %c0_i32_0 : i32, i32
  }
  func.func @transform_4(%arg0: i32) -> (i32, i32) {
    %c0_i32 = arith.constant 0 : i32
    %c0_i32_0 = arith.constant 0 : i32
    %c0_i32_1 = arith.constant 0 : i32
    return %c0_i32, %c0_i32_0 : i32, i32
  }
  func.func @transform_5(%arg0: i32) -> (i32, i32) {
    %c0_i32 = arith.constant 0 : i32
    %c0_i32_0 = arith.constant 0 : i32
    %c0_i32_1 = arith.constant 0 : i32
    return %c0_i32, %c0_i32_0 : i32, i32
  }
  func.func @transform_6(%arg0: i32) -> (i32, i32) {
    %c0_i32 = arith.constant 0 : i32
    %c0_i32_0 = arith.constant 0 : i32
    %c0_i32_1 = arith.constant 0 : i32
    return %c0_i32, %c0_i32_0 : i32, i32
  }
  func.func @transform_7(%arg0: i32) -> (i32, i32, i32) {
    %c0_i32 = arith.constant 0 : i32
    %c0_i32_0 = arith.constant 0 : i32
    %c0_i32_1 = arith.constant 0 : i32
    return %arg0, %c0_i32, %c0_i32_0 : i32, i32, i32
  }
}

</mosaic_0001>

<bundles_post_ra>
// kernel: basic_forward.1
= control target key start
LH: loop header
LB: loop body
LE: loop exit
PB: predicated region body
PF: predicated region fallthrough
CT: control target
= control target key end

     0   :  { %s8340_s24 = smov 0   ;;  %s12420_s0 = inlined_call_operand.vmem [shape: bf16[2,16,16,4], index: 0, kind: input, shape index: {}]   ;;  %s12421_s1 = inlined_call_operand.vmem [shape: bf16[36,8], index: 1, kind: input, shape index: {}]   ;;  %s12422_s2 = inlined_call_operand.vmem [shape: f32[1,8], index: 2, kind: input, shape index: {}]   ;;  %s12423_s3 = inlined_call_operand.vmem [shape: bf16[72,8], index: 3, kind: input, shape index: {}]   ;;  %s12424_s4 = inlined_call_operand.vmem [shape: f32[1,8], index: 4, kind: input, shape index: {}]   ;;  %s12425_s5 = inlined_call_operand.vmem [shape: bf16[8,72], index: 5, kind: input, shape index: {}]   ;;  %s12426_s6 = inlined_call_operand.vmem [shape: f32[8,1], index: 6, kind: input, shape index: {}]   ;;  %s12427_s7 = inlined_call_operand.vmem [shape: f32[2,8,256], index: 7, kind: output, shape index: {}]  }
   0x1 LB: > { %s6038_s25 = sadd.s32 4294967295, %s8284_s24   ;;  %p6042_p0 = scmp.ge.s32.totalorder %s8284_s24, 1  ;;  %s8284_s24 = sphi %s8340_s24, %s17_s24  }
   0x2   : > { %p237_p1 = scmp.lt.s32.totalorder %s8284_s24, 3 }
   0x4   : > { %p238_p2 = pnand %p6042_p0, %p237_p1 }
   0x6   : > { %241 = sbr.rel (%p238_p2) target bundleno = 1696 (0x6a0), region = 48 }
   0xb   : > { %vm280_vm0 = vcmask 31744   ;;  %vm283_vm1 = vcmask 25600   ;;  %p8350_p3 = scmp.lt.s32.totalorder %s6038_s25, 1  ;;  %v12428_v0 = vmov 0.0   ;;  %s8287_s8 = smov 4   ;;  %vm1778_vm2 = vcmask 64512  }
   0xc   : > { %281 = vst.msk [vmem:[#allocation2] sm:$0xff] %vm280_vm0, %v12428_v0  ;;  %282 = vst.msk [vmem:[#allocation2 + $0x8] sm:$0xff] %vm280_vm0, %v12428_v0  ;;  %s8288_s9 = smov 8   ;;  %s8289_s10 = smov 12   ;;  %vm2101_vm3 = vcmask 1041408   ;;  %vm1811_vm4 = vcmask 97280  }
   0xd   : > { %284 = vst.msk [vmem:[#allocation2 + $0x10] sm:$0x3] %vm283_vm1, %v12428_v0  ;;  %287 = vst.msk [vmem:[#allocation2 + $0x28] sm:$0x3] %vm283_vm1, %v12428_v0  ;;  %s12882_s25 = smov (!%p8350_p3, %s6038_s25), 1  ;;  %s8290_s11 = smov 16  }
   0xe   : > { %285 = vst.msk [vmem:[#allocation2 + $0x18] sm:$0xff] %vm280_vm0, %v12428_v0  ;;  %286 = vst.msk [vmem:[#allocation2 + $0x20] sm:$0xff] %vm280_vm0, %v12428_v0  ;;  %s6092_s27 = sshll.u32 %s12882_s25, 7  ;;  %s8291_s12 = smov 20   ;;  %vm1844_vm5 = vcmask 130048   ;;  %vm1877_vm6 = vcmask 162816  }
   0xf   : > { %288 = vst.msk [vmem:[#allocation2 + $0x30] sm:$0xff] %vm280_vm0, %v12428_v0  ;;  %289 = vst.msk [vmem:[#allocation2 + $0x38] sm:$0xff] %vm280_vm0, %v12428_v0  ;;  %s8472_s30 = scalar_lea.vmem %s12420_s0, %s6092_s27  ;;  %s8292_s13 = smov 24   ;;  %vm1910_vm7 = vcmask 195584   ;;  %vm1943_vm8 = vcmask 228352   ;;  %vm1976_vm9 = vcmask 261120  }
  0x10   : > { %290 = vst.msk [vmem:[#allocation2 + $0x40] sm:$0x3] %vm283_vm1, %v12428_v0  ;;  %293 = vst.msk [vmem:[#allocation2 + $0x58] sm:$0x3] %vm283_vm1, %v12428_v0  ;;  %v6158_v1 = vld [vmem:[%s8472_s30 + $0x8] sm:$0xff]   ;;  %v6095_v2 = vld [vmem:[%s8472_s30] sm:$0xff]  }
  0x11   : > { %291 = vst.msk [vmem:[#allocation2 + $0x48] sm:$0xff] %vm280_vm0, %v12428_v0  ;;  %292 = vst.msk [vmem:[#allocation2 + $0x50] sm:$0xff] %vm280_vm0, %v12428_v0  ;;  %v6159_v3 = vld [vmem:[%s8472_s30 + $0x10] sm:$0xff]   ;;  %v6100_v4 = vunpack.c.l.bf16 %v6158_v1  ;;  %v6101_v5 = vunpack.c.h.bf16 %v6158_v1  ;;  %v6096_v6 = vunpack.c.l.bf16 %v6095_v2  ;;  %v6097_v7 = vunpack.c.h.bf16 %v6095_v2  ;;  %v6160_v8 = vld [vmem:[%s8472_s30 + $0x18] sm:$0xff]   ;;  %s8293_s14 = smov 28   ;;  %s8294_s21 = smov 32  }
  0x12   : > { %294 = vst.msk [vmem:[#allocation2 + $0x60] sm:$0xff] %vm280_vm0, %v12428_v0  ;;  %295 = vst.msk [vmem:[#allocation2 + $0x68] sm:$0xff] %vm280_vm0, %v12428_v0  ;;  %v6161_v9 = vld [vmem:[%s8472_s30 + $0x20] sm:$0xff]   ;;  %v6162_v10 = vld [vmem:[%s8472_s30 + $0x28] sm:$0xff]   ;;  %v6104_v13 = vunpack.c.l.bf16 %v6159_v3  ;;  %v6105_v14 = vunpack.c.h.bf16 %v6159_v3  ;;  %v6108_v15 = vunpack.c.l.bf16 %v6160_v8  ;;  %v6109_v16 = vunpack.c.h.bf16 %v6160_v8  ;;  %s8295_s26 = smov 40   ;;  %s8296_s27 = smov 48  }
  0x13   : > { %296 = vst.msk [vmem:[#allocation2 + $0x70] sm:$0x3] %vm283_vm1, %v12428_v0  ;;  %299 = vst.msk [vmem:[#allocation2 + $0x88] sm:$0x3] %vm283_vm1, %v12428_v0  ;;  %v465_v11 = vld [vmem:[#allocation2 + $0x1] sm:$0xff]  ;;  %v6163_v17 = vld [vmem:[%s8472_s30 + $0x30] sm:$0xff]   ;;  %v6112_v19 = vunpack.c.l.bf16 %v6161_v9  ;;  %v6113_v20 = vunpack.c.h.bf16 %v6161_v9  ;;  %v6116_v21 = vunpack.c.l.bf16 %v6162_v10  ;;  %v6117_v25 = vunpack.c.h.bf16 %v6162_v10 }
  0x14   : > { %297 = vst.msk [vmem:[#allocation2 + $0x78] sm:$0xff] %vm280_vm0, %v12428_v0  ;;  %298 = vst.msk [vmem:[#allocation2 + $0x80] sm:$0xff] %vm280_vm0, %v12428_v0  ;;  %v466_v12 = vld [vmem:[#allocation2 + $0x9] sm:$0xff]  ;;  %v6164_v22 = vld [vmem:[%s8472_s30 + $0x38] sm:$0xff]   ;;  %v6120_v26 = vunpack.c.l.bf16 %v6163_v17  ;;  %v6121_v27 = vunpack.c.h.bf16 %v6163_v17  ;;  %vm2052_vm10 = vcmask 293888   ;;  %vm2300_vm11 = vcmask 58368  }
  0x15   : > { %300 = vst.msk [vmem:[#allocation2 + $0x90] sm:$0xff] %vm280_vm0, %v12428_v0  ;;  %301 = vst.msk [vmem:[#allocation2 + $0x98] sm:$0xff] %vm280_vm0, %v12428_v0  ;;  %v6343_v18 = vpack.i.bf16 %v466_v12, %v465_v11  ;;  %v6165_v23 = vld [vmem:[%s8472_s30 + $0x40] sm:$0xff]   ;;  %v6166_v24 = vld [vmem:[%s8472_s30 + $0x48] sm:$0xff]   ;;  %v6124_v28 = vunpack.c.l.bf16 %v6164_v22  ;;  %v6125_v32 = vunpack.c.h.bf16 %v6164_v22  ;;  %vm4067_vm12 = vcmask 1043456   ;;  %s8297_s16 = smov 56  }
  0x16   : > { %302 = vst.msk [vmem:[#allocation2 + $0xa0] sm:$0x3] %vm283_vm1, %v12428_v0  ;;  %305 = vst.msk [vmem:[#allocation2 + $0xb8] sm:$0x3] %vm283_vm1, %v12428_v0  ;;  %v6167_v29 = vld [vmem:[%s8472_s30 + $0x50] sm:$0xff]   ;;  %v6168_v30 = vld [vmem:[%s8472_s30 + $0x58] sm:$0xff]   ;;  %v6128_v33 = vunpack.c.l.bf16 %v6165_v23  ;;  %v6129_v34 = vunpack.c.h.bf16 %v6165_v23  ;;  %v6132_v35 = vunpack.c.l.bf16 %v6166_v24  ;;  %v6133_v38 = vunpack.c.h.bf16 %v6166_v24 }
  0x17   : > { %303 = vst.msk [vmem:[#allocation2 + $0xa8] sm:$0xff] %vm280_vm0, %v12428_v0  ;;  %304 = vst.msk [vmem:[#allocation2 + $0xb0] sm:$0xff] %vm280_vm0, %v12428_v0  ;;  %v6169_v31 = vld [vmem:[%s8472_s30 + $0x60] sm:$0xff]   ;;  %6344 = vrot.lane.b32.xlu0 %v6343_v18, %s8287_s8  ;;  %v6170_v36 = vld [vmem:[%s8472_s30 + $0x68] sm:$0xff]   ;;  %v6136_v39 = vunpack.c.l.bf16 %v6167_v29  ;;  %v6137_v40 = vunpack.c.h.bf16 %v6167_v29  ;;  %v6140_v41 = vunpack.c.l.bf16 %v6168_v30  ;;  %v6141_v43 = vunpack.c.h.bf16 %v6168_v30  ;;  %s8298_s19 = smov 64   ;;  %s6093_s23 = sshll.u32 %s12882_s25, 4 }
  0x18   : > { %306 = vst.msk [vmem:[#allocation2 + $0xc0] sm:$0xff] %vm280_vm0, %v12428_v0  ;;  %307 = vst.msk [vmem:[#allocation2 + $0xc8] sm:$0xff] %vm280_vm0, %v12428_v0  ;;  %v6171_v37 = vld [vmem:[%s8472_s30 + $0x70] sm:$0xff]   ;;  %v6172_v42 = vld [vmem:[%s8472_s30 + $0x78] sm:$0xff]   ;;  %v6144_v44 = vunpack.c.l.bf16 %v6169_v31  ;;  %v6145_v45 = vunpack.c.h.bf16 %v6169_v31  ;;  %v6148_v46 = vunpack.c.l.bf16 %v6170_v36  ;;  %v6149_v47 = vunpack.c.h.bf16 %v6170_v36  ;;  %s278_s28 = scalar_lea.vmem %s12427_s7, %s6093_s23 }
  0x19   : > { %308 = vst.msk [vmem:[#allocation2 + $0xd0] sm:$0x3] %vm283_vm1, %v12428_v0  ;;  %311 = vst.msk [vmem:[#allocation2 + $0xe8] sm:$0x3] %vm283_vm1, %v12428_v0  ;;  %v6152_v48 = vunpack.c.l.bf16 %v6171_v37  ;;  %v6153_v49 = vunpack.c.h.bf16 %v6171_v37  ;;  %v6156_v50 = vunpack.c.l.bf16 %v6172_v42  ;;  %v6157_v51 = vunpack.c.h.bf16 %v6172_v42 }
  0x1a   : > { %309 = vst.msk [vmem:[#allocation2 + $0xd8] sm:$0xff] %vm280_vm0, %v12428_v0  ;;  %310 = vst.msk [vmem:[#allocation2 + $0xe0] sm:$0xff] %vm280_vm0, %v12428_v0  ;;  %vm3827_vm13 = vcmask 326656   ;;  %vm3860_vm14 = vcmask 392192   ;;  %vm3893_vm15 = vcmask 457728  }
  0x1b   : > { %312 = vst.msk [vmem:[#allocation2 + $0xf0] sm:$0xff] %vm280_vm0, %v12428_v0  ;;  %313 = vst.msk [vmem:[#allocation2 + $0xf8] sm:$0xff] %vm280_vm0, %v12428_v0 }
  0x1c   : > { %314 = vst.msk [vmem:[#allocation2 + $0x100] sm:$0x3] %vm283_vm1, %v12428_v0  ;;  %317 = vst.msk [vmem:[#allocation2 + $0x118] sm:$0x3] %vm283_vm1, %v12428_v0 }
  0x1d   : > { %315 = vst.msk [vmem:[#allocation2 + $0x108] sm:$0xff] %vm280_vm0, %v12428_v0  ;;  %316 = vst.msk [vmem:[#allocation2 + $0x110] sm:$0xff] %vm280_vm0, %v12428_v0 }
  0x1e   : > { %318 = vst.msk [vmem:[#allocation2 + $0x120] sm:$0xff] %vm280_vm0, %v12428_v0  ;;  %319 = vst.msk [vmem:[#allocation2 + $0x128] sm:$0xff] %vm280_vm0, %v12428_v0 }
  0x1f   : > { %320 = vst.msk [vmem:[#allocation2 + $0x130] sm:$0x3] %vm283_vm1, %v12428_v0  ;;  %323 = vst.msk [vmem:[#allocation2 + $0x148] sm:$0x3] %vm283_vm1, %v12428_v0 }
  0x20   : > { %321 = vst.msk [vmem:[#allocation2 + $0x138] sm:$0xff] %vm280_vm0, %v12428_v0  ;;  %322 = vst.msk [vmem:[#allocation2 + $0x140] sm:$0xff] %vm280_vm0, %v12428_v0 }
  0x21   : > { %324 = vst.msk [vmem:[#allocation2 + $0x150] sm:$0xff] %vm280_vm0, %v12428_v0  ;;  %325 = vst.msk [vmem:[#allocation2 + $0x158] sm:$0xff] %vm280_vm0, %v12428_v0 }
  0x22   : > { %326 = vst.msk [vmem:[#allocation2 + $0x160] sm:$0x3] %vm283_vm1, %v12428_v0  ;;  %329 = vst.msk [vmem:[#allocation2 + $0x178] sm:$0x3] %vm283_vm1, %v12428_v0 }
  0x23   : > { %327 = vst.msk [vmem:[#allocation2 + $0x168] sm:$0xff] %vm280_vm0, %v12428_v0  ;;  %328 = vst.msk [vmem:[#allocation2 + $0x170] sm:$0xff] %vm280_vm0, %v12428_v0 }
  0x24   : > { %330 = vst.msk [vmem:[#allocation2 + $0x180] sm:$0xff] %vm280_vm0, %v12428_v0  ;;  %331 = vst.msk [vmem:[#allocation2 + $0x188] sm:$0xff] %vm280_vm0, %v12428_v0 }
  0x25   : > { %332 = vst.msk [vmem:[#allocation2 + $0x190] sm:$0x3] %vm283_vm1, %v12428_v0  ;;  %335 = vst.msk [vmem:[#allocation2 + $0x1a8] sm:$0x3] %vm283_vm1, %v12428_v0  ;;  %vm4018_vm1 = vcmask 588800  }
  0x26   : > { %333 = vst.msk [vmem:[#allocation2 + $0x198] sm:$0xff] %vm280_vm0, %v12428_v0  ;;  %334 = vst.msk [vmem:[#allocation2 + $0x1a0] sm:$0xff] %vm280_vm0, %v12428_v0 }
  0x27   : > { %403 = vst.msk [vmem:[#allocation2 + $0x31] sm:$0xff] %vm280_vm0, %v6100_v4  ;;  %404 = vst.msk [vmem:[#allocation2 + $0x39] sm:$0xff] %vm280_vm0, %v6101_v5 }
  0x28   : > { %401 = vst.msk [vmem:[#allocation2 + $0x19] sm:$0xff] %vm280_vm0, %v6096_v6  ;;  %402 = vst.msk [vmem:[#allocation2 + $0x21] sm:$0xff] %vm280_vm0, %v6097_v7 }
  0x29   : > { %405 = vst.msk [vmem:[#allocation2 + $0x49] sm:$0xff] %vm280_vm0, %v6104_v13  ;;  %406 = vst.msk [vmem:[#allocation2 + $0x51] sm:$0xff] %vm280_vm0, %v6105_v14 }
  0x2a   : > { %407 = vst.msk [vmem:[#allocation2 + $0x61] sm:$0xff] %vm280_vm0, %v6108_v15  ;;  %408 = vst.msk [vmem:[#allocation2 + $0x69] sm:$0xff] %vm280_vm0, %v6109_v16 }
  0x2b   : > { %409 = vst.msk [vmem:[#allocation2 + $0x79] sm:$0xff] %vm280_vm0, %v6112_v19  ;;  %410 = vst.msk [vmem:[#allocation2 + $0x81] sm:$0xff] %vm280_vm0, %v6113_v20 }
  0x2c   : > { %411 = vst.msk [vmem:[#allocation2 + $0x91] sm:$0xff] %vm280_vm0, %v6116_v21  ;;  %412 = vst.msk [vmem:[#allocation2 + $0x99] sm:$0xff] %vm280_vm0, %v6117_v25 }
  0x2d   : > { %413 = vst.msk [vmem:[#allocation2 + $0xa9] sm:$0xff] %vm280_vm0, %v6120_v26  ;;  %414 = vst.msk [vmem:[#allocation2 + $0xb1] sm:$0xff] %vm280_vm0, %v6121_v27 }
  0x2e   : > { %415 = vst.msk [vmem:[#allocation2 + $0xc1] sm:$0xff] %vm280_vm0, %v6124_v28  ;;  %416 = vst.msk [vmem:[#allocation2 + $0xc9] sm:$0xff] %vm280_vm0, %v6125_v32  ;;  %v469_v52 = vld [vmem:[#allocation2 + $0x31] sm:$0xff]  ;;  %v470_v53 = vld [vmem:[#allocation2 + $0x39] sm:$0xff] }
  0x2f   : > { %417 = vst.msk [vmem:[#allocation2 + $0xd9] sm:$0xff] %vm280_vm0, %v6128_v33  ;;  %418 = vst.msk [vmem:[#allocation2 + $0xe1] sm:$0xff] %vm280_vm0, %v6129_v34  ;;  %v467_v54 = vld [vmem:[#allocation2 + $0x19] sm:$0xff]  ;;  %v8521_v55 = vpack.i.bf16 %v470_v53, %v469_v52  ;;  %v468_v56 = vld [vmem:[#allocation2 + $0x21] sm:$0xff] }
  0x30   : > { %419 = vst.msk [vmem:[#allocation2 + $0xf1] sm:$0xff] %vm280_vm0, %v6132_v35  ;;  %420 = vst.msk [vmem:[#allocation2 + $0xf9] sm:$0xff] %vm280_vm0, %v6133_v38  ;;  %v471_v57 = vld [vmem:[#allocation2 + $0x49] sm:$0xff]  ;;  %v472_v58 = vld [vmem:[#allocation2 + $0x51] sm:$0xff]  ;;  %v8525_v59 = vpack.i.bf16 %v468_v56, %v467_v54 }
  0x31   : > { %421 = vst.msk [vmem:[#allocation2 + $0x109] sm:$0xff] %vm280_vm0, %v6136_v39  ;;  %422 = vst.msk [vmem:[#allocation2 + $0x111] sm:$0xff] %vm280_vm0, %v6137_v40  ;;  %v473_v60 = vld [vmem:[#allocation2 + $0x61] sm:$0xff]  ;;  %v474_v61 = vld [vmem:[#allocation2 + $0x69] sm:$0xff]  ;;  %6354 = vrot.lane.b32.xlu1 %v8521_v55, %s8287_s8  ;;  %v8529_v62 = vpack.i.bf16 %v472_v58, %v471_v57 }
  0x32   : > { %423 = vst.msk [vmem:[#allocation2 + $0x121] sm:$0xff] %vm280_vm0, %v6140_v41  ;;  %424 = vst.msk [vmem:[#allocation2 + $0x129] sm:$0xff] %vm280_vm0, %v6141_v43  ;;  %6349 = vrot.lane.b32.xlu0 %v8525_v59, %s8287_s8  ;;  %v8533_v63 = vpack.i.bf16 %v474_v61, %v473_v60  ;;  %v475_v1 = vld [vmem:[#allocation2 + $0x79] sm:$0xff]  ;;  %v476_v2 = vld [vmem:[#allocation2 + $0x81] sm:$0xff] }
  0x33   : > { %425 = vst.msk [vmem:[#allocation2 + $0x139] sm:$0xff] %vm280_vm0, %v6144_v44  ;;  %426 = vst.msk [vmem:[#allocation2 + $0x141] sm:$0xff] %vm280_vm0, %v6145_v45  ;;  %v477_v3 = vld [vmem:[#allocation2 + $0x91] sm:$0xff]  ;;  %v478_v4 = vld [vmem:[#allocation2 + $0x99] sm:$0xff]  ;;  %v8537_v5 = vpack.i.bf16 %v476_v2, %v475_v1 }
  0x34   : > { %427 = vst.msk [vmem:[#allocation2 + $0x151] sm:$0xff] %vm280_vm0, %v6148_v46  ;;  %428 = vst.msk [vmem:[#allocation2 + $0x159] sm:$0xff] %vm280_vm0, %v6149_v47  ;;  %v8541_v6 = vpack.i.bf16 %v478_v4, %v477_v3  ;;  %v479_v7 = vld [vmem:[#allocation2 + $0xa9] sm:$0xff]  ;;  %v480_v8 = vld [vmem:[#allocation2 + $0xb1] sm:$0xff] }
  0x35   : > { %429 = vst.msk [vmem:[#allocation2 + $0x169] sm:$0xff] %vm280_vm0, %v6152_v48  ;;  %430 = vst.msk [vmem:[#allocation2 + $0x171] sm:$0xff] %vm280_vm0, %v6153_v49  ;;  %6359 = vrot.lane.b32.xlu1 %v8529_v62, %s8287_s8  ;;  %v481_v9 = vld [vmem:[#allocation2 + $0xc1] sm:$0xff]  ;;  %v482_v10 = vld [vmem:[#allocation2 + $0xc9] sm:$0xff]  ;;  %v8545_v11 = vpack.i.bf16 %v480_v8, %v479_v7 }
  0x36   : > { %431 = vst.msk [vmem:[#allocation2 + $0x181] sm:$0xff] %vm280_vm0, %v6156_v50  ;;  %432 = vst.msk [vmem:[#allocation2 + $0x189] sm:$0xff] %vm280_vm0, %v6157_v51  ;;  %6364 = vrot.lane.b32.xlu0 %v8533_v63, %s8287_s8  ;;  %v8549_v12 = vpack.i.bf16 %v482_v10, %v481_v9  ;;  %v483_v13 = vld [vmem:[#allocation2 + $0xd9] sm:$0xff]  ;;  %v484_v14 = vld [vmem:[#allocation2 + $0xe1] sm:$0xff] }
  0x37   : > { %v485_v15 = vld [vmem:[#allocation2 + $0xf1] sm:$0xff]  ;;  %v486_v16 = vld [vmem:[#allocation2 + $0xf9] sm:$0xff]  ;;  %v8553_v17 = vpack.i.bf16 %v484_v14, %v483_v13  ;;  %2298 = vst.msk [vmem:[#allocation3] sm:$0xff] %vm1778_vm2, %v12428_v0  ;;  %2299 = vst.msk [vmem:[#allocation3 + $0x8] sm:$0xff] %vm1778_vm2, %v12428_v0 }
  0x38   : > { %v8557_v18 = vpack.i.bf16 %v486_v16, %v485_v15  ;;  %v487_v19 = vld [vmem:[#allocation2 + $0x109] sm:$0xff]  ;;  %v488_v20 = vld [vmem:[#allocation2 + $0x111] sm:$0xff]  ;;  %2302 = vst.msk [vmem:[#allocation3 + $0x18] sm:$0xff] %vm1778_vm2, %v12428_v0  ;;  %2303 = vst.msk [vmem:[#allocation3 + $0x20] sm:$0xff] %vm1778_vm2, %v12428_v0 }
  0x39   : > { %6369 = vrot.lane.b32.xlu1 %v8537_v5, %s8287_s8  ;;  %v489_v21 = vld [vmem:[#allocation2 + $0x121] sm:$0xff]  ;;  %v490_v22 = vld [vmem:[#allocation2 + $0x129] sm:$0xff]  ;;  %v8561_v23 = vpack.i.bf16 %v488_v20, %v487_v19  ;;  %2305 = vst.msk [vmem:[#allocation3 + $0x30] sm:$0xff] %vm1778_vm2, %v12428_v0  ;;  %2306 = vst.msk [vmem:[#allocation3 + $0x38] sm:$0xff] %vm1778_vm2, %v12428_v0 }
  0x3a   : > { %6374 = vrot.lane.b32.xlu0 %v8541_v6, %s8287_s8  ;;  %v8565_v24 = vpack.i.bf16 %v490_v22, %v489_v21  ;;  %v491_v25 = vld [vmem:[#allocation2 + $0x139] sm:$0xff]  ;;  %v492_v26 = vld [vmem:[#allocation2 + $0x141] sm:$0xff]  ;;  %2308 = vst.msk [vmem:[#allocation3 + $0x48] sm:$0xff] %vm1778_vm2, %v12428_v0  ;;  %2309 = vst.msk [vmem:[#allocation3 + $0x50] sm:$0xff] %vm1778_vm2, %v12428_v0 }
  0x3b   : > { %v493_v27 = vld [vmem:[#allocation2 + $0x151] sm:$0xff]  ;;  %v494_v28 = vld [vmem:[#allocation2 + $0x159] sm:$0xff]  ;;  %2311 = vst.msk [vmem:[#allocation3 + $0x60] sm:$0xff] %vm1778_vm2, %v12428_v0  ;;  %2312 = vst.msk [vmem:[#allocation3 + $0x68] sm:$0xff] %vm1778_vm2, %v12428_v0  ;;  %v8641_v29 = vpack.i.bf16 %v492_v26, %v491_v25 }
  0x3c   : > { %2314 = vst.msk [vmem:[#allocation3 + $0x78] sm:$0xff] %vm1778_vm2, %v12428_v0  ;;  %2315 = vst.msk [vmem:[#allocation3 + $0x80] sm:$0xff] %vm1778_vm2, %v12428_v0  ;;  %v8645_v30 = vpack.i.bf16 %v494_v28, %v493_v27  ;;  %v495_v31 = vld [vmem:[#allocation2 + $0x169] sm:$0xff]  ;;  %v496_v32 = vld [vmem:[#allocation2 + $0x171] sm:$0xff] }
  0x3d   : > { %6379 = vrot.lane.b32.xlu1 %v8545_v11, %s8287_s8  ;;  %2317 = vst.msk [vmem:[#allocation3 + $0x90] sm:$0xff] %vm1778_vm2, %v12428_v0  ;;  %2318 = vst.msk [vmem:[#allocation3 + $0x98] sm:$0xff] %vm1778_vm2, %v12428_v0  ;;  %v497_v33 = vld [vmem:[#allocation2 + $0x2] sm:$0xff]  ;;  %v498_v34 = vld [vmem:[#allocation2 + $0xa] sm:$0xff]  ;;  %v8649_v35 = vpack.i.bf16 %v496_v32, %v495_v31 }
  0x3e   : > { %6384 = vrot.lane.b32.xlu0 %v8549_v12, %s8287_s8  ;;  %2320 = vst.msk [vmem:[#allocation3 + $0xa8] sm:$0xff] %vm1778_vm2, %v12428_v0  ;;  %2321 = vst.msk [vmem:[#allocation3 + $0xb0] sm:$0xff] %vm1778_vm2, %v12428_v0  ;;  %v6423_v36 = vpack.i.bf16 %v498_v34, %v497_v33  ;;  %v499_v37 = vld [vmem:[#allocation2 + $0x1a] sm:$0xff]  ;;  %v500_v38 = vld [vmem:[#allocation2 + $0x22] sm:$0xff] }
  0x3f   : > { %2323 = vst.msk [vmem:[#allocation3 + $0xc0] sm:$0xff] %vm1778_vm2, %v12428_v0  ;;  %2324 = vst.msk [vmem:[#allocation3 + $0xc8] sm:$0xff] %vm1778_vm2, %v12428_v0  ;;  %v501_v39 = vld [vmem:[#allocation2 + $0x32] sm:$0xff]  ;;  %v502_v40 = vld [vmem:[#allocation2 + $0x3a] sm:$0xff]  ;;  %v8655_v41 = vpack.i.bf16 %v500_v38, %v499_v37 }
  0x40   : > { %2326 = vst.msk [vmem:[#allocation3 + $0xd8] sm:$0xff] %vm1778_vm2, %v12428_v0  ;;  %2327 = vst.msk [vmem:[#allocation3 + $0xe0] sm:$0xff] %vm1778_vm2, %v12428_v0  ;;  %v8658_v42 = vpack.i.bf16 %v502_v40, %v501_v39  ;;  %v503_v43 = vld [vmem:[#allocation2 + $0x4a] sm:$0xff]  ;;  %v504_v44 = vld [vmem:[#allocation2 + $0x52] sm:$0xff] }
  0x41   : > { %6389 = vrot.lane.b32.xlu1 %v8553_v17, %s8287_s8  ;;  %2329 = vst.msk [vmem:[#allocation3 + $0xf0] sm:$0xff] %vm1778_vm2, %v12428_v0  ;;  %2330 = vst.msk [vmem:[#allocation3 + $0xf8] sm:$0xff] %vm1778_vm2, %v12428_v0  ;;  %v505_v45 = vld [vmem:[#allocation2 + $0x62] sm:$0xff]  ;;  %v506_v46 = vld [vmem:[#allocation2 + $0x6a] sm:$0xff]  ;;  %v8662_v47 = vpack.i.bf16 %v504_v44, %v503_v43 }
  0x42   : > { %6394 = vrot.lane.b32.xlu0 %v8557_v18, %s8287_s8  ;;  %2332 = vst.msk [vmem:[#allocation3 + $0x108] sm:$0xff] %vm1778_vm2, %v12428_v0  ;;  %2333 = vst.msk [vmem:[#allocation3 + $0x110] sm:$0xff] %vm1778_vm2, %v12428_v0  ;;  %v8666_v48 = vpack.i.bf16 %v506_v46, %v505_v45  ;;  %v507_v49 = vld [vmem:[#allocation2 + $0x7a] sm:$0xff]  ;;  %v508_v50 = vld [vmem:[#allocation2 + $0x82] sm:$0xff] }
  0x43   : > { %2335 = vst.msk [vmem:[#allocation3 + $0x120] sm:$0xff] %vm1778_vm2, %v12428_v0  ;;  %2336 = vst.msk [vmem:[#allocation3 + $0x128] sm:$0xff] %vm1778_vm2, %v12428_v0  ;;  %v509_v51 = vld [vmem:[#allocation2 + $0x92] sm:$0xff]  ;;  %v510_v52 = vld [vmem:[#allocation2 + $0x9a] sm:$0xff]  ;;  %v8670_v53 = vpack.i.bf16 %v508_v50, %v507_v49 }
  0x44   : > { %2338 = vst.msk [vmem:[#allocation3 + $0x138] sm:$0xff] %vm1778_vm2, %v12428_v0  ;;  %2339 = vst.msk [vmem:[#allocation3 + $0x140] sm:$0xff] %vm1778_vm2, %v12428_v0  ;;  %v8674_v54 = vpack.i.bf16 %v510_v52, %v509_v51  ;;  %v511_v56 = vld [vmem:[#allocation2 + $0xaa] sm:$0xff]  ;;  %v512_v57 = vld [vmem:[#allocation2 + $0xb2] sm:$0xff] }
  0x45   : > { %2341 = vst.msk [vmem:[#allocation3 + $0x150] sm:$0xff] %vm1778_vm2, %v12428_v0  ;;  %2342 = vst.msk [vmem:[#allocation3 + $0x158] sm:$0xff] %vm1778_vm2, %v12428_v0  ;;  %6399 = vrot.lane.b32.xlu1 %v8561_v23, %s8287_s8  ;;  %v513_v58 = vld [vmem:[#allocation2 + $0xc2] sm:$0xff]  ;;  %v514_v60 = vld [vmem:[#allocation2 + $0xca] sm:$0xff]  ;;  %v8678_v61 = vpack.i.bf16 %v512_v57, %v511_v56 }
  0x46   : > { %2344 = vst.msk [vmem:[#allocation3 + $0x168] sm:$0xff] %vm1778_vm2, %v12428_v0  ;;  %2345 = vst.msk [vmem:[#allocation3 + $0x170] sm:$0xff] %vm1778_vm2, %v12428_v0  ;;  %6404 = vrot.lane.b32.xlu0 %v8565_v24, %s8287_s8  ;;  %v8682_v1 = vpack.i.bf16 %v514_v60, %v513_v58  ;;  %v515_v2 = vld [vmem:[#allocation2 + $0xda] sm:$0xff]  ;;  %v516_v3 = vld [vmem:[#allocation2 + $0xe2] sm:$0xff] }
  0x47   : > { %2347 = vst.msk [vmem:[#allocation3 + $0x180] sm:$0xff] %vm1778_vm2, %v12428_v0  ;;  %2348 = vst.msk [vmem:[#allocation3 + $0x188] sm:$0xff] %vm1778_vm2, %v12428_v0  ;;  %v517_v4 = vld [vmem:[#allocation2 + $0xf2] sm:$0xff]  ;;  %v518_v7 = vld [vmem:[#allocation2 + $0xfa] sm:$0xff]  ;;  %v8686_v8 = vpack.i.bf16 %v516_v3, %v515_v2 }
  0x48   : > { %2350 = vst.msk [vmem:[#allocation3 + $0x198] sm:$0xff] %vm1778_vm2, %v12428_v0  ;;  %2351 = vst.msk [vmem:[#allocation3 + $0x1a0] sm:$0xff] %vm1778_vm2, %v12428_v0  ;;  %v8690_v9 = vpack.i.bf16 %v518_v7, %v517_v4  ;;  %v519_v10 = vld [vmem:[#allocation2 + $0x10a] sm:$0xff]  ;;  %v520_v13 = vld [vmem:[#allocation2 + $0x112] sm:$0xff] }
  0x49   : > { %6409 = vrot.lane.b32.xlu1 %v8641_v29, %s8287_s8  ;;  %v521_v14 = vld [vmem:[#allocation2 + $0x122] sm:$0xff]  ;;  %v522_v15 = vld [vmem:[#allocation2 + $0x12a] sm:$0xff]  ;;  %v8694_v16 = vpack.i.bf16 %v520_v13, %v519_v10  ;;  %v523_v20 = vld [vmem:[#allocation2 + $0x13a] sm:$0xff] }
  0x4a   : > { %6414 = vrot.lane.b32.xlu0 %v8645_v30, %s8287_s8  ;;  %v8698_v19 = vpack.i.bf16 %v522_v15, %v521_v14  ;;  %v524_v21 = vld [vmem:[#allocation2 + $0x142] sm:$0xff]  ;;  %v525_v22 = vld [vmem:[#allocation2 + $0x152] sm:$0xff]  ;;  %v526_v25 = vld [vmem:[#allocation2 + $0x15a] sm:$0xff] }
  0x4b   : > { %v8702_v26 = vpack.i.bf16 %v524_v21, %v523_v20  ;;  %v8706_v27 = vpack.i.bf16 %v526_v25, %v525_v22  ;;  %v527_v28 = vld [vmem:[#allocation2 + $0x16a] sm:$0xff]  ;;  %v528_v31 = vld [vmem:[#allocation2 + $0x172] sm:$0xff]  ;;  %v8710_v33 = vld [vmem:[#allocation2 + $0x20] sm:$0xff] }
  0x4c   : > { %v8708_v32 = vld [vmem:[#allocation2 + $0x18] sm:$0xff]  ;;  %v8714_v34 = vpack.i.bf16 %v528_v31, %v527_v28  ;;  %v8720_v37 = vld [vmem:[#allocation2 + $0x30] sm:$0xff]  ;;  %v8724_v39 = vld [vmem:[#allocation2 + $0x48] sm:$0xff] }
  0x4d   : > { %6419 = vrot.lane.b32.xlu1 %v8649_v35, %s8287_s8  ;;  %v8722_v38 = vld [vmem:[#allocation2 + $0x38] sm:$0xff]  ;;  %v8726_v40 = vld [vmem:[#allocation2 + $0x50] sm:$0xff]  ;;  %v8739_v45 = vld [vmem:[#allocation2 + $0x60] sm:$0xff] }
  0x4e   : > { %6424 = vrot.lane.b32.xlu0 %v6423_v36, %s8288_s9  ;;  %v6503_v36 = vpack.i.bf16 %v8710_v33, %v8708_v32  ;;  %v8732_v43 = vpack.i.bf16 %v8722_v38, %v8720_v37  ;;  %v8737_v44 = vpack.i.bf16 %v8726_v40, %v8724_v39  ;;  %v8741_v46 = vld [vmem:[#allocation2 + $0x68] sm:$0xff]  ;;  %v8743_v49 = vld [vmem:[#allocation2 + $0x78] sm:$0xff]  ;;  %v8745_v50 = vld [vmem:[#allocation2 + $0x80] sm:$0xff] }
  0x4f   : > { %v8751_v51 = vpack.i.bf16 %v8741_v46, %v8739_v45  ;;  %v8757_v52 = vpack.i.bf16 %v8745_v50, %v8743_v49  ;;  %v8759_v56 = vld [vmem:[#allocation2 + $0x90] sm:$0xff]  ;;  %v8761_v57 = vld [vmem:[#allocation2 + $0x98] sm:$0xff]  ;;  %v8763_v58 = vld [vmem:[#allocation2 + $0xa8] sm:$0xff] }
  0x50   : > { %12570 = vst [vmem:[#allocation4_spill] sm:$0xff] %v8763_v58  ;;  %v8765_v60 = vld [vmem:[#allocation2 + $0xb0] sm:$0xff]  ;;  %v8771_v2 = vpack.i.bf16 %v8761_v57, %v8759_v56  ;;  %v8779_v4 = vld [vmem:[#allocation2 + $0xc0] sm:$0xff]  ;;  %v8781_v7 = vld [vmem:[#allocation2 + $0xc8] sm:$0xff] }
  0x51   : > { %6429 = vrot.lane.b32.xlu1 %v8655_v41, %s8288_s9  ;;  %v8777_v3 = vpack.i.bf16 %v8765_v60, %v8763_v58  ;;  %12571 = vst [vmem:[#allocation5_spill] sm:$0xff] %v8779_v4  ;;  %12572 = vst [vmem:[#allocation6_spill] sm:$0xff] %v8781_v7  ;;  %v8783_v10 = vld [vmem:[#allocation2 + $0xd8] sm:$0xff]  ;;  %v8785_v13 = vld [vmem:[#allocation2 + $0xe0] sm:$0xff]  ;;  %v8791_v14 = vpack.i.bf16 %v8781_v7, %v8779_v4 }
  0x52   : > { %6434 = vrot.lane.b32.xlu0 %v8658_v42, %s8288_s9  ;;  %12573 = vst [vmem:[#allocation7_spill] sm:$0xff] %v8783_v10  ;;  %12574 = vst [vmem:[#allocation8_spill] sm:$0xff] %v8785_v13  ;;  %v8797_v15 = vpack.i.bf16 %v8785_v13, %v8783_v10  ;;  %v8799_v20 = vld [vmem:[#allocation2 + $0xf0] sm:$0xff]  ;;  %v8801_v21 = vld [vmem:[#allocation2 + $0xf8] sm:$0xff] }
  0x53   : > { %12575 = vst [vmem:[#allocation9_spill] sm:$0xff] %v8799_v20  ;;  %12576 = vst [vmem:[#allocation10_spill] sm:$0xff] %v8801_v21  ;;  %v8803_v22 = vld [vmem:[#allocation2 + $0x108] sm:$0xff]  ;;  %v8805_v25 = vld [vmem:[#allocation2 + $0x110] sm:$0xff]  ;;  %v8811_v28 = vpack.i.bf16 %v8801_v21, %v8799_v20 }
  0x54   : > { %12577 = vst [vmem:[#allocation11_spill] sm:$0xff] %v8803_v22  ;;  %12578 = vst [vmem:[#allocation12_spill] sm:$0xff] %v8805_v25  ;;  %v8817_v31 = vpack.i.bf16 %v8805_v25, %v8803_v22  ;;  %v8821_v0 = vld [vmem:[#allocation2 + $0x128] sm:$0xff]  ;;  %v8823_v10 = vld [vmem:[#allocation2 + $0x138] sm:$0xff] }
  0x55   : > { %6439 = vrot.lane.b32.xlu1 %v8662_v47, %s8288_s9  ;;  %12580 = vst [vmem:[#allocation14_spill] sm:$0xff] %v8821_v0  ;;  %12581 = vst [vmem:[#allocation15_spill] sm:$0xff] %v8823_v10  ;;  %v8825_v13 = vld [vmem:[#allocation2 + $0x140] sm:$0xff]  ;;  %v8839_v25 = vld [vmem:[#allocation2 + $0x150] sm:$0xff] }
  0x56   : > { %6444 = vrot.lane.b32.xlu0 %v8666_v48, %s8288_s9  ;;  %12582 = vst [vmem:[#allocation16_spill] sm:$0xff] %v8825_v13  ;;  %v8837_v22 = vpack.i.bf16 %v8825_v13, %v8823_v10  ;;  %v8841_v21 = vld [vmem:[#allocation2 + $0x158] sm:$0xff]  ;;  %v8843_v4 = vld [vmem:[#allocation2 + $0x168] sm:$0xff]  ;;  %v8845_v7 = vld [vmem:[#allocation2 + $0x170] sm:$0xff] }
  0x57   : > { %v8857_v10 = vpack.i.bf16 %v8845_v7, %v8843_v4  ;;  %v559_v13 = vld [vmem:[#allocation2 + $0x180] sm:$0xff] }
  0x59   : > { %6449 = vrot.lane.b32.xlu1 %v8670_v53, %s8288_s9 }
  0x5a   : > { %6454 = vrot.lane.b32.xlu0 %v8674_v54, %s8288_s9 }
  0x5d   : > { %6459 = vrot.lane.b32.xlu1 %v8678_v61, %s8288_s9 }
  0x5e   : > { %6464 = vrot.lane.b32.xlu0 %v8682_v1, %s8288_s9 }
  0x61   : > { %6469 = vrot.lane.b32.xlu1 %v8686_v8, %s8288_s9 }
  0x62   : > { %6474 = vrot.lane.b32.xlu0 %v8690_v9, %s8288_s9 }
  0x65   : > { %6479 = vrot.lane.b32.xlu1 %v8694_v16, %s8288_s9 }
  0x66   : > { %6484 = vrot.lane.b32.xlu0 %v8698_v19, %s8288_s9 }
  0x69   : > { %6489 = vrot.lane.b32.xlu1 %v8702_v26, %s8288_s9 }
  0x6a   : > { %6494 = vrot.lane.b32.xlu0 %v8706_v27, %s8288_s9 }
  0x6d   : > { %6499 = vrot.lane.b32.xlu1 %v8714_v34, %s8288_s9 }
  0x6e   : > { %6504 = vrot.lane.b32.xlu0 %v6503_v36, %s8289_s10  ;;  %v8819_v36 = vld [vmem:[#allocation2 + $0x120] sm:$0xff] }
  0x6f   : > { %12579 = vst [vmem:[#allocation13_spill] sm:$0xff] %v8819_v36  ;;  %v8831_v20 = vpack.i.bf16 %v8821_v0, %v8819_v36  ;;  %v8851_v36 = vpack.i.bf16 %v8841_v21, %v8839_v25  ;;  %v560_v0 = vld [vmem:[#allocation2 + $0x188] sm:$0xff] }
  0x70   : > { %v8861_v58 = vpack.i.bf16 %v560_v0, %v559_v13 }
  0x71   : > { %6509 = vrot.lane.b32.xlu1 %v8732_v43, %s8289_s10 }
  0x72   : > { %6514 = vrot.lane.b32.xlu0 %v8737_v44, %s8289_s10 }
  0x75   : > { %6519 = vrot.lane.b32.xlu1 %v8751_v51, %s8289_s10 }
  0x76   : > { %6524 = vrot.lane.b32.xlu0 %v8757_v52, %s8289_s10 }
  0x79   : > { %6529 = vrot.lane.b32.xlu1 %v8771_v2, %s8289_s10 }
  0x7a   : > { %6534 = vrot.lane.b32.xlu0 %v8777_v3, %s8289_s10 }
  0x7d   : > { %6539 = vrot.lane.b32.xlu1 %v8791_v14, %s8289_s10 }
  0x7e   : > { %6544 = vrot.lane.b32.xlu0 %v8797_v15, %s8289_s10 }
  0x81   : > { %6549 = vrot.lane.b32.xlu1 %v8811_v28, %s8289_s10 }
  0x82   : > { %6554 = vrot.lane.b32.xlu0 %v8817_v31, %s8289_s10 }
  0x85   : > { %6559 = vrot.lane.b32.xlu1 %v8831_v20, %s8289_s10 }
  0x86   : > { %6564 = vrot.lane.b32.xlu0 %v8837_v22, %s8289_s10 }
  0x89   : > { %6569 = vrot.lane.b32.xlu1 %v8851_v36, %s8289_s10  ;;  %v8885_v0 = vpop.permute.xlu0 %6344 }
  0x8a   : > { %6574 = vrot.lane.b32.xlu0 %v8857_v10, %s8289_s10 }
  0x8d   : > { %6579 = vrot.lane.b32.xlu1 %v8861_v58, %s8289_s10 }
  0x8e   : > { %6584 = vrot.lane.b32.xlu0 %v8525_v59, %s8290_s11 }
  0x91   : > { %6589 = vrot.lane.b32.xlu1 %v8521_v55, %s8290_s11 }
  0x92   : > { %6594 = vrot.lane.b32.xlu0 %v8529_v62, %s8290_s11  ;;  %v591_v62 = vld [vmem:[#allocation2 + $0x181] sm:$0xff] }
  0x95   : > { %6599 = vrot.lane.b32.xlu1 %v8533_v63, %s8290_s11  ;;  %v592_v63 = vld [vmem:[#allocation2 + $0x189] sm:$0xff] }
  0x96   : > { %6604 = vrot.lane.b32.xlu0 %v8537_v5, %s8290_s11 }
  0x99   : > { %6609 = vrot.lane.b32.xlu1 %v8541_v6, %s8290_s11 }
  0x9a   : > { %6614 = vrot.lane.b32.xlu0 %v8545_v11, %s8290_s11  ;;  %v8905_v11 = vpack.i.bf16 %v592_v63, %v591_v62 }
  0x9d   : > { %6619 = vrot.lane.b32.xlu1 %v8549_v12, %s8290_s11 }
  0x9e   : > { %6624 = vrot.lane.b32.xlu0 %v8553_v17, %s8290_s11 }
  0xa1   : > { %6629 = vrot.lane.b32.xlu1 %v8557_v18, %s8290_s11 }
  0xa2   : > { %6634 = vrot.lane.b32.xlu0 %v8561_v23, %s8290_s11 }
  0xa3   : > { %v8891_v55 = vpop.permute.xlu1 %6354 }
  0xa4   : > { %v8893_v59 = vpop.permute.xlu0 %6349 }
  0xa5   : > { %6639 = vrot.lane.b32.xlu1 %v8565_v24, %s8290_s11 }
  0xa6   : > { %6644 = vrot.lane.b32.xlu0 %v8641_v29, %s8290_s11 }
  0xa7   : > { %v8899_v5 = vpop.permute.xlu1 %6359 }
  0xa8   : > { %v8901_v6 = vpop.permute.xlu0 %6364 }
  0xa9   : > { %6649 = vrot.lane.b32.xlu1 %v8645_v30, %s8290_s11 }
  0xaa   : > { %6654 = vrot.lane.b32.xlu0 %v8649_v35, %s8290_s11 }
  0xab   : > { %v8909_v12 = vpop.permute.xlu1 %6369 }
  0xac   : > { %v8911_v17 = vpop.permute.xlu0 %6374 }
  0xad   : > { %6659 = vrot.lane.b32.xlu1 %v8905_v11, %s8290_s11 }
  0xae   : > { %6664 = vrot.lane.b32.xlu0 %v8655_v41, %s8291_s12 }
  0xaf   : > { %v8917_v18 = vpop.permute.xlu1 %6379 }
  0xb0   : > { %v8919_v23 = vpop.permute.xlu0 %6384 }
  0xb1   : > { %6669 = vrot.lane.b32.xlu1 %v8658_v42, %s8291_s12 }
  0xb2   : > { %6674 = vrot.lane.b32.xlu0 %v8662_v47, %s8291_s12 }
  0xb3   : > { %v8925_v24 = vpop.permute.xlu1 %6389 }
  0xb4   : > { %v8927_v29 = vpop.permute.xlu0 %6394 }
  0xb5   : > { %6679 = vrot.lane.b32.xlu1 %v8666_v48, %s8291_s12 }
  0xb6   : > { %6684 = vrot.lane.b32.xlu0 %v8670_v53, %s8291_s12 }
  0xb7   : > { %v8933_v30 = vpop.permute.xlu1 %6399 }
  0xb8   : > { %v8935_v35 = vpop.permute.xlu0 %6404 }
  0xb9   : > { %6689 = vrot.lane.b32.xlu1 %v8674_v54, %s8291_s12 }
  0xba   : > { %6694 = vrot.lane.b32.xlu0 %v8678_v61, %s8291_s12  ;;  %v623_v61 = vld [vmem:[#allocation2 + $0x182] sm:$0xff] }
  0xbb   : > { %v8941_v41 = vpop.permute.xlu1 %6409 }
  0xbc   : > { %v8943_v42 = vpop.permute.xlu0 %6414 }
  0xbd   : > { %6699 = vrot.lane.b32.xlu1 %v8682_v1, %s8291_s12  ;;  %v624_v1 = vld [vmem:[#allocation2 + $0x18a] sm:$0xff] }
  0xbe   : > { %6704 = vrot.lane.b32.xlu0 %v8686_v8, %s8291_s12 }
  0xbf   : > { %v8949_v47 = vpop.permute.xlu1 %6419 }
  0xc0   : > { %v8951_v48 = vpop.permute.xlu0 %6424 }
  0xc1   : > { %6709 = vrot.lane.b32.xlu1 %v8690_v9, %s8291_s12  ;;  %v8971_v9 = vpack.i.bf16 %v624_v1, %v623_v61  ;;  %v658_v1 = vld [vmem:[#allocation2 + $0x31] sm:$0xff] }
  0xc2   : > { %6714 = vrot.lane.b32.xlu0 %v8694_v16, %s8291_s12 }
  0xc3   : > { %v8957_v53 = vpop.permute.xlu1 %6429 }
  0xc4   : > { %v8959_v54 = vpop.permute.xlu0 %6434 }
  0xc5   : > { %6719 = vrot.lane.b32.xlu1 %v8698_v19, %s8291_s12 }
  0xc6   : > { %6724 = vrot.lane.b32.xlu0 %v8702_v26, %s8291_s12 }
  0xc7   : > { %v8965_v8 = vpop.permute.xlu1 %6439 }
  0xc8   : > { %v8967_v13 = vpop.permute.xlu0 %6444 }
  0xc9   : > { %6729 = vrot.lane.b32.xlu1 %v8706_v27, %s8291_s12 }
  0xca   : > { %6734 = vrot.lane.b32.xlu0 %v8714_v34, %s8291_s12 }
  0xcb   : > { %v8975_v16 = vpop.permute.xlu1 %6449 }
  0xcc   : > { %v8977_v19 = vpop.permute.xlu0 %6454 }
  0xcd   : > { %6739 = vrot.lane.b32.xlu1 %v8971_v9, %s8291_s12 }
  0xce   : > { %6744 = vrot.lane.b32.xlu0 %v8732_v43, %s8292_s13 }
  0xcf   : > { %v8983_v26 = vpop.permute.xlu1 %6459 }
  0xd0   : > { %v8985_v62 = vpop.permute.xlu0 %6464 }
  0xd1   : > { %6749 = vrot.lane.b32.xlu1 %v8737_v44, %s8292_s13 }
  0xd2   : > { %6754 = vrot.lane.b32.xlu0 %v8751_v51, %s8292_s13 }
  0xd3   : > { %v8991_v27 = vpop.permute.xlu1 %6469 }
  0xd4   : > { %v8993_v34 = vpop.permute.xlu0 %6474 }
  0xd5   : > { %6759 = vrot.lane.b32.xlu1 %v8757_v52, %s8292_s13 }
  0xd6   : > { %6764 = vrot.lane.b32.xlu0 %v8771_v2, %s8292_s13 }
  0xd7   : > { %v8999_v43 = vpop.permute.xlu1 %6479 }
  0xd8   : > { %v9001_v63 = vpop.permute.xlu0 %6484 }
  0xd9   : > { %12583 = vst [vmem:[#allocation17_spill] sm:$0xff] %v9001_v63  ;;  %6769 = vrot.lane.b32.xlu1 %v8777_v3, %s8292_s13  ;;  %v672_v63 = vld [vmem:[#allocation2 + $0xd9] sm:$0xff] }
  0xda   : > { %6774 = vrot.lane.b32.xlu0 %v8791_v14, %s8292_s13 }
  0xdb   : > { %v9007_v44 = vpop.permute.xlu1 %6489 }
  0xdc   : > { %12584 = vst [vmem:[#allocation18_spill] sm:$0xff] %v9007_v44  ;;  %v9009_v51 = vpop.permute.xlu0 %6494 }
  0xdd   : > { %12585 = vst [vmem:[#allocation19_spill] sm:$0xff] %v9009_v51  ;;  %6779 = vrot.lane.b32.xlu1 %v8797_v15, %s8292_s13  ;;  %v656_v15 = vld [vmem:[#allocation2 + $0x198] sm:$0xff]  ;;  %v663_v51 = vld [vmem:[#allocation2 + $0x69] sm:$0xff] }
  0xde   : > { %6784 = vrot.lane.b32.xlu0 %v8811_v28, %s8292_s13  ;;  %v657_v28 = vld [vmem:[#allocation2 + $0x1a0] sm:$0xff] }
  0xdf   : > { %v9015_v52 = vpop.permute.xlu1 %6499 }
  0xe0   : > { %12586 = vst [vmem:[#allocation20_spill] sm:$0xff] %v9015_v52  ;;  %v9017_v2 = vpop.permute.xlu0 %6504 }
  0xe1   : > { %12587 = vst [vmem:[#allocation21_spill] sm:$0xff] %v9017_v2  ;;  %6789 = vrot.lane.b32.xlu1 %v8817_v31, %s8292_s13  ;;  %v659_v2 = vld [vmem:[#allocation2 + $0x39] sm:$0xff] }
  0xe2   : > { %6794 = vrot.lane.b32.xlu0 %v8831_v20, %s8292_s13  ;;  %v6818_v20 = vpack.i.bf16 %v657_v28, %v656_v15  ;;  %v664_v15 = vld [vmem:[#allocation2 + $0x79] sm:$0xff]  ;;  %v665_v28 = vld [vmem:[#allocation2 + $0x81] sm:$0xff] }
  0xe3   : > { %v9023_v3 = vpop.permute.xlu1 %6509 }
  0xe4   : > { %12588 = vst [vmem:[#allocation22_spill] sm:$0xff] %v9023_v3  ;;  %v9025_v14 = vpop.permute.xlu0 %6514  ;;  %v661_v3 = vld [vmem:[#allocation2 + $0x51] sm:$0xff] }
  0xe5   : > { %12589 = vst [vmem:[#allocation23_spill] sm:$0xff] %v9025_v14  ;;  %6799 = vrot.lane.b32.xlu1 %v8837_v22, %s8292_s13  ;;  %v6823_v14 = vpack.i.bf16 %v659_v2, %v658_v1  ;;  %v660_v22 = vld [vmem:[#allocation2 + $0x49] sm:$0xff]  ;;  %v667_v2 = vld [vmem:[#allocation2 + $0x99] sm:$0xff] }
  0xe6   : > { %6804 = vrot.lane.b32.xlu0 %v8851_v36, %s8292_s13  ;;  %v662_v36 = vld [vmem:[#allocation2 + $0x61] sm:$0xff] }
  0xe7   : > { %v9031_v61 = vpop.permute.xlu1 %6519 }
  0xe8   : > { %12590 = vst [vmem:[#allocation24_spill] sm:$0xff] %v9031_v61  ;;  %v9033_v31 = vpop.permute.xlu0 %6524  ;;  %v6828_v61 = vpack.i.bf16 %v661_v3, %v660_v22  ;;  %v669_v3 = vld [vmem:[#allocation2 + $0xb1] sm:$0xff] }
  0xe9   : > { %12591 = vst [vmem:[#allocation25_spill] sm:$0xff] %v9033_v31  ;;  %6809 = vrot.lane.b32.xlu1 %v8857_v10, %s8292_s13  ;;  %v6833_v10 = vpack.i.bf16 %v663_v51, %v662_v36  ;;  %v671_v51 = vld [vmem:[#allocation2 + $0xc9] sm:$0xff] }
  0xea   : > { %6814 = vrot.lane.b32.xlu0 %v8861_v58, %s8292_s13  ;;  %v666_v58 = vld [vmem:[#allocation2 + $0x91] sm:$0xff] }
  0xeb   : > { %v9039_v52 = vpop.permute.xlu1 %6529 }
  0xec   : > { %12592 = vst [vmem:[#allocation26_spill] sm:$0xff] %v9039_v52  ;;  %v9041_v44 = vpop.permute.xlu0 %6534  ;;  %v6838_v52 = vpack.i.bf16 %v665_v28, %v664_v15  ;;  %v675_v28 = vld [vmem:[#allocation2 + $0xf9] sm:$0xff] }
  0xed   : > { %12593 = vst [vmem:[#allocation27_spill] sm:$0xff] %v9041_v44  ;;  %6819 = vrot.lane.b32.xlu1 %v6818_v20, %s8292_s13  ;;  %v6843_v44 = vpack.i.bf16 %v667_v2, %v666_v58  ;;  %v668_v20 = vld [vmem:[#allocation2 + $0xa9] sm:$0xff] }
  0xee   : > { %6824 = vrot.lane.b32.xlu0 %v6823_v14, %s8293_s14  ;;  %v670_v14 = vld [vmem:[#allocation2 + $0xc1] sm:$0xff] }
  0xef   : > { %v9045_v31 = vpop.permute.xlu1 %6539 }
  0xf0   : > { %12594 = vst [vmem:[#allocation28_spill] sm:$0xff] %v9045_v31  ;;  %v9047_v1 = vpop.permute.xlu0 %6544  ;;  %v6848_v31 = vpack.i.bf16 %v669_v3, %v668_v20  ;;  %v679_v3 = vld [vmem:[#allocation2 + $0x129] sm:$0xff] }
  0xf1   : > { %12595 = vst [vmem:[#allocation29_spill] sm:$0xff] %v9047_v1  ;;  %6829 = vrot.lane.b32.xlu1 %v6828_v61, %s8293_s14  ;;  %v6853_v1 = vpack.i.bf16 %v671_v51, %v670_v14  ;;  %v673_v61 = vld [vmem:[#allocation2 + $0xe1] sm:$0xff]  ;;  %v8264_v51 = vld [vmem:[%s12421_s1 + $0x10] ss:$0 sps:$4 sm:$0x33]  }
  0xf2   : > { %6834 = vrot.lane.b32.xlu0 %v6833_v10, %s8293_s14  ;;  %v674_v10 = vld [vmem:[#allocation2 + $0xf1] sm:$0xff]  ;;  %v6858_v2 = vpack.i.bf16 %v673_v61, %v672_v63  ;;  %6311 = vmatprep.subr.msk.bf16.mxu0 %vm2101_vm3, %v8264_v51  ;;  %v2103_v61 = vsel %vm2101_vm3, %v8264_v51, 0 }
  0xf3   : > { %v9051_v22 = vpop.permute.xlu1 %6549  ;;  %6232 = vmatpush3.bf16.msra.mxu0 %v2103_v61  ;;  %v8266_v61 = vld [vmem:[%s12421_s1] sm:$0xff]  }
  0xf4   : > { %12596 = vst [vmem:[#allocation30_spill] sm:$0xff] %v9051_v22  ;;  %v9053_v36 = vpop.permute.xlu0 %6554  ;;  %v676_v22 = vld [vmem:[#allocation2 + $0x109] sm:$0xff] }
  0xf5   : > { %12597 = vst [vmem:[#allocation31_spill] sm:$0xff] %v9053_v36  ;;  %6839 = vrot.lane.b32.xlu1 %v6838_v52, %s8293_s14  ;;  %v6863_v36 = vpack.i.bf16 %v675_v28, %v674_v10  ;;  %v677_v52 = vld [vmem:[#allocation2 + $0x111] sm:$0xff] }
  0xf6   : > { %6844 = vrot.lane.b32.xlu0 %v6843_v44, %s8293_s14  ;;  %v678_v44 = vld [vmem:[#allocation2 + $0x121] sm:$0xff]  ;;  %v682_v28 = vld [vmem:[#allocation2 + $0x151] sm:$0xff] }
  0xf7   : > { %v9057_v15 = vpop.permute.xlu1 %6559  ;;  %v6873_v63 = vpack.i.bf16 %v679_v3, %v678_v44  ;;  %v685_v44 = vld [vmem:[#allocation2 + $0x171] sm:$0xff] }
  0xf8   : > { %v9059_v58 = vpop.permute.xlu0 %6564 }
  0xf9   : > { %12598 = vst [vmem:[#allocation32_spill] sm:$0xff] %v9059_v58  ;;  %6849 = vrot.lane.b32.xlu1 %v6848_v31, %s8293_s14  ;;  %v6868_v58 = vpack.i.bf16 %v677_v52, %v676_v22  ;;  %v680_v31 = vld [vmem:[#allocation2 + $0x139] sm:$0xff]  ;;  %v684_v52 = vld [vmem:[#allocation2 + $0x169] sm:$0xff] }
  0xfa   : > { %6854 = vrot.lane.b32.xlu0 %v6853_v1, %s8293_s14  ;;  %v681_v1 = vld [vmem:[#allocation2 + $0x141] sm:$0xff] }
  0xfb   : > { %v9063_v20 = vpop.permute.xlu1 %6569  ;;  %v6878_v22 = vpack.i.bf16 %v681_v1, %v680_v31  ;;  %v690_v31 = vld [vmem:[#allocation2 + $0x32] sm:$0xff]  ;;  %v691_v1 = vld [vmem:[#allocation2 + $0x3a] sm:$0xff] }
  0xfc   : > { %12599 = vst [vmem:[#allocation33_spill] sm:$0xff] %v9063_v20  ;;  %v9065_v14 = vpop.permute.xlu0 %6574  ;;  %v683_v20 = vld [vmem:[#allocation2 + $0x159] sm:$0xff] }
  0xfd   : > { %12600 = vst [vmem:[#allocation34_spill] sm:$0xff] %v9065_v14  ;;  %6859 = vrot.lane.b32.xlu1 %v6858_v2, %s8293_s14  ;;  %v8265_v2 = vld [vmem:[%s12421_s1 + $0x8] sm:$0xff]  }
  0xfe   : > { %6864 = vrot.lane.b32.xlu0 %v6863_v36, %s8293_s14  ;;  %v6883_v36 = vpack.i.bf16 %v683_v20, %v682_v28  ;;  %6233 = vmatprep.subr.bf16.mxu0 %v8265_v2 }
  0xff   : > { %v9072_v10 = vpop.permute.xlu1 %6579  ;;  %6234 = vmatpush3.bf16.msra.mxu0 %v8265_v2 }
 0x100   : > { %12601 = vst [vmem:[#allocation35_spill] sm:$0xff] %v9072_v10  ;;  %v9074_v14 = vpop.permute.xlu0 %6584  ;;  %v6888_v10 = vpack.i.bf16 %v685_v44, %v684_v52  ;;  %6235 = vmatprep.subr.bf16.mxu0 %v8266_v61  ;;  %v692_v52 = vld [vmem:[#allocation2 + $0x4a] sm:$0xff]  ;;  %v693_v44 = vld [vmem:[#allocation2 + $0x52] sm:$0xff] }
 0x101   : > { %12602 = vst [vmem:[#allocation36_spill] sm:$0xff] %v9074_v14  ;;  %6869 = vrot.lane.b32.xlu1 %v6868_v58, %s8293_s14  ;;  %v688_v58 = vld [vmem:[#allocation2 + $0x199] sm:$0xff] }
 0x102   : > { %6874 = vrot.lane.b32.xlu0 %v6873_v63, %s8293_s14  ;;  %v689_v63 = vld [vmem:[#allocation2 + $0x1a1] sm:$0xff] }
 0x103   : > { %v9081_v3 = vpop.permute.xlu1 %6589  ;;  %6236 = vmatpush3.bf16.msra.mxu0 %v8266_v61  ;;  %v6898_v2 = vpack.i.bf16 %v689_v63, %v688_v58  ;;  %v6908_v61 = vpack.i.bf16 %v693_v44, %v692_v52  ;;  %v696_v58 = vld [vmem:[#allocation2 + $0x7a] sm:$0xff]  ;;  %v697_v63 = vld [vmem:[#allocation2 + $0x82] sm:$0xff]  ;;  %v701_v52 = vld [vmem:[#allocation2 + $0xb2] sm:$0xff] }
 0x104   : > { %12603 = vst [vmem:[#allocation37_spill] sm:$0xff] %v9081_v3  ;;  %v9083_v51 = vpop.permute.xlu0 %6594  ;;  %v695_v3 = vld [vmem:[#allocation2 + $0x6a] sm:$0xff] }
 0x105   : > { %12604 = vst [vmem:[#allocation38_spill] sm:$0xff] %v9083_v51  ;;  %6879 = vrot.lane.b32.xlu1 %v6878_v22, %s8293_s14  ;;  %v6903_v22 = vpack.i.bf16 %v691_v1, %v690_v31  ;;  %v694_v51 = vld [vmem:[#allocation2 + $0x62] sm:$0xff]  ;;  %v699_v31 = vld [vmem:[#allocation2 + $0x9a] sm:$0xff] }
 0x106   : > { %6884 = vrot.lane.b32.xlu0 %v6883_v36, %s8293_s14 }
 0x107   : > { %v9090_v20 = vpop.permute.xlu1 %6599 }
 0x108   : > { %12605 = vst [vmem:[#allocation39_spill] sm:$0xff] %v9090_v20  ;;  %v9092_v28 = vpop.permute.xlu0 %6604  ;;  %v704_v20 = vld [vmem:[#allocation2 + $0xda] sm:$0xff] }
 0x109   : > { %12606 = vst [vmem:[#allocation40_spill] sm:$0xff] %v9092_v28  ;;  %6889 = vrot.lane.b32.xlu1 %v6888_v10, %s8293_s14  ;;  %v6913_v10 = vpack.i.bf16 %v695_v3, %v694_v51  ;;  %v703_v3 = vld [vmem:[#allocation2 + $0xca] sm:$0xff] }
 0x10a   : > { %6894 = vrot.lane.b32.xlu0 %v8905_v11, %s8293_s14  ;;  %v698_v11 = vld [vmem:[#allocation2 + $0x92] sm:$0xff] }
 0x10b   : > { %v9097_v36 = vpop.permute.xlu1 %6609 }
 0x10c   : > { %12607 = vst [vmem:[#allocation41_spill] sm:$0xff] %v9097_v36  ;;  %v9099_v14 = vpop.permute.xlu0 %6614  ;;  %v6918_v36 = vpack.i.bf16 %v697_v63, %v696_v58  ;;  %v707_v63 = vld [vmem:[#allocation2 + $0xfa] sm:$0xff] }
 0x10d   : > { %12608 = vst [vmem:[#allocation42_spill] sm:$0xff] %v9099_v14  ;;  %6899 = vrot.lane.b32.xlu1 %v6898_v2, %s8293_s14  ;;  %v6923_v14 = vpack.i.bf16 %v699_v31, %v698_v11  ;;  %v700_v2 = vld [vmem:[#allocation2 + $0xaa] sm:$0xff] }
 0x10e   : > { %6904 = vrot.lane.b32.xlu0 %v6903_v22, %s8294_s21  ;;  %v702_v22 = vld [vmem:[#allocation2 + $0xc2] sm:$0xff] }
 0x10f   : > { %v9103_v28 = vpop.permute.xlu1 %6619 }
 0x110   : > { %12609 = vst [vmem:[#allocation43_spill] sm:$0xff] %v9103_v28  ;;  %v9105_v1 = vpop.permute.xlu0 %6624  ;;  %v6928_v28 = vpack.i.bf16 %v701_v52, %v700_v2  ;;  %v711_v52 = vld [vmem:[#allocation2 + $0x12a] sm:$0xff] }
 0x111   : > { %12610 = vst [vmem:[#allocation44_spill] sm:$0xff] %v9105_v1  ;;  %6909 = vrot.lane.b32.xlu1 %v6908_v61, %s8294_s21  ;;  %v6933_v1 = vpack.i.bf16 %v703_v3, %v702_v22  ;;  %v705_v61 = vld [vmem:[#allocation2 + $0xe2] sm:$0xff] }
 0x112   : > { %6914 = vrot.lane.b32.xlu0 %v6913_v10, %s8294_s21  ;;  %v706_v10 = vld [vmem:[#allocation2 + $0xf2] sm:$0xff]  ;;  %v6938_v31 = vpack.i.bf16 %v705_v61, %v704_v20  ;;  %v715_v61 = vld [vmem:[#allocation2 + $0x15a] sm:$0xff] }
 0x113   : > { %v9109_v44 = vpop.permute.xlu1 %6629 }
 0x114   : > { %12611 = vst [vmem:[#allocation45_spill] sm:$0xff] %v9109_v44  ;;  %v9111_v51 = vpop.permute.xlu0 %6634  ;;  %v708_v44 = vld [vmem:[#allocation2 + $0x10a] sm:$0xff] }
 0x115   : > { %12612 = vst [vmem:[#allocation46_spill] sm:$0xff] %v9111_v51  ;;  %6919 = vrot.lane.b32.xlu1 %v6918_v36, %s8294_s21  ;;  %v6943_v51 = vpack.i.bf16 %v707_v63, %v706_v10  ;;  %v709_v36 = vld [vmem:[#allocation2 + $0x112] sm:$0xff] }
 0x116   : > { %6924 = vrot.lane.b32.xlu0 %v6923_v14, %s8294_s21  ;;  %v710_v14 = vld [vmem:[#allocation2 + $0x122] sm:$0xff]  ;;  %v6948_v3 = vpack.i.bf16 %v709_v36, %v708_v44 }
 0x117   : > { %v9115_v58 = vpop.permute.xlu1 %6639 }
 0x118   : > { %12613 = vst [vmem:[#allocation47_spill] sm:$0xff] %v9115_v58  ;;  %v9117_v11 = vpop.permute.xlu0 %6644  ;;  %v712_v58 = vld [vmem:[#allocation2 + $0x13a] sm:$0xff] }
 0x119   : > { %12614 = vst [vmem:[#allocation48_spill] sm:$0xff] %v9117_v11  ;;  %6929 = vrot.lane.b32.xlu1 %v6928_v28, %s8294_s21  ;;  %v6953_v11 = vpack.i.bf16 %v711_v52, %v710_v14  ;;  %v713_v28 = vld [vmem:[#allocation2 + $0x142] sm:$0xff]  ;;  %v720_v14 = vld [vmem:[#allocation2 + $0x19a] sm:$0xff] }
 0x11a   : > { %6934 = vrot.lane.b32.xlu0 %v6933_v1, %s8294_s21  ;;  %v714_v1 = vld [vmem:[#allocation2 + $0x152] sm:$0xff]  ;;  %v6958_v63 = vpack.i.bf16 %v713_v28, %v712_v58  ;;  %v721_v52 = vld [vmem:[#allocation2 + $0x1a2] sm:$0xff] }
 0x11b   : > { %v9121_v2 = vpop.permute.xlu1 %6649  ;;  %v6978_v58 = vpack.i.bf16 %v721_v52, %v720_v14  ;;  %v6357_v14 = vunpack.i.h.bf16 %v8891_v55  ;;  %v6356_v52 = vunpack.i.l.bf16 %v8891_v55 }
 0x11c   : > { %12615 = vst [vmem:[#allocation49_spill] sm:$0xff] %v9121_v2  ;;  %v9123_v22 = vpop.permute.xlu0 %6654  ;;  %v716_v2 = vld [vmem:[#allocation2 + $0x16a] sm:$0xff] }
 0x11d   : > { %12616 = vst [vmem:[#allocation50_spill] sm:$0xff] %v9123_v22  ;;  %6939 = vrot.lane.b32.xlu1 %v6938_v31, %s8294_s21  ;;  %v6963_v22 = vpack.i.bf16 %v715_v61, %v714_v1  ;;  %v717_v31 = vld [vmem:[#allocation2 + $0x172] sm:$0xff] }
 0x11e   : > { %6944 = vrot.lane.b32.xlu0 %v6943_v51, %s8294_s21  ;;  %v6968_v36 = vpack.i.bf16 %v717_v31, %v716_v2  ;;  %v6346_v31 = vunpack.i.l.bf16 %v8885_v0 }
 0x11f   : > { %v9127_v20 = vpop.permute.xlu1 %6659 }
 0x120   : > { %12617 = vst [vmem:[#allocation51_spill] sm:$0xff] %v9127_v20  ;;  %v9129_v10 = vpop.permute.xlu0 %6664 }
 0x121   : > { %6949 = vrot.lane.b32.xlu1 %v6948_v3, %s8294_s21 }
 0x122   : > { %6954 = vrot.lane.b32.xlu0 %v6953_v11, %s8294_s21 }
 0x123   : > { %v9133_v44 = vpop.permute.xlu1 %6669 }
 0x124   : > { %v9135_v51 = vpop.permute.xlu0 %6674 }
 0x125   : > { %6959 = vrot.lane.b32.xlu1 %v6958_v63, %s8294_s21  ;;  %v6347_v63 = vunpack.i.h.bf16 %v8885_v0  ;;  %v6366_v0 = vunpack.i.l.bf16 %v8901_v6 }
 0x126   : > { %6964 = vrot.lane.b32.xlu0 %v6963_v22, %s8294_s21 }
 0x127   : > { %v9139_v20 = vpop.permute.xlu1 %6679 }
 0x128   : > { %12618 = vst [vmem:[#allocation52_spill] sm:$0xff] %v9139_v20  ;;  %v9141_v3 = vpop.permute.xlu0 %6684 }
 0x129   : > { %12619 = vst [vmem:[#allocation53_spill] sm:$0xff] %v9141_v3  ;;  %6969 = vrot.lane.b32.xlu1 %v6968_v36, %s8294_s21  ;;  %v434_v36 = vld [vmem:[#allocation2 + $0x8] sm:$0xff]  ;;  %v6372_v3 = vunpack.i.h.bf16 %v8909_v12 }
 0x12a   : > { %6974 = vrot.lane.b32.xlu0 %v8971_v9, %s8294_s21  ;;  %v433_v9 = vld [vmem:[#allocation2] sm:$0xff]  ;;  %v9175_v55 = vsel %vm280_vm0, %v434_v36, %v6347_v63  ;;  %v6376_v63 = vunpack.i.l.bf16 %v8911_v17 }
 0x12b   : > { %v9146_v11 = vpop.permute.xlu1 %6689  ;;  %v9178_v20 = vsel %vm280_vm0, %v433_v9, %v6346_v31 }
 0x12c   : > { %12620 = vst [vmem:[#allocation54_spill] sm:$0xff] %v9146_v11  ;;  %v9148_v28 = vpop.permute.xlu0 %6694 }
 0x12d   : > { %12621 = vst [vmem:[#allocation55_spill] sm:$0xff] %v9148_v28  ;;  %6979 = vrot.lane.b32.xlu1 %v6978_v58, %s8294_s21  ;;  %v6351_v58 = vunpack.i.l.bf16 %v8893_v59 }
 0x12f   : > { %v9151_v2 = vpop.permute.xlu1 %6699 }
 0x130   : > { %12622 = vst [vmem:[#allocation56_spill] sm:$0xff] %v9151_v2  ;;  %v9153_v22 = vpop.permute.xlu0 %6704  ;;  %v6367_v2 = vunpack.i.h.bf16 %v8901_v6  ;;  %v9192_v6 = vsel %vm280_vm0, %v8708_v32, %v6351_v58  ;;  %v12632_v58 = vld [vmem:[#allocation6_spill] sm:$0xff] }
 0x131   : > { %12623 = vst [vmem:[#allocation57_spill] sm:$0xff] %v9153_v22  ;;  %v6352_v22 = vunpack.i.h.bf16 %v8893_v59  ;;  %v6371_v59 = vunpack.i.l.bf16 %v8909_v12 }
 0x132   : > { %v9211_v32 = vsel %vm280_vm0, %v8741_v46, %v6367_v2  ;;  %v6387_v2 = vunpack.i.h.bf16 %v8919_v23 }
 0x133   : > { %v9155_v1 = vpop.permute.xlu1 %6709  ;;  %v9199_v12 = vsel %vm280_vm0, %v8710_v33, %v6352_v22  ;;  %v9221_v33 = vsel %vm280_vm0, %v8745_v50, %v6372_v3  ;;  %v6381_v22 = vunpack.i.l.bf16 %v8917_v18  ;;  %v9237_v50 = vsel %vm280_vm0, %v8759_v56, %v6376_v63 }
 0x134   : > { %12624 = vst [vmem:[#allocation58_spill] sm:$0xff] %v9155_v1  ;;  %v9157_v61 = vpop.permute.xlu0 %6714  ;;  %v6362_v1 = vunpack.i.h.bf16 %v8899_v5  ;;  %v6392_v3 = vunpack.i.h.bf16 %v8925_v24  ;;  %v6411_v63 = vunpack.i.l.bf16 %v8941_v41 }
 0x135   : > { %12625 = vst [vmem:[#allocation59_spill] sm:$0xff] %v9157_v61  ;;  %v6361_v61 = vunpack.i.l.bf16 %v8899_v5  ;;  %v9184_v5 = vsel %vm280_vm0, %v8720_v37, %v6356_v52  ;;  %v6406_v52 = vunpack.i.l.bf16 %v8935_v35 }
 0x136   : > { %v9203_v37 = vsel %vm280_vm0, %v8726_v40, %v6362_v1  ;;  %v6382_v40 = vunpack.i.h.bf16 %v8917_v18  ;;  %v6391_v18 = vunpack.i.l.bf16 %v8925_v24  ;;  %v6397_v1 = vunpack.i.h.bf16 %v8927_v29 }
 0x137   : > { %v9164_v28 = vpop.permute.xlu1 %6719 }
 0x138   : > { %12626 = vst [vmem:[#allocation60_spill] sm:$0xff] %v9164_v28  ;;  %v9170_v11 = vpop.permute.xlu0 %6724  ;;  %v6377_v28 = vunpack.i.h.bf16 %v8911_v17  ;;  %v9217_v17 = vsel %vm280_vm0, %v8739_v45, %v6366_v0  ;;  %v6386_v45 = vunpack.i.l.bf16 %v8919_v23  ;;  %v6407_v23 = vunpack.i.h.bf16 %v8935_v35 }
 0x139   : > { %12627 = vst [vmem:[#allocation61_spill] sm:$0xff] %v9170_v11  ;;  %v9188_v11 = vsel %vm280_vm0, %v8722_v38, %v6357_v14  ;;  %v9207_v38 = vsel %vm280_vm0, %v8724_v39, %v6361_v61  ;;  %v9227_v39 = vsel %vm280_vm0, %v8743_v49, %v6371_v59  ;;  %v6396_v61 = vunpack.i.l.bf16 %v8927_v29  ;;  %v12631_v14 = vld [vmem:[#allocation4_spill] sm:$0xff] }
 0x13a   : > { %v9231_v46 = vsel %vm280_vm0, %v8761_v57, %v6377_v28  ;;  %v6402_v57 = vunpack.i.h.bf16 %v8933_v30  ;;  %v6401_v28 = vunpack.i.l.bf16 %v8933_v30  ;;  %v9252_v56 = vsel %vm280_vm0, %v8765_v60, %v6382_v40  ;;  %v12633_v30 = vld [vmem:[#allocation5_spill] sm:$0xff]  ;;  %v12634_v40 = vld [vmem:[#allocation8_spill] sm:$0xff] }
 0x13b   : > { %v9195_v31 = vpop.permute.xlu1 %6729  ;;  %v9256_v24 = vsel %vm280_vm0, %v12631_v14, %v6381_v22  ;;  %v6412_v29 = vunpack.i.h.bf16 %v8941_v41  ;;  %v9262_v0 = vsel %vm280_vm0, %v12632_v58, %v6387_v2  ;;  %v9266_v59 = vsel %vm280_vm0, %v12633_v30, %v6386_v45  ;;  %v12635_v14 = vld [vmem:[#allocation7_spill] sm:$0xff]  ;;  %v12637_v30 = vld [vmem:[#allocation9_spill] sm:$0xff] }
 0x13c   : > { %12628 = vst [vmem:[#allocation62_spill] sm:$0xff] %v9195_v31  ;;  %v9213_v36 = vpop.permute.xlu0 %6734  ;;  %v6417_v60 = vunpack.i.h.bf16 %v8943_v42  ;;  %v9272_v22 = vsel %vm280_vm0, %v12634_v40, %v6392_v3  ;;  %v9276_v35 = vsel %vm280_vm0, %v12635_v14, %v6391_v18  ;;  %v6416_v58 = vunpack.i.l.bf16 %v8943_v42  ;;  %v12639_v40 = vld [vmem:[#allocation11_spill] sm:$0xff]  ;;  %v12640_v14 = vld [vmem:[#allocation14_spill] sm:$0xff]  ;;  %v12642_v42 = vld [vmem:[#allocation13_spill] sm:$0xff] }
 0x13d   : > { %12629 = vst [vmem:[#allocation63_spill] sm:$0xff] %v9213_v36  ;;  %v9287_v41 = vsel %vm280_vm0, %v12637_v30, %v6396_v61  ;;  %v12638_v36 = vld [vmem:[#allocation12_spill] sm:$0xff]  ;;  %v9295_v18 = vsel %vm280_vm0, %v12639_v40, %v6401_v28  ;;  %v9305_v31 = vsel %vm280_vm0, %v12642_v42, %v6406_v52  ;;  %v12644_v28 = vld [vmem:[#allocation15_spill] sm:$0xff]  ;;  %v6426_v52 = vunpack.i.l.bf16 %v8951_v48 }
 0x13e   : > { %v9291_v3 = vsel %vm280_vm0, %v12638_v36, %v6402_v57  ;;  %v12643_v61 = vld [vmem:[#allocation16_spill] sm:$0xff]  ;;  %v6422_v36 = vunpack.i.h.bf16 %v8949_v47  ;;  %v6421_v57 = vunpack.i.l.bf16 %v8949_v47  ;;  %v9315_v40 = vsel %vm280_vm0, %v12644_v28, %v6411_v63 }
 0x13f   : > { %v9242_v49 = vpop.permute.xlu1 %6739  ;;  %v9309_v30 = vsel %vm280_vm0, %v12643_v61, %v6412_v29  ;;  %v9325_v29 = vsel %vm280_vm0, %v8839_v25, %v6416_v58  ;;  %v6432_v42 = vunpack.i.h.bf16 %v8957_v53  ;;  %v6431_v47 = vunpack.i.l.bf16 %v8957_v53 }
 0x140   : > { %12630 = vst [vmem:[#allocation64_spill] sm:$0xff] %v9242_v49  ;;  %v9248_v9 = vpop.permute.xlu0 %6744  ;;  %v12636_v49 = vld [vmem:[#allocation10_spill] sm:$0xff]  ;;  %v6437_v61 = vunpack.i.h.bf16 %v8959_v54  ;;  %v6436_v28 = vunpack.i.l.bf16 %v8959_v54  ;;  %v9340_v25 = vsel %vm280_vm0, %v8845_v7, %v6422_v36  ;;  %v9344_v53 = vsel %vm280_vm0, %v8843_v4, %v6421_v57 }
 0x141   : > { %v9280_v2 = vsel %vm280_vm0, %v12636_v49, %v6397_v1  ;;  %v9299_v1 = vsel %vm280_vm0, %v12640_v14, %v6407_v23  ;;  %v9319_v23 = vsel %vm280_vm0, %v8841_v21, %v6417_v60  ;;  %v6427_v14 = vunpack.i.h.bf16 %v8951_v48 }
 0x142   : > { %v6442_v21 = vunpack.i.h.bf16 %v8965_v8  ;;  %v6441_v60 = vunpack.i.l.bf16 %v8965_v8  ;;  %v6446_v48 = vunpack.i.l.bf16 %v8967_v13  ;;  %v6447_v58 = vunpack.i.h.bf16 %v8967_v13 }
 0x143   : > { %v9283_v45 = vpop.permute.xlu1 %6749  ;;  %v6452_v54 = vunpack.i.h.bf16 %v8975_v16  ;;  %v9354_v8 = vsel %vm1778_vm2, %v9178_v20, %v6426_v52  ;;  %v6456_v7 = vunpack.i.l.bf16 %v8977_v19  ;;  %v9360_v4 = vsel %vm1778_vm2, %v9192_v6, %v6431_v47 }
 0x144   : > { %v9301_v49 = vpop.permute.xlu0 %6754  ;;  %v9364_v13 = vsel %vm1778_vm2, %v9199_v12, %v6432_v42  ;;  %v6457_v36 = vunpack.i.h.bf16 %v8977_v19  ;;  %v9379_v6 = vsel %vm1778_vm2, %v9203_v37, %v6442_v21  ;;  %v9383_v12 = vsel %vm1778_vm2, %v9207_v38, %v6441_v60 }
 0x145   : > { %12641 = vst [vmem:[#allocation4_spill] sm:$0xff] %v9301_v49  ;;  %v9393_v19 = vsel %vm1778_vm2, %v9211_v32, %v6447_v58  ;;  %v6462_v37 = vunpack.i.h.bf16 %v8983_v26  ;;  %v6467_v52 = vunpack.i.h.bf16 %v8985_v62  ;;  %v6466_v32 = vunpack.i.l.bf16 %v8985_v62  ;;  %v12647_v62 = vld [vmem:[#allocation17_spill] sm:$0xff] }
 0x146   : > { %v6472_v42 = vunpack.i.h.bf16 %v8991_v27  ;;  %v6476_v47 = vunpack.i.l.bf16 %v8993_v34  ;;  %v6487_v60 = vunpack.i.h.bf16 %v12647_v62  ;;  %vm3926_vm0 = vcmask 523264  }
 0x147   : > { %v9330_v63 = vpop.permute.xlu1 %6759  ;;  %v9438_v58 = vsel %vm1778_vm2, %v9266_v59, %v6466_v32 }
 0x148   : > { %12645 = vst [vmem:[#allocation6_spill] sm:$0xff] %v9330_v63  ;;  %v9336_v49 = vpop.permute.xlu0 %6764  ;;  %v9350_v63 = vsel %vm1778_vm2, %v9175_v55, %v6427_v14  ;;  %v9368_v55 = vsel %vm1778_vm2, %v9188_v11, %v6437_v61  ;;  %v9387_v11 = vsel %vm1778_vm2, %v9217_v17, %v6446_v48  ;;  %v6461_v14 = vunpack.i.l.bf16 %v8983_v26  ;;  %v12649_v48 = vld [vmem:[#allocation18_spill] sm:$0xff] }
 0x149   : > { %12646 = vst [vmem:[#allocation5_spill] sm:$0xff] %v9336_v49  ;;  %v6451_v49 = vunpack.i.l.bf16 %v8975_v16  ;;  %v9375_v16 = vsel %vm1778_vm2, %v9184_v5, %v6436_v28  ;;  %v9397_v5 = vsel %vm1778_vm2, %v9221_v33, %v6452_v54  ;;  %v9407_v17 = vsel %vm1778_vm2, %v9237_v50, %v6456_v7 }
 0x14a   : > { %v9413_v33 = vsel %vm1778_vm2, %v9231_v46, %v6457_v36  ;;  %v6471_v26 = vunpack.i.l.bf16 %v8991_v27  ;;  %v6477_v50 = vunpack.i.h.bf16 %v8993_v34  ;;  %v6481_v61 = vunpack.i.l.bf16 %v8999_v43 }
 0x14b   : > { %v9371_v20 = vpop.permute.xlu1 %6769  ;;  %v9403_v38 = vsel %vm1778_vm2, %v9227_v39, %v6451_v49  ;;  %v6482_v49 = vunpack.i.h.bf16 %v8999_v43  ;;  %v6486_v28 = vunpack.i.l.bf16 %v12647_v62  ;;  %v9428_v46 = vsel %vm1778_vm2, %v9252_v56, %v6462_v37  ;;  %v12650_v56 = vld [vmem:[#allocation19_spill] sm:$0xff] }
 0x14c   : > { %v9389_v57 = vpop.permute.xlu0 %6774  ;;  %v9432_v27 = vsel %vm1778_vm2, %v9256_v24, %v6461_v14  ;;  %v6492_v34 = vunpack.i.h.bf16 %v12649_v48  ;;  %v9442_v43 = vsel %vm1778_vm2, %v9262_v0, %v6467_v52  ;;  %v6491_v54 = vunpack.i.l.bf16 %v12649_v48 }
 0x14d   : > { %v6496_v7 = vunpack.i.l.bf16 %v12650_v56  ;;  %v9448_v24 = vsel %vm1778_vm2, %v9272_v22, %v6472_v42  ;;  %v9452_v36 = vsel %vm1778_vm2, %v9276_v35, %v6471_v26  ;;  %v9456_v59 = vsel %vm1778_vm2, %v9287_v41, %v6476_v47  ;;  %v12654_v47 = vld [vmem:[#allocation21_spill] sm:$0xff] }
 0x14e   : > { %v6497_v37 = vunpack.i.h.bf16 %v12650_v56  ;;  %v9463_v14 = vsel %vm1778_vm2, %v9280_v2, %v6477_v50  ;;  %v9467_v22 = vsel %vm1778_vm2, %v9291_v3, %v6482_v49  ;;  %v9471_v35 = vsel %vm1778_vm2, %v9295_v18, %v6481_v61  ;;  %v12653_v3 = vld [vmem:[#allocation20_spill] sm:$0xff]  ;;  %v12655_v49 = vld [vmem:[#allocation22_spill] sm:$0xff]  ;;  %v12659_v56 = vld [vmem:[#allocation25_spill] sm:$0xff] }
 0x14f   : > { %v9418_v39 = vpop.permute.xlu1 %6779  ;;  %v9475_v41 = vsel %vm1778_vm2, %v9305_v31, %v6486_v28  ;;  %v9481_v32 = vsel %vm1778_vm2, %v9299_v1, %v6487_v60  ;;  %v9485_v2 = vsel %vm1778_vm2, %v9309_v30, %v6492_v34  ;;  %v6502_v42 = vunpack.i.h.bf16 %v12653_v3  ;;  %v12656_v28 = vld [vmem:[#allocation23_spill] sm:$0xff] }
 0x150   : > { %v9424_v21 = vpop.permute.xlu0 %6784  ;;  %v6501_v26 = vunpack.i.l.bf16 %v12653_v3  ;;  %v9491_v18 = vsel %vm1778_vm2, %v9315_v40, %v6491_v54  ;;  %v9495_v31 = vsel %vm1778_vm2, %v9325_v29, %v6496_v7  ;;  %v6507_v50 = vunpack.i.h.bf16 %v12654_v47  ;;  %v12658_v29 = vld [vmem:[#allocation24_spill] sm:$0xff] }
 0x151   : > { %12648 = vst [vmem:[#allocation8_spill] sm:$0xff] %v9424_v21  ;;  %v6506_v1 = vunpack.i.l.bf16 %v12654_v47  ;;  %v9501_v30 = vsel %vm1778_vm2, %v9319_v23, %v6497_v37  ;;  %v6512_v61 = vunpack.i.h.bf16 %v12655_v49  ;;  %v6511_v62 = vunpack.i.l.bf16 %v12655_v49  ;;  %v12663_v49 = vld [vmem:[#allocation26_spill] sm:$0xff] }
 0x152   : > { %v6516_v60 = vunpack.i.l.bf16 %v12656_v28  ;;  %v6517_v48 = vunpack.i.h.bf16 %v12656_v28  ;;  %v6522_v34 = vunpack.i.h.bf16 %v12658_v29  ;;  %v6521_v54 = vunpack.i.l.bf16 %v12658_v29 }
 0x153   : > { %v9459_v0 = vpop.permute.xlu1 %6789  ;;  %v6526_v7 = vunpack.i.l.bf16 %v12659_v56  ;;  %v9516_v23 = vsel %vm1778_vm2, %v9340_v25, %v6502_v42  ;;  %v9520_v37 = vsel %vm1778_vm2, %v9344_v53, %v6501_v26  ;;  %v6527_v47 = vunpack.i.h.bf16 %v12659_v56  ;;  %v12664_v25 = vld [vmem:[#allocation27_spill] sm:$0xff]  ;;  %v12669_v56 = vld [vmem:[#allocation30_spill] sm:$0xff] }
 0x154   : > { %12651 = vst [vmem:[#allocation7_spill] sm:$0xff] %v9459_v0  ;;  %v9477_v52 = vpop.permute.xlu0 %6794  ;;  %12661 = vst [vmem:[#allocation11_spill] sm:$0xff] %v9516_v23  ;;  %v6531_v28 = vunpack.i.l.bf16 %v12663_v49  ;;  %v9530_v29 = vsel %vm1811_vm4, %v9350_v63, %v6507_v50  ;;  %v6536_v42 = vunpack.i.l.bf16 %v12664_v25  ;;  %v9536_v53 = vsel %vm1811_vm4, %v9360_v4, %v6511_v62 }
 0x155   : > { %12652 = vst [vmem:[#allocation10_spill] sm:$0xff] %v9477_v52  ;;  %12662 = vst [vmem:[#allocation14_spill] sm:$0xff] %v9520_v37  ;;  %v9540_v26 = vsel %vm1811_vm4, %v9364_v13, %v6512_v61  ;;  %v9551_v50 = vsel %vm1811_vm4, %v9368_v55, %v6517_v48  ;;  %v9555_v4 = vsel %vm1811_vm4, %v9383_v12, %v6521_v54  ;;  %v12667_v12 = vld [vmem:[#allocation28_spill] sm:$0xff]  ;;  %v12687_v52 = vld [vmem:[#allocation47_spill] sm:$0xff] }
 0x156   : > { %v9559_v13 = vsel %vm1811_vm4, %v9379_v6, %v6522_v34  ;;  %v9569_v62 = vsel %vm1811_vm4, %v9393_v19, %v6527_v47  ;;  %v9573_v55 = vsel %vm1811_vm4, %v9403_v38, %v6531_v28  ;;  %v6541_v48 = vunpack.i.l.bf16 %v12667_v12  ;;  %v12668_v34 = vld [vmem:[#allocation29_spill] sm:$0xff] }
 0x157   : > { %v9506_v40 = vpop.permute.xlu1 %6799  ;;  %v6547_v54 = vunpack.i.h.bf16 %v12668_v34  ;;  %v6546_v19 = vunpack.i.l.bf16 %v12668_v34  ;;  %v6551_v47 = vunpack.i.l.bf16 %v12669_v56  ;;  %v6562_v28 = vunpack.i.h.bf16 %v9057_v15 }
 0x158   : > { %12657 = vst [vmem:[#allocation9_spill] sm:$0xff] %v9506_v40  ;;  %v9512_v3 = vpop.permute.xlu0 %6804  ;;  %v9526_v40 = vsel %vm1811_vm4, %v9354_v8, %v6506_v1  ;;  %v9544_v8 = vsel %vm1811_vm4, %v9375_v16, %v6516_v60  ;;  %v6537_v1 = vunpack.i.h.bf16 %v12664_v25  ;;  %v9563_v16 = vsel %vm1811_vm4, %v9387_v11, %v6526_v7 }
 0x159   : > { %12660 = vst [vmem:[#allocation12_spill] sm:$0xff] %v9512_v3  ;;  %v6532_v3 = vunpack.i.h.bf16 %v12663_v49  ;;  %v6542_v60 = vunpack.i.h.bf16 %v12667_v12  ;;  %v9583_v11 = vsel %vm1811_vm4, %v9407_v17, %v6536_v42  ;;  %v6552_v7 = vunpack.i.h.bf16 %v12669_v56  ;;  %v12670_v49 = vld [vmem:[#allocation31_spill] sm:$0xff]  ;;  %v12672_v42 = vld [vmem:[#allocation32_spill] sm:$0xff] }
 0x15a   : > { %v9589_v38 = vsel %vm1811_vm4, %v9413_v33, %v6537_v1  ;;  %v6557_v17 = vunpack.i.h.bf16 %v12670_v49  ;;  %v6561_v25 = vunpack.i.l.bf16 %v9057_v15  ;;  %v6566_v12 = vunpack.i.l.bf16 %v12672_v42 }
 0x15b   : > { %v9547_v63 = vpop.permute.xlu1 %6809  ;;  %v9579_v6 = vsel %vm1811_vm4, %v9397_v5, %v6532_v3  ;;  %v6556_v5 = vunpack.i.l.bf16 %v12670_v49  ;;  %v9604_v33 = vsel %vm1811_vm4, %v9432_v27, %v6541_v48  ;;  %v9608_v1 = vsel %vm1811_vm4, %v9428_v46, %v6542_v60  ;;  %v12674_v27 = vld [vmem:[#allocation34_spill] sm:$0xff] }
 0x15c   : > { %12665 = vst [vmem:[#allocation13_spill] sm:$0xff] %v9547_v63  ;;  %v9565_v61 = vpop.permute.xlu0 %6814  ;;  %v6567_v56 = vunpack.i.h.bf16 %v12672_v42  ;;  %v9614_v23 = vsel %vm1811_vm4, %v9438_v58, %v6546_v19  ;;  %v9618_v15 = vsel %vm1811_vm4, %v9442_v43, %v6547_v54  ;;  %v6576_v48 = vunpack.i.l.bf16 %v12674_v27  ;;  %v12681_v63 = vld [vmem:[#allocation41_spill] sm:$0xff] }
 0x15d   : > { %12666 = vst [vmem:[#allocation16_spill] sm:$0xff] %v9565_v61  ;;  %v9624_v46 = vsel %vm1811_vm4, %v9452_v36, %v6551_v47  ;;  %v9628_v60 = vsel %vm1811_vm4, %v9448_v24, %v6552_v7  ;;  %v9632_v58 = vsel %vm1811_vm4, %v9456_v59, %v6556_v5  ;;  %v6577_v19 = vunpack.i.h.bf16 %v12674_v27 }
 0x15e   : > { %v9639_v54 = vsel %vm1811_vm4, %v9463_v14, %v6557_v17  ;;  %v9643_v36 = vsel %vm1811_vm4, %v9471_v35, %v6561_v25  ;;  %v9647_v24 = vsel %vm1811_vm4, %v9467_v22, %v6562_v28  ;;  %v9651_v59 = vsel %vm1811_vm4, %v9475_v41, %v6566_v12  ;;  %v12675_v35 = vld [vmem:[#allocation36_spill] sm:$0xff]  ;;  %v12676_v17 = vld [vmem:[#allocation37_spill] sm:$0xff]  ;;  %v12677_v25 = vld [vmem:[#allocation38_spill] sm:$0xff] }
 0x15f   : > { %v9594_v3 = vpop.permute.xlu1 %6819  ;;  %v9657_v47 = vsel %vm1811_vm4, %v9481_v32, %v6567_v56  ;;  %v6587_v5 = vunpack.i.h.bf16 %v12675_v35  ;;  %v9671_v41 = vsel %vm1811_vm4, %v9495_v31, %v6576_v48  ;;  %v6592_v28 = vunpack.i.h.bf16 %v12676_v17  ;;  %v12678_v56 = vld [vmem:[#allocation39_spill] sm:$0xff] }
 0x160   : > { %12671 = vst [vmem:[#allocation15_spill] sm:$0xff] %v9594_v3  ;;  %v9600_v34 = vpop.permute.xlu0 %6824  ;;  %v12673_v3 = vld [vmem:[#allocation33_spill] sm:$0xff]  ;;  %v6591_v32 = vunpack.i.l.bf16 %v12676_v17  ;;  %v6597_v42 = vunpack.i.h.bf16 %v12677_v25  ;;  %v6596_v12 = vunpack.i.l.bf16 %v12677_v25  ;;  %v6602_v48 = vunpack.i.h.bf16 %v12678_v56 }
 0x161   : > { %v6571_v49 = vunpack.i.l.bf16 %v12673_v3  ;;  %v6572_v37 = vunpack.i.h.bf16 %v12673_v3  ;;  %v6586_v3 = vunpack.i.l.bf16 %v12675_v35  ;;  %v12680_v35 = vld [vmem:[#allocation40_spill] sm:$0xff]  ;;  %v6611_v27 = vunpack.i.l.bf16 %v12681_v63 }
 0x162   : > { %v6606_v17 = vunpack.i.l.bf16 %v12680_v35  ;;  %v6607_v25 = vunpack.i.h.bf16 %v12680_v35  ;;  %v9702_v31 = vsel %vm1844_vm5, %v9536_v53, %v6591_v32  ;;  %v6641_v0 = vunpack.i.l.bf16 %v12687_v52 }
 0x163   : > { %v9635_v43 = vpop.permute.xlu1 %6829  ;;  %v9661_v14 = vsel %vm1811_vm4, %v9491_v18, %v6571_v49  ;;  %v9667_v22 = vsel %vm1811_vm4, %v9485_v2, %v6572_v37  ;;  %v9677_v18 = vsel %vm1811_vm4, %v9501_v30, %v6577_v19  ;;  %v6601_v49 = vunpack.i.l.bf16 %v12678_v56 }
 0x164   : > { %v9653_v7 = vpop.permute.xlu0 %6834  ;;  %v9692_v30 = vsel %vm1844_vm5, %v9526_v40, %v6586_v3  ;;  %v9696_v19 = vsel %vm1844_vm5, %v9530_v29, %v6587_v5  ;;  %v9706_v56 = vsel %vm1844_vm5, %v9540_v26, %v6592_v28  ;;  %v6612_v37 = vunpack.i.h.bf16 %v12681_v63  ;;  %v12682_v40 = vld [vmem:[#allocation42_spill] sm:$0xff]  ;;  %v12683_v28 = vld [vmem:[#allocation43_spill] sm:$0xff] }
 0x165   : > { %v6616_v3 = vunpack.i.l.bf16 %v12682_v40  ;;  %v9712_v29 = vsel %vm1844_vm5, %v9544_v8, %v6596_v12  ;;  %v9716_v5 = vsel %vm1844_vm5, %v9551_v50, %v6597_v42  ;;  %v9720_v53 = vsel %vm1844_vm5, %v9555_v4, %v6601_v49 }
 0x166   : > { %v6617_v32 = vunpack.i.h.bf16 %v12682_v40  ;;  %v9727_v63 = vsel %vm1844_vm5, %v9559_v13, %v6602_v48  ;;  %v9731_v8 = vsel %vm1844_vm5, %v9563_v16, %v6606_v17  ;;  %v6622_v12 = vunpack.i.h.bf16 %v12683_v28  ;;  %v12684_v13 = vld [vmem:[#allocation44_spill] sm:$0xff]  ;;  %v12685_v40 = vld [vmem:[#allocation45_spill] sm:$0xff] }
 0x167   : > { %v9682_v2 = vpop.permute.xlu1 %6839  ;;  %v6621_v50 = vunpack.i.l.bf16 %v12683_v28  ;;  %v9739_v4 = vsel %vm1844_vm5, %v9569_v62, %v6607_v25  ;;  %v9743_v49 = vsel %vm1844_vm5, %v9573_v55, %v6611_v27  ;;  %v6627_v48 = vunpack.i.h.bf16 %v12684_v13  ;;  %v12686_v27 = vld [vmem:[#allocation46_spill] sm:$0xff] }
 0x168   : > { %v9688_v61 = vpop.permute.xlu0 %6844  ;;  %v6626_v35 = vunpack.i.l.bf16 %v12684_v13  ;;  %v9749_v16 = vsel %vm1844_vm5, %v9579_v6, %v6612_v37  ;;  %v9753_v17 = vsel %vm1844_vm5, %v9583_v11, %v6616_v3  ;;  %v6632_v62 = vunpack.i.h.bf16 %v12685_v40 }
 0x169   : > { %v6631_v25 = vunpack.i.l.bf16 %v12685_v40  ;;  %v9759_v55 = vsel %vm1844_vm5, %v9589_v38, %v6617_v32  ;;  %v6637_v28 = vunpack.i.h.bf16 %v12686_v27  ;;  %v6636_v13 = vunpack.i.l.bf16 %v12686_v27  ;;  %v12689_v38 = vld [vmem:[#allocation48_spill] sm:$0xff] }
 0x16a   : > { %v9768_v11 = vsel %vm1844_vm5, %v9604_v33, %v6621_v50  ;;  %v9772_v37 = vsel %vm1844_vm5, %v9608_v1, %v6622_v12  ;;  %v6642_v3 = vunpack.i.h.bf16 %v12687_v52  ;;  %v6646_v32 = vunpack.i.l.bf16 %v12689_v38  ;;  %v12690_v50 = vld [vmem:[#allocation49_spill] sm:$0xff] }
 0x16b   : > { %v9723_v26 = vpop.permute.xlu1 %6849  ;;  %v9780_v27 = vsel %vm1844_vm5, %v9614_v23, %v6626_v35  ;;  %v6647_v33 = vunpack.i.h.bf16 %v12689_v38  ;;  %v6651_v21 = vunpack.i.l.bf16 %v12690_v50  ;;  %v9790_v1 = vsel %vm1844_vm5, %v9624_v46, %v6631_v25  ;;  %v12691_v23 = vld [vmem:[#allocation50_spill] sm:$0xff] }
 0x16c   : > { %v9735_v42 = vpop.permute.xlu0 %6854  ;;  %v9794_v52 = vsel %vm1844_vm5, %v9628_v60, %v6632_v62  ;;  %v6652_v12 = vunpack.i.h.bf16 %v12690_v50  ;;  %v6656_v35 = vunpack.i.l.bf16 %v12691_v23  ;;  %v9808_v46 = vsel %vm1844_vm5, %v9643_v36, %v6641_v0 }
 0x16d   : > { %v6657_v25 = vunpack.i.h.bf16 %v12691_v23  ;;  %v9815_v62 = vsel %vm1844_vm5, %v9647_v24, %v6642_v3  ;;  %v9827_v0 = vsel %vm1844_vm5, %v9657_v47, %v6647_v33  ;;  %v9831_v36 = vsel %vm1844_vm5, %v9661_v14, %v6651_v21  ;;  %v12698_v33 = vld [vmem:[#allocation52_spill] sm:$0xff]  ;;  %v12699_v23 = vld [vmem:[#allocation53_spill] sm:$0xff]  ;;  %v12700_v14 = vld [vmem:[#allocation54_spill] sm:$0xff] }
 0x16e   : > { %12692 = vst [vmem:[#allocation18_spill] sm:$0xff] %v9827_v0  ;;  %12693 = vst [vmem:[#allocation19_spill] sm:$0xff] %v9831_v36  ;;  %v6672_v24 = vunpack.i.h.bf16 %v9133_v44  ;;  %v6671_v3 = vunpack.i.l.bf16 %v9133_v44  ;;  %v6677_v38 = vunpack.i.h.bf16 %v9135_v51  ;;  %v6676_v47 = vunpack.i.l.bf16 %v9135_v51 }
 0x16f   : > { %v9764_v6 = vpop.permute.xlu1 %6859  ;;  %v9847_v21 = vsel %vm1844_vm5, %v9677_v18, %v6657_v25  ;;  %v6681_v50 = vunpack.i.l.bf16 %v12698_v33  ;;  %v6682_v51 = vunpack.i.h.bf16 %v12698_v33  ;;  %v6686_v18 = vunpack.i.l.bf16 %v12699_v23 }
 0x170   : > { %12688 = vst [vmem:[#allocation17_spill] sm:$0xff] %v9764_v6  ;;  %v9776_v40 = vpop.permute.xlu0 %6864  ;;  %v9784_v6 = vsel %vm1844_vm5, %v9618_v15, %v6627_v48  ;;  %v9800_v15 = vsel %vm1844_vm5, %v9632_v58, %v6636_v13  ;;  %v9804_v48 = vsel %vm1844_vm5, %v9639_v54, %v6637_v28  ;;  %v9819_v58 = vsel %vm1844_vm5, %v9651_v59, %v6646_v32 }
 0x171   : > { %v6667_v54 = vunpack.i.h.bf16 %v9129_v10  ;;  %v6666_v28 = vunpack.i.l.bf16 %v9129_v10  ;;  %v9837_v59 = vsel %vm1844_vm5, %v9667_v22, %v6652_v12  ;;  %v9841_v10 = vsel %vm1844_vm5, %v9671_v41, %v6656_v35  ;;  %12696 = vst [vmem:[#allocation22_spill] sm:$0xff] %v9847_v21 }
 0x172   : > { %12694 = vst [vmem:[#allocation20_spill] sm:$0xff] %v9837_v59  ;;  %12695 = vst [vmem:[#allocation21_spill] sm:$0xff] %v9841_v10  ;;  %v1880_v25 = vsel %vm1877_vm6, %v9702_v31, %v6671_v3  ;;  %v1881_v32 = vsel %vm1877_vm6, %v9706_v56, %v6672_v24  ;;  %v6687_v44 = vunpack.i.h.bf16 %v12699_v23  ;;  %v6746_v33 = vunpack.i.l.bf16 %v9248_v9 }
 0x173   : > { %v9811_v60 = vpop.permute.xlu1 %6869  ;;  %v1878_v41 = vsel %vm1877_vm6, %v9692_v30, %v6666_v28  ;;  %v1879_v12 = vsel %vm1877_vm6, %v9696_v19, %v6667_v54  ;;  %v6691_v30 = vunpack.i.l.bf16 %v12700_v14  ;;  %v1882_v19 = vsel %vm1877_vm6, %v9712_v29, %v6676_v47 }
 0x174   : > { %v9823_v13 = vpop.permute.xlu0 %6874  ;;  %v1883_v54 = vsel %vm1877_vm6, %v9716_v5, %v6677_v38  ;;  %v6692_v28 = vunpack.i.h.bf16 %v12700_v14  ;;  %v9876_v31 = vsel %vm1877_vm6, %v9720_v53, %v6681_v50  ;;  %v6747_v56 = vunpack.i.h.bf16 %v9248_v9  ;;  %v12702_v38 = vld [vmem:[#allocation4_spill] sm:$0xff] }
 0x175   : > { %v6752_v24 = vunpack.i.h.bf16 %v9283_v45  ;;  %v6751_v3 = vunpack.i.l.bf16 %v9283_v45  ;;  %v9885_v29 = vsel %vm1877_vm6, %v9727_v63, %v6682_v51  ;;  %v9889_v5 = vsel %vm1877_vm6, %v9731_v8, %v6686_v18  ;;  %v12704_v63 = vld [vmem:[#allocation55_spill] sm:$0xff] }
 0x176   : > { %v6757_v53 = vunpack.i.h.bf16 %v12702_v38  ;;  %v6756_v47 = vunpack.i.l.bf16 %v12702_v38  ;;  %v9897_v45 = vsel %vm1877_vm6, %v9739_v4, %v6687_v44  ;;  %v9901_v14 = vsel %vm1877_vm6, %v9743_v49, %v6691_v30 }
 0x177   : > { %v9852_v22 = vpop.permute.xlu1 %6879  ;;  %v6697_v50 = vunpack.i.h.bf16 %v12704_v63  ;;  %v6696_v51 = vunpack.i.l.bf16 %v12704_v63  ;;  %v9907_v8 = vsel %vm1877_vm6, %v9749_v16, %v6692_v28  ;;  %v6827_v18 = vunpack.i.h.bf16 %v9600_v34  ;;  %v12706_v28 = vld [vmem:[#allocation6_spill] sm:$0xff] }
 0x178   : > { %v9860_v35 = vpop.permute.xlu0 %6884  ;;  %v6826_v38 = vunpack.i.l.bf16 %v9600_v34  ;;  %v1911_v21 = vsel %vm1910_vm7, %v1878_v41, %v6746_v33  ;;  %v1913_v4 = vsel %vm1910_vm7, %v1880_v25, %v6751_v3  ;;  %v1914_v44 = vsel %vm1910_vm7, %v1881_v32, %v6752_v24  ;;  %v12707_v3 = vld [vmem:[#allocation5_spill] sm:$0xff] }
 0x179   : > { %v6831_v49 = vunpack.i.l.bf16 %v9635_v43  ;;  %v1912_v63 = vsel %vm1910_vm7, %v1879_v12, %v6747_v56  ;;  %v1915_v10 = vsel %vm1910_vm7, %v1882_v19, %v6756_v47  ;;  %v1916_v16 = vsel %vm1910_vm7, %v1883_v54, %v6757_v53 }
 0x17a   : > { %v6762_v59 = vunpack.i.h.bf16 %v12706_v28  ;;  %v6832_v34 = vunpack.i.h.bf16 %v9635_v43  ;;  %v6837_v41 = vunpack.i.h.bf16 %v9653_v7  ;;  %v6836_v25 = vunpack.i.l.bf16 %v9653_v7 }
 0x17b   : > { %v9881_v23 = vpop.permute.xlu1 %6889  ;;  %v6761_v24 = vunpack.i.l.bf16 %v12706_v28  ;;  %v1944_v12 = vsel %vm1943_vm8, %v1911_v21, %v6826_v38  ;;  %v1945_v19 = vsel %vm1943_vm8, %v1912_v63, %v6827_v18  ;;  %v6766_v54 = vunpack.i.l.bf16 %v12707_v3 }
 0x17c   : > { %12701 = vst [vmem:[#allocation23_spill] sm:$0xff] %v9881_v23  ;;  %v9893_v9 = vpop.permute.xlu0 %6894  ;;  %v1946_v56 = vsel %vm1943_vm8, %v1913_v4, %v6831_v49  ;;  %v1947_v7 = vsel %vm1943_vm8, %v1914_v44, %v6832_v34  ;;  %v1948_v0 = vsel %vm1943_vm8, %v1915_v10, %v6836_v25  ;;  %v1949_v21 = vsel %vm1943_vm8, %v1916_v16, %v6837_v41 }
 0x17d   : > { %12703 = vst [vmem:[#allocation24_spill] sm:$0xff] %v9893_v9  ;;  %v6842_v63 = vunpack.i.h.bf16 %v9682_v2  ;;  %v6841_v4 = vunpack.i.l.bf16 %v9682_v2  ;;  %v6847_v44 = vunpack.i.h.bf16 %v9688_v61  ;;  %v6846_v41 = vunpack.i.l.bf16 %v9688_v61 }
 0x17e   : > { %v1917_v61 = vsel %vm1910_vm7, %v9876_v31, %v6761_v24 }
 0x17f   : > { %v9915_v30 = vpop.permute.xlu1 %6899 }
 0x180   : > { %12705 = vst [vmem:[#allocation25_spill] sm:$0xff] %v9915_v30  ;;  %v6905_v36 = vpop.permute.xlu0 %6904  ;;  %v6767_v30 = vunpack.i.h.bf16 %v12707_v3 }
 0x181   : > { %v6907_v32 = vunpack.i.h.bf16 %v6905_v36  ;;  %v6906_v33 = vunpack.i.l.bf16 %v6905_v36 }
 0x183   : > { %v6910_v43 = vpop.permute.xlu1 %6909  ;;  %v1977_v53 = vsel %vm1976_vm9, %v1944_v12, %v6906_v33  ;;  %v1978_v47 = vsel %vm1976_vm9, %v1945_v19, %v6907_v32 }
 0x184   : > { %v6912_v36 = vunpack.i.h.bf16 %v6910_v43  ;;  %v6911_v9 = vunpack.i.l.bf16 %v6910_v43  ;;  %v6915_v28 = vpop.permute.xlu0 %6914  ;;  %v2009_v23 = vpack.c.bf16 %v1978_v47, %v1977_v53  ;;  %v1918_v47 = vsel %vm1910_vm7, %v9885_v29, %v6762_v59  ;;  %v12709_v29 = vld [vmem:[#allocation57_spill] sm:$0xff] }
 0x185   : > { %v6917_v18 = vunpack.i.h.bf16 %v6915_v28  ;;  %v6916_v38 = vunpack.i.l.bf16 %v6915_v28  ;;  %v6707_v24 = vunpack.i.h.bf16 %v12709_v29  ;;  %v6706_v28 = vunpack.i.l.bf16 %v12709_v29 }
 0x186   : > { %v1979_v49 = vsel %vm1976_vm9, %v1946_v56, %v6911_v9  ;;  %v1980_v32 = vsel %vm1976_vm9, %v1947_v7, %v6912_v36  ;;  %6237 = vmatprep.mubr.msk.bf16.mxu0 %vm2052_vm10, %v2009_v23  ;;  %v1890_v9 = vsel %vm1877_vm6, %v9753_v17, %v6696_v51  ;;  %v1891_v23 = vsel %vm1877_vm6, %v9759_v55, %v6697_v50 }
 0x187   : > { %v1981_v34 = vsel %vm1976_vm9, %v1948_v0, %v6916_v38  ;;  %v1982_v10 = vsel %vm1976_vm9, %v1949_v21, %v6917_v18  ;;  %v6920_v25 = vpop.permute.xlu1 %6919  ;;  %v2010_v16 = vpack.c.bf16 %v1980_v32, %v1979_v49  ;;  %v12708_v0 = vld [vmem:[#allocation56_spill] sm:$0xff]  ;;  %v1919_v17 = vsel %vm1910_vm7, %v9889_v5, %v6766_v54 }
 0x188   : > { %v6922_v33 = vunpack.i.h.bf16 %v6920_v25  ;;  %v6921_v3 = vunpack.i.l.bf16 %v6920_v25  ;;  %v6925_v12 = vpop.permute.xlu0 %6924  ;;  %v2011_v2 = vpack.c.bf16 %v1982_v10, %v1981_v34  ;;  %v6702_v43 = vunpack.i.h.bf16 %v12708_v0 }
 0x189   : > { %v6927_v19 = vunpack.i.h.bf16 %v6925_v12  ;;  %v6926_v56 = vunpack.i.l.bf16 %v6925_v12  ;;  %6238 = vmatmul.mubr.msk.bf16.vlgmr.msra.gmra.mxu0 %vm2052_vm10, %v2010_v16  ;;  %v6701_v53 = vunpack.i.l.bf16 %v12708_v0  ;;  %v1920_v55 = vsel %vm1910_vm7, %v9897_v45, %v6767_v30  ;;  %v12710_v0 = vld [vmem:[#allocation58_spill] sm:$0xff] }
 0x18a   : > { %6241 = vmatprep.mubr.msk.bf16.mxu0 %vm2052_vm10, %v2011_v2  ;;  %v1950_v50 = vsel %vm1943_vm8, %v1917_v61, %v6841_v4  ;;  %v1951_v51 = vsel %vm1943_vm8, %v1918_v47, %v6842_v63  ;;  %v1952_v7 = vsel %vm1943_vm8, %v1919_v17, %v6846_v41  ;;  %v1953_v36 = vsel %vm1943_vm8, %v1920_v55, %v6847_v44  ;;  %v12711_v17 = vld [vmem:[#allocation8_spill] sm:$0xff] }
 0x18b   : > { %v1983_v31 = vsel %vm1976_vm9, %v1950_v50, %v6921_v3  ;;  %v1984_v59 = vsel %vm1976_vm9, %v1951_v51, %v6922_v33  ;;  %v1985_v5 = vsel %vm1976_vm9, %v1952_v7, %v6926_v56  ;;  %v1986_v45 = vsel %vm1976_vm9, %v1953_v36, %v6927_v19  ;;  %v6930_v30 = vpop.permute.xlu1 %6929  ;;  %v12712_v7 = vld [vmem:[#allocation17_spill] sm:$0xff] }
 0x18c   : > { %v6772_v54 = vunpack.i.h.bf16 %v9371_v20  ;;  %v6771_v21 = vunpack.i.l.bf16 %v9371_v20  ;;  %v6777_v18 = vunpack.i.h.bf16 %v9389_v57  ;;  %v6776_v38 = vunpack.i.l.bf16 %v9389_v57  ;;  %v6935_v63 = vpop.permute.xlu0 %6934 }
 0x18d   : > { %v6852_v4 = vunpack.i.h.bf16 %v9723_v26  ;;  %v6851_v49 = vunpack.i.l.bf16 %v9723_v26  ;;  %v6857_v32 = vunpack.i.h.bf16 %v9735_v42  ;;  %v2012_v44 = vpack.c.bf16 %v1984_v59, %v1983_v31 }
 0x18e   : > { %v6856_v34 = vunpack.i.l.bf16 %v9735_v42  ;;  %v6932_v10 = vunpack.i.h.bf16 %v6930_v30  ;;  %v6931_v25 = vunpack.i.l.bf16 %v6930_v30  ;;  %v2013_v16 = vpack.c.bf16 %v1986_v45, %v1985_v5  ;;  %v12713_v30 = vld [vmem:[#allocation59_spill] sm:$0xff] }
 0x18f   : > { %v1892_v20 = vsel %vm1877_vm6, %v9768_v11, %v6701_v53  ;;  %v1893_v41 = vsel %vm1877_vm6, %v9772_v37, %v6702_v43  ;;  %v6937_v57 = vunpack.i.h.bf16 %v6935_v63  ;;  %v6936_v33 = vunpack.i.l.bf16 %v6935_v63  ;;  %v6940_v53 = vpop.permute.xlu1 %6939 }
 0x190   : > { %v1894_v26 = vsel %vm1877_vm6, %v9780_v27, %v6706_v28  ;;  %v1895_v3 = vsel %vm1877_vm6, %v9784_v6, %v6707_v24  ;;  %v1921_v42 = vsel %vm1910_vm7, %v9901_v14, %v6771_v21  ;;  %v1922_v12 = vsel %vm1910_vm7, %v9907_v8, %v6772_v54  ;;  %v6945_v51 = vpop.permute.xlu0 %6944 }
 0x191   : > { %6242 = vmatmul.mubr.msk.bf16.gmra.mxu0 %vm2052_vm10, %v2012_v44  ;;  %v1923_v11 = vsel %vm1910_vm7, %v1890_v9, %v6776_v38  ;;  %v1924_v37 = vsel %vm1910_vm7, %v1891_v23, %v6777_v18  ;;  %v1954_v2 = vsel %vm1943_vm8, %v1921_v42, %v6851_v49  ;;  %v1955_v19 = vsel %vm1943_vm8, %v1922_v12, %v6852_v4  ;;  %v12715_v12 = vld [vmem:[#allocation10_spill] sm:$0xff] }
 0x192   : > { %6245 = vmatprep.mubr.msk.bf16.mxu0 %vm2052_vm10, %v2013_v16  ;;  %v1956_v27 = vsel %vm1943_vm8, %v1923_v11, %v6856_v34  ;;  %v1957_v6 = vsel %vm1943_vm8, %v1924_v37, %v6857_v32  ;;  %v1987_v56 = vsel %vm1976_vm9, %v1954_v2, %v6931_v25  ;;  %v1988_v14 = vsel %vm1976_vm9, %v1955_v19, %v6932_v10 }
 0x193   : > { %v6712_v8 = vunpack.i.h.bf16 %v12710_v0  ;;  %v6711_v43 = vunpack.i.l.bf16 %v12710_v0  ;;  %v1989_v9 = vsel %vm1976_vm9, %v1956_v27, %v6936_v33  ;;  %v1990_v23 = vsel %vm1976_vm9, %v1957_v6, %v6937_v57  ;;  %v6950_v33 = vpop.permute.xlu1 %6949 }
 0x194   : > { %v6782_v61 = vunpack.i.h.bf16 %v9418_v39  ;;  %v6781_v47 = vunpack.i.l.bf16 %v9418_v39  ;;  %v6787_v55 = vunpack.i.h.bf16 %v12711_v17  ;;  %v6786_v50 = vunpack.i.l.bf16 %v12711_v17  ;;  %v6955_v2 = vpop.permute.xlu0 %6954 }
 0x195   : > { %v6862_v36 = vunpack.i.h.bf16 %v12712_v7  ;;  %v6861_v31 = vunpack.i.l.bf16 %v12712_v7  ;;  %v6867_v59 = vunpack.i.h.bf16 %v9776_v40  ;;  %v2014_v29 = vpack.c.bf16 %v1988_v14, %v1987_v56 }
 0x196   : > { %v6866_v24 = vunpack.i.l.bf16 %v9776_v40  ;;  %v6942_v28 = vunpack.i.h.bf16 %v6940_v53  ;;  %v6941_v5 = vunpack.i.l.bf16 %v6940_v53  ;;  %v2015_v45 = vpack.c.bf16 %v1990_v23, %v1989_v9 }
 0x197   : > { %v6717_v54 = vunpack.i.h.bf16 %v12713_v30  ;;  %v6716_v39 = vunpack.i.l.bf16 %v12713_v30  ;;  %v6947_v21 = vunpack.i.h.bf16 %v6945_v51  ;;  %v6946_v18 = vunpack.i.l.bf16 %v6945_v51  ;;  %v6960_v30 = vpop.permute.xlu1 %6959 }
 0x198   : > { %v1896_v38 = vsel %vm1877_vm6, %v9790_v1, %v6711_v43  ;;  %v1897_v63 = vsel %vm1877_vm6, %v9794_v52, %v6712_v8  ;;  %v1925_v4 = vsel %vm1910_vm7, %v1892_v20, %v6781_v47  ;;  %v1926_v40 = vsel %vm1910_vm7, %v1893_v41, %v6782_v61  ;;  %v12716_v8 = vld [vmem:[#allocation60_spill] sm:$0xff]  ;;  %v12717_v61 = vld [vmem:[#allocation61_spill] sm:$0xff] }
 0x199   : > { %6246 = vmatmul.mubr.msk.bf16.gmra.mxu0 %vm2052_vm10, %v2014_v29  ;;  %v1927_v49 = vsel %vm1910_vm7, %v1894_v26, %v6786_v50  ;;  %v1928_v32 = vsel %vm1910_vm7, %v1895_v3, %v6787_v55  ;;  %v1958_v44 = vsel %vm1943_vm8, %v1925_v4, %v6861_v31  ;;  %v1959_v34 = vsel %vm1943_vm8, %v1926_v40, %v6862_v36  ;;  %v12714_v26 = vld [vmem:[#allocation7_spill] sm:$0xff]  ;;  %v6965_v4 = vpop.permute.xlu0 %6964 }
 0x19a   : > { %6249 = vmatprep.mubr.msk.bf16.mxu0 %vm2052_vm10, %v2015_v45  ;;  %v1960_v10 = vsel %vm1943_vm8, %v1927_v49, %v6866_v24  ;;  %v1961_v1 = vsel %vm1943_vm8, %v1928_v32, %v6867_v59  ;;  %v1991_v52 = vsel %vm1976_vm9, %v1958_v44, %v6941_v5  ;;  %v1992_v25 = vsel %vm1976_vm9, %v1959_v34, %v6942_v28 }
 0x19b   : > { %v1898_v16 = vsel %vm1877_vm6, %v9800_v15, %v6716_v39  ;;  %v1899_v20 = vsel %vm1877_vm6, %v9804_v48, %v6717_v54  ;;  %v1993_v41 = vsel %vm1976_vm9, %v1960_v10, %v6946_v18  ;;  %v1994_v57 = vsel %vm1976_vm9, %v1961_v1, %v6947_v21  ;;  %v12718_v54 = vld [vmem:[#allocation9_spill] sm:$0xff]  ;;  %v12719_v18 = vld [vmem:[#allocation12_spill] sm:$0xff] }
 0x19c   : > { %v6792_v3 = vunpack.i.h.bf16 %v12714_v26  ;;  %v6791_v42 = vunpack.i.l.bf16 %v12714_v26  ;;  %v6797_v11 = vunpack.i.h.bf16 %v12715_v12  ;;  %v6796_v37 = vunpack.i.l.bf16 %v12715_v12 }
 0x19d   : > { %v6872_v19 = vunpack.i.h.bf16 %v9811_v60  ;;  %v6871_v15 = vunpack.i.l.bf16 %v9811_v60  ;;  %v6877_v48 = vunpack.i.h.bf16 %v9823_v13  ;;  %v2016_v27 = vpack.c.bf16 %v1992_v25, %v1991_v52  ;;  %v12720_v52 = vld [vmem:[#allocation18_spill] sm:$0xff] }
 0x19e   : > { %v6876_v6 = vunpack.i.l.bf16 %v9823_v13  ;;  %v6952_v56 = vunpack.i.h.bf16 %v6950_v33  ;;  %v6951_v14 = vunpack.i.l.bf16 %v6950_v33  ;;  %v2017_v0 = vpack.c.bf16 %v1994_v57, %v1993_v41  ;;  %v12721_v41 = vld [vmem:[#allocation62_spill] sm:$0xff] }
 0x19f   : > { %v6722_v43 = vunpack.i.h.bf16 %v12716_v8  ;;  %v6721_v9 = vunpack.i.l.bf16 %v12716_v8  ;;  %v6957_v23 = vunpack.i.h.bf16 %v6955_v2  ;;  %v6956_v53 = vunpack.i.l.bf16 %v6955_v2 }
 0x1a0   : > { %v6727_v47 = vunpack.i.h.bf16 %v12717_v61  ;;  %v6726_v60 = vunpack.i.l.bf16 %v12717_v61  ;;  %v1929_v17 = vsel %vm1910_vm7, %v1896_v38, %v6791_v42  ;;  %v1930_v55 = vsel %vm1910_vm7, %v1897_v63, %v6792_v3  ;;  %v12725_v61 = vld [vmem:[#allocation23_spill] sm:$0xff] }
 0x1a1   : > { %6250 = vmatmul.mubr.msk.bf16.gmra.mxu0 %vm2052_vm10, %v2016_v27  ;;  %v1931_v13 = vsel %vm1910_vm7, %v1898_v16, %v6796_v37  ;;  %v1932_v50 = vsel %vm1910_vm7, %v1899_v20, %v6797_v11  ;;  %v1962_v51 = vsel %vm1943_vm8, %v1929_v17, %v6871_v15  ;;  %v1963_v7 = vsel %vm1943_vm8, %v1930_v55, %v6872_v19  ;;  %v12722_v19 = vld [vmem:[#allocation63_spill] sm:$0xff]  ;;  %v12726_v17 = vld [vmem:[#allocation24_spill] sm:$0xff] }
 0x1a2   : > { %6253 = vmatprep.mubr.msk.bf16.mxu0 %vm2052_vm10, %v2017_v0  ;;  %v1964_v36 = vsel %vm1943_vm8, %v1931_v13, %v6876_v6  ;;  %v1965_v31 = vsel %vm1943_vm8, %v1932_v50, %v6877_v48  ;;  %v1995_v59 = vsel %vm1976_vm9, %v1962_v51, %v6951_v14  ;;  %v1996_v29 = vsel %vm1976_vm9, %v1963_v7, %v6952_v56  ;;  %v6970_v56 = vpop.permute.xlu1 %6969  ;;  %v12723_v14 = vld [vmem:[#allocation13_spill] sm:$0xff] }
 0x1a3   : > { %v1900_v24 = vsel %vm1877_vm6, %v9808_v46, %v6721_v9  ;;  %v1901_v28 = vsel %vm1877_vm6, %v9815_v62, %v6722_v43  ;;  %v1997_v5 = vsel %vm1976_vm9, %v1964_v36, %v6956_v53  ;;  %v1998_v45 = vsel %vm1976_vm9, %v1965_v31, %v6957_v23  ;;  %v12724_v43 = vld [vmem:[#allocation16_spill] sm:$0xff]  ;;  %v6975_v53 = vpop.permute.xlu0 %6974  ;;  %v12727_v31 = vld [vmem:[#allocation19_spill] sm:$0xff] }
 0x1a4   : > { %v6802_v39 = vunpack.i.h.bf16 %v12718_v54  ;;  %v6801_v21 = vunpack.i.l.bf16 %v12718_v54  ;;  %v6807_v38 = vunpack.i.h.bf16 %v12719_v18  ;;  %v6806_v63 = vunpack.i.l.bf16 %v12719_v18  ;;  %v12730_v54 = vld [vmem:[#allocation22_spill] sm:$0xff] }
 0x1a5   : > { %v6882_v40 = vunpack.i.h.bf16 %v9852_v22  ;;  %v6881_v46 = vunpack.i.l.bf16 %v9852_v22  ;;  %v6887_v62 = vunpack.i.h.bf16 %v9860_v35  ;;  %v2018_v49 = vpack.c.bf16 %v1996_v29, %v1995_v59  ;;  %v12728_v29 = vld [vmem:[#allocation20_spill] sm:$0xff] }
 0x1a6   : > { %v6886_v32 = vunpack.i.l.bf16 %v9860_v35  ;;  %v6962_v44 = vunpack.i.h.bf16 %v6960_v30  ;;  %v6961_v34 = vunpack.i.l.bf16 %v6960_v30  ;;  %v2019_v10 = vpack.c.bf16 %v1998_v45, %v1997_v5  ;;  %v12729_v45 = vld [vmem:[#allocation21_spill] sm:$0xff] }
 0x1a7   : > { %v1902_v1 = vsel %vm1877_vm6, %v9819_v58, %v6726_v60  ;;  %v1903_v25 = vsel %vm1877_vm6, %v12720_v52, %v6727_v47  ;;  %v6967_v16 = vunpack.i.h.bf16 %v6965_v4  ;;  %v6966_v20 = vunpack.i.l.bf16 %v6965_v4 }
 0x1a8   : > { %v6732_v22 = vunpack.i.h.bf16 %v12721_v41  ;;  %v6731_v57 = vunpack.i.l.bf16 %v12721_v41  ;;  %v1933_v33 = vsel %vm1910_vm7, %v1900_v24, %v6801_v21  ;;  %v1934_v35 = vsel %vm1910_vm7, %v1901_v28, %v6802_v39  ;;  %v12734_v41 = vld [vmem:[#allocation14_spill] sm:$0xff] }
 0x1a9   : > { %6254 = vmatmul.mubr.msk.bf16.gmra.mxu0 %vm2052_vm10, %v2018_v49  ;;  %v1935_v26 = vsel %vm1910_vm7, %v1902_v1, %v6806_v63  ;;  %v1936_v58 = vsel %vm1910_vm7, %v1903_v25, %v6807_v38  ;;  %v1966_v3 = vsel %vm1943_vm8, %v1933_v33, %v6881_v46  ;;  %v1967_v42 = vsel %vm1943_vm8, %v1934_v35, %v6882_v40  ;;  %v6980_v25 = vpop.permute.xlu1 %6979  ;;  %v12736_v33 = vld [vmem:[#allocation11_spill] sm:$0xff] }
 0x1aa   : > { %6257 = vmatprep.mubr.msk.bf16.mxu0 %vm2052_vm10, %v2019_v10  ;;  %v1968_v12 = vsel %vm1943_vm8, %v1935_v26, %v6886_v32  ;;  %v1969_v11 = vsel %vm1943_vm8, %v1936_v58, %v6887_v62  ;;  %v1999_v37 = vsel %vm1976_vm9, %v1966_v3, %v6961_v34  ;;  %v2000_v2 = vsel %vm1976_vm9, %v1967_v42, %v6962_v44  ;;  %v12731_v44 = vld [vmem:[#allocation64_spill] sm:$0xff]  ;;  %v12737_v26 = vld [vmem:[#allocation15_spill] sm:$0xff] }
 0x1ab   : > { %v6737_v15 = vunpack.i.h.bf16 %v12722_v19  ;;  %v6736_v48 = vunpack.i.l.bf16 %v12722_v19  ;;  %v2001_v27 = vsel %vm1976_vm9, %v1968_v12, %v6966_v20  ;;  %v2002_v6 = vsel %vm1976_vm9, %v1969_v11, %v6967_v16  ;;  %v12732_v16 = vld [vmem:[#allocation35_spill] sm:$0xff] }
 0x1ac   : > { %v6812_v0 = vunpack.i.h.bf16 %v12723_v14  ;;  %v6811_v8 = vunpack.i.l.bf16 %v12723_v14  ;;  %v6817_v9 = vunpack.i.h.bf16 %v12724_v43  ;;  %v6816_v23 = vunpack.i.l.bf16 %v12724_v43  ;;  %v12738_v42 = vld [vmem:[#allocation51_spill] sm:$0xff] }
 0x1ad   : > { %v6892_v47 = vunpack.i.h.bf16 %v12725_v61  ;;  %v6891_v60 = vunpack.i.l.bf16 %v12725_v61  ;;  %v6897_v55 = vunpack.i.h.bf16 %v12726_v17  ;;  %v2020_v13 = vpack.c.bf16 %v2000_v2, %v1999_v37  ;;  %v12740_v37 = vld [vmem:[#allocation25_spill] sm:$0xff] }
 0x1ae   : > { %v6896_v50 = vunpack.i.l.bf16 %v12726_v17  ;;  %v6972_v51 = vunpack.i.h.bf16 %v6970_v56  ;;  %v6971_v7 = vunpack.i.l.bf16 %v6970_v56  ;;  %v2021_v36 = vpack.c.bf16 %v2002_v6, %v2001_v27 }
 0x1af   : > { %v1904_v59 = vsel %vm1877_vm6, %v12727_v31, %v6731_v57  ;;  %v1905_v24 = vsel %vm1877_vm6, %v12728_v29, %v6732_v22  ;;  %v6977_v28 = vunpack.i.h.bf16 %v6975_v53  ;;  %v6976_v5 = vunpack.i.l.bf16 %v6975_v53  ;;  %v10198_v31 = vld [vmem:[%s12422_s2] ss:$0 sm:$0xff] }
 0x1b0   : > { %v1906_v30 = vsel %vm1877_vm6, %v12729_v45, %v6736_v48  ;;  %v1907_v39 = vsel %vm1877_vm6, %v12730_v54, %v6737_v15  ;;  %v1937_v21 = vsel %vm1910_vm7, %v1904_v59, %v6811_v8  ;;  %v1938_v18 = vsel %vm1910_vm7, %v1905_v24, %v6812_v0 }
 0x1b1   : > { %6258 = vmatmul.mubr.msk.bf16.gmra.mxu0 %vm2052_vm10, %v2020_v13  ;;  %v1939_v38 = vsel %vm1910_vm7, %v1906_v30, %v6816_v23  ;;  %v1940_v63 = vsel %vm1910_vm7, %v1907_v39, %v6817_v9  ;;  %v1970_v4 = vsel %vm1943_vm8, %v1937_v21, %v6891_v60  ;;  %v1971_v40 = vsel %vm1943_vm8, %v1938_v18, %v6892_v47 }
 0x1b2   : > { %6261 = vmatprep.mubr.msk.bf16.mxu0 %vm2052_vm10, %v2021_v36  ;;  %v1972_v46 = vsel %vm1943_vm8, %v1939_v38, %v6896_v50  ;;  %v1973_v62 = vsel %vm1943_vm8, %v1940_v63, %v6897_v55  ;;  %v2003_v49 = vsel %vm1976_vm9, %v1970_v4, %v6971_v7  ;;  %v2004_v32 = vsel %vm1976_vm9, %v1971_v40, %v6972_v51  ;;  %v2418_v55 = vld [vmem:[#allocation3 + $0x1] sm:$0xff] }
 0x1b3   : > { %v6742_v34 = vunpack.i.h.bf16 %v12731_v44  ;;  %v6741_v10 = vunpack.i.l.bf16 %v12731_v44  ;;  %v2005_v1 = vsel %vm1976_vm9, %v1972_v46, %v6976_v5  ;;  %v2006_v52 = vsel %vm1976_vm9, %v1973_v62, %v6977_v28  ;;  %v2450_v51 = vld [vmem:[#allocation3 + $0x2] sm:$0xff] }
 0x1b4   : > { %v12733_v20 = vunpack.i.l.bf16 %v12732_v16  ;;  %v12735_v57 = vunpack.i.h.bf16 %v12732_v16  ;;  %v6822_v58 = vunpack.i.h.bf16 %v12737_v26  ;;  %v6821_v3 = vunpack.i.l.bf16 %v12737_v26 }
 0x1b5   : > { %v12739_v12 = vunpack.i.l.bf16 %v12738_v42  ;;  %v6902_v2 = vunpack.i.h.bf16 %v12740_v37  ;;  %v6901_v19 = vunpack.i.l.bf16 %v12740_v37  ;;  %v2022_v15 = vpack.c.bf16 %v2004_v32, %v2003_v49 }
 0x1b6   : > { %v1842_v22 = vsel %vm1811_vm4, %v12734_v41, %v12733_v20  ;;  %v1843_v35 = vsel %vm1811_vm4, %v12736_v33, %v12735_v57  ;;  %v12741_v48 = vunpack.i.h.bf16 %v12738_v42  ;;  %v6982_v6 = vunpack.i.h.bf16 %v6980_v25 }
 0x1b7   : > { %v1875_v11 = vsel %vm1844_vm5, %v1842_v22, %v12739_v12  ;;  %v6981_v56 = vunpack.i.l.bf16 %v6980_v25  ;;  %v2023_v14 = vpack.c.bf16 %v2006_v52, %v2005_v1  ;;  %v12742_v17 = vmov 0.0  }
 0x1b8   : > { %v1876_v27 = vsel %vm1844_vm5, %v1843_v35, %v12741_v48  ;;  %v1908_v0 = vsel %vm1877_vm6, %v1875_v11, %v6741_v10  ;;  %2307 = vst.msk [vmem:[#allocation3 + $0x40] sm:$0x3] %vm2300_vm11, %v12742_v17  ;;  %2301 = vst.msk [vmem:[#allocation3 + $0x10] sm:$0x3] %vm2300_vm11, %v12742_v17 }
 0x1b9   : > { %v1909_v8 = vsel %vm1877_vm6, %v1876_v27, %v6742_v34  ;;  %6262 = vmatmul.mubr.msk.bf16.gmra.mxu0 %vm2052_vm10, %v2022_v15  ;;  %v1941_v43 = vsel %vm1910_vm7, %v1908_v0, %v6821_v3  ;;  %2304 = vst.msk [vmem:[#allocation3 + $0x28] sm:$0x3] %vm2300_vm11, %v12742_v17  ;;  %2310 = vst.msk [vmem:[#allocation3 + $0x58] sm:$0x3] %vm2300_vm11, %v12742_v17 }
 0x1ba   : > { %v1942_v9 = vsel %vm1910_vm7, %v1909_v8, %v6822_v58  ;;  %6265 = vmatprep.mubr.msk.bf16.mxu0 %vm2052_vm10, %v2023_v14  ;;  %v1974_v23 = vsel %vm1943_vm8, %v1941_v43, %v6901_v19  ;;  %2313 = vst.msk [vmem:[#allocation3 + $0x70] sm:$0x3] %vm2300_vm11, %v12742_v17  ;;  %2316 = vst.msk [vmem:[#allocation3 + $0x88] sm:$0x3] %vm2300_vm11, %v12742_v17 }
 0x1bb   : > { %v1975_v53 = vsel %vm1943_vm8, %v1942_v9, %v6902_v2  ;;  %v2007_v61 = vsel %vm1976_vm9, %v1974_v23, %v6981_v56  ;;  %2319 = vst.msk [vmem:[#allocation3 + $0xa0] sm:$0x3] %vm2300_vm11, %v12742_v17  ;;  %2322 = vst.msk [vmem:[#allocation3 + $0xb8] sm:$0x3] %vm2300_vm11, %v12742_v17 }
 0x1bc   : > { %v2008_v47 = vsel %vm1976_vm9, %v1975_v53, %v6982_v6  ;;  %2325 = vst.msk [vmem:[#allocation3 + $0xd0] sm:$0x3] %vm2300_vm11, %v12742_v17  ;;  %2328 = vst.msk [vmem:[#allocation3 + $0xe8] sm:$0x3] %vm2300_vm11, %v12742_v17 }
 0x1bd   : > { %v2024_v60 = vpack.c.bf16 %v2008_v47, %v2007_v61  ;;  %2331 = vst.msk [vmem:[#allocation3 + $0x100] sm:$0x3] %vm2300_vm11, %v12742_v17  ;;  %2334 = vst.msk [vmem:[#allocation3 + $0x118] sm:$0x3] %vm2300_vm11, %v12742_v17 }
 0x1be   : > { %2337 = vst.msk [vmem:[#allocation3 + $0x130] sm:$0x3] %vm2300_vm11, %v12742_v17  ;;  %2340 = vst.msk [vmem:[#allocation3 + $0x148] sm:$0x3] %vm2300_vm11, %v12742_v17 }
 0x1bf   : > { %2343 = vst.msk [vmem:[#allocation3 + $0x160] sm:$0x3] %vm2300_vm11, %v12742_v17  ;;  %2346 = vst.msk [vmem:[#allocation3 + $0x178] sm:$0x3] %vm2300_vm11, %v12742_v17  ;;  %v2419_v13 = vld [vmem:[#allocation3 + $0x9] sm:$0xff] }
 0x1c0   : > { %2349 = vst.msk [vmem:[#allocation3 + $0x190] sm:$0x3] %vm2300_vm11, %v12742_v17  ;;  %2352 = vst.msk [vmem:[#allocation3 + $0x1a8] sm:$0x3] %vm2300_vm11, %v12742_v17  ;;  %v6983_v50 = vpack.i.bf16 %v2419_v13, %v2418_v55  ;;  %v2451_v7 = vld [vmem:[#allocation3 + $0xa] sm:$0xff] }
 0x1c1   : > { %6266 = vmatmul.mubr.msk.bf16.gmra.mxu0 %vm2052_vm10, %v2024_v60  ;;  %v6988_v36 = vpack.i.bf16 %v2451_v7, %v2450_v51 }
 0x1c2   : > { %6984 = vrot.lane.b32.xlu0 %v6983_v50, %s8288_s9 }
 0x1c6   : > { %6989 = vrot.lane.b32.xlu0 %v6988_v36, %s8290_s11 }
 0x249   : > { %v6239_v59 = vpop.f32.mrf.mxu0 }
 0x24a   : > { %v2148_v29 = vadd.f32 %v6239_v59, %v10198_v31 }
 0x24b   : > { %v2139_v24 = vpop.f32.mrf.mxu0 }
 0x24c   : > { %v2268_v28 = vmax.f32 %v2148_v29, 0.0  ;;  %v2140_v5 = vadd.f32 %v10198_v31, %v2139_v24 }
 0x24d   : > { %v6240_v45 = vpop.f32.mrf.mxu0 }
 0x24e   : > { %2356 = vst.msk [vmem:[#allocation3 + $0x31] sm:$0xff] %vm1778_vm2, %v2268_v28  ;;  %v2266_v30 = vmax.f32 %v2140_v5, 0.0  ;;  %v2151_v54 = vadd.f32 %v6240_v45, %v10198_v31 }
 0x24f   : > { %v2142_v39 = vpop.f32.mrf.mxu0 }
 0x250   : > { %2354 = vst.msk [vmem:[#allocation3 + $0x19] sm:$0xff] %vm1778_vm2, %v2266_v30  ;;  %v2269_v21 = vmax.f32 %v2151_v54, 0.0  ;;  %v2143_v18 = vadd.f32 %v10198_v31, %v2142_v39 }
 0x251   : > { %v6243_v38 = vpop.f32.mrf.mxu0 }
 0x252   : > { %2357 = vst.msk [vmem:[#allocation3 + $0x39] sm:$0xff] %vm1778_vm2, %v2269_v21  ;;  %v2267_v63 = vmax.f32 %v2143_v18, 0.0  ;;  %v2164_v4 = vadd.f32 %v6243_v38, %v10198_v31 }
 0x253   : > { %v2155_v40 = vpop.f32.mrf.mxu0 }
 0x254   : > { %2355 = vst.msk [vmem:[#allocation3 + $0x21] sm:$0xff] %vm1778_vm2, %v2267_v63  ;;  %v2272_v46 = vmax.f32 %v2164_v4, 0.0  ;;  %v2156_v62 = vadd.f32 %v10198_v31, %v2155_v40 }
 0x255   : > { %v6244_v49 = vpop.f32.mrf.mxu0  ;;  %v10214_v52 = vld [vmem:[#allocation3 + $0x30] sm:$0xff] }
 0x256   : > { %2360 = vst.msk [vmem:[#allocation3 + $0x61] sm:$0xff] %vm1778_vm2, %v2272_v46  ;;  %v2270_v32 = vmax.f32 %v2156_v62, 0.0  ;;  %v2167_v44 = vadd.f32 %v6244_v49, %v10198_v31  ;;  %v2422_v20 = vld [vmem:[#allocation3 + $0x31] sm:$0xff] }
 0x257   : > { %v2158_v34 = vpop.f32.mrf.mxu0  ;;  %v10237_v14 = vld [vmem:[#allocation3 + $0x18] sm:$0xff] }
 0x258   : > { %2358 = vst.msk [vmem:[#allocation3 + $0x49] sm:$0xff] %vm1778_vm2, %v2270_v32  ;;  %v2273_v10 = vmax.f32 %v2167_v44, 0.0  ;;  %v2159_v1 = vadd.f32 %v10198_v31, %v2158_v34  ;;  %v2514_v60 = vld [vmem:[#allocation3 + $0x19] sm:$0xff] }
 0x259   : > { %v6247_v25 = vpop.f32.mrf.mxu0  ;;  %v10216_v16 = vld [vmem:[#allocation3 + $0x38] sm:$0xff] }
 0x25a   : > { %v2423_v41 = vld [vmem:[#allocation3 + $0x39] sm:$0xff]  ;;  %2361 = vst.msk [vmem:[#allocation3 + $0x69] sm:$0xff] %vm1778_vm2, %v2273_v10  ;;  %v2271_v22 = vmax.f32 %v2159_v1, 0.0  ;;  %v2180_v57 = vadd.f32 %v6247_v25, %v10198_v31  ;;  %v10222_v33 = vpack.i.bf16 %v10216_v16, %v10214_v52 }
 0x25b   : > { %v6993_v35 = vpack.i.bf16 %v2423_v41, %v2422_v20  ;;  %v2171_v26 = vpop.f32.mrf.mxu0  ;;  %v2454_v58 = vld [vmem:[#allocation3 + $0x32] sm:$0xff]  ;;  %v2455_v3 = vld [vmem:[#allocation3 + $0x3a] sm:$0xff]  ;;  %v2547_v7 = vld [vmem:[#allocation3 + $0x22] sm:$0xff] }
 0x25c   : > { %2359 = vst.msk [vmem:[#allocation3 + $0x51] sm:$0xff] %vm1778_vm2, %v2271_v22  ;;  %v2276_v42 = vmax.f32 %v2180_v57, 0.0  ;;  %v2172_v12 = vadd.f32 %v10198_v31, %v2171_v26  ;;  %7004 = vrot.lane.b32.xlu1 %v10222_v33, %s8292_s13  ;;  %v6998_v19 = vpack.i.bf16 %v2455_v3, %v2454_v58  ;;  %v10231_v48 = vld [vmem:[#allocation3 + $0x20] sm:$0xff] }
 0x25d   : > { %6994 = vrot.lane.b32.xlu0 %v6993_v35, %s8288_s9  ;;  %v6248_v11 = vpop.f32.mrf.mxu0  ;;  %v7028_v43 = vpack.i.bf16 %v10231_v48, %v10237_v14  ;;  %v2515_v23 = vld [vmem:[#allocation3 + $0x21] sm:$0xff] }
 0x25e   : > { %2364 = vst.msk [vmem:[#allocation3 + $0x91] sm:$0xff] %vm1778_vm2, %v2276_v42  ;;  %v2274_v37 = vmax.f32 %v2172_v12, 0.0  ;;  %v2183_v2 = vadd.f32 %v6248_v11, %v10198_v31  ;;  %v7033_v13 = vpack.i.bf16 %v2515_v23, %v2514_v60  ;;  %v2546_v51 = vld [vmem:[#allocation3 + $0x1a] sm:$0xff] }
 0x25f   : > { %v2174_v15 = vpop.f32.mrf.mxu0  ;;  %v7038_v5 = vpack.i.bf16 %v2547_v7, %v2546_v51  ;;  %v2426_v38 = vld [vmem:[#allocation3 + $0x61] sm:$0xff] }
 0x260   : > { %2362 = vst.msk [vmem:[#allocation3 + $0x79] sm:$0xff] %vm1778_vm2, %v2274_v37  ;;  %v2277_v27 = vmax.f32 %v2183_v2, 0.0  ;;  %v2175_v6 = vadd.f32 %v10198_v31, %v2174_v15  ;;  %7009 = vrot.lane.b32.xlu1 %v6993_v35, %s8294_s21  ;;  %v10261_v63 = vld [vmem:[#allocation3 + $0x60] sm:$0xff]  ;;  %v10282_v3 = vld [vmem:[#allocation3 + $0x48] sm:$0xff] }
 0x261   : > { %6999 = vrot.lane.b32.xlu0 %v6998_v19, %s8290_s11  ;;  %v6251_v56 = vpop.f32.mrf.mxu0  ;;  %v2427_v30 = vld [vmem:[#allocation3 + $0x69] sm:$0xff]  ;;  %12744 = vst [vmem:[#allocation27_spill] sm:$0xff] %v10282_v3 }
 0x262   : > { %2365 = vst.msk [vmem:[#allocation3 + $0x99] sm:$0xff] %vm1778_vm2, %v2277_v27  ;;  %v2275_v0 = vmax.f32 %v2175_v6, 0.0  ;;  %v2196_v8 = vadd.f32 %v6251_v56, %v10198_v31  ;;  %v10255_v54 = vld [vmem:[#allocation3 + $0x68] sm:$0xff]  ;;  %v7043_v46 = vpack.i.bf16 %v2427_v30, %v2426_v38 }
 0x263   : > { %v2187_v9 = vpop.f32.mrf.mxu0  ;;  %v10267_v62 = vpack.i.bf16 %v10255_v54, %v10261_v63  ;;  %v2458_v32 = vld [vmem:[#allocation3 + $0x62] sm:$0xff]  ;;  %v2459_v44 = vld [vmem:[#allocation3 + $0x6a] sm:$0xff]  ;;  %v2551_v23 = vld [vmem:[#allocation3 + $0x52] sm:$0xff] }
 0x264   : > { %2363 = vst.msk [vmem:[#allocation3 + $0x81] sm:$0xff] %vm1778_vm2, %v2275_v0  ;;  %v2280_v53 = vmax.f32 %v2196_v8, 0.0  ;;  %v2188_v61 = vadd.f32 %v10198_v31, %v2187_v9  ;;  %7014 = vrot.lane.b32.xlu1 %v6998_v19, %s8295_s26  ;;  %v7048_v41 = vpack.i.bf16 %v2459_v44, %v2458_v32  ;;  %v10276_v57 = vld [vmem:[#allocation3 + $0x50] sm:$0xff] }
 0x265   : > { %7029 = vrot.lane.b32.xlu0 %v7028_v43, %s8292_s13  ;;  %v6252_v47 = vpop.f32.mrf.mxu0  ;;  %12743 = vst [vmem:[#allocation26_spill] sm:$0xff] %v10276_v57  ;;  %v10288_v11 = vpack.i.bf16 %v10276_v57, %v10282_v3  ;;  %v2519_v2 = vld [vmem:[#allocation3 + $0x51] sm:$0xff]  ;;  %v2518_v6 = vld [vmem:[#allocation3 + $0x49] sm:$0xff] }
 0x266   : > { %2368 = vst.msk [vmem:[#allocation3 + $0xc1] sm:$0xff] %vm1778_vm2, %v2280_v53  ;;  %v2278_v17 = vmax.f32 %v2188_v61, 0.0  ;;  %v2199_v55 = vadd.f32 %v6252_v47, %v10198_v31  ;;  %v7083_v8 = vpack.i.bf16 %v2519_v2, %v2518_v6  ;;  %v2550_v9 = vld [vmem:[#allocation3 + $0x4a] sm:$0xff] }
 0x267   : > { %v2190_v50 = vpop.f32.mrf.mxu0 }
 0x268   : > { %2366 = vst.msk [vmem:[#allocation3 + $0xa9] sm:$0xff] %vm1778_vm2, %v2278_v17  ;;  %v2281_v36 = vmax.f32 %v2199_v55, 0.0  ;;  %v2191_v59 = vadd.f32 %v10198_v31, %v2190_v50  ;;  %7019 = vrot.lane.b32.xlu1 %v7033_v13, %s8288_s9  ;;  %v7088_v55 = vpack.i.bf16 %v2551_v23, %v2550_v9 }
 0x269   : > { %7034 = vrot.lane.b32.xlu0 %v7033_v13, %s8294_s21  ;;  %v6255_v29 = vpop.f32.mrf.mxu0  ;;  %v2431_v50 = vld [vmem:[#allocation3 + $0x99] sm:$0xff] }
 0x26a   : > { %2369 = vst.msk [vmem:[#allocation3 + $0xc9] sm:$0xff] %vm1778_vm2, %v2281_v36  ;;  %v2279_v24 = vmax.f32 %v2191_v59, 0.0  ;;  %v2212_v28 = vadd.f32 %v6255_v29, %v10198_v31  ;;  %v10303_v51 = vld [vmem:[#allocation3 + $0x98] sm:$0xff] }
 0x26b   : > { %v2203_v45 = vpop.f32.mrf.mxu0  ;;  %12745 = vst [vmem:[#allocation28_spill] sm:$0xff] %v10303_v51  ;;  %v2430_v29 = vld [vmem:[#allocation3 + $0x91] sm:$0xff] }
 0x26c   : > { %2367 = vst.msk [vmem:[#allocation3 + $0xb1] sm:$0xff] %vm1778_vm2, %v2279_v24  ;;  %v2284_v39 = vmax.f32 %v2212_v28, 0.0  ;;  %v2204_v21 = vadd.f32 %v10198_v31, %v2203_v45  ;;  %7024 = vrot.lane.b32.xlu1 %v7038_v5, %s8290_s11  ;;  %v10309_v24 = vld [vmem:[#allocation3 + $0x90] sm:$0xff]  ;;  %v7093_v45 = vpack.i.bf16 %v2431_v50, %v2430_v29 }
 0x26d   : > { %7039 = vrot.lane.b32.xlu0 %v7038_v5, %s8295_s26  ;;  %v6256_v18 = vpop.f32.mrf.mxu0  ;;  %12746 = vst [vmem:[#allocation29_spill] sm:$0xff] %v10309_v24  ;;  %v10315_v30 = vpack.i.bf16 %v10303_v51, %v10309_v24  ;;  %v2434_v2 = vld [vmem:[#allocation3 + $0xc1] sm:$0xff] }
 0x26e   : > { %2372 = vst.msk [vmem:[#allocation3 + $0xf1] sm:$0xff] %vm1778_vm2, %v2284_v39  ;;  %v2282_v4 = vmax.f32 %v2204_v21, 0.0  ;;  %v2215_v40 = vadd.f32 %v6256_v18, %v10198_v31  ;;  %v2462_v21 = vld [vmem:[#allocation3 + $0x92] sm:$0xff]  ;;  %v2463_v18 = vld [vmem:[#allocation3 + $0x9a] sm:$0xff] }
 0x26f   : > { %v2206_v49 = vpop.f32.mrf.mxu0  ;;  %v7098_v32 = vpack.i.bf16 %v2463_v18, %v2462_v21 }
 0x270   : > { %2370 = vst.msk [vmem:[#allocation3 + $0xd9] sm:$0xff] %vm1778_vm2, %v2282_v4  ;;  %v2285_v34 = vmax.f32 %v2215_v40, 0.0  ;;  %v2207_v10 = vadd.f32 %v10198_v31, %v2206_v49  ;;  %7054 = vrot.lane.b32.xlu1 %v10267_v62, %s8292_s13 }
 0x271   : > { %7044 = vrot.lane.b32.xlu0 %v7043_v46, %s8288_s9  ;;  %v6259_v1 = vpop.f32.mrf.mxu0  ;;  %v2466_v6 = vld [vmem:[#allocation3 + $0xc2] sm:$0xff] }
 0x272   : > { %2373 = vst.msk [vmem:[#allocation3 + $0xf9] sm:$0xff] %vm1778_vm2, %v2285_v34  ;;  %v2283_v25 = vmax.f32 %v2207_v10, 0.0  ;;  %v2228_v20 = vadd.f32 %v6259_v1, %v10198_v31  ;;  %v10324_v34 = vld [vmem:[#allocation3 + $0x80] sm:$0xff] }
 0x273   : > { %v2219_v22 = vpop.f32.mrf.mxu0  ;;  %12747 = vst [vmem:[#allocation30_spill] sm:$0xff] %v10324_v34  ;;  %v2527_v23 = vld [vmem:[#allocation3 + $0xb1] sm:$0xff] }
 0x274   : > { %2371 = vst.msk [vmem:[#allocation3 + $0xe1] sm:$0xff] %vm1778_vm2, %v2283_v25  ;;  %v2288_v35 = vmax.f32 %v2228_v20, 0.0  ;;  %v2220_v26 = vadd.f32 %v10198_v31, %v2219_v22  ;;  %7059 = vrot.lane.b32.xlu1 %v7043_v46, %s8294_s21  ;;  %v10330_v25 = vld [vmem:[#allocation3 + $0x78] sm:$0xff]  ;;  %v2523_v22 = vld [vmem:[#allocation3 + $0x81] sm:$0xff] }
 0x275   : > { %7049 = vrot.lane.b32.xlu0 %v7048_v41, %s8290_s11  ;;  %v6260_v58 = vpop.f32.mrf.mxu0  ;;  %12748 = vst [vmem:[#allocation31_spill] sm:$0xff] %v10330_v25  ;;  %v2438_v50 = vld [vmem:[#allocation3 + $0xf1] sm:$0xff] }
 0x276   : > { %2376 = vst.msk [vmem:[#allocation3 + $0x121] sm:$0xff] %vm1778_vm2, %v2288_v35  ;;  %v2286_v42 = vmax.f32 %v2220_v26, 0.0  ;;  %v2231_v12 = vadd.f32 %v6260_v58, %v10198_v31  ;;  %v2554_v26 = vld [vmem:[#allocation3 + $0x7a] sm:$0xff]  ;;  %v2555_v58 = vld [vmem:[#allocation3 + $0x82] sm:$0xff] }
 0x277   : > { %v2222_v37 = vpop.f32.mrf.mxu0 }
 0x278   : > { %2374 = vst.msk [vmem:[#allocation3 + $0x109] sm:$0xff] %vm1778_vm2, %v2286_v42  ;;  %v2289_v19 = vmax.f32 %v2231_v12, 0.0  ;;  %v2223_v15 = vadd.f32 %v10198_v31, %v2222_v37  ;;  %7064 = vrot.lane.b32.xlu1 %v7048_v41, %s8295_s26  ;;  %v10335_v41 = vpack.i.bf16 %v10324_v34, %v10330_v25  ;;  %v10347_v42 = vpack.i.bf16 %v2555_v58, %v2554_v26  ;;  %v2435_v12 = vld [vmem:[#allocation3 + $0xc9] sm:$0xff] }
 0x279   : > { %7079 = vrot.lane.b32.xlu0 %v10288_v11, %s8292_s13  ;;  %v6263_v27 = vpop.f32.mrf.mxu0  ;;  %v10349_v37 = vld [vmem:[#allocation3 + $0xc8] sm:$0xff]  ;;  %v2470_v29 = vld [vmem:[#allocation3 + $0xf2] sm:$0xff] }
 0x27a   : > { %2377 = vst.msk [vmem:[#allocation3 + $0x129] sm:$0xff] %vm1778_vm2, %v2289_v19  ;;  %v2287_v56 = vmax.f32 %v2223_v15, 0.0  ;;  %v2244_v0 = vadd.f32 %v6263_v27, %v10198_v31  ;;  %12749 = vst [vmem:[#allocation32_spill] sm:$0xff] %v10349_v37  ;;  %v10355_v19 = vld [vmem:[#allocation3 + $0xc0] sm:$0xff]  ;;  %v7143_v15 = vpack.i.bf16 %v2435_v12, %v2434_v2  ;;  %v10443_v12 = vpop.permute.xlu0 %6984 }
 0x27b   : > { %v2235_v43 = vpop.f32.mrf.mxu0  ;;  %12750 = vst [vmem:[#allocation33_spill] sm:$0xff] %v10355_v19  ;;  %v10359_v27 = vpack.i.bf16 %v10349_v37, %v10355_v19  ;;  %v2531_v18 = vld [vmem:[#allocation3 + $0xe1] sm:$0xff] }
 0x27c   : > { %2375 = vst.msk [vmem:[#allocation3 + $0x111] sm:$0xff] %vm1778_vm2, %v2287_v56  ;;  %v2292_v53 = vmax.f32 %v2244_v0, 0.0  ;;  %v2236_v61 = vadd.f32 %v10198_v31, %v2235_v43  ;;  %7069 = vrot.lane.b32.xlu1 %v7083_v8, %s8288_s9  ;;  %v2467_v56 = vld [vmem:[#allocation3 + $0xca] sm:$0xff] }
 0x27d   : > { %7084 = vrot.lane.b32.xlu0 %v7083_v8, %s8294_s21  ;;  %v6264_v47 = vpop.f32.mrf.mxu0  ;;  %v7148_v0 = vpack.i.bf16 %v2467_v56, %v2466_v6  ;;  %v10364_v8 = vld [vmem:[#allocation3 + $0xb0] sm:$0xff]  ;;  %v10368_v43 = vld [vmem:[#allocation3 + $0xa8] sm:$0xff] }
 0x27e   : > { %2380 = vst.msk [vmem:[#allocation3 + $0x151] sm:$0xff] %vm1778_vm2, %v2292_v53  ;;  %v2290_v60 = vmax.f32 %v2236_v61, 0.0  ;;  %v2247_v17 = vadd.f32 %v6264_v47, %v10198_v31  ;;  %12751 = vst [vmem:[#allocation34_spill] sm:$0xff] %v10364_v8  ;;  %v10372_v9 = vpack.i.bf16 %v10364_v8, %v10368_v43  ;;  %v2526_v53 = vld [vmem:[#allocation3 + $0xa9] sm:$0xff] }
 0x27f   : > { %v2238_v13 = vpop.f32.mrf.mxu0  ;;  %12752 = vst [vmem:[#allocation36_spill] sm:$0xff] %v10368_v43  ;;  %v10377_v61 = vpack.i.bf16 %v2527_v23, %v2526_v53  ;;  %v2558_v47 = vld [vmem:[#allocation3 + $0xaa] sm:$0xff] }
 0x280   : > { %2378 = vst.msk [vmem:[#allocation3 + $0x139] sm:$0xff] %vm1778_vm2, %v2290_v60  ;;  %v2293_v7 = vmax.f32 %v2247_v17, 0.0  ;;  %v2239_v36 = vadd.f32 %v10198_v31, %v2238_v13  ;;  %7074 = vrot.lane.b32.xlu1 %v7088_v55, %s8290_s11  ;;  %v2559_v60 = vld [vmem:[#allocation3 + $0xb2] sm:$0xff]  ;;  %v2534_v23 = vld [vmem:[#allocation3 + $0x109] sm:$0xff] }
 0x281   : > { %7089 = vrot.lane.b32.xlu0 %v7088_v55, %s8295_s26  ;;  %v6267_v59 = vpop.f32.mrf.mxu0  ;;  %v10383_v17 = vpack.i.bf16 %v2559_v60, %v2558_v47  ;;  %v2439_v55 = vld [vmem:[#allocation3 + $0xf9] sm:$0xff]  ;;  %v2475_v26 = vld [vmem:[#allocation3 + $0x12a] sm:$0xff] }
 0x282   : > { %2381 = vst.msk [vmem:[#allocation3 + $0x159] sm:$0xff] %vm1778_vm2, %v2293_v7  ;;  %v2291_v28 = vmax.f32 %v2239_v36, 0.0  ;;  %v2260_v5 = vadd.f32 %v6267_v59, %v10198_v31  ;;  %v10385_v13 = vld [vmem:[#allocation3 + $0xf8] sm:$0xff]  ;;  %v10391_v7 = vld [vmem:[#allocation3 + $0xf0] sm:$0xff]  ;;  %v10393_v36 = vpack.i.bf16 %v2439_v55, %v2438_v50 }
 0x283   : > { %v2251_v39 = vpop.f32.mrf.mxu0  ;;  %12753 = vst [vmem:[#allocation37_spill] sm:$0xff] %v10385_v13  ;;  %12754 = vst [vmem:[#allocation38_spill] sm:$0xff] %v10391_v7  ;;  %v10397_v59 = vpack.i.bf16 %v10385_v13, %v10391_v7  ;;  %v2503_v2 = vld [vmem:[#allocation3 + $0x110] sm:$0xff] }
 0x284   : > { %2379 = vst.msk [vmem:[#allocation3 + $0x141] sm:$0xff] %vm1778_vm2, %v2291_v28  ;;  %v2296_v38 = vmax.f32 %v2260_v5, 0.0  ;;  %v2252_v4 = vadd.f32 %v10198_v31, %v2251_v39  ;;  %7104 = vrot.lane.b32.xlu1 %v10315_v30, %s8292_s13  ;;  %v2471_v28 = vld [vmem:[#allocation3 + $0xfa] sm:$0xff]  ;;  %v2535_v56 = vld [vmem:[#allocation3 + $0x111] sm:$0xff] }
 0x285   : > { %7094 = vrot.lane.b32.xlu0 %v7093_v45, %s8288_s9  ;;  %v6268_v40 = vpop.f32.mrf.mxu0  ;;  %v7198_v5 = vpack.i.bf16 %v2471_v28, %v2470_v29  ;;  %v10408_v39 = vld [vmem:[#allocation3 + $0xd8] sm:$0xff]  ;;  %v10455_v53 = vpack.i.bf16 %v2535_v56, %v2534_v23  ;;  %v2566_v47 = vld [vmem:[#allocation3 + $0x10a] sm:$0xff] }
 0x286   : > { %2384 = vst.msk [vmem:[#allocation3 + $0x181] sm:$0xff] %vm1778_vm2, %v2296_v38  ;;  %v2294_v46 = vmax.f32 %v2252_v4, 0.0  ;;  %v2263_v49 = vadd.f32 %v6268_v40, %v10198_v31  ;;  %12756 = vst [vmem:[#allocation40_spill] sm:$0xff] %v10408_v39  ;;  %v2530_v38 = vld [vmem:[#allocation3 + $0xd9] sm:$0xff] }
 0x287   : > { %v2254_v44 = vpop.f32.mrf.mxu0  ;;  %v10417_v4 = vpack.i.bf16 %v2531_v18, %v2530_v38  ;;  %v2562_v40 = vld [vmem:[#allocation3 + $0xda] sm:$0xff]  ;;  %v2567_v60 = vld [vmem:[#allocation3 + $0x112] sm:$0xff] }
 0x288   : > { %2382 = vst.msk [vmem:[#allocation3 + $0x169] sm:$0xff] %vm1778_vm2, %v2294_v46  ;;  %v2297_v10 = vmax.f32 %v2263_v49, 0.0  ;;  %v2255_v1 = vadd.f32 %v10198_v31, %v2254_v44  ;;  %7109 = vrot.lane.b32.xlu1 %v7093_v45, %s8294_s21  ;;  %v2522_v31 = vld [vmem:[#allocation3 + $0x79] sm:$0xff]  ;;  %v2563_v46 = vld [vmem:[#allocation3 + $0xe2] sm:$0xff]  ;;  %v10465_v29 = vpack.i.bf16 %v2567_v60, %v2566_v47  ;;  %v2446_v18 = vld [vmem:[#allocation3 + $0x151] sm:$0xff] }
 0x289   : > { %7099 = vrot.lane.b32.xlu0 %v7098_v32, %s8290_s11  ;;  %v10341_v35 = vpack.i.bf16 %v2523_v22, %v2522_v31  ;;  %v10403_v45 = vld [vmem:[#allocation3 + $0xe0] sm:$0xff]  ;;  %v10423_v49 = vpack.i.bf16 %v2563_v46, %v2562_v40  ;;  %v10425_v44 = vld [vmem:[#allocation3 + $0x128] sm:$0xff]  ;;  %v2508_v38 = vld [vmem:[#allocation3 + $0x150] sm:$0xff] }
 0x28a   : > { %2385 = vst.msk [vmem:[#allocation3 + $0x189] sm:$0xff] %vm1778_vm2, %v2297_v10  ;;  %v2295_v20 = vmax.f32 %v2255_v1, 0.0  ;;  %12755 = vst [vmem:[#allocation39_spill] sm:$0xff] %v10403_v45  ;;  %v10412_v21 = vpack.i.bf16 %v10403_v45, %v10408_v39  ;;  %v2442_v10 = vld [vmem:[#allocation3 + $0x121] sm:$0xff]  ;;  %v2447_v28 = vld [vmem:[#allocation3 + $0x159] sm:$0xff] }
 0x28b   : > { %12757 = vst [vmem:[#allocation41_spill] sm:$0xff] %v10425_v44  ;;  %v10431_v1 = vld [vmem:[#allocation3 + $0x120] sm:$0xff]  ;;  %v2506_v23 = vld [vmem:[#allocation3 + $0x138] sm:$0xff] }
 0x28c   : > { %2383 = vst.msk [vmem:[#allocation3 + $0x171] sm:$0xff] %vm1778_vm2, %v2295_v20  ;;  %7114 = vrot.lane.b32.xlu1 %v7098_v32, %s8295_s26  ;;  %v2443_v32 = vld [vmem:[#allocation3 + $0x129] sm:$0xff]  ;;  %12758 = vst [vmem:[#allocation42_spill] sm:$0xff] %v10431_v1  ;;  %v10437_v22 = vpack.i.bf16 %v10425_v44, %v10431_v1  ;;  %v2507_v56 = vld [vmem:[#allocation3 + $0x140] sm:$0xff] }
 0x28d   : > { %7129 = vrot.lane.b32.xlu0 %v10335_v41, %s8292_s13  ;;  %v10433_v20 = vpack.i.bf16 %v2443_v32, %v2442_v10  ;;  %v2474_v31 = vld [vmem:[#allocation3 + $0x122] sm:$0xff]  ;;  %v10475_v32 = vpack.i.bf16 %v2447_v28, %v2446_v18  ;;  %v10497_v28 = vpack.i.bf16 %v2507_v56, %v2506_v23  ;;  %v2538_v18 = vld [vmem:[#allocation3 + $0x139] sm:$0xff] }
 0x28e   : > { %v7248_v58 = vpack.i.bf16 %v2475_v26, %v2474_v31  ;;  %v2478_v31 = vld [vmem:[#allocation3 + $0x152] sm:$0xff]  ;;  %v2479_v26 = vld [vmem:[#allocation3 + $0x15a] sm:$0xff]  ;;  %v2571_v44 = vld [vmem:[#allocation3 + $0x142] sm:$0xff] }
 0x28f   : > { %v2570_v1 = vld [vmem:[#allocation3 + $0x13a] sm:$0xff]  ;;  %v2542_v37 = vld [vmem:[#allocation3 + $0x169] sm:$0xff] }
 0x290   : > { %7119 = vrot.lane.b32.xlu1 %v10341_v35, %s8288_s9  ;;  %v10517_v7 = vpack.i.bf16 %v2571_v44, %v2570_v1  ;;  %v2544_v25 = vld [vmem:[#allocation3 + $0x181] sm:$0xff] }
 0x291   : > { %7134 = vrot.lane.b32.xlu0 %v10341_v35, %s8294_s21  ;;  %v2513_v39 = vld [vmem:[#allocation3 + $0x188] sm:$0xff] }
 0x292   : > { %v2545_v1 = vld [vmem:[#allocation3 + $0x189] sm:$0xff] }
 0x293   : > { %v2511_v45 = vld [vmem:[#allocation3 + $0x170] sm:$0xff] }
 0x294   : > { %7124 = vrot.lane.b32.xlu1 %v10347_v42, %s8290_s11  ;;  %v2543_v44 = vld [vmem:[#allocation3 + $0x171] sm:$0xff] }
 0x295   : > { %7139 = vrot.lane.b32.xlu0 %v10347_v42, %s8295_s26  ;;  %v10539_v51 = vpack.i.bf16 %v2543_v44, %v2542_v37  ;;  %v2576_v44 = vld [vmem:[#allocation3 + $0x182] sm:$0xff] }
 0x298   : > { %7154 = vrot.lane.b32.xlu1 %v10359_v27, %s8292_s13 }
 0x299   : > { %7144 = vrot.lane.b32.xlu0 %v7143_v15, %s8288_s9 }
 0x29c   : > { %7159 = vrot.lane.b32.xlu1 %v7143_v15, %s8294_s21  ;;  %v2502_v15 = vld [vmem:[#allocation3 + $0x108] sm:$0xff] }
 0x29d   : > { %7149 = vrot.lane.b32.xlu0 %v7148_v0, %s8290_s11  ;;  %v10448_v6 = vpack.i.bf16 %v2503_v2, %v2502_v15  ;;  %v10487_v15 = vpack.i.bf16 %v2479_v26, %v2478_v31 }
 0x2a0   : > { %7164 = vrot.lane.b32.xlu1 %v7148_v0, %s8295_s26  ;;  %v10453_v0 = vpop.permute.xlu0 %6989 }
 0x2a1   : > { %7179 = vrot.lane.b32.xlu0 %v10372_v9, %s8292_s13 }
 0x2a4   : > { %7169 = vrot.lane.b32.xlu1 %v10377_v61, %s8288_s9 }
 0x2a5   : > { %7184 = vrot.lane.b32.xlu0 %v10377_v61, %s8294_s21 }
 0x2a8   : > { %7174 = vrot.lane.b32.xlu1 %v10383_v17, %s8290_s11 }
 0x2a9   : > { %7189 = vrot.lane.b32.xlu0 %v10383_v17, %s8295_s26 }
 0x2ac   : > { %7204 = vrot.lane.b32.xlu1 %v10397_v59, %s8292_s13 }
 0x2ad   : > { %7194 = vrot.lane.b32.xlu0 %v10393_v36, %s8288_s9 }
 0x2b0   : > { %7209 = vrot.lane.b32.xlu1 %v10393_v36, %s8294_s21 }
 0x2b1   : > { %7199 = vrot.lane.b32.xlu0 %v7198_v5, %s8290_s11 }
 0x2b4   : > { %7214 = vrot.lane.b32.xlu1 %v7198_v5, %s8295_s26  ;;  %v2509_v5 = vld [vmem:[#allocation3 + $0x158] sm:$0xff] }
 0x2b5   : > { %7229 = vrot.lane.b32.xlu0 %v10412_v21, %s8292_s13  ;;  %v10477_v10 = vpack.i.bf16 %v2509_v5, %v2508_v38  ;;  %v2539_v5 = vld [vmem:[#allocation3 + $0x141] sm:$0xff] }
 0x2b6   : > { %v10507_v26 = vpack.i.bf16 %v2539_v5, %v2538_v18  ;;  %v2510_v5 = vld [vmem:[#allocation3 + $0x168] sm:$0xff]  ;;  %v2512_v18 = vld [vmem:[#allocation3 + $0x180] sm:$0xff] }
 0x2b7   : > { %v10527_v43 = vpack.i.bf16 %v2511_v45, %v2510_v5  ;;  %v10529_v19 = vpack.i.bf16 %v2513_v39, %v2512_v18  ;;  %v10541_v45 = vpack.i.bf16 %v2545_v1, %v2544_v25  ;;  %v2574_v39 = vld [vmem:[#allocation3 + $0x16a] sm:$0xff]  ;;  %v2575_v5 = vld [vmem:[#allocation3 + $0x172] sm:$0xff] }
 0x2b8   : > { %7219 = vrot.lane.b32.xlu1 %v10417_v4, %s8288_s9  ;;  %v10551_v3 = vpack.i.bf16 %v2575_v5, %v2574_v39  ;;  %v2577_v1 = vld [vmem:[#allocation3 + $0x18a] sm:$0xff] }
 0x2b9   : > { %7234 = vrot.lane.b32.xlu0 %v10417_v4, %s8294_s21 }
 0x2bc   : > { %7224 = vrot.lane.b32.xlu1 %v10423_v49, %s8290_s11 }
 0x2bd   : > { %7239 = vrot.lane.b32.xlu0 %v10423_v49, %s8295_s26 }
 0x2c0   : > { %7254 = vrot.lane.b32.xlu1 %v10437_v22, %s8292_s13 }
 0x2c1   : > { %7244 = vrot.lane.b32.xlu0 %v10433_v20, %s8288_s9 }
 0x2c4   : > { %7259 = vrot.lane.b32.xlu1 %v10433_v20, %s8294_s21 }
 0x2c5   : > { %7249 = vrot.lane.b32.xlu0 %v7248_v58, %s8290_s11 }
 0x2c8   : > { %7264 = vrot.lane.b32.xlu1 %v7248_v58, %s8295_s26 }
 0x2c9   : > { %7279 = vrot.lane.b32.xlu0 %v10448_v6, %s8292_s13 }
 0x2cc   : > { %7269 = vrot.lane.b32.xlu1 %v10455_v53, %s8288_s9 }
 0x2cd   : > { %7284 = vrot.lane.b32.xlu0 %v10455_v53, %s8294_s21 }
 0x2ce   : > { %v10461_v55 = vpop.permute.xlu1 %7004 }
 0x2cf   : > { %v10463_v50 = vpop.permute.xlu0 %6994 }
 0x2d0   : > { %7274 = vrot.lane.b32.xlu1 %v10465_v29, %s8290_s11 }
 0x2d1   : > { %7289 = vrot.lane.b32.xlu0 %v10465_v29, %s8295_s26 }
 0x2d2   : > { %v10471_v40 = vpop.permute.xlu1 %7009 }
 0x2d3   : > { %v10473_v46 = vpop.permute.xlu0 %6999 }
 0x2d4   : > { %7304 = vrot.lane.b32.xlu1 %v10477_v10, %s8292_s13 }
 0x2d5   : > { %7294 = vrot.lane.b32.xlu0 %v10475_v32, %s8288_s9 }
 0x2d6   : > { %v10483_v58 = vpop.permute.xlu1 %7014 }
 0x2d7   : > { %v10485_v2 = vpop.permute.xlu0 %7029 }
 0x2d8   : > { %7309 = vrot.lane.b32.xlu1 %v10475_v32, %s8294_s21 }
 0x2d9   : > { %7299 = vrot.lane.b32.xlu0 %v10487_v15, %s8290_s11 }
 0x2da   : > { %v10495_v60 = vpop.permute.xlu1 %7019 }
 0x2db   : > { %v10493_v47 = vpop.permute.xlu0 %7034 }
 0x2dc   : > { %7314 = vrot.lane.b32.xlu1 %v10487_v15, %s8295_s26 }
 0x2dd   : > { %7329 = vrot.lane.b32.xlu0 %v10497_v28, %s8292_s13 }
 0x2de   : > { %v10505_v31 = vpop.permute.xlu1 %7024 }
 0x2df   : > { %v10503_v38 = vpop.permute.xlu0 %7039 }
 0x2e0   : > { %7319 = vrot.lane.b32.xlu1 %v10507_v26, %s8288_s9 }
 0x2e1   : > { %7334 = vrot.lane.b32.xlu0 %v10507_v26, %s8294_s21 }
 0x2e2   : > { %v10515_v23 = vpop.permute.xlu1 %7054 }
 0x2e3   : > { %v10513_v56 = vpop.permute.xlu0 %7044 }
 0x2e4   : > { %7324 = vrot.lane.b32.xlu1 %v10517_v7, %s8290_s11 }
 0x2e5   : > { %7339 = vrot.lane.b32.xlu0 %v10517_v7, %s8295_s26 }
 0x2e6   : > { %v10525_v8 = vpop.permute.xlu1 %7059 }
 0x2e7   : > { %v10523_v13 = vpop.permute.xlu0 %7049 }
 0x2e8   : > { %7344 = vrot.lane.b32.xlu1 %v10529_v19, %s8292_s13 }
 0x2e9   : > { %7364 = vrot.lane.b32.xlu0 %v10527_v43, %s8292_s13 }
 0x2ea   : > { %v10537_v24 = vpop.permute.xlu1 %7064 }
 0x2eb   : > { %v10535_v34 = vpop.permute.xlu0 %7079  ;;  %12759 = vst [vmem:[#allocation43_spill] sm:$0xff] %v10537_v24  ;;  %v10569_v24 = vpack.i.bf16 %v2577_v1, %v2576_v44 }
 0x2ec   : > { %7349 = vrot.lane.b32.xlu1 %v10541_v45, %s8294_s21 }
 0x2ed   : > { %7369 = vrot.lane.b32.xlu0 %v10539_v51, %s8294_s21 }
 0x2ee   : > { %v10549_v57 = vpop.permute.xlu1 %7069 }
 0x2ef   : > { %v10547_v18 = vpop.permute.xlu0 %7084 }
 0x2f0   : > { %12760 = vst [vmem:[#allocation44_spill] sm:$0xff] %v10547_v18  ;;  %7354 = vrot.lane.b32.xlu1 %v10539_v51, %s8288_s9 }
 0x2f1   : > { %7374 = vrot.lane.b32.xlu0 %v10551_v3, %s8295_s26 }
 0x2f2   : > { %v10559_v37 = vpop.permute.xlu1 %7074 }
 0x2f3   : > { %v10557_v25 = vpop.permute.xlu0 %7089 }
 0x2f4   : > { %12761 = vst [vmem:[#allocation45_spill] sm:$0xff] %v10557_v25  ;;  %7359 = vrot.lane.b32.xlu1 %v10551_v3, %s8290_s11 }
 0x2f5   : > { %7384 = vrot.lane.b32.xlu0 %v10222_v33, %s8296_s27  ;;  %v8267_v33 = vld [vmem:[%s12423_s3 + $0x20] ss:$0 sps:$4 sm:$0xff]  }
 0x2f6   : > { %v10567_v5 = vpop.permute.xlu1 %7104  ;;  %6312 = vmatprep.subr.msk.bf16.mxu1 %vm4067_vm12, %v8267_v33 }
 0x2f7   : > { %v10565_v39 = vpop.permute.xlu0 %7094  ;;  %12762 = vst [vmem:[#allocation46_spill] sm:$0xff] %v10567_v5  ;;  %v2646_v5 = vld [vmem:[#allocation3 + $0x52] sm:$0xff] }
 0x2f8   : > { %7379 = vrot.lane.b32.xlu1 %v10569_v24, %s8295_s26 }
 0x2f9   : > { %7394 = vrot.lane.b32.xlu0 %v10267_v62, %s8296_s27 }
 0x2fa   : > { %v10577_v18 = vpop.permute.xlu1 %7109 }
 0x2fb   : > { %v10575_v25 = vpop.permute.xlu0 %7099  ;;  %12764 = vst [vmem:[#allocation48_spill] sm:$0xff] %v10577_v18 }
 0x2fc   : > { %12763 = vst [vmem:[#allocation47_spill] sm:$0xff] %v10575_v25  ;;  %7389 = vrot.lane.b32.xlu1 %v10288_v11, %s8296_s27  ;;  %v8268_v11 = vld [vmem:[%s12423_s3 + $0x18] sm:$0xff]  }
 0x2fd   : > { %7404 = vrot.lane.b32.xlu0 %v10315_v30, %s8296_s27  ;;  %v4069_v30 = vsel %vm4067_vm12, %v8267_v33, 0 }
 0x2fe   : > { %v10588_v62 = vpop.permute.xlu1 %7114  ;;  %6270 = vmatpush3.bf16.msra.mxu1 %v4069_v30  ;;  %v2612_v30 = vld [vmem:[#allocation3 + $0x39] sm:$0xff] }
 0x2ff   : > { %v10586_v44 = vpop.permute.xlu0 %7129  ;;  %12766 = vst [vmem:[#allocation50_spill] sm:$0xff] %v10588_v62  ;;  %6271 = vmatprep.subr.bf16.mxu1 %v8268_v11 }
 0x300   : > { %12765 = vst [vmem:[#allocation49_spill] sm:$0xff] %v10586_v44  ;;  %7399 = vrot.lane.b32.xlu1 %v10335_v41, %s8296_s27  ;;  %v8269_v41 = vld [vmem:[%s12423_s3 + $0x10] sm:$0xff]  }
 0x301   : > { %7414 = vrot.lane.b32.xlu0 %v10359_v27, %s8296_s27  ;;  %v2644_v44 = vld [vmem:[#allocation3 + $0x3a] sm:$0xff] }
 0x302   : > { %v10599_v18 = vpop.permute.xlu1 %7119  ;;  %6272 = vmatpush3.bf16.msra.mxu1 %v8268_v11 }
 0x303   : > { %v10597_v1 = vpop.permute.xlu0 %7134  ;;  %12768 = vst [vmem:[#allocation53_spill] sm:$0xff] %v10599_v18  ;;  %6273 = vmatprep.subr.bf16.mxu1 %v8269_v41  ;;  %v2620_v18 = vld [vmem:[#allocation3 + $0x99] sm:$0xff] }
 0x304   : > { %12767 = vst [vmem:[#allocation52_spill] sm:$0xff] %v10597_v1  ;;  %7409 = vrot.lane.b32.xlu1 %v10372_v9, %s8296_s27  ;;  %v8270_v9 = vld [vmem:[%s12423_s3 + $0x8] sm:$0xff]  }
 0x305   : > { %7424 = vrot.lane.b32.xlu0 %v10397_v59, %s8296_s27  ;;  %v2611_v59 = vld [vmem:[#allocation3 + $0x31] sm:$0xff] }
 0x306   : > { %v10610_v33 = vpop.permute.xlu1 %7124  ;;  %6274 = vmatpush3.bf16.msra.mxu1 %v8269_v41  ;;  %v2643_v1 = vld [vmem:[#allocation3 + $0x32] sm:$0xff] }
 0x307   : > { %v10608_v27 = vpop.permute.xlu0 %7139  ;;  %12770 = vst [vmem:[#allocation4_spill] sm:$0xff] %v10610_v33  ;;  %6275 = vmatprep.subr.bf16.mxu1 %v8270_v9 }
 0x308   : > { %12769 = vst [vmem:[#allocation54_spill] sm:$0xff] %v10608_v27  ;;  %7419 = vrot.lane.b32.xlu1 %v10412_v21, %s8296_s27  ;;  %v7443_v27 = vpack.i.bf16 %v2612_v30, %v2611_v59  ;;  %v8271_v21 = vld [vmem:[%s12423_s3] sm:$0xff]  }
 0x309   : > { %7434 = vrot.lane.b32.xlu0 %v10437_v22, %s8296_s27  ;;  %v2616_v30 = vld [vmem:[#allocation3 + $0x69] sm:$0xff]  ;;  %v2614_v59 = vld [vmem:[#allocation3 + $0x51] sm:$0xff] }
 0x30a   : > { %v10621_v62 = vpop.permute.xlu1 %7154  ;;  %6276 = vmatpush3.bf16.msra.mxu1 %v8270_v9 }
 0x30b   : > { %v10619_v11 = vpop.permute.xlu0 %7144  ;;  %12772 = vst [vmem:[#allocation6_spill] sm:$0xff] %v10621_v62  ;;  %v7453_v62 = vpack.i.bf16 %v2644_v44, %v2643_v1  ;;  %6277 = vmatprep.subr.bf16.mxu1 %v8271_v21  ;;  %v2648_v44 = vld [vmem:[#allocation3 + $0x6a] sm:$0xff] }
 0x30c   : > { %12771 = vst [vmem:[#allocation55_spill] sm:$0xff] %v10619_v11  ;;  %7429 = vrot.lane.b32.xlu1 %v10448_v6, %s8296_s27  ;;  %v2615_v6 = vld [vmem:[#allocation3 + $0x61] sm:$0xff]  ;;  %v2645_v1 = vld [vmem:[#allocation3 + $0x4a] sm:$0xff] }
 0x30d   : > { %7444 = vrot.lane.b32.xlu0 %v7443_v27, %s8297_s16  ;;  %v2613_v27 = vld [vmem:[#allocation3 + $0x49] sm:$0xff] }
 0x30e   : > { %v10631_v41 = vpop.permute.xlu1 %7159  ;;  %6278 = vmatpush3.bf16.msra.mxu1 %v8271_v21  ;;  %v7448_v25 = vpack.i.bf16 %v2614_v59, %v2613_v27  ;;  %v7458_v21 = vpack.i.bf16 %v2646_v5, %v2645_v1 }
 0x30f   : > { %v10629_v22 = vpop.permute.xlu0 %7149  ;;  %12774 = vst [vmem:[#allocation56_spill] sm:$0xff] %v10631_v41  ;;  %v2647_v41 = vld [vmem:[#allocation3 + $0x62] sm:$0xff] }
 0x310   : > { %12773 = vst [vmem:[#allocation5_spill] sm:$0xff] %v10629_v22  ;;  %7439 = vrot.lane.b32.xlu1 %v10497_v28, %s8296_s27  ;;  %v7463_v22 = vpack.i.bf16 %v2616_v30, %v2615_v6  ;;  %v7473_v33 = vpack.i.bf16 %v2648_v44, %v2647_v41  ;;  %v2619_v30 = vld [vmem:[#allocation3 + $0x91] sm:$0xff]  ;;  %v2624_v41 = vld [vmem:[#allocation3 + $0xc9] sm:$0xff]  ;;  %v2623_v44 = vld [vmem:[#allocation3 + $0xc1] sm:$0xff] }
 0x311   : > { %7454 = vrot.lane.b32.xlu0 %v7453_v62, %s8298_s19  ;;  %v7483_v27 = vpack.i.bf16 %v2620_v18, %v2619_v30  ;;  %v2655_v30 = vld [vmem:[#allocation3 + $0xc2] sm:$0xff] }
 0x312   : > { %v10638_v11 = vpop.permute.xlu1 %7164 }
 0x313   : > { %v10636_v9 = vpop.permute.xlu0 %7179  ;;  %12775 = vst [vmem:[#allocation57_spill] sm:$0xff] %v10638_v11  ;;  %v2652_v11 = vld [vmem:[#allocation3 + $0x9a] sm:$0xff] }
 0x314   : > { %7449 = vrot.lane.b32.xlu1 %v7448_v25, %s8297_s16 }
 0x315   : > { %7464 = vrot.lane.b32.xlu0 %v7463_v22, %s8297_s16  ;;  %v2651_v22 = vld [vmem:[#allocation3 + $0x92] sm:$0xff] }
 0x316   : > { %v10644_v28 = vpop.permute.xlu1 %7169 }
 0x317   : > { %v10642_v62 = vpop.permute.xlu0 %7184 }
 0x318   : > { %7459 = vrot.lane.b32.xlu1 %v7458_v21, %s8298_s19  ;;  %v7503_v21 = vpack.i.bf16 %v2624_v41, %v2623_v44  ;;  %v2659_v41 = vld [vmem:[#allocation3 + $0xf2] sm:$0xff]  ;;  %v2660_v44 = vld [vmem:[#allocation3 + $0xfa] sm:$0xff] }
 0x319   : > { %7474 = vrot.lane.b32.xlu0 %v7473_v33, %s8298_s19  ;;  %v7493_v33 = vpack.i.bf16 %v2652_v11, %v2651_v22 }
 0x31a   : > { %v10650_v6 = vpop.permute.xlu1 %7174 }
 0x31b   : > { %v10648_v59 = vpop.permute.xlu0 %7189 }
 0x31c   : > { %7469 = vrot.lane.b32.xlu1 %v10341_v35, %s8297_s16 }
 0x31d   : > { %7484 = vrot.lane.b32.xlu0 %v7483_v27, %s8297_s16  ;;  %v2656_v27 = vld [vmem:[#allocation3 + $0xca] sm:$0xff] }
 0x31e   : > { %v10657_v5 = vpop.permute.xlu1 %7204  ;;  %v7513_v22 = vpack.i.bf16 %v2656_v27, %v2655_v30  ;;  %v7533_v30 = vpack.i.bf16 %v2660_v44, %v2659_v41 }
 0x31f   : > { %v10655_v25 = vpop.permute.xlu0 %7194 }
 0x320   : > { %7479 = vrot.lane.b32.xlu1 %v10347_v42, %s8298_s19 }
 0x321   : > { %7494 = vrot.lane.b32.xlu0 %v7493_v33, %s8298_s19 }
 0x322   : > { %v10664_v1 = vpop.permute.xlu1 %7209 }
 0x323   : > { %v10662_v18 = vpop.permute.xlu0 %7199 }
 0x324   : > { %7489 = vrot.lane.b32.xlu1 %v10377_v61, %s8297_s16 }
 0x325   : > { %7504 = vrot.lane.b32.xlu0 %v7503_v21, %s8297_s16 }
 0x326   : > { %v10671_v11 = vpop.permute.xlu1 %7214 }
 0x327   : > { %v10669_v35 = vpop.permute.xlu0 %7229  ;;  %12776 = vst [vmem:[#allocation58_spill] sm:$0xff] %v10671_v11  ;;  %v2664_v11 = vld [vmem:[#allocation3 + $0x12a] sm:$0xff] }
 0x328   : > { %7499 = vrot.lane.b32.xlu1 %v10383_v17, %s8298_s19 }
 0x329   : > { %7514 = vrot.lane.b32.xlu0 %v7513_v22, %s8298_s19  ;;  %v2663_v22 = vld [vmem:[#allocation3 + $0x122] sm:$0xff] }
 0x32a   : > { %v10678_v33 = vpop.permute.xlu1 %7219  ;;  %v7553_v41 = vpack.i.bf16 %v2664_v11, %v2663_v22  ;;  %v6986_v11 = vunpack.i.l.bf16 %v10443_v12  ;;  %v2386_v22 = vld [vmem:[#allocation3] sm:$0xff] }
 0x32b   : > { %v10676_v42 = vpop.permute.xlu0 %7234 }
 0x32c   : > { %7509 = vrot.lane.b32.xlu1 %v10417_v4, %s8297_s16 }
 0x32d   : > { %7524 = vrot.lane.b32.xlu0 %v10393_v36, %s8297_s16 }
 0x32e   : > { %v10686_v21 = vpop.permute.xlu1 %7224 }
 0x32f   : > { %v10684_v61 = vpop.permute.xlu0 %7239 }
 0x330   : > { %7519 = vrot.lane.b32.xlu1 %v10423_v49, %s8298_s19 }
 0x331   : > { %7534 = vrot.lane.b32.xlu0 %v7533_v30, %s8298_s19 }
 0x332   : > { %v10693_v27 = vpop.permute.xlu1 %7254 }
 0x333   : > { %v10691_v17 = vpop.permute.xlu0 %7244 }
 0x334   : > { %7529 = vrot.lane.b32.xlu1 %v10455_v53, %s8297_s16 }
 0x335   : > { %7544 = vrot.lane.b32.xlu0 %v10433_v20, %s8297_s16 }
 0x336   : > { %v10701_v4 = vpop.permute.xlu1 %7259 }
 0x337   : > { %v10699_v36 = vpop.permute.xlu0 %7249  ;;  %12777 = vst [vmem:[#allocation8_spill] sm:$0xff] %v10701_v4  ;;  %v7027_v4 = vunpack.i.h.bf16 %v10505_v31 }
 0x338   : > { %7539 = vrot.lane.b32.xlu1 %v10465_v29, %s8298_s19  ;;  %v6987_v29 = vunpack.i.h.bf16 %v10443_v12  ;;  %v3699_v12 = vsel %vm1778_vm2, %v2386_v22, %v6986_v11  ;;  %v2610_v11 = vld [vmem:[#allocation3 + $0x1a0] sm:$0xff] }
 0x339   : > { %7554 = vrot.lane.b32.xlu0 %v7553_v41, %s8298_s19 }
 0x33a   : > { %v10708_v44 = vpop.permute.xlu1 %7264 }
 0x33b   : > { %v10706_v49 = vpop.permute.xlu0 %7279  ;;  %12778 = vst [vmem:[#allocation17_spill] sm:$0xff] %v10708_v44 }
 0x33c   : > { %7549 = vrot.lane.b32.xlu1 %v10507_v26, %s8297_s16  ;;  %v2387_v26 = vld [vmem:[#allocation3 + $0x8] sm:$0xff] }
 0x33d   : > { %7564 = vrot.lane.b32.xlu0 %v10477_v10, %s8296_s27  ;;  %v3700_v41 = vsel %vm1778_vm2, %v2387_v26, %v6987_v29  ;;  %v2609_v29 = vld [vmem:[#allocation3 + $0x198] sm:$0xff]  ;;  %v7007_v26 = vunpack.i.h.bf16 %v10461_v55 }
 0x33e   : > { %v10716_v53 = vpop.permute.xlu1 %7269 }
 0x33f   : > { %v10714_v20 = vpop.permute.xlu0 %7284  ;;  %12779 = vst [vmem:[#allocation59_spill] sm:$0xff] %v10716_v53  ;;  %v6997_v53 = vunpack.i.h.bf16 %v10463_v50 }
 0x340   : > { %7559 = vrot.lane.b32.xlu1 %v10517_v7, %s8298_s19  ;;  %v6991_v7 = vunpack.i.l.bf16 %v10453_v0 }
 0x341   : > { %7574 = vrot.lane.b32.xlu0 %v10475_v32, %s8297_s16  ;;  %v6992_v32 = vunpack.i.h.bf16 %v10453_v0  ;;  %v7026_v0 = vunpack.i.l.bf16 %v10505_v31 }
 0x342   : > { %v10726_v10 = vpop.permute.xlu1 %7274  ;;  %v3731_v22 = vsel %vm1844_vm5, %v3699_v12, %v6991_v7  ;;  %v3704_v7 = vsel %vm1778_vm2, %v10216_v16, %v6997_v53  ;;  %v7032_v12 = vunpack.i.h.bf16 %v10485_v2  ;;  %v7012_v16 = vunpack.i.h.bf16 %v10471_v40 }
 0x343   : > { %v10724_v30 = vpop.permute.xlu0 %7289  ;;  %12781 = vst [vmem:[#allocation10_spill] sm:$0xff] %v10726_v10  ;;  %v7036_v53 = vunpack.i.l.bf16 %v10493_v47 }
 0x344   : > { %12780 = vst [vmem:[#allocation7_spill] sm:$0xff] %v10724_v30  ;;  %7569 = vrot.lane.b32.xlu1 %v10527_v43, %s8296_s27  ;;  %v6996_v30 = vunpack.i.l.bf16 %v10463_v50  ;;  %v7021_v43 = vunpack.i.l.bf16 %v10495_v60  ;;  %v3732_v50 = vsel %vm1844_vm5, %v3700_v41, %v6992_v32  ;;  %v10768_v41 = vpack.i.bf16 %v2610_v11, %v2609_v29 }
 0x345   : > { %7584 = vrot.lane.b32.xlu0 %v10487_v15, %s8298_s19  ;;  %v7022_v15 = vunpack.i.h.bf16 %v10495_v60  ;;  %v7006_v60 = vunpack.i.l.bf16 %v10461_v55  ;;  %v7042_v11 = vunpack.i.h.bf16 %v10503_v38 }
 0x346   : > { %v10739_v10 = vpop.permute.xlu1 %7304  ;;  %v3703_v31 = vsel %vm1778_vm2, %v10214_v52, %v6996_v30  ;;  %v3701_v32 = vsel %vm1778_vm2, %v10237_v14, %v7021_v43  ;;  %v2641_v52 = vld [vmem:[#allocation3 + $0x199] sm:$0xff]  ;;  %v2642_v30 = vld [vmem:[#allocation3 + $0x1a1] sm:$0xff]  ;;  %v7037_v14 = vunpack.i.h.bf16 %v10493_v47 }
 0x347   : > { %v10737_v44 = vpop.permute.xlu0 %7294  ;;  %12783 = vst [vmem:[#allocation61_spill] sm:$0xff] %v10739_v10  ;;  %v7002_v10 = vunpack.i.h.bf16 %v10473_v46  ;;  %v3702_v55 = vsel %vm1778_vm2, %v10231_v48, %v7022_v15  ;;  %v7011_v48 = vunpack.i.l.bf16 %v10471_v40  ;;  %v2673_v15 = vld [vmem:[#allocation3 + $0x19a] sm:$0xff]  ;;  %v7017_v40 = vunpack.i.h.bf16 %v10483_v58 }
 0x348   : > { %12782 = vst [vmem:[#allocation60_spill] sm:$0xff] %v10737_v44  ;;  %7579 = vrot.lane.b32.xlu1 %v10539_v51, %s8297_s16 }
 0x349   : > { %7594 = vrot.lane.b32.xlu0 %v10529_v19, %s8296_s27  ;;  %v7001_v19 = vunpack.i.l.bf16 %v10473_v46  ;;  %v7031_v46 = vunpack.i.l.bf16 %v10485_v2  ;;  %v2674_v2 = vld [vmem:[#allocation3 + $0x1a2] sm:$0xff] }
 0x34a   : > { %v10760_v51 = vpop.permute.xlu1 %7309 }
 0x34b   : > { %v10758_v44 = vpop.permute.xlu0 %7299  ;;  %12785 = vst [vmem:[#allocation12_spill] sm:$0xff] %v10760_v51  ;;  %v3734_v51 = vsel %vm1844_vm5, %v3702_v55, %v7027_v4  ;;  %v3735_v43 = vsel %vm1844_vm5, %v3703_v31, %v7001_v19  ;;  %v3736_v4 = vsel %vm1844_vm5, %v3704_v7, %v7002_v10  ;;  %v7016_v31 = vunpack.i.l.bf16 %v10483_v58 }
 0x34c   : > { %12784 = vst [vmem:[#allocation9_spill] sm:$0xff] %v10758_v44  ;;  %v3733_v44 = vsel %vm1844_vm5, %v3701_v32, %v7026_v0  ;;  %7589 = vrot.lane.b32.xlu1 %v10551_v3, %s8298_s19  ;;  %v7041_v0 = vunpack.i.l.bf16 %v10503_v38  ;;  %v10789_v3 = vpack.i.bf16 %v2642_v30, %v2641_v52  ;;  %v3766_v32 = vsel %vm1910_vm7, %v3734_v51, %v7007_v26 }
 0x34d   : > { %7604 = vrot.lane.b32.xlu0 %v10541_v45, %s8297_s16  ;;  %v3765_v47 = vsel %vm1910_vm7, %v3733_v44, %v7006_v60  ;;  %v3764_v10 = vsel %vm1910_vm7, %v3732_v50, %v7032_v12  ;;  %v3763_v19 = vsel %vm1910_vm7, %v3731_v22, %v7031_v46  ;;  %v10802_v7 = vpack.i.bf16 %v2674_v2, %v2673_v15 }
 0x34e   : > { %v10787_v29 = vpop.permute.xlu1 %7314  ;;  %v3795_v38 = vsel %vm1976_vm9, %v3763_v19, %v7036_v53  ;;  %v3796_v44 = vsel %vm1976_vm9, %v3764_v10, %v7037_v14  ;;  %v7047_v26 = vunpack.i.h.bf16 %v10513_v56  ;;  %v7046_v58 = vunpack.i.l.bf16 %v10513_v56 }
 0x34f   : > { %v10785_v45 = vpop.permute.xlu0 %7329  ;;  %12786 = vst [vmem:[#allocation18_spill] sm:$0xff] %v10787_v29  ;;  %v10809_v50 = vsel %vm3827_vm13, %v3795_v38, %v7041_v0  ;;  %v7071_v22 = vunpack.i.l.bf16 %v10549_v57  ;;  %v3797_v51 = vsel %vm1976_vm9, %v3765_v47, %v7011_v48  ;;  %v3798_v55 = vsel %vm1976_vm9, %v3766_v32, %v7012_v16  ;;  %v12787_v0 = vld [vmem:[#allocation27_spill] sm:$0xff]  ;;  %v12789_v38 = vld [vmem:[#allocation44_spill] sm:$0xff] }
 0x350   : > { %7599 = vrot.lane.b32.xlu1 %v10768_v41, %s8296_s27  ;;  %v10819_v52 = vsel %vm3827_vm13, %v3796_v44, %v7042_v11  ;;  %v7051_v30 = vunpack.i.l.bf16 %v10523_v13  ;;  %v7072_v56 = vunpack.i.h.bf16 %v10549_v57  ;;  %v7076_v12 = vunpack.i.l.bf16 %v10559_v37 }
 0x351   : > { %7614 = vrot.lane.b32.xlu0 %v10569_v24, %s8298_s19  ;;  %v7057_v46 = vunpack.i.h.bf16 %v10515_v23  ;;  %v7056_v14 = vunpack.i.l.bf16 %v10515_v23  ;;  %v7052_v53 = vunpack.i.h.bf16 %v10523_v13  ;;  %v7077_v15 = vunpack.i.h.bf16 %v10559_v37 }
 0x352   : > { %v10814_v24 = vpop.permute.xlu1 %7319  ;;  %v3708_v16 = vsel %vm1778_vm2, %v10255_v54, %v7047_v26  ;;  %v3707_v48 = vsel %vm1778_vm2, %v10261_v63, %v7046_v58  ;;  %v10835_v57 = vsel %vm3827_vm13, %v3797_v51, %v7016_v31  ;;  %v10838_v2 = vsel %vm3827_vm13, %v3798_v55, %v7017_v40  ;;  %v12788_v31 = vld [vmem:[#allocation26_spill] sm:$0xff]  ;;  %v12790_v58 = vld [vmem:[#allocation43_spill] sm:$0xff]  ;;  %v12791_v51 = vld [vmem:[#allocation45_spill] sm:$0xff] }
 0x353   : > { %v10812_v60 = vpop.permute.xlu0 %7334  ;;  %v7062_v23 = vunpack.i.h.bf16 %v10525_v8  ;;  %v7082_v13 = vunpack.i.h.bf16 %v10535_v34  ;;  %v7081_v37 = vunpack.i.l.bf16 %v10535_v34  ;;  %v3705_v11 = vsel %vm1778_vm2, %v12787_v0, %v7071_v22 }
 0x354   : > { %7609 = vrot.lane.b32.xlu1 %v10789_v3, %s8297_s16  ;;  %v3739_v63 = vsel %vm1844_vm5, %v3707_v48, %v7051_v30  ;;  %v7061_v32 = vunpack.i.l.bf16 %v10525_v8  ;;  %v3706_v40 = vsel %vm1778_vm2, %v12788_v31, %v7072_v56  ;;  %v3737_v10 = vsel %vm1844_vm5, %v3705_v11, %v7076_v12  ;;  %v12794_v31 = vld [vmem:[#allocation53_spill] sm:$0xff] }
 0x355   : > { %v3740_v19 = vsel %vm1844_vm5, %v3708_v16, %v7052_v53  ;;  %v7087_v34 = vunpack.i.h.bf16 %v12789_v38  ;;  %v7086_v44 = vunpack.i.l.bf16 %v12789_v38  ;;  %v3738_v26 = vsel %vm1844_vm5, %v3706_v40, %v7077_v15 }
 0x356   : > { %v10847_v54 = vpop.permute.xlu1 %7324  ;;  %v7067_v22 = vunpack.i.h.bf16 %v12790_v58  ;;  %v7066_v8 = vunpack.i.l.bf16 %v12790_v58  ;;  %v7092_v55 = vunpack.i.h.bf16 %v12791_v51  ;;  %v7091_v30 = vunpack.i.l.bf16 %v12791_v51  ;;  %v12798_v51 = vld [vmem:[#allocation47_spill] sm:$0xff] }
 0x357   : > { %v10845_v47 = vpop.permute.xlu0 %7339  ;;  %v3768_v56 = vsel %vm1910_vm7, %v3736_v4, %v7082_v13  ;;  %v3767_v12 = vsel %vm1910_vm7, %v3735_v43, %v7081_v37  ;;  %v3769_v53 = vsel %vm1910_vm7, %v3737_v10, %v7056_v14  ;;  %v7097_v16 = vunpack.i.h.bf16 %v10565_v39  ;;  %v12795_v13 = vld [vmem:[#allocation4_spill] sm:$0xff] }
 0x358   : > { %7619 = vrot.lane.b32.xlu1 %v10802_v7, %s8298_s19  ;;  %v3770_v0 = vsel %vm1910_vm7, %v3738_v26, %v7057_v46  ;;  %v7096_v11 = vunpack.i.l.bf16 %v10565_v39  ;;  %v7122_v40 = vunpack.i.h.bf16 %v12794_v31  ;;  %v7121_v38 = vunpack.i.l.bf16 %v12794_v31  ;;  %v12796_v46 = vld [vmem:[#allocation46_spill] sm:$0xff] }
 0x359   : > { %v3799_v4 = vsel %vm1976_vm9, %v3767_v12, %v7086_v44  ;;  %v3800_v43 = vsel %vm1976_vm9, %v3768_v56, %v7087_v34  ;;  %v7127_v14 = vunpack.i.h.bf16 %v12795_v13  ;;  %v7126_v37 = vunpack.i.l.bf16 %v12795_v13  ;;  %v12797_v44 = vld [vmem:[#allocation28_spill] sm:$0xff]  ;;  %v12802_v13 = vld [vmem:[#allocation30_spill] sm:$0xff] }
 0x35a   : > { %v10870_v48 = vpop.permute.xlu1 %7344  ;;  %v10883_v10 = vsel %vm3827_vm13, %v3799_v4, %v7091_v30  ;;  %v10886_v39 = vsel %vm3827_vm13, %v3800_v43, %v7092_v55  ;;  %v7107_v26 = vunpack.i.h.bf16 %v12796_v46  ;;  %v7106_v58 = vunpack.i.l.bf16 %v12796_v46  ;;  %v12801_v4 = vld [vmem:[#allocation29_spill] sm:$0xff] }
 0x35b   : > { %v10868_v15 = vpop.permute.xlu0 %7364  ;;  %12793 = vst [vmem:[#allocation63_spill] sm:$0xff] %v10870_v48  ;;  %v3712_v34 = vsel %vm1778_vm2, %v12797_v44, %v7097_v16  ;;  %v7101_v56 = vunpack.i.l.bf16 %v12798_v51  ;;  %v3802_v30 = vsel %vm1976_vm9, %v3770_v0, %v7062_v23  ;;  %v3711_v55 = vsel %vm1778_vm2, %v12801_v4, %v7096_v11  ;;  %v12803_v48 = vld [vmem:[#allocation31_spill] sm:$0xff]  ;;  %v12804_v44 = vld [vmem:[#allocation49_spill] sm:$0xff]  ;;  %v12805_v23 = vld [vmem:[#allocation52_spill] sm:$0xff] }
 0x35c   : > { %12792 = vst [vmem:[#allocation62_spill] sm:$0xff] %v10868_v15  ;;  %7634 = vrot.lane.b32.xlu1 %v10768_v41, %s8296_s27  ;;  %v3801_v41 = vsel %vm1976_vm9, %v3769_v53, %v7061_v32  ;;  %v7102_v43 = vunpack.i.h.bf16 %v12798_v51  ;;  %v3710_v46 = vsel %vm1778_vm2, %v12802_v13, %v7122_v40  ;;  %v3709_v16 = vsel %vm1778_vm2, %v12803_v48, %v7121_v38  ;;  %v12806_v38 = vld [vmem:[#allocation48_spill] sm:$0xff] }
 0x35d   : > { %v7132_v15 = vunpack.i.h.bf16 %v12804_v44  ;;  %v3742_v32 = vsel %vm1844_vm5, %v3710_v46, %v7127_v14  ;;  %v7137_v53 = vunpack.i.h.bf16 %v12805_v23  ;;  %v7136_v0 = vunpack.i.l.bf16 %v12805_v23  ;;  %v12807_v14 = vld [vmem:[#allocation54_spill] sm:$0xff] }
 0x35e   : > { %v10895_v31 = vpop.permute.xlu1 %7349  ;;  %v10915_v11 = vsel %vm3827_vm13, %v3801_v41, %v7066_v8  ;;  %v10918_v48 = vsel %vm3827_vm13, %v3802_v30, %v7067_v22  ;;  %v3743_v40 = vsel %vm1844_vm5, %v3711_v55, %v7101_v56  ;;  %v7112_v51 = vunpack.i.h.bf16 %v12806_v38  ;;  %v12810_v55 = vld [vmem:[#allocation50_spill] sm:$0xff] }
 0x35f   : > { %v10893_v12 = vpop.permute.xlu0 %7369  ;;  %12800 = vst [vmem:[#allocation16_spill] sm:$0xff] %v10895_v31  ;;  %v3741_v31 = vsel %vm1844_vm5, %v3709_v16, %v7126_v37  ;;  %v7111_v37 = vunpack.i.l.bf16 %v12806_v38  ;;  %v7141_v4 = vunpack.i.l.bf16 %v12807_v14  ;;  %v3744_v46 = vsel %vm1844_vm5, %v3712_v34, %v7102_v43  ;;  %v12811_v43 = vld [vmem:[#allocation55_spill] sm:$0xff] }
 0x360   : > { %12799 = vst [vmem:[#allocation13_spill] sm:$0xff] %v10893_v12  ;;  %v7131_v12 = vunpack.i.l.bf16 %v12804_v44  ;;  %7639 = vrot.lane.b32.xlu1 %v10789_v3, %s8297_s16  ;;  %v7142_v8 = vunpack.i.h.bf16 %v12807_v14  ;;  %v3773_v41 = vsel %vm1910_vm7, %v3741_v31, %v7106_v58  ;;  %v3774_v22 = vsel %vm1910_vm7, %v3742_v32, %v7107_v26  ;;  %v12813_v32 = vld [vmem:[#allocation5_spill] sm:$0xff] }
 0x361   : > { %v3772_v30 = vsel %vm1910_vm7, %v3740_v19, %v7132_v15  ;;  %v7117_v16 = vunpack.i.h.bf16 %v12810_v55  ;;  %v7116_v44 = vunpack.i.l.bf16 %v12810_v55  ;;  %v7147_v38 = vunpack.i.h.bf16 %v12811_v43 }
 0x362   : > { %v10926_v3 = vpop.permute.xlu1 %7354  ;;  %v3771_v56 = vsel %vm1910_vm7, %v3739_v63, %v7131_v12  ;;  %v3804_v34 = vsel %vm1976_vm9, %v3772_v30, %v7137_v53  ;;  %v7146_v58 = vunpack.i.l.bf16 %v12811_v43  ;;  %v7171_v63 = vunpack.i.l.bf16 %v10644_v28 }
 0x363   : > { %v10924_v13 = vpop.permute.xlu0 %7374  ;;  %12809 = vst [vmem:[#allocation24_spill] sm:$0xff] %v10926_v3  ;;  %v3803_v23 = vsel %vm1976_vm9, %v3771_v56, %v7136_v0  ;;  %v3805_v12 = vsel %vm1976_vm9, %v3773_v41, %v7111_v37  ;;  %v10953_v31 = vsel %vm3827_vm13, %v3804_v34, %v7142_v8  ;;  %v7151_v53 = vunpack.i.l.bf16 %v12813_v32  ;;  %v12815_v37 = vld [vmem:[#allocation32_spill] sm:$0xff]  ;;  %v12816_v41 = vld [vmem:[#allocation33_spill] sm:$0xff] }
 0x364   : > { %12808 = vst [vmem:[#allocation23_spill] sm:$0xff] %v10924_v13  ;;  %7644 = vrot.lane.b32.xlu1 %v10802_v7, %s8298_s19  ;;  %v10943_v26 = vsel %vm3827_vm13, %v3803_v23, %v7141_v4  ;;  %v3806_v7 = vsel %vm1976_vm9, %v3774_v22, %v7112_v51  ;;  %v7172_v0 = vunpack.i.h.bf16 %v10644_v28  ;;  %v7176_v14 = vunpack.i.l.bf16 %v10650_v6  ;;  %v12814_v4 = vld [vmem:[#allocation6_spill] sm:$0xff]  ;;  %v12817_v34 = vld [vmem:[#allocation56_spill] sm:$0xff] }
 0x365   : > { %v7157_v56 = vunpack.i.h.bf16 %v12814_v4  ;;  %v7156_v30 = vunpack.i.l.bf16 %v12814_v4  ;;  %v7152_v55 = vunpack.i.h.bf16 %v12813_v32  ;;  %v7177_v23 = vunpack.i.h.bf16 %v10650_v6 }
 0x366   : > { %v10948_v15 = vpop.permute.xlu1 %7359  ;;  %v3716_v51 = vsel %vm1778_vm2, %v12815_v37, %v7147_v38  ;;  %v3715_v8 = vsel %vm1778_vm2, %v12816_v41, %v7146_v58  ;;  %v10967_v22 = vsel %vm3827_vm13, %v3805_v12, %v7116_v44  ;;  %v10970_v28 = vsel %vm3827_vm13, %v3806_v7, %v7117_v16  ;;  %v12820_v12 = vld [vmem:[#allocation34_spill] sm:$0xff] }
 0x367   : > { %v10946_v19 = vpop.permute.xlu0 %7384  ;;  %12812 = vst [vmem:[#allocation19_spill] sm:$0xff] %v10948_v15  ;;  %v7162_v43 = vunpack.i.h.bf16 %v12817_v34  ;;  %v7161_v4 = vunpack.i.l.bf16 %v12817_v34  ;;  %v7181_v32 = vunpack.i.l.bf16 %v10636_v9  ;;  %v12818_v15 = vld [vmem:[#allocation36_spill] sm:$0xff]  ;;  %v3747_v58 = vsel %vm1844_vm5, %v3715_v8, %v7151_v53 }
 0x368   : > { %v3713_v6 = vsel %vm1778_vm2, %v12818_v15, %v7171_v63  ;;  %v7182_v44 = vunpack.i.h.bf16 %v10636_v9  ;;  %v3714_v16 = vsel %vm1778_vm2, %v12820_v12, %v7172_v0  ;;  %v3748_v37 = vsel %vm1844_vm5, %v3716_v51, %v7152_v55  ;;  %v12821_v15 = vld [vmem:[#allocation57_spill] sm:$0xff] }
 0x369   : > { %v3745_v7 = vsel %vm1844_vm5, %v3713_v6, %v7176_v14  ;;  %v7187_v41 = vunpack.i.h.bf16 %v10642_v62  ;;  %v7186_v34 = vunpack.i.l.bf16 %v10642_v62  ;;  %v3746_v63 = vsel %vm1844_vm5, %v3714_v16, %v7177_v23 }
 0x36a   : > { %v10979_v38 = vpop.permute.xlu1 %7379  ;;  %v7167_v3 = vunpack.i.h.bf16 %v12821_v15  ;;  %v7192_v53 = vunpack.i.h.bf16 %v10648_v59  ;;  %v7191_v9 = vunpack.i.l.bf16 %v10648_v59  ;;  %v3775_v0 = vsel %vm1910_vm7, %v3743_v40, %v7181_v32 }
 0x36b   : > { %v10977_v13 = vpop.permute.xlu0 %7394  ;;  %12819 = vst [vmem:[#allocation20_spill] sm:$0xff] %v10979_v38  ;;  %v7166_v38 = vunpack.i.l.bf16 %v12821_v15  ;;  %v3777_v14 = vsel %vm1910_vm7, %v3745_v7, %v7156_v30  ;;  %v7197_v55 = vunpack.i.h.bf16 %v10655_v25  ;;  %v7221_v51 = vunpack.i.l.bf16 %v10678_v33 }
 0x36c   : > { %v3776_v23 = vsel %vm1910_vm7, %v3744_v46, %v7182_v44  ;;  %v3778_v6 = vsel %vm1910_vm7, %v3746_v63, %v7157_v56  ;;  %v7222_v12 = vunpack.i.h.bf16 %v10678_v33  ;;  %v7226_v59 = vunpack.i.l.bf16 %v10686_v21  ;;  %v12822_v56 = vld [vmem:[#allocation37_spill] sm:$0xff] }
 0x36d   : > { %v3807_v40 = vsel %vm1976_vm9, %v3775_v0, %v7186_v34  ;;  %v3808_v30 = vsel %vm1976_vm9, %v3776_v23, %v7187_v41  ;;  %v7196_v32 = vunpack.i.l.bf16 %v10655_v25  ;;  %v7227_v16 = vunpack.i.h.bf16 %v10686_v21  ;;  %v12823_v41 = vld [vmem:[#allocation40_spill] sm:$0xff]  ;;  %v12824_v23 = vld [vmem:[#allocation39_spill] sm:$0xff] }
 0x36e   : > { %v11000_v62 = vpop.permute.xlu1 %7389  ;;  %v11011_v7 = vsel %vm3827_vm13, %v3807_v40, %v7191_v9  ;;  %v11014_v15 = vsel %vm3827_vm13, %v3808_v30, %v7192_v53  ;;  %v7207_v46 = vunpack.i.h.bf16 %v10657_v5  ;;  %v3809_v33 = vsel %vm1976_vm9, %v3777_v14, %v7161_v4 }
 0x36f   : > { %v10998_v8 = vpop.permute.xlu0 %7404  ;;  %v3720_v44 = vsel %vm1778_vm2, %v12822_v56, %v7197_v55  ;;  %v7206_v34 = vunpack.i.l.bf16 %v10657_v5  ;;  %v3717_v25 = vsel %vm1778_vm2, %v12823_v41, %v7221_v51  ;;  %v3810_v9 = vsel %vm1976_vm9, %v3778_v6, %v7162_v43  ;;  %v12825_v55 = vld [vmem:[#allocation38_spill] sm:$0xff] }
 0x370   : > { %v7202_v53 = vunpack.i.h.bf16 %v10662_v18  ;;  %v7201_v0 = vunpack.i.l.bf16 %v10662_v18  ;;  %v3718_v4 = vsel %vm1778_vm2, %v12824_v23, %v7222_v12  ;;  %v3749_v14 = vsel %vm1844_vm5, %v3717_v25, %v7226_v59 }
 0x371   : > { %v3719_v5 = vsel %vm1778_vm2, %v12825_v55, %v7196_v32  ;;  %v7231_v51 = vunpack.i.l.bf16 %v10669_v35  ;;  %v3750_v40 = vsel %vm1844_vm5, %v3718_v4, %v7227_v16  ;;  %v11038_v30 = vsel %vm3827_vm13, %v3809_v33, %v7166_v38 }
 0x372   : > { %v11025_v21 = vpop.permute.xlu1 %7399  ;;  %v7212_v43 = vunpack.i.h.bf16 %v10664_v1  ;;  %v7232_v6 = vunpack.i.h.bf16 %v10669_v35  ;;  %v7236_v18 = vunpack.i.l.bf16 %v10676_v42  ;;  %v11044_v12 = vsel %vm3827_vm13, %v3810_v9, %v7167_v3  ;;  %v12826_v9 = vld [vmem:[#allocation58_spill] sm:$0xff] }
 0x373   : > { %v11023_v63 = vpop.permute.xlu0 %7414  ;;  %v7211_v59 = vunpack.i.l.bf16 %v10664_v1  ;;  %v7237_v32 = vunpack.i.h.bf16 %v10676_v42  ;;  %v7241_v56 = vunpack.i.l.bf16 %v10684_v61  ;;  %v3781_v16 = vsel %vm1910_vm7, %v3749_v14, %v7206_v34 }
 0x374   : > { %v3751_v33 = vsel %vm1844_vm5, %v3719_v5, %v7201_v0  ;;  %v3752_v35 = vsel %vm1844_vm5, %v3720_v44, %v7202_v53  ;;  %v7242_v25 = vunpack.i.h.bf16 %v10684_v61  ;;  %v3782_v3 = vsel %vm1910_vm7, %v3750_v40, %v7207_v46 }
 0x375   : > { %v3779_v1 = vsel %vm1910_vm7, %v3747_v58, %v7231_v51  ;;  %v7217_v42 = vunpack.i.h.bf16 %v12826_v9  ;;  %v7247_v23 = vunpack.i.h.bf16 %v10691_v17  ;;  %v7246_v34 = vunpack.i.l.bf16 %v10691_v17 }
 0x376   : > { %v11052_v38 = vpop.permute.xlu1 %7409  ;;  %v3780_v4 = vsel %vm1910_vm7, %v3748_v37, %v7232_v6  ;;  %v7216_v14 = vunpack.i.l.bf16 %v12826_v9  ;;  %v3811_v0 = vsel %vm1976_vm9, %v3779_v1, %v7236_v18  ;;  %v3813_v44 = vsel %vm1976_vm9, %v3781_v16, %v7211_v59  ;;  %v12827_v6 = vld [vmem:[#allocation41_spill] sm:$0xff]  ;;  %v12828_v59 = vld [vmem:[#allocation42_spill] sm:$0xff]  ;;  %v12831_v9 = vld [vmem:[#allocation8_spill] sm:$0xff] }
 0x377   : > { %v11050_v41 = vpop.permute.xlu0 %7424  ;;  %v3812_v61 = vsel %vm1976_vm9, %v3780_v4, %v7237_v32  ;;  %v11068_v58 = vsel %vm3827_vm13, %v3811_v0, %v7241_v56  ;;  %v7251_v46 = vunpack.i.l.bf16 %v10699_v36  ;;  %v3814_v37 = vsel %vm1976_vm9, %v3782_v3, %v7212_v43  ;;  %v12832_v4 = vld [vmem:[#allocation59_spill] sm:$0xff] }
 0x378   : > { %v11077_v55 = vsel %vm3827_vm13, %v3812_v61, %v7242_v25  ;;  %v7282_v51 = vunpack.i.h.bf16 %v10706_v49  ;;  %v7281_v40 = vunpack.i.l.bf16 %v10706_v49  ;;  %v3724_v18 = vsel %vm1778_vm2, %v12827_v6, %v7247_v23 }
 0x379   : > { %v3723_v32 = vsel %vm1778_vm2, %v12828_v59, %v7246_v34  ;;  %v7256_v56 = vunpack.i.l.bf16 %v10693_v27  ;;  %v11088_v43 = vsel %vm3827_vm13, %v3813_v44, %v7216_v14  ;;  %v7252_v16 = vunpack.i.h.bf16 %v10699_v36  ;;  %v12835_v34 = vld [vmem:[#allocation17_spill] sm:$0xff] }
 0x37a   : > { %v11073_v17 = vpop.permute.xlu1 %7419  ;;  %v7287_v25 = vunpack.i.h.bf16 %v10714_v20  ;;  %v7286_v3 = vunpack.i.l.bf16 %v10714_v20  ;;  %v11094_v1 = vsel %vm3827_vm13, %v3814_v37, %v7217_v42  ;;  %v11097_v49 = vsel %vm1844_vm5, %v3723_v32, %v7251_v46  ;;  %v12833_v37 = vld [vmem:[#allocation10_spill] sm:$0xff] }
 0x37b   : > { %v11071_v53 = vpop.permute.xlu0 %7434  ;;  %12829 = vst [vmem:[#allocation21_spill] sm:$0xff] %v11094_v1  ;;  %12830 = vst [vmem:[#allocation22_spill] sm:$0xff] %v11097_v49  ;;  %v7271_v14 = vunpack.i.l.bf16 %v12832_v4  ;;  %v3783_v36 = vsel %vm1910_vm7, %v3751_v33, %v7281_v40  ;;  %v3784_v20 = vsel %vm1910_vm7, %v3752_v35, %v7282_v51  ;;  %v7387_v42 = vunpack.i.h.bf16 %v10946_v19  ;;  %v2408_v35 = vld [vmem:[#allocation3 + $0x108] sm:$0xff] }
 0x37c   : > { %v7386_v61 = vunpack.i.l.bf16 %v10946_v19  ;;  %v7272_v46 = vunpack.i.h.bf16 %v12832_v4  ;;  %v7276_v6 = vunpack.i.l.bf16 %v12833_v37  ;;  %v11111_v23 = vsel %vm1844_vm5, %v3724_v18, %v7252_v16  ;;  %v12836_v40 = vld [vmem:[#allocation7_spill] sm:$0xff]  ;;  %v2409_v18 = vld [vmem:[#allocation3 + $0x110] sm:$0xff] }
 0x37d   : > { %12834 = vst [vmem:[#allocation64_spill] sm:$0xff] %v11111_v23  ;;  %v3815_v29 = vsel %vm1976_vm9, %v3783_v36, %v7286_v3  ;;  %v3816_v33 = vsel %vm1976_vm9, %v3784_v20, %v7287_v25  ;;  %v3721_v51 = vsel %vm1778_vm2, %v2408_v35, %v7271_v14  ;;  %v7292_v19 = vunpack.i.h.bf16 %v12836_v40 }
 0x37e   : > { %v11102_v44 = vpop.permute.xlu1 %7429  ;;  %v7291_v4 = vunpack.i.l.bf16 %v12836_v40  ;;  %v7277_v49 = vunpack.i.h.bf16 %v12833_v37  ;;  %v3861_v3 = vsel %vm3860_vm14, %v10809_v50, %v7386_v61  ;;  %v3862_v25 = vsel %vm3860_vm14, %v10819_v52, %v7387_v42 }
 0x37f   : > { %v7445_v0 = vpop.permute.xlu0 %7444  ;;  %v3722_v14 = vsel %vm1778_vm2, %v2409_v18, %v7272_v46  ;;  %v3753_v36 = vsel %vm1844_vm5, %v3721_v51, %v7276_v6  ;;  %v7397_v35 = vunpack.i.h.bf16 %v10977_v13  ;;  %v7396_v40 = vunpack.i.l.bf16 %v10977_v13 }
 0x380   : > { %v7447_v59 = vunpack.i.h.bf16 %v7445_v0  ;;  %v7446_v32 = vunpack.i.l.bf16 %v7445_v0  ;;  %v3754_v50 = vsel %vm1844_vm5, %v3722_v14, %v7277_v49  ;;  %v7392_v52 = vunpack.i.h.bf16 %v11000_v62 }
 0x381   : > { %v7391_v42 = vunpack.i.l.bf16 %v11000_v62  ;;  %v11142_v13 = vsel %vm3827_vm13, %v3816_v33, %v7292_v19  ;;  %v12837_v62 = vunpack.i.h.bf16 %v10693_v27  ;;  %v3866_v33 = vsel %vm3860_vm14, %v10886_v39, %v7397_v35 }
 0x382   : > { %v11120_v0 = vpop.permute.xlu1 %7439  ;;  %v3894_v20 = vsel %vm3893_vm15, %v3861_v3, %v7446_v32  ;;  %v3895_v37 = vsel %vm3893_vm15, %v3862_v25, %v7447_v59  ;;  %v7266_v32 = vunpack.i.l.bf16 %v12835_v34  ;;  %v11139_v59 = vsel %vm3827_vm13, %v3815_v29, %v7291_v4  ;;  %v12838_v3 = vld [vmem:[#allocation60_spill] sm:$0xff] }
 0x383   : > { %v7455_v1 = vpop.permute.xlu0 %7454  ;;  %v7297_v25 = vunpack.i.h.bf16 %v12838_v3  ;;  %v3865_v29 = vsel %vm3860_vm14, %v10883_v10, %v7396_v40  ;;  %v7406_v19 = vunpack.i.l.bf16 %v10998_v8  ;;  %v3863_v4 = vsel %vm3860_vm14, %v10835_v57, %v7391_v42 }
 0x384   : > { %v7457_v16 = vunpack.i.h.bf16 %v7455_v1  ;;  %v7456_v23 = vunpack.i.l.bf16 %v7455_v1  ;;  %v3864_v27 = vsel %vm3860_vm14, %v10838_v2, %v7392_v52  ;;  %v7402_v42 = vunpack.i.h.bf16 %v11025_v21 }
 0x386   : > { %v3927_v1 = vsel %vm3926_vm0, %v3894_v20, %v7456_v23  ;;  %v3928_v5 = vsel %vm3926_vm0, %v3895_v37, %v7457_v16  ;;  %v7450_v46 = vpop.permute.xlu1 %7449  ;;  %v3785_v23 = vsel %vm1910_vm7, %v3753_v36, %v7256_v56  ;;  %v7407_v56 = vunpack.i.h.bf16 %v10998_v8 }
 0x387   : > { %v7465_v61 = vpop.permute.xlu0 %7464  ;;  %v3959_v6 = vpack.c.bf16 %v3928_v5, %v3927_v1  ;;  %v7452_v49 = vunpack.i.h.bf16 %v7450_v46  ;;  %v7451_v16 = vunpack.i.l.bf16 %v7450_v46  ;;  %v3786_v5 = vsel %vm1910_vm7, %v3754_v50, %v12837_v62  ;;  %v12839_v62 = vld [vmem:[#allocation61_spill] sm:$0xff] }
 0x388   : > { %v7467_v51 = vunpack.i.h.bf16 %v7465_v61  ;;  %v7466_v18 = vunpack.i.l.bf16 %v7465_v61  ;;  %v7401_v61 = vunpack.i.l.bf16 %v11025_v21 }
 0x389   : > { %6279 = vmatprep.mubr.msk.bf16.mxu1 %vm4018_vm1, %v3959_v6  ;;  %v3896_v35 = vsel %vm3893_vm15, %v3863_v4, %v7451_v16  ;;  %v3897_v8 = vsel %vm3893_vm15, %v3864_v27, %v7452_v49  ;;  %v7296_v16 = vunpack.i.l.bf16 %v12838_v3  ;;  %v7307_v49 = vunpack.i.h.bf16 %v12839_v62  ;;  %v2415_v27 = vld [vmem:[#allocation3 + $0x158] sm:$0xff] }
 0x38a   : > { %v7460_v36 = vpop.permute.xlu1 %7459  ;;  %v3898_v10 = vsel %vm3893_vm15, %v3865_v29, %v7466_v18  ;;  %v3899_v39 = vsel %vm3893_vm15, %v3866_v33, %v7467_v51  ;;  %v7306_v29 = vunpack.i.l.bf16 %v12839_v62  ;;  %v12840_v33 = vunpack.i.l.bf16 %v12831_v9 }
 0x38b   : > { %v7475_v14 = vpop.permute.xlu0 %7474  ;;  %v7462_v1 = vunpack.i.h.bf16 %v7460_v36  ;;  %v7461_v50 = vunpack.i.l.bf16 %v7460_v36  ;;  %v11178_v21 = vsel %vm1778_vm2, %v2415_v27, %v7297_v25  ;;  %v3869_v3 = vsel %vm3860_vm14, %v10943_v26, %v7406_v19 }
 0x38c   : > { %v7477_v20 = vunpack.i.h.bf16 %v7475_v14  ;;  %v7476_v37 = vunpack.i.l.bf16 %v7475_v14  ;;  %v3817_v4 = vsel %vm1976_vm9, %v3785_v23, %v12840_v33  ;;  %v3867_v25 = vsel %vm3860_vm14, %v10915_v11, %v7401_v61 }
 0x38d   : > { %v3929_v2 = vsel %vm3926_vm0, %v3896_v35, %v7461_v50  ;;  %v3930_v52 = vsel %vm3926_vm0, %v3897_v8, %v7462_v1  ;;  %v3870_v1 = vsel %vm3860_vm14, %v10953_v31, %v7407_v56  ;;  %v12841_v50 = vunpack.i.h.bf16 %v12831_v9 }
 0x38e   : > { %v3931_v40 = vsel %vm3926_vm0, %v3898_v10, %v7476_v37  ;;  %v3932_v57 = vsel %vm3926_vm0, %v3899_v39, %v7477_v20  ;;  %v7470_v6 = vpop.permute.xlu1 %7469  ;;  %v3960_v18 = vpack.c.bf16 %v3930_v52, %v3929_v2  ;;  %v7417_v10 = vunpack.i.h.bf16 %v11023_v63 }
 0x38f   : > { %v7485_v46 = vpop.permute.xlu0 %7484  ;;  %v3961_v51 = vpack.c.bf16 %v3932_v57, %v3931_v40  ;;  %v7472_v20 = vunpack.i.h.bf16 %v7470_v6  ;;  %v7471_v37 = vunpack.i.l.bf16 %v7470_v6  ;;  %v3818_v23 = vsel %vm1976_vm9, %v3786_v5, %v12841_v50 }
 0x390   : > { %v7487_v14 = vunpack.i.h.bf16 %v7485_v46  ;;  %v7486_v36 = vunpack.i.l.bf16 %v7485_v46  ;;  %6280 = vmatmul.mubr.msk.bf16.vlgmr.msra.gmra.mxu1 %vm4018_vm1, %v3960_v18  ;;  %v7416_v39 = vunpack.i.l.bf16 %v11023_v63  ;;  %v3868_v35 = vsel %vm3860_vm14, %v10918_v48, %v7402_v42  ;;  %v2414_v42 = vld [vmem:[#allocation3 + $0x150] sm:$0xff] }
 0x391   : > { %6283 = vmatprep.mubr.msk.bf16.mxu1 %vm4018_vm1, %v3961_v51  ;;  %v3900_v57 = vsel %vm3893_vm15, %v3867_v25, %v7471_v37  ;;  %v3901_v63 = vsel %vm3893_vm15, %v3868_v35, %v7472_v20  ;;  %v7412_v61 = vunpack.i.h.bf16 %v11052_v38  ;;  %v7411_v46 = vunpack.i.l.bf16 %v11052_v38  ;;  %v12844_v35 = vld [vmem:[#allocation12_spill] sm:$0xff] }
 0x392   : > { %v7480_v19 = vpop.permute.xlu1 %7479  ;;  %v3902_v5 = vsel %vm3893_vm15, %v3869_v3, %v7486_v36  ;;  %v3903_v40 = vsel %vm3893_vm15, %v3870_v1, %v7487_v14  ;;  %v3727_v27 = vsel %vm1778_vm2, %v2414_v42, %v7296_v16  ;;  %v12842_v14 = vld [vmem:[#allocation9_spill] sm:$0xff]  ;;  %v11209_v20 = vsel %vm3827_vm13, %v3817_v4, %v7266_v32 }
 0x393   : > { %v7495_v26 = vpop.permute.xlu0 %7494  ;;  %v7482_v56 = vunpack.i.h.bf16 %v7480_v19  ;;  %v7481_v9 = vunpack.i.l.bf16 %v7480_v19  ;;  %v7302_v36 = vunpack.i.h.bf16 %v12842_v14  ;;  %v12843_v37 = vunpack.i.h.bf16 %v12835_v34 }
 0x394   : > { %v7497_v8 = vunpack.i.h.bf16 %v7495_v26  ;;  %v7496_v31 = vunpack.i.l.bf16 %v7495_v26  ;;  %v7301_v16 = vunpack.i.l.bf16 %v12842_v14  ;;  %v7312_v26 = vunpack.i.h.bf16 %v12844_v35 }
 0x395   : > { %v3933_v48 = vsel %vm3926_vm0, %v3900_v57, %v7481_v9  ;;  %v3934_v52 = vsel %vm3926_vm0, %v3901_v63, %v7482_v56  ;;  %v11214_v3 = vsel %vm3827_vm13, %v3818_v23, %v12843_v37  ;;  %v3873_v19 = vsel %vm3860_vm14, %v11011_v7, %v7416_v39 }
 0x396   : > { %v3935_v2 = vsel %vm3926_vm0, %v3902_v5, %v7496_v31  ;;  %v3936_v11 = vsel %vm3926_vm0, %v3903_v40, %v7497_v8  ;;  %v7490_v18 = vpop.permute.xlu1 %7489  ;;  %v3962_v51 = vpack.c.bf16 %v3934_v52, %v3933_v48  ;;  %v3874_v32 = vsel %vm3860_vm14, %v11014_v15, %v7417_v10 }
 0x397   : > { %v7505_v6 = vpop.permute.xlu0 %7504  ;;  %v3963_v33 = vpack.c.bf16 %v3936_v11, %v3935_v2  ;;  %v7492_v50 = vunpack.i.h.bf16 %v7490_v18  ;;  %v7491_v25 = vunpack.i.l.bf16 %v7490_v18  ;;  %v7427_v34 = vunpack.i.h.bf16 %v11050_v41 }
 0x398   : > { %v7507_v1 = vunpack.i.h.bf16 %v7505_v6  ;;  %v7506_v38 = vunpack.i.l.bf16 %v7505_v6  ;;  %6284 = vmatmul.mubr.msk.bf16.gmra.mxu1 %vm4018_vm1, %v3962_v51  ;;  %v7426_v4 = vunpack.i.l.bf16 %v11050_v41  ;;  %v3871_v23 = vsel %vm3860_vm14, %v10967_v22, %v7411_v46 }
 0x399   : > { %6287 = vmatprep.mubr.msk.bf16.mxu1 %vm4018_vm1, %v3963_v33  ;;  %v3872_v8 = vsel %vm3860_vm14, %v10970_v28, %v7412_v61  ;;  %v3904_v40 = vsel %vm3893_vm15, %v3871_v23, %v7491_v25  ;;  %v7422_v2 = vunpack.i.h.bf16 %v11073_v17  ;;  %v7421_v11 = vunpack.i.l.bf16 %v11073_v17 }
 0x39a   : > { %v7500_v56 = vpop.permute.xlu1 %7499  ;;  %v3906_v15 = vsel %vm3893_vm15, %v3873_v19, %v7506_v38  ;;  %v3907_v10 = vsel %vm3893_vm15, %v3874_v32, %v7507_v1  ;;  %v3905_v41 = vsel %vm3893_vm15, %v3872_v8, %v7492_v50  ;;  %v11241_v46 = vsel %vm1844_vm5, %v3727_v27, %v7301_v16 }
 0x39b   : > { %v7515_v31 = vpop.permute.xlu0 %7514  ;;  %v7502_v7 = vunpack.i.h.bf16 %v7500_v56  ;;  %v7501_v39 = vunpack.i.l.bf16 %v7500_v56  ;;  %v11245_v6 = vsel %vm1844_vm5, %v11178_v21, %v7302_v36  ;;  %v7311_v18 = vunpack.i.l.bf16 %v12844_v35  ;;  %v12851_v35 = vld [vmem:[#allocation63_spill] sm:$0xff] }
 0x39c   : > { %v7517_v9 = vunpack.i.h.bf16 %v7515_v31  ;;  %v7516_v5 = vunpack.i.l.bf16 %v7515_v31  ;;  %v7332_v51 = vunpack.i.h.bf16 %v10785_v45  ;;  %v7322_v17 = vunpack.i.h.bf16 %v10814_v24 }
 0x39d   : > { %v3937_v28 = vsel %vm3926_vm0, %v3904_v40, %v7501_v39  ;;  %v3938_v63 = vsel %vm3926_vm0, %v3905_v41, %v7502_v7  ;;  %v7321_v38 = vunpack.i.l.bf16 %v10814_v24  ;;  %v3877_v27 = vsel %vm3860_vm14, %v11068_v58, %v7426_v4 }
 0x39e   : > { %v3939_v57 = vsel %vm3926_vm0, %v3906_v15, %v7516_v5  ;;  %v3940_v22 = vsel %vm3926_vm0, %v3907_v10, %v7517_v9  ;;  %v7510_v52 = vpop.permute.xlu1 %7509  ;;  %v3964_v42 = vpack.c.bf16 %v3938_v63, %v3937_v28  ;;  %v3878_v21 = vsel %vm3860_vm14, %v11077_v55, %v7427_v34  ;;  %v2413_v9 = vld [vmem:[#allocation3 + $0x140] sm:$0xff]  ;;  %v2412_v63 = vld [vmem:[#allocation3 + $0x138] sm:$0xff] }
 0x39f   : > { %v7525_v48 = vpop.permute.xlu0 %7524  ;;  %v3965_v61 = vpack.c.bf16 %v3940_v22, %v3939_v57  ;;  %v7512_v37 = vunpack.i.h.bf16 %v7510_v52  ;;  %v7511_v1 = vunpack.i.l.bf16 %v7510_v52  ;;  %v7437_v36 = vunpack.i.h.bf16 %v11071_v53 }
 0x3a0   : > { %v7527_v33 = vunpack.i.h.bf16 %v7525_v48  ;;  %v7526_v14 = vunpack.i.l.bf16 %v7525_v48  ;;  %6288 = vmatmul.mubr.msk.bf16.gmra.mxu1 %vm4018_vm1, %v3964_v42  ;;  %v7436_v50 = vunpack.i.l.bf16 %v11071_v53  ;;  %v3875_v25 = vsel %vm3860_vm14, %v11038_v30, %v7421_v11 }
 0x3a1   : > { %6291 = vmatprep.mubr.msk.bf16.mxu1 %vm4018_vm1, %v3965_v61  ;;  %v3876_v16 = vsel %vm3860_vm14, %v11044_v12, %v7422_v2  ;;  %v3908_v8 = vsel %vm3893_vm15, %v3875_v25, %v7511_v1  ;;  %v7432_v5 = vunpack.i.h.bf16 %v11102_v44  ;;  %v7431_v7 = vunpack.i.l.bf16 %v11102_v44  ;;  %v12845_v1 = vld [vmem:[#allocation21_spill] sm:$0xff] }
 0x3a2   : > { %v7520_v24 = vpop.permute.xlu1 %7519  ;;  %v3910_v55 = vsel %vm3893_vm15, %v3877_v27, %v7526_v14  ;;  %v3911_v34 = vsel %vm3893_vm15, %v3878_v21, %v7527_v33  ;;  %v3909_v53 = vsel %vm3893_vm15, %v3876_v16, %v7512_v37  ;;  %v7331_v41 = vunpack.i.l.bf16 %v10785_v45 }
 0x3a3   : > { %v7535_v19 = vpop.permute.xlu0 %7534  ;;  %v7522_v58 = vunpack.i.h.bf16 %v7520_v24  ;;  %v7521_v4 = vunpack.i.l.bf16 %v7520_v24  ;;  %v7337_v57 = vunpack.i.h.bf16 %v10812_v60  ;;  %v7336_v22 = vunpack.i.l.bf16 %v10812_v60 }
 0x3a4   : > { %v7537_v32 = vunpack.i.h.bf16 %v7535_v19  ;;  %v7536_v23 = vunpack.i.l.bf16 %v7535_v19  ;;  %v3726_v28 = vsel %vm1778_vm2, %v2413_v9, %v7322_v17  ;;  %v3725_v44 = vsel %vm1778_vm2, %v2412_v63, %v7321_v38 }
 0x3a5   : > { %v3941_v12 = vsel %vm3926_vm0, %v3908_v8, %v7521_v4  ;;  %v3942_v56 = vsel %vm3926_vm0, %v3909_v53, %v7522_v58  ;;  %v7341_v42 = vunpack.i.l.bf16 %v10845_v47  ;;  %v7327_v61 = vunpack.i.h.bf16 %v10847_v54  ;;  %v12846_v53 = vld [vmem:[#allocation22_spill] sm:$0xff] }
 0x3a6   : > { %v3943_v31 = vsel %vm3926_vm0, %v3910_v55, %v7536_v23  ;;  %v3944_v30 = vsel %vm3926_vm0, %v3911_v34, %v7537_v32  ;;  %v7530_v15 = vpop.permute.xlu1 %7529  ;;  %v3966_v10 = vpack.c.bf16 %v3942_v56, %v3941_v12  ;;  %v7326_v33 = vunpack.i.l.bf16 %v10847_v54 }
 0x3a7   : > { %v7545_v39 = vpop.permute.xlu0 %7544  ;;  %v3967_v40 = vpack.c.bf16 %v3944_v30, %v3943_v31  ;;  %v7532_v48 = vunpack.i.h.bf16 %v7530_v15  ;;  %v7531_v52 = vunpack.i.l.bf16 %v7530_v15  ;;  %v3881_v60 = vsel %vm3860_vm14, %v11139_v59, %v7436_v50  ;;  %v12847_v30 = vld [vmem:[#allocation18_spill] sm:$0xff] }
 0x3a8   : > { %v7547_v2 = vunpack.i.h.bf16 %v7545_v39  ;;  %v7546_v11 = vunpack.i.l.bf16 %v7545_v39  ;;  %6292 = vmatmul.mubr.msk.bf16.gmra.mxu1 %vm4018_vm1, %v3966_v10  ;;  %v3882_v14 = vsel %vm3860_vm14, %v11142_v13, %v7437_v36  ;;  %v3879_v37 = vsel %vm3860_vm14, %v11088_v43, %v7431_v7 }
 0x3a9   : > { %6295 = vmatprep.mubr.msk.bf16.mxu1 %vm4018_vm1, %v3967_v40  ;;  %v3880_v17 = vsel %vm3860_vm14, %v12845_v1, %v7432_v5  ;;  %v3912_v59 = vsel %vm3893_vm15, %v3879_v37, %v7531_v52  ;;  %v7442_v23 = vunpack.i.h.bf16 %v11120_v0  ;;  %v7441_v58 = vunpack.i.l.bf16 %v11120_v0  ;;  %v12848_v5 = vld [vmem:[#allocation64_spill] sm:$0xff] }
 0x3aa   : > { %v7540_v27 = vpop.permute.xlu1 %7539  ;;  %v3914_v19 = vsel %vm3893_vm15, %v3881_v60, %v7546_v11  ;;  %v3915_v24 = vsel %vm3893_vm15, %v3882_v14, %v7547_v2  ;;  %v3913_v13 = vsel %vm3893_vm15, %v3880_v17, %v7532_v48  ;;  %v3787_v31 = vsel %vm1910_vm7, %v12846_v53, %v7331_v41 }
 0x3ab   : > { %v7555_v38 = vpop.permute.xlu0 %7554  ;;  %v7542_v16 = vunpack.i.h.bf16 %v7540_v27  ;;  %v7541_v54 = vunpack.i.l.bf16 %v7540_v27  ;;  %v7317_v12 = vunpack.i.h.bf16 %v12847_v30  ;;  %v3757_v56 = vsel %vm1844_vm5, %v3725_v44, %v7326_v33 }
 0x3ac   : > { %v7557_v21 = vunpack.i.h.bf16 %v7555_v38  ;;  %v7556_v25 = vunpack.i.l.bf16 %v7555_v38  ;;  %v3758_v9 = vsel %vm1844_vm5, %v3726_v28, %v7327_v61  ;;  %v3788_v7 = vsel %vm1910_vm7, %v12848_v5, %v7332_v51  ;;  %v12849_v61 = vld [vmem:[#allocation62_spill] sm:$0xff] }
 0x3ad   : > { %v3945_v50 = vsel %vm3926_vm0, %v3912_v59, %v7541_v54  ;;  %v3946_v32 = vsel %vm3926_vm0, %v3913_v13, %v7542_v16  ;;  %v3819_v0 = vsel %vm1976_vm9, %v3787_v31, %v7336_v22  ;;  %v7316_v10 = vunpack.i.l.bf16 %v12847_v30  ;;  %v12850_v54 = vld [vmem:[#allocation13_spill] sm:$0xff] }
 0x3ae   : > { %v3947_v36 = vsel %vm3926_vm0, %v3914_v19, %v7556_v25  ;;  %v3948_v43 = vsel %vm3926_vm0, %v3915_v24, %v7557_v21  ;;  %v7550_v55 = vpop.permute.xlu1 %7549  ;;  %v3968_v34 = vpack.c.bf16 %v3946_v32, %v3945_v50  ;;  %v3820_v40 = vsel %vm1976_vm9, %v3788_v7, %v7337_v57 }
 0x3af   : > { %v7565_v4 = vpop.permute.xlu0 %7564  ;;  %v3969_v8 = vpack.c.bf16 %v3948_v43, %v3947_v36  ;;  %v7552_v39 = vunpack.i.h.bf16 %v7550_v55  ;;  %v7551_v15 = vunpack.i.l.bf16 %v7550_v55  ;;  %v7342_v41 = vunpack.i.h.bf16 %v10845_v47 }
 0x3b0   : > { %6296 = vmatmul.mubr.msk.bf16.gmra.mxu1 %vm4018_vm1, %v3968_v34  ;;  %v3852_v63 = vsel %vm3827_vm13, %v3819_v0, %v7341_v42  ;;  %v3789_v45 = vsel %vm1910_vm7, %v3757_v56, %v7306_v29  ;;  %v3790_v51 = vsel %vm1910_vm7, %v3758_v9, %v7307_v49  ;;  %v3883_v22 = vsel %vm3860_vm14, %v11209_v20, %v7441_v58  ;;  %v12853_v0 = vld [vmem:[#allocation23_spill] sm:$0xff] }
 0x3b1   : > { %6299 = vmatprep.mubr.msk.bf16.mxu1 %vm4018_vm1, %v3969_v8  ;;  %v3884_v57 = vsel %vm3860_vm14, %v11214_v3, %v7442_v23  ;;  %v7567_v2 = vunpack.i.h.bf16 %v7565_v4  ;;  %v7566_v11 = vunpack.i.l.bf16 %v7565_v4  ;;  %v3916_v44 = vsel %vm3893_vm15, %v3883_v22, %v7551_v15 }
 0x3b2   : > { %v7560_v47 = vpop.permute.xlu1 %7559  ;;  %v3917_v29 = vsel %vm3893_vm15, %v3884_v57, %v7552_v39  ;;  %v3853_v49 = vsel %vm3827_vm13, %v3820_v40, %v7342_v41  ;;  %v7367_v33 = vunpack.i.h.bf16 %v12849_v61  ;;  %v7366_v60 = vunpack.i.l.bf16 %v12849_v61  ;;  %v2417_v40 = vld [vmem:[#allocation3 + $0x170] sm:$0xff]  ;;  %v12854_v41 = vld [vmem:[#allocation19_spill] sm:$0xff] }
 0x3b3   : > { %v7575_v28 = vpop.permute.xlu0 %7574  ;;  %v7562_v48 = vunpack.i.h.bf16 %v7560_v47  ;;  %v7561_v52 = vunpack.i.l.bf16 %v7560_v47  ;;  %v3821_v1 = vsel %vm1976_vm9, %v3789_v45, %v7311_v18  ;;  %v3822_v17 = vsel %vm1976_vm9, %v3790_v51, %v7312_v26  ;;  %v12852_v26 = vld [vmem:[#allocation24_spill] sm:$0xff] }
 0x3b4   : > { %v7577_v42 = vunpack.i.h.bf16 %v7575_v28  ;;  %v7576_v62 = vunpack.i.l.bf16 %v7575_v28  ;;  %v3885_v27 = vsel %vm3860_vm14, %v3852_v63, %v7566_v11  ;;  %v3886_v21 = vsel %vm3860_vm14, %v3853_v49, %v7567_v2 }
 0x3b5   : > { %v3949_v20 = vsel %vm3926_vm0, %v3916_v44, %v7561_v52  ;;  %v3950_v3 = vsel %vm3926_vm0, %v3917_v29, %v7562_v48  ;;  %v7372_v19 = vunpack.i.h.bf16 %v12850_v54  ;;  %v7371_v24 = vunpack.i.l.bf16 %v12850_v54 }
 0x3b6   : > { %v7570_v37 = vpop.permute.xlu1 %7569  ;;  %v3970_v38 = vpack.c.bf16 %v3950_v3, %v3949_v20  ;;  %v3918_v59 = vsel %vm3893_vm15, %v3885_v27, %v7576_v62  ;;  %v3919_v13 = vsel %vm3893_vm15, %v3886_v21, %v7577_v42  ;;  %v7347_v18 = vunpack.i.h.bf16 %v12851_v35 }
 0x3b7   : > { %v7585_v14 = vpop.permute.xlu0 %7584  ;;  %v7357_v36 = vunpack.i.h.bf16 %v12852_v26  ;;  %v7356_v32 = vunpack.i.l.bf16 %v12852_v26  ;;  %v7572_v23 = vunpack.i.h.bf16 %v7570_v37  ;;  %v7571_v58 = vunpack.i.l.bf16 %v7570_v37  ;;  %v12856_v26 = vld [vmem:[#allocation20_spill] sm:$0xff] }
 0x3b8   : > { %v7587_v25 = vunpack.i.h.bf16 %v7585_v14  ;;  %v7586_v16 = vunpack.i.l.bf16 %v7585_v14  ;;  %6300 = vmatmul.mubr.msk.bf16.gmra.mxu1 %vm4018_vm1, %v3970_v38  ;;  %v3791_v8 = vsel %vm1910_vm7, %v11241_v46, %v7366_v60  ;;  %v3792_v53 = vsel %vm1910_vm7, %v11245_v6, %v7367_v33  ;;  %v2416_v46 = vld [vmem:[#allocation3 + $0x168] sm:$0xff] }
 0x3b9   : > { %v3854_v31 = vsel %vm3827_vm13, %v3821_v1, %v7316_v10  ;;  %v3855_v30 = vsel %vm3827_vm13, %v3822_v17, %v7317_v12  ;;  %v3823_v56 = vsel %vm1976_vm9, %v3791_v8, %v7371_v24  ;;  %v3824_v9 = vsel %vm1976_vm9, %v3792_v53, %v7372_v19  ;;  %v12855_v19 = vld [vmem:[#allocation16_spill] sm:$0xff] }
 0x3ba   : > { %v3951_v43 = vsel %vm3926_vm0, %v3918_v59, %v7586_v16  ;;  %v3952_v50 = vsel %vm3926_vm0, %v3919_v13, %v7587_v25  ;;  %v7580_v55 = vpop.permute.xlu1 %7579  ;;  %v7377_v39 = vunpack.i.h.bf16 %v12853_v0  ;;  %v7376_v15 = vunpack.i.l.bf16 %v12853_v0 }
 0x3bb   : > { %v7595_v4 = vpop.permute.xlu0 %7594  ;;  %v3971_v34 = vpack.c.bf16 %v3952_v50, %v3951_v43  ;;  %v7582_v5 = vunpack.i.h.bf16 %v7580_v55  ;;  %v7581_v7 = vunpack.i.l.bf16 %v7580_v55  ;;  %v7362_v6 = vunpack.i.h.bf16 %v12854_v41 }
 0x3bc   : > { %v7361_v10 = vunpack.i.l.bf16 %v12854_v41  ;;  %v3730_v12 = vsel %vm1778_vm2, %v2417_v40, %v7357_v36  ;;  %v3729_v63 = vsel %vm1778_vm2, %v2416_v46, %v7356_v32  ;;  %v3887_v45 = vsel %vm3860_vm14, %v3854_v31, %v7571_v58  ;;  %v4329_v40 = vld [vmem:[#allocation3 + $0x1] sm:$0xff]  ;;  %v4330_v41 = vld [vmem:[#allocation3 + $0x9] sm:$0xff] }
 0x3bd   : > { %6303 = vmatprep.mubr.msk.bf16.mxu1 %vm4018_vm1, %v3971_v34  ;;  %v3888_v51 = vsel %vm3860_vm14, %v3855_v30, %v7572_v23  ;;  %v7597_v28 = vunpack.i.h.bf16 %v7595_v4  ;;  %v7596_v47 = vunpack.i.l.bf16 %v7595_v4  ;;  %v3920_v48 = vsel %vm3893_vm15, %v3887_v45, %v7581_v7  ;;  %v11408_v45 = vld [vmem:[%s12424_s4] ss:$0 sm:$0xff] }
 0x3be   : > { %v7590_v57 = vpop.permute.xlu1 %7589  ;;  %v3921_v52 = vsel %vm3893_vm15, %v3888_v51, %v7582_v5  ;;  %v3761_v42 = vsel %vm1844_vm5, %v3729_v63, %v7361_v10  ;;  %v3762_v62 = vsel %vm1844_vm5, %v3730_v12, %v7362_v6  ;;  %v7346_v33 = vunpack.i.l.bf16 %v12851_v35  ;;  %v4361_v10 = vld [vmem:[#allocation3 + $0x2] sm:$0xff]  ;;  %v4362_v12 = vld [vmem:[#allocation3 + $0xa] sm:$0xff] }
 0x3bf   : > { %v7605_v22 = vpop.permute.xlu0 %7604  ;;  %v7592_v2 = vunpack.i.h.bf16 %v7590_v57  ;;  %v7591_v11 = vunpack.i.l.bf16 %v7590_v57  ;;  %v3856_v20 = vsel %vm3827_vm13, %v3823_v56, %v7376_v15  ;;  %v3857_v3 = vsel %vm3827_vm13, %v3824_v9, %v7377_v39 }
 0x3c0   : > { %v7607_v44 = vunpack.i.h.bf16 %v7605_v22  ;;  %v7606_v29 = vunpack.i.l.bf16 %v7605_v22  ;;  %v3889_v1 = vsel %vm3860_vm14, %v3856_v20, %v7596_v47  ;;  %v3890_v17 = vsel %vm3860_vm14, %v3857_v3, %v7597_v28 }
 0x3c1   : > { %v3953_v49 = vsel %vm3926_vm0, %v3920_v48, %v7591_v11  ;;  %v3954_v61 = vsel %vm3926_vm0, %v3921_v52, %v7592_v2  ;;  %v3793_v21 = vsel %vm1910_vm7, %v3761_v42, %v7346_v33  ;;  %v3794_v25 = vsel %vm1910_vm7, %v3762_v62, %v7347_v18 }
 0x3c2   : > { %v7600_v14 = vpop.permute.xlu1 %7599  ;;  %v3972_v37 = vpack.c.bf16 %v3954_v61, %v3953_v49  ;;  %v3922_v16 = vsel %vm3893_vm15, %v3889_v1, %v7606_v29  ;;  %v3923_v54 = vsel %vm3893_vm15, %v3890_v17, %v7607_v44  ;;  %v7352_v24 = vunpack.i.h.bf16 %v12855_v19 }
 0x3c3   : > { %v7615_v60 = vpop.permute.xlu0 %7614  ;;  %v7351_v59 = vunpack.i.l.bf16 %v12855_v19  ;;  %v7382_v36 = vunpack.i.h.bf16 %v12856_v26  ;;  %v7381_v43 = vunpack.i.l.bf16 %v12856_v26  ;;  %v7602_v58 = vunpack.i.h.bf16 %v7600_v14 }
 0x3c4   : > { %v7617_v38 = vunpack.i.h.bf16 %v7615_v60  ;;  %v7616_v27 = vunpack.i.l.bf16 %v7615_v60  ;;  %6304 = vmatmul.mubr.msk.bf16.gmra.mxu1 %vm4018_vm1, %v3972_v37  ;;  %v3826_v23 = vsel %vm1976_vm9, %v3794_v25, %v7352_v24  ;;  %v7601_v4 = vunpack.i.l.bf16 %v7600_v14 }
 0x3c5   : > { %v3825_v32 = vsel %vm1976_vm9, %v3793_v21, %v7351_v59  ;;  %v3859_v53 = vsel %vm3827_vm13, %v3826_v23, %v7382_v36  ;;  %v7623_v6 = vpack.i.bf16 %v4330_v41, %v4329_v40  ;;  %v7628_v63 = vpack.i.bf16 %v4362_v12, %v4361_v10 }
 0x3c6   : > { %v3955_v13 = vsel %vm3926_vm0, %v3922_v16, %v7616_v27  ;;  %v3956_v35 = vsel %vm3926_vm0, %v3923_v54, %v7617_v38  ;;  %v7610_v50 = vpop.permute.xlu1 %7609  ;;  %v3858_v8 = vsel %vm3827_vm13, %v3825_v32, %v7381_v43  ;;  %v3892_v56 = vsel %vm3860_vm14, %v3859_v53, %v7602_v58 }
 0x3c7   : > { %v3973_v18 = vpack.c.bf16 %v3956_v35, %v3955_v13  ;;  %v7612_v55 = vunpack.i.h.bf16 %v7610_v50  ;;  %v7611_v34 = vunpack.i.l.bf16 %v7610_v50  ;;  %v3891_v30 = vsel %vm3860_vm14, %v3858_v8, %v7601_v4  ;;  %7624 = vrot.lane.b32.xlu0 %v7623_v6, %s8288_s9 }
 0x3c9   : > { %6307 = vmatprep.mubr.msk.bf16.mxu1 %vm4018_vm1, %v3973_v18  ;;  %v3924_v7 = vsel %vm3893_vm15, %v3891_v30, %v7611_v34  ;;  %v3925_v0 = vsel %vm3893_vm15, %v3892_v56, %v7612_v55 }
 0x3ca   : > { %v7620_v31 = vpop.permute.xlu1 %7619 }
 0x3cb   : > { %v7622_v9 = vunpack.i.h.bf16 %v7620_v31  ;;  %v7621_v5 = vunpack.i.l.bf16 %v7620_v31  ;;  %7629 = vrot.lane.b32.xlu0 %v7628_v63, %s8290_s11 }
 0x3cd   : > { %v3957_v39 = vsel %vm3926_vm0, %v3924_v7, %v7621_v5  ;;  %v3958_v15 = vsel %vm3926_vm0, %v3925_v0, %v7622_v9 }
 0x3ce   : > { %v3974_v46 = vpack.c.bf16 %v3958_v15, %v3957_v39 }
 0x3d0   : > { %6308 = vmatmul.mubr.msk.bf16.gmra.mxu1 %vm4018_vm1, %v3974_v46 }
 0x450   : > { %v6281_v51 = vpop.f32.mrf.mxu1 }
 0x451   : > { %v4114_v22 = vadd.f32 %v6281_v51, %v11408_v45 }
 0x452   : > { %v4105_v57 = vpop.f32.mrf.mxu1 }
 0x453   : > { %v4234_v28 = vmax.f32 %v4114_v22, 0.0  ;;  %v4106_v47 = vadd.f32 %v11408_v45, %v4105_v57 }
 0x454   : > { %v6282_v2 = vpop.f32.mrf.mxu1 }
 0x455   : > { %4266 = vst.msk [vmem:[#allocation3 + $0x31] sm:$0xff] %vm1778_vm2, %v4234_v28  ;;  %v4232_v11 = vmax.f32 %v4106_v47, 0.0  ;;  %v4117_v48 = vadd.f32 %v6282_v2, %v11408_v45 }
 0x456   : > { %v4108_v52 = vpop.f32.mrf.mxu1 }
 0x457   : > { %4264 = vst.msk [vmem:[#allocation3 + $0x19] sm:$0xff] %vm1778_vm2, %v4232_v11  ;;  %v4235_v44 = vmax.f32 %v4117_v48, 0.0  ;;  %v4109_v29 = vadd.f32 %v11408_v45, %v4108_v52 }
 0x458   : > { %v6285_v42 = vpop.f32.mrf.mxu1 }
 0x459   : > { %4267 = vst.msk [vmem:[#allocation3 + $0x39] sm:$0xff] %vm1778_vm2, %v4235_v44  ;;  %v4233_v62 = vmax.f32 %v4109_v29, 0.0  ;;  %v4130_v49 = vadd.f32 %v6285_v42, %v11408_v45 }
 0x45a   : > { %v4121_v61 = vpop.f32.mrf.mxu1 }
 0x45b   : > { %4265 = vst.msk [vmem:[#allocation3 + $0x21] sm:$0xff] %vm1778_vm2, %v4233_v62  ;;  %v4238_v33 = vmax.f32 %v4130_v49, 0.0  ;;  %v4122_v20 = vadd.f32 %v11408_v45, %v4121_v61 }
 0x45c   : > { %v6286_v3 = vpop.f32.mrf.mxu1  ;;  %v4395_v38 = vld [vmem:[#allocation3 + $0x30] sm:$0xff] }
 0x45d   : > { %4270 = vst.msk [vmem:[#allocation3 + $0x61] sm:$0xff] %vm1778_vm2, %v4238_v33  ;;  %v4236_v60 = vmax.f32 %v4122_v20, 0.0  ;;  %v4133_v14 = vadd.f32 %v6286_v3, %v11408_v45  ;;  %v4333_v25 = vld [vmem:[#allocation3 + $0x31] sm:$0xff] }
 0x45e   : > { %v4124_v37 = vpop.f32.mrf.mxu1  ;;  %v4331_v32 = vld [vmem:[#allocation3 + $0x19] sm:$0xff] }
 0x45f   : > { %4268 = vst.msk [vmem:[#allocation3 + $0x49] sm:$0xff] %vm1778_vm2, %v4236_v60  ;;  %v4239_v1 = vmax.f32 %v4133_v14, 0.0  ;;  %v4125_v17 = vadd.f32 %v11408_v45, %v4124_v37  ;;  %v4393_v5 = vld [vmem:[#allocation3 + $0x18] sm:$0xff] }
 0x460   : > { %v6289_v27 = vpop.f32.mrf.mxu1  ;;  %v4396_v21 = vld [vmem:[#allocation3 + $0x38] sm:$0xff] }
 0x461   : > { %v4334_v16 = vld [vmem:[#allocation3 + $0x39] sm:$0xff]  ;;  %4271 = vst.msk [vmem:[#allocation3 + $0x69] sm:$0xff] %vm1778_vm2, %v4239_v1  ;;  %v4237_v54 = vmax.f32 %v4125_v17, 0.0  ;;  %v4146_v19 = vadd.f32 %v6289_v27, %v11408_v45  ;;  %v7658_v24 = vpack.i.bf16 %v4396_v21, %v4395_v38 }
 0x462   : > { %v7648_v59 = vpack.i.bf16 %v4334_v16, %v4333_v25  ;;  %v4137_v13 = vpop.f32.mrf.mxu1  ;;  %v4365_v35 = vld [vmem:[#allocation3 + $0x32] sm:$0xff]  ;;  %v4366_v26 = vld [vmem:[#allocation3 + $0x3a] sm:$0xff]  ;;  %v4364_v31 = vld [vmem:[#allocation3 + $0x22] sm:$0xff] }
 0x463   : > { %v4332_v36 = vld [vmem:[#allocation3 + $0x21] sm:$0xff]  ;;  %4269 = vst.msk [vmem:[#allocation3 + $0x51] sm:$0xff] %vm1778_vm2, %v4237_v54  ;;  %v4242_v43 = vmax.f32 %v4146_v19, 0.0  ;;  %v4138_v50 = vadd.f32 %v11408_v45, %v4137_v13  ;;  %7659 = vrot.lane.b32.xlu1 %v7658_v24, %s8292_s13  ;;  %v7653_v4 = vpack.i.bf16 %v4366_v26, %v4365_v35 }
 0x464   : > { %7649 = vrot.lane.b32.xlu0 %v7648_v59, %s8288_s9  ;;  %v6290_v18 = vpop.f32.mrf.mxu1  ;;  %v7663_v55 = vpack.i.bf16 %v4332_v36, %v4331_v32  ;;  %v4394_v8 = vld [vmem:[#allocation3 + $0x20] sm:$0xff] }
 0x465   : > { %4274 = vst.msk [vmem:[#allocation3 + $0x91] sm:$0xff] %vm1778_vm2, %v4242_v43  ;;  %v4240_v23 = vmax.f32 %v4138_v50, 0.0  ;;  %v4149_v58 = vadd.f32 %v6290_v18, %v11408_v45  ;;  %v4363_v53 = vld [vmem:[#allocation3 + $0x1a] sm:$0xff]  ;;  %v7673_v39 = vpack.i.bf16 %v4394_v8, %v4393_v5 }
 0x466   : > { %v4140_v34 = vpop.f32.mrf.mxu1  ;;  %v7668_v15 = vpack.i.bf16 %v4364_v31, %v4363_v53  ;;  %v4337_v63 = vld [vmem:[#allocation3 + $0x61] sm:$0xff]  ;;  %v4335_v62 = vld [vmem:[#allocation3 + $0x49] sm:$0xff] }
 0x467   : > { %4272 = vst.msk [vmem:[#allocation3 + $0x79] sm:$0xff] %vm1778_vm2, %v4240_v23  ;;  %v4243_v30 = vmax.f32 %v4149_v58, 0.0  ;;  %v4141_v56 = vadd.f32 %v11408_v45, %v4140_v34  ;;  %7664 = vrot.lane.b32.xlu1 %v7663_v55, %s8288_s9  ;;  %v11444_v51 = vld [vmem:[#allocation3 + $0x60] sm:$0xff]  ;;  %v11477_v58 = vld [vmem:[#allocation3 + $0x48] sm:$0xff] }
 0x468   : > { %7654 = vrot.lane.b32.xlu0 %v7653_v4, %s8290_s11  ;;  %v6293_v9 = vpop.f32.mrf.mxu1  ;;  %v4338_v40 = vld [vmem:[#allocation3 + $0x69] sm:$0xff] }
 0x469   : > { %4275 = vst.msk [vmem:[#allocation3 + $0x99] sm:$0xff] %vm1778_vm2, %v4243_v30  ;;  %v4241_v7 = vmax.f32 %v4141_v56, 0.0  ;;  %v4162_v0 = vadd.f32 %v6293_v9, %v11408_v45  ;;  %v11438_v41 = vld [vmem:[#allocation3 + $0x68] sm:$0xff]  ;;  %v7678_v28 = vpack.i.bf16 %v4338_v40, %v4337_v63 }
 0x46a   : > { %v4153_v46 = vpop.f32.mrf.mxu1  ;;  %v7688_v47 = vpack.i.bf16 %v11438_v41, %v11444_v51  ;;  %v4369_v11 = vld [vmem:[#allocation3 + $0x62] sm:$0xff]  ;;  %v4370_v48 = vld [vmem:[#allocation3 + $0x6a] sm:$0xff]  ;;  %v4368_v14 = vld [vmem:[#allocation3 + $0x52] sm:$0xff] }
 0x46b   : > { %4273 = vst.msk [vmem:[#allocation3 + $0x81] sm:$0xff] %vm1778_vm2, %v4241_v7  ;;  %v4246_v6 = vmax.f32 %v4162_v0, 0.0  ;;  %v4154_v10 = vadd.f32 %v11408_v45, %v4153_v46  ;;  %7669 = vrot.lane.b32.xlu1 %v7668_v15, %s8290_s11  ;;  %v4336_v52 = vld [vmem:[#allocation3 + $0x51] sm:$0xff]  ;;  %v7683_v33 = vpack.i.bf16 %v4370_v48, %v4369_v11 }
 0x46c   : > { %7674 = vrot.lane.b32.xlu0 %v7673_v39, %s8292_s13  ;;  %v6294_v12 = vpop.f32.mrf.mxu1  ;;  %v7703_v20 = vpack.i.bf16 %v4336_v52, %v4335_v62  ;;  %v4367_v60 = vld [vmem:[#allocation3 + $0x4a] sm:$0xff] }
 0x46d   : > { %4278 = vst.msk [vmem:[#allocation3 + $0xc1] sm:$0xff] %vm1778_vm2, %v4246_v6  ;;  %v4244_v22 = vmax.f32 %v4154_v10, 0.0  ;;  %v4165_v57 = vadd.f32 %v6294_v12, %v11408_v45  ;;  %v7708_v21 = vpack.i.bf16 %v4368_v14, %v4367_v60  ;;  %v4403_v59 = vld [vmem:[#allocation3 + $0x90] sm:$0xff] }
 0x46e   : > { %v4156_v2 = vpop.f32.mrf.mxu1  ;;  %v11470_v43 = vld [vmem:[#allocation3 + $0x50] sm:$0xff]  ;;  %v4339_v4 = vld [vmem:[#allocation3 + $0x79] sm:$0xff] }
 0x46f   : > { %4276 = vst.msk [vmem:[#allocation3 + $0xa9] sm:$0xff] %vm1778_vm2, %v4244_v22  ;;  %v4247_v44 = vmax.f32 %v4165_v57, 0.0  ;;  %v4157_v29 = vadd.f32 %v11408_v45, %v4156_v2  ;;  %7689 = vrot.lane.b32.xlu1 %v7688_v47, %s8292_s13  ;;  %v7713_v8 = vpack.i.bf16 %v11470_v43, %v11477_v58  ;;  %v4341_v40 = vld [vmem:[#allocation3 + $0x91] sm:$0xff] }
 0x470   : > { %7679 = vrot.lane.b32.xlu0 %v7678_v28, %s8288_s9  ;;  %v6297_v42 = vpop.f32.mrf.mxu1  ;;  %v4404_v16 = vld [vmem:[#allocation3 + $0x98] sm:$0xff] }
 0x471   : > { %4279 = vst.msk [vmem:[#allocation3 + $0xc9] sm:$0xff] %vm1778_vm2, %v4247_v44  ;;  %v4245_v49 = vmax.f32 %v4157_v29, 0.0  ;;  %v4178_v61 = vadd.f32 %v6297_v42, %v11408_v45  ;;  %v11468_v26 = vpack.i.bf16 %v4404_v16, %v4403_v59  ;;  %v4342_v39 = vld [vmem:[#allocation3 + $0x99] sm:$0xff] }
 0x472   : > { %v4169_v3 = vpop.f32.mrf.mxu1  ;;  %v4340_v50 = vld [vmem:[#allocation3 + $0x81] sm:$0xff]  ;;  %v7723_v12 = vpack.i.bf16 %v4342_v39, %v4341_v40  ;;  %v4373_v57 = vld [vmem:[#allocation3 + $0x92] sm:$0xff] }
 0x473   : > { %4277 = vst.msk [vmem:[#allocation3 + $0xb1] sm:$0xff] %vm1778_vm2, %v4245_v49  ;;  %v4250_v37 = vmax.f32 %v4178_v61, 0.0  ;;  %v4170_v1 = vadd.f32 %v11408_v45, %v4169_v3  ;;  %7704 = vrot.lane.b32.xlu1 %v7703_v20, %s8288_s9  ;;  %v11483_v53 = vpack.i.bf16 %v4340_v50, %v4339_v4  ;;  %v4371_v30 = vld [vmem:[#allocation3 + $0x7a] sm:$0xff]  ;;  %v4372_v56 = vld [vmem:[#allocation3 + $0x82] sm:$0xff] }
 0x474   : > { %7684 = vrot.lane.b32.xlu0 %v7683_v33, %s8290_s11  ;;  %v6298_v17 = vpop.f32.mrf.mxu1  ;;  %v11491_v0 = vpack.i.bf16 %v4372_v56, %v4371_v30  ;;  %v4407_v6 = vld [vmem:[#allocation3 + $0xc0] sm:$0xff]  ;;  %v11548_v30 = vld [vmem:[#allocation3 + $0x78] sm:$0xff] }
 0x475   : > { %4282 = vst.msk [vmem:[#allocation3 + $0xf1] sm:$0xff] %vm1778_vm2, %v4250_v37  ;;  %v4248_v38 = vmax.f32 %v4170_v1, 0.0  ;;  %v4181_v27 = vadd.f32 %v6298_v17, %v11408_v45 }
 0x476   : > { %v4172_v25 = vpop.f32.mrf.mxu1  ;;  %v4343_v52 = vld [vmem:[#allocation3 + $0xa9] sm:$0xff] }
 0x477   : > { %4280 = vst.msk [vmem:[#allocation3 + $0xd9] sm:$0xff] %vm1778_vm2, %v4248_v38  ;;  %v4251_v54 = vmax.f32 %v4181_v27, 0.0  ;;  %v4173_v19 = vadd.f32 %v11408_v45, %v4172_v25  ;;  %7709 = vrot.lane.b32.xlu1 %v7708_v21, %s8290_s11 }
 0x478   : > { %7694 = vrot.lane.b32.xlu0 %v7678_v28, %s8294_s21  ;;  %v6301_v24 = vpop.f32.mrf.mxu1  ;;  %v4408_v15 = vld [vmem:[#allocation3 + $0xc8] sm:$0xff]  ;;  %v4374_v28 = vld [vmem:[#allocation3 + $0x9a] sm:$0xff] }
 0x479   : > { %4283 = vst.msk [vmem:[#allocation3 + $0xf9] sm:$0xff] %vm1778_vm2, %v4251_v54  ;;  %v4249_v13 = vmax.f32 %v4173_v19, 0.0  ;;  %v4194_v35 = vadd.f32 %v6301_v24, %v11408_v45  ;;  %v11498_v63 = vpack.i.bf16 %v4408_v15, %v4407_v6  ;;  %v7728_v42 = vpack.i.bf16 %v4374_v28, %v4373_v57 }
 0x47a   : > { %v4185_v36 = vpop.f32.mrf.mxu1  ;;  %v4344_v47 = vld [vmem:[#allocation3 + $0xb1] sm:$0xff] }
 0x47b   : > { %4281 = vst.msk [vmem:[#allocation3 + $0xe1] sm:$0xff] %vm1778_vm2, %v4249_v13  ;;  %v4254_v18 = vmax.f32 %v4194_v35, 0.0  ;;  %v4186_v32 = vadd.f32 %v11408_v45, %v4185_v36  ;;  %7734 = vrot.lane.b32.xlu1 %v11468_v26, %s8292_s13  ;;  %v11506_v62 = vpack.i.bf16 %v4344_v47, %v4343_v52  ;;  %v4375_v61 = vld [vmem:[#allocation3 + $0xaa] sm:$0xff] }
 0x47c   : > { %7699 = vrot.lane.b32.xlu0 %v7683_v33, %s8295_s26  ;;  %v6302_v23 = vpop.f32.mrf.mxu1  ;;  %v4376_v33 = vld [vmem:[#allocation3 + $0xb2] sm:$0xff] }
 0x47d   : > { %4286 = vst.msk [vmem:[#allocation3 + $0x121] sm:$0xff] %vm1778_vm2, %v4254_v18  ;;  %v4252_v55 = vmax.f32 %v4186_v32, 0.0  ;;  %v4197_v34 = vadd.f32 %v6302_v23, %v11408_v45  ;;  %v11514_v14 = vpack.i.bf16 %v4376_v33, %v4375_v61  ;;  %v4411_v17 = vld [vmem:[#allocation3 + $0xf0] sm:$0xff] }
 0x47e   : > { %v4188_v31 = vpop.f32.mrf.mxu1  ;;  %v4347_v24 = vld [vmem:[#allocation3 + $0xd9] sm:$0xff] }
 0x47f   : > { %4284 = vst.msk [vmem:[#allocation3 + $0x109] sm:$0xff] %vm1778_vm2, %v4252_v55  ;;  %v4255_v9 = vmax.f32 %v4197_v34, 0.0  ;;  %v4189_v5 = vadd.f32 %v11408_v45, %v4188_v31  ;;  %7764 = vrot.lane.b32.xlu1 %v11483_v53, %s8288_s9 }
 0x480   : > { %7714 = vrot.lane.b32.xlu0 %v7713_v8, %s8292_s13  ;;  %v4412_v37 = vld [vmem:[#allocation3 + $0xf8] sm:$0xff] }
 0x481   : > { %4287 = vst.msk [vmem:[#allocation3 + $0x129] sm:$0xff] %vm1778_vm2, %v4255_v9  ;;  %v4253_v7 = vmax.f32 %v4189_v5, 0.0  ;;  %v7893_v27 = vpack.i.bf16 %v4412_v37, %v4411_v17  ;;  %v11596_v37 = vpop.permute.xlu0 %7624 }
 0x482   : > { %v4348_v25 = vld [vmem:[#allocation3 + $0xe1] sm:$0xff]  ;;  %12857 = vst [vmem:[#allocation35_spill] sm:$0xff] %v11596_v37 }
 0x483   : > { %4285 = vst.msk [vmem:[#allocation3 + $0x111] sm:$0xff] %vm1778_vm2, %v4253_v7  ;;  %7769 = vrot.lane.b32.xlu1 %v11491_v0, %s8290_s11  ;;  %v11526_v35 = vpack.i.bf16 %v4348_v25, %v4347_v24  ;;  %v4379_v50 = vld [vmem:[#allocation3 + $0xda] sm:$0xff]  ;;  %v4380_v18 = vld [vmem:[#allocation3 + $0xe2] sm:$0xff] }
 0x484   : > { %7719 = vrot.lane.b32.xlu0 %v7703_v20, %s8294_s21  ;;  %v6305_v46 = vpop.f32.mrf.mxu1  ;;  %v11535_v55 = vpack.i.bf16 %v4380_v18, %v4379_v50  ;;  %v4447_v56 = vld [vmem:[#allocation3 + $0x121] sm:$0xff] }
 0x485   : > { %v4210_v10 = vadd.f32 %v6305_v46, %v11408_v45  ;;  %v11606_v25 = vpop.permute.xlu0 %7629 }
 0x486   : > { %v4201_v22 = vpop.f32.mrf.mxu1  ;;  %v4351_v40 = vld [vmem:[#allocation3 + $0x109] sm:$0xff]  ;;  %12858 = vst [vmem:[#allocation14_spill] sm:$0xff] %v11606_v25 }
 0x487   : > { %v4258_v2 = vmax.f32 %v4210_v10, 0.0  ;;  %v4202_v11 = vadd.f32 %v11408_v45, %v4201_v22  ;;  %7814 = vrot.lane.b32.xlu1 %v11498_v63, %s8292_s13 }
 0x488   : > { %7724 = vrot.lane.b32.xlu0 %v7723_v12, %s8288_s9  ;;  %v6306_v48 = vpop.f32.mrf.mxu1  ;;  %v4416_v34 = vld [vmem:[#allocation3 + $0x128] sm:$0xff] }
 0x489   : > { %4290 = vst.msk [vmem:[#allocation3 + $0x151] sm:$0xff] %vm1778_vm2, %v4258_v2  ;;  %v4256_v44 = vmax.f32 %v4202_v11, 0.0  ;;  %v4213_v29 = vadd.f32 %v6306_v48, %v11408_v45  ;;  %v4448_v31 = vld [vmem:[#allocation3 + $0x129] sm:$0xff]  ;;  %v4345_v48 = vld [vmem:[#allocation3 + $0xc1] sm:$0xff] }
 0x48a   : > { %v4204_v49 = vpop.f32.mrf.mxu1  ;;  %v11552_v5 = vpack.i.bf16 %v4448_v31, %v4447_v56  ;;  %v4479_v7 = vld [vmem:[#allocation3 + $0x122] sm:$0xff]  ;;  %v4480_v39 = vld [vmem:[#allocation3 + $0x12a] sm:$0xff] }
 0x48b   : > { %4288 = vst.msk [vmem:[#allocation3 + $0x139] sm:$0xff] %vm1778_vm2, %v4256_v44  ;;  %v4259_v20 = vmax.f32 %v4213_v29, 0.0  ;;  %v4205_v3 = vadd.f32 %v11408_v45, %v4204_v49  ;;  %7844 = vrot.lane.b32.xlu1 %v11506_v62, %s8288_s9  ;;  %v11557_v15 = vpack.i.bf16 %v4480_v39, %v4479_v7  ;;  %v4352_v46 = vld [vmem:[#allocation3 + $0x111] sm:$0xff]  ;;  %v4346_v2 = vld [vmem:[#allocation3 + $0xc9] sm:$0xff] }
 0x48c   : > { %7729 = vrot.lane.b32.xlu0 %v7728_v42, %s8290_s11  ;;  %v7953_v6 = vpack.i.bf16 %v4352_v46, %v4351_v40  ;;  %v4383_v10 = vld [vmem:[#allocation3 + $0x10a] sm:$0xff]  ;;  %v7803_v44 = vpack.i.bf16 %v4346_v2, %v4345_v48  ;;  %v4382_v48 = vld [vmem:[#allocation3 + $0xfa] sm:$0xff] }
 0x48d   : > { %4291 = vst.msk [vmem:[#allocation3 + $0x159] sm:$0xff] %vm1778_vm2, %v4259_v20  ;;  %v4257_v60 = vmax.f32 %v4205_v3, 0.0  ;;  %v4378_v49 = vld [vmem:[#allocation3 + $0xca] sm:$0xff] }
 0x48f   : > { %4289 = vst.msk [vmem:[#allocation3 + $0x141] sm:$0xff] %vm1778_vm2, %v4257_v60  ;;  %7849 = vrot.lane.b32.xlu1 %v11514_v14, %s8290_s11 }
 0x490   : > { %7739 = vrot.lane.b32.xlu0 %v7723_v12, %s8294_s21  ;;  %v6309_v1 = vpop.f32.mrf.mxu1  ;;  %v4419_v28 = vld [vmem:[#allocation3 + $0x150] sm:$0xff] }
 0x491   : > { %v4226_v38 = vadd.f32 %v6309_v1, %v11408_v45  ;;  %v4451_v52 = vld [vmem:[#allocation3 + $0x151] sm:$0xff] }
 0x492   : > { %v4217_v21 = vpop.f32.mrf.mxu1  ;;  %v4355_v1 = vld [vmem:[#allocation3 + $0x139] sm:$0xff] }
 0x493   : > { %v4262_v16 = vmax.f32 %v4226_v38, 0.0  ;;  %v4218_v54 = vadd.f32 %v11408_v45, %v4217_v21  ;;  %7894 = vrot.lane.b32.xlu1 %v7893_v27, %s8292_s13  ;;  %v11631_v18 = vld [vmem:[#allocation3 + $0x138] sm:$0xff] }
 0x494   : > { %7744 = vrot.lane.b32.xlu0 %v7728_v42, %s8295_s26  ;;  %v6310_v19 = vpop.f32.mrf.mxu1  ;;  %v4420_v57 = vld [vmem:[#allocation3 + $0x158] sm:$0xff] }
 0x495   : > { %4294 = vst.msk [vmem:[#allocation3 + $0x181] sm:$0xff] %vm1778_vm2, %v4262_v16  ;;  %v4260_v59 = vmax.f32 %v4218_v54, 0.0  ;;  %v4229_v13 = vadd.f32 %v6310_v19, %v11408_v45  ;;  %v7983_v47 = vpack.i.bf16 %v4420_v57, %v4419_v28  ;;  %v4452_v11 = vld [vmem:[#allocation3 + $0x159] sm:$0xff]  ;;  %v11608_v54 = vld [vmem:[#allocation3 + $0xb0] sm:$0xff] }
 0x496   : > { %v4220_v36 = vpop.f32.mrf.mxu1  ;;  %v11577_v29 = vpack.i.bf16 %v4452_v11, %v4451_v52  ;;  %v4483_v61 = vld [vmem:[#allocation3 + $0x152] sm:$0xff]  ;;  %v4356_v60 = vld [vmem:[#allocation3 + $0x141] sm:$0xff] }
 0x497   : > { %4292 = vst.msk [vmem:[#allocation3 + $0x169] sm:$0xff] %vm1778_vm2, %v4260_v59  ;;  %v4263_v32 = vmax.f32 %v4229_v13, 0.0  ;;  %v4221_v23 = vadd.f32 %v11408_v45, %v4220_v36  ;;  %7899 = vrot.lane.b32.xlu1 %v11526_v35, %s8288_s9  ;;  %v4415_v45 = vld [vmem:[#allocation3 + $0x120] sm:$0xff]  ;;  %v8013_v17 = vpack.i.bf16 %v4356_v60, %v4355_v1  ;;  %v4381_v11 = vld [vmem:[#allocation3 + $0xf2] sm:$0xff] }
 0x498   : > { %7749 = vrot.lane.b32.xlu0 %v11468_v26, %s8296_s27  ;;  %v11541_v8 = vpack.i.bf16 %v4416_v34, %v4415_v45  ;;  %v11543_v26 = vld [vmem:[#allocation3 + $0x80] sm:$0xff] }
 0x499   : > { %4295 = vst.msk [vmem:[#allocation3 + $0x189] sm:$0xff] %vm1778_vm2, %v4263_v32  ;;  %v4261_v4 = vmax.f32 %v4221_v23, 0.0  ;;  %v7773_v9 = vpack.i.bf16 %v11543_v26, %v11548_v30  ;;  %v4387_v38 = vld [vmem:[#allocation3 + $0x13a] sm:$0xff]  ;;  %v4388_v27 = vld [vmem:[#allocation3 + $0x142] sm:$0xff] }
 0x49a   : > { %v8018_v16 = vpack.i.bf16 %v4388_v27, %v4387_v38  ;;  %v11626_v50 = vld [vmem:[#allocation3 + $0x140] sm:$0xff] }
 0x49b   : > { %4293 = vst.msk [vmem:[#allocation3 + $0x171] sm:$0xff] %vm1778_vm2, %v4261_v4  ;;  %7904 = vrot.lane.b32.xlu1 %v11535_v55, %s8290_s11  ;;  %v11639_v4 = vpack.i.bf16 %v11626_v50, %v11631_v18 }
 0x49c   : > { %7754 = vrot.lane.b32.xlu0 %v7723_v12, %s8297_s16  ;;  %v4384_v12 = vld [vmem:[#allocation3 + $0x112] sm:$0xff]  ;;  %v4423_v7 = vld [vmem:[#allocation3 + $0x180] sm:$0xff] }
 0x49d   : > { %v11566_v22 = vpack.i.bf16 %v4384_v12, %v4383_v10  ;;  %v4349_v12 = vld [vmem:[#allocation3 + $0xf1] sm:$0xff]  ;;  %v4455_v57 = vld [vmem:[#allocation3 + $0x181] sm:$0xff] }
 0x49f   : > { %7939 = vrot.lane.b32.xlu1 %v11541_v8, %s8292_s13 }
 0x4a0   : > { %7759 = vrot.lane.b32.xlu0 %v7728_v42, %s8298_s19  ;;  %v4377_v42 = vld [vmem:[#allocation3 + $0xc2] sm:$0xff] }
 0x4a1   : > { %v7808_v33 = vpack.i.bf16 %v4378_v49, %v4377_v42  ;;  %v4456_v10 = vld [vmem:[#allocation3 + $0x189] sm:$0xff]  ;;  %v11678_v49 = vpack.i.bf16 %v4382_v48, %v4381_v11 }
 0x4a2   : > { %v8058_v2 = vpack.i.bf16 %v4456_v10, %v4455_v57  ;;  %v4487_v52 = vld [vmem:[#allocation3 + $0x182] sm:$0xff]  ;;  %v4392_v57 = vld [vmem:[#allocation3 + $0x172] sm:$0xff] }
 0x4a3   : > { %7944 = vrot.lane.b32.xlu1 %v11552_v5, %s8294_s21 }
 0x4a4   : > { %7774 = vrot.lane.b32.xlu0 %v7773_v9, %s8292_s13 }
 0x4a7   : > { %7949 = vrot.lane.b32.xlu1 %v11557_v15, %s8295_s26 }
 0x4a8   : > { %7779 = vrot.lane.b32.xlu0 %v11483_v53, %s8294_s21 }
 0x4ab   : > { %7954 = vrot.lane.b32.xlu1 %v7953_v6, %s8288_s9 }
 0x4ac   : > { %7784 = vrot.lane.b32.xlu0 %v11491_v0, %s8295_s26 }
 0x4af   : > { %7959 = vrot.lane.b32.xlu1 %v11566_v22, %s8290_s11 }
 0x4b0   : > { %7789 = vrot.lane.b32.xlu0 %v7773_v9, %s8296_s27  ;;  %v4424_v9 = vld [vmem:[#allocation3 + $0x188] sm:$0xff] }
 0x4b1   : > { %v8053_v40 = vpack.i.bf16 %v4424_v9, %v4423_v7  ;;  %v4360_v9 = vld [vmem:[#allocation3 + $0x171] sm:$0xff]  ;;  %v4359_v7 = vld [vmem:[#allocation3 + $0x169] sm:$0xff] }
 0x4b2   : > { %v11706_v10 = vpack.i.bf16 %v4360_v9, %v4359_v7 }
 0x4b3   : > { %7969 = vrot.lane.b32.xlu1 %v7953_v6, %s8294_s21  ;;  %v4350_v6 = vld [vmem:[#allocation3 + $0xf9] sm:$0xff] }
 0x4b4   : > { %7794 = vrot.lane.b32.xlu0 %v11483_v53, %s8297_s16  ;;  %v4484_v53 = vld [vmem:[#allocation3 + $0x15a] sm:$0xff] }
 0x4b5   : > { %v11582_v20 = vpack.i.bf16 %v4484_v53, %v4483_v61  ;;  %v4410_v53 = vld [vmem:[#allocation3 + $0xe0] sm:$0xff] }
 0x4b7   : > { %7984 = vrot.lane.b32.xlu1 %v7983_v47, %s8292_s13 }
 0x4b8   : > { %7799 = vrot.lane.b32.xlu0 %v11491_v0, %s8298_s19  ;;  %v11589_v0 = vpop.permute.xlu1 %7634 }
 0x4bb   : > { %7989 = vrot.lane.b32.xlu1 %v11577_v29, %s8294_s21 }
 0x4bc   : > { %7804 = vrot.lane.b32.xlu0 %v7803_v44, %s8288_s9  ;;  %v11594_v3 = vpop.permute.xlu1 %7639 }
 0x4bf   : > { %7994 = vrot.lane.b32.xlu1 %v11582_v20, %s8295_s26 }
 0x4c0   : > { %7809 = vrot.lane.b32.xlu0 %v7808_v33, %s8290_s11  ;;  %v11604_v21 = vpop.permute.xlu1 %7644 }
 0x4c3   : > { %7999 = vrot.lane.b32.xlu1 %v7983_v47, %s8296_s27  ;;  %v11669_v47 = vpack.i.bf16 %v4350_v6, %v4349_v12  ;;  %v4391_v12 = vld [vmem:[#allocation3 + $0x16a] sm:$0xff] }
 0x4c4   : > { %7819 = vrot.lane.b32.xlu0 %v7803_v44, %s8294_s21  ;;  %v11714_v11 = vpack.i.bf16 %v4392_v57, %v4391_v12 }
 0x4c7   : > { %8004 = vrot.lane.b32.xlu1 %v11577_v29, %s8297_s16 }
 0x4c8   : > { %7824 = vrot.lane.b32.xlu0 %v7808_v33, %s8295_s26 }
 0x4cb   : > { %8009 = vrot.lane.b32.xlu1 %v11582_v20, %s8298_s19 }
 0x4cc   : > { %7829 = vrot.lane.b32.xlu0 %v11498_v63, %s8296_s27  ;;  %v11612_v63 = vld [vmem:[#allocation3 + $0xa8] sm:$0xff] }
 0x4cd   : > { %v7853_v59 = vpack.i.bf16 %v11608_v54, %v11612_v63 }
 0x4cf   : > { %8014 = vrot.lane.b32.xlu1 %v8013_v17, %s8288_s9 }
 0x4d0   : > { %7834 = vrot.lane.b32.xlu0 %v7803_v44, %s8297_s16  ;;  %v4488_v44 = vld [vmem:[#allocation3 + $0x18a] sm:$0xff] }
 0x4d1   : > { %v8063_v61 = vpack.i.bf16 %v4488_v44, %v4487_v52  ;;  %v11722_v44 = vld [vmem:[#allocation3 + $0x110] sm:$0xff] }
 0x4d3   : > { %8019 = vrot.lane.b32.xlu1 %v8018_v16, %s8290_s11 }
 0x4d4   : > { %7839 = vrot.lane.b32.xlu0 %v7808_v33, %s8298_s19  ;;  %v4409_v33 = vld [vmem:[#allocation3 + $0xd8] sm:$0xff] }
 0x4d5   : > { %v11614_v19 = vpop.permute.xlu1 %7659 }
 0x4d6   : > { %12859 = vst [vmem:[#allocation11_spill] sm:$0xff] %v11614_v19  ;;  %v11616_v24 = vpop.permute.xlu0 %7649 }
 0x4d7   : > { %8029 = vrot.lane.b32.xlu1 %v8013_v17, %s8294_s21 }
 0x4d8   : > { %7854 = vrot.lane.b32.xlu0 %v7853_v59, %s8292_s13 }
 0x4d9   : > { %v11624_v36 = vpop.permute.xlu1 %7664 }
 0x4da   : > { %v11622_v13 = vpop.permute.xlu0 %7654  ;;  %12860 = vst [vmem:[#allocation15_spill] sm:$0xff] %v11624_v36 }
 0x4db   : > { %8034 = vrot.lane.b32.xlu1 %v8018_v16, %s8295_s26 }
 0x4dc   : > { %7859 = vrot.lane.b32.xlu0 %v11506_v62, %s8294_s21 }
 0x4dd   : > { %v11635_v23 = vpop.permute.xlu1 %7669 }
 0x4de   : > { %v11633_v32 = vpop.permute.xlu0 %7674  ;;  %12862 = vst [vmem:[#allocation25_spill] sm:$0xff] %v11635_v23 }
 0x4df   : > { %12861 = vst [vmem:[#allocation51_spill] sm:$0xff] %v11633_v32  ;;  %8039 = vrot.lane.b32.xlu1 %v11639_v4, %s8296_s27 }
 0x4e0   : > { %7864 = vrot.lane.b32.xlu0 %v11514_v14, %s8295_s26 }
 0x4e1   : > { %v11647_v45 = vpop.permute.xlu1 %7689 }
 0x4e2   : > { %v11645_v34 = vpop.permute.xlu0 %7679 }
 0x4e3   : > { %8044 = vrot.lane.b32.xlu1 %v8013_v17, %s8297_s16  ;;  %v7908_v17 = vpack.i.bf16 %v4410_v53, %v4409_v33 }
 0x4e4   : > { %7869 = vrot.lane.b32.xlu0 %v7853_v59, %s8296_s27 }
 0x4e5   : > { %v11653_v56 = vpop.permute.xlu1 %7704 }
 0x4e6   : > { %v11651_v31 = vpop.permute.xlu0 %7684  ;;  %v7707_v57 = vunpack.i.h.bf16 %v11653_v56  ;;  %v7706_v32 = vunpack.i.l.bf16 %v11653_v56 }
 0x4e7   : > { %8049 = vrot.lane.b32.xlu1 %v8018_v16, %s8298_s19 }
 0x4e8   : > { %7874 = vrot.lane.b32.xlu0 %v11506_v62, %s8297_s16 }
 0x4e9   : > { %v11660_v46 = vpop.permute.xlu1 %7709 }
 0x4ea   : > { %v11658_v39 = vpop.permute.xlu0 %7694  ;;  %v7712_v23 = vunpack.i.h.bf16 %v11660_v46 }
 0x4eb   : > { %8054 = vrot.lane.b32.xlu1 %v8053_v40, %s8292_s13 }
 0x4ec   : > { %7879 = vrot.lane.b32.xlu0 %v11514_v14, %s8298_s19 }
 0x4ed   : > { %v11667_v62 = vpop.permute.xlu1 %7734 }
 0x4ee   : > { %v11665_v28 = vpop.permute.xlu0 %7699 }
 0x4ef   : > { %8059 = vrot.lane.b32.xlu1 %v8058_v2, %s8294_s21 }
 0x4f0   : > { %7884 = vrot.lane.b32.xlu0 %v11669_v47, %s8288_s9 }
 0x4f1   : > { %v11676_v42 = vpop.permute.xlu1 %7764 }
 0x4f2   : > { %v11674_v14 = vpop.permute.xlu0 %7714 }
 0x4f3   : > { %12863 = vst [vmem:[#allocation27_spill] sm:$0xff] %v11674_v14  ;;  %8064 = vrot.lane.b32.xlu1 %v8063_v61, %s8295_s26  ;;  %v7711_v14 = vunpack.i.l.bf16 %v11660_v46  ;;  %v5615_v46 = vsel %vm1778_vm2, %v11477_v58, %v7706_v32  ;;  %v7687_v58 = vunpack.i.h.bf16 %v11651_v31  ;;  %v7686_v32 = vunpack.i.l.bf16 %v11651_v31 }
 0x4f4   : > { %7889 = vrot.lane.b32.xlu0 %v11678_v49, %s8290_s11  ;;  %v7697_v31 = vunpack.i.h.bf16 %v11658_v39 }
 0x4f5   : > { %v11685_v1 = vpop.permute.xlu1 %7769 }
 0x4f6   : > { %v11683_v60 = vpop.permute.xlu0 %7719 }
 0x4f7   : > { %12864 = vst [vmem:[#allocation26_spill] sm:$0xff] %v11683_v60  ;;  %8069 = vrot.lane.b32.xlu1 %v8053_v40, %s8296_s27 }
 0x4f8   : > { %7909 = vrot.lane.b32.xlu0 %v7908_v17, %s8292_s13 }
 0x4f9   : > { %v11691_v27 = vpop.permute.xlu1 %7814 }
 0x4fa   : > { %v11689_v38 = vpop.permute.xlu0 %7724 }
 0x4fb   : > { %8074 = vrot.lane.b32.xlu1 %v8058_v2, %s8297_s16 }
 0x4fc   : > { %7914 = vrot.lane.b32.xlu0 %v7908_v17, %s8296_s27  ;;  %v11728_v17 = vld [vmem:[#allocation3 + $0x108] sm:$0xff] }
 0x4fd   : > { %v11697_v59 = vpop.permute.xlu1 %7844  ;;  %v11734_v12 = vpack.i.bf16 %v11722_v44, %v11728_v17 }
 0x4fe   : > { %v11695_v16 = vpop.permute.xlu0 %7729 }
 0x4ff   : > { %8079 = vrot.lane.b32.xlu1 %v8063_v61, %s8298_s19 }
 0x500   : > { %7919 = vrot.lane.b32.xlu0 %v11526_v35, %s8297_s16 }
 0x501   : > { %v11704_v6 = vpop.permute.xlu1 %7849 }
 0x502   : > { %v11702_v40 = vpop.permute.xlu0 %7739 }
 0x503   : > { %8084 = vrot.lane.b32.xlu1 %v11706_v10, %s8288_s9 }
 0x504   : > { %7924 = vrot.lane.b32.xlu0 %v11535_v55, %s8298_s19 }
 0x505   : > { %v7895_v35 = vpop.permute.xlu1 %7894 }
 0x506   : > { %v11712_v2 = vpop.permute.xlu0 %7744  ;;  %v7897_v37 = vunpack.i.h.bf16 %v7895_v35  ;;  %v7896_v19 = vunpack.i.l.bf16 %v7895_v35 }
 0x507   : > { %8089 = vrot.lane.b32.xlu1 %v11714_v11, %s8290_s11 }
 0x508   : > { %7929 = vrot.lane.b32.xlu0 %v11552_v5, %s8288_s9 }
 0x509   : > { %v7900_v52 = vpop.permute.xlu1 %7899 }
 0x50a   : > { %v11720_v48 = vpop.permute.xlu0 %7749  ;;  %v7902_v55 = vunpack.i.h.bf16 %v7900_v52  ;;  %v7901_v61 = vunpack.i.l.bf16 %v7900_v52 }
 0x50b   : > { %8104 = vrot.lane.b32.xlu1 %v11566_v22, %s8295_s26 }
 0x50c   : > { %7934 = vrot.lane.b32.xlu0 %v11557_v15, %s8290_s11  ;;  %v5628_v60 = vsel %vm1778_vm2, %v4410_v53, %v7902_v55  ;;  %v5627_v22 = vsel %vm1778_vm2, %v4409_v33, %v7901_v61  ;;  %v7692_v55 = vunpack.i.h.bf16 %v11647_v45 }
 0x50d   : > { %v7905_v7 = vpop.permute.xlu1 %7904 }
 0x50e   : > { %v11730_v9 = vpop.permute.xlu0 %7754  ;;  %v7907_v52 = vunpack.i.h.bf16 %v7905_v7  ;;  %v7906_v25 = vunpack.i.l.bf16 %v7905_v7 }
 0x50f   : > { %8114 = vrot.lane.b32.xlu1 %v11541_v8, %s8296_s27  ;;  %v5616_v8 = vsel %vm1778_vm2, %v11470_v43, %v7707_v57  ;;  %v7691_v43 = vunpack.i.l.bf16 %v11647_v45 }
 0x510   : > { %7964 = vrot.lane.b32.xlu0 %v11734_v12, %s8292_s13  ;;  %v5659_v56 = vsel %vm1844_vm5, %v5627_v22, %v7906_v25  ;;  %v5660_v7 = vsel %vm1844_vm5, %v5628_v60, %v7907_v52  ;;  %v7682_v25 = vunpack.i.h.bf16 %v11645_v34  ;;  %v5647_v60 = vsel %vm1844_vm5, %v5615_v46, %v7711_v14  ;;  %v11788_v22 = vld [vmem:[#allocation3 + $0x68] sm:$0xff] }
 0x511   : > { %v11750_v35 = vpop.permute.xlu1 %7939  ;;  %v11753_v53 = vsel %vm1910_vm7, %v5659_v56, %v7896_v19  ;;  %v11756_v33 = vsel %vm1910_vm7, %v5660_v7, %v7897_v37  ;;  %v7681_v19 = vunpack.i.l.bf16 %v11645_v34  ;;  %v5648_v37 = vsel %vm1844_vm5, %v5616_v8, %v7712_v23 }
 0x512   : > { %v11748_v36 = vpop.permute.xlu0 %7759  ;;  %12865 = vst [vmem:[#allocation44_spill] sm:$0xff] %v11753_v53  ;;  %12866 = vst [vmem:[#allocation43_spill] sm:$0xff] %v11756_v33  ;;  %v5680_v57 = vsel %vm1910_vm7, %v5648_v37, %v7692_v55  ;;  %v5618_v23 = vsel %vm1778_vm2, %v11438_v41, %v7682_v25  ;;  %v7696_v14 = vunpack.i.l.bf16 %v11658_v39  ;;  %v11796_v41 = vld [vmem:[#allocation3 + $0x170] sm:$0xff]  ;;  %v4493_v55 = vld [vmem:[#allocation3 + $0x60] sm:$0xff] }
 0x513   : > { %8124 = vrot.lane.b32.xlu1 %v11552_v5, %s8297_s16  ;;  %v5679_v5 = vsel %vm1910_vm7, %v5647_v60, %v7691_v43  ;;  %v5617_v45 = vsel %vm1778_vm2, %v11444_v51, %v7681_v19  ;;  %v5650_v7 = vsel %vm1844_vm5, %v5618_v23, %v7687_v58  ;;  %v4461_v51 = vld [vmem:[#allocation3 + $0x4a] sm:$0xff]  ;;  %v4462_v25 = vld [vmem:[#allocation3 + $0x52] sm:$0xff]  ;;  %v5712_v39 = vsel %vm1976_vm9, %v5680_v57, %v7697_v31 }
 0x514   : > { %7974 = vrot.lane.b32.xlu0 %v11577_v29, %s8288_s9  ;;  %v5649_v56 = vsel %vm1844_vm5, %v5617_v45, %v7686_v32  ;;  %v5711_v19 = vsel %vm1976_vm9, %v5679_v5, %v7696_v14  ;;  %v8108_v32 = vpack.i.bf16 %v11788_v22, %v4493_v55  ;;  %v7752_v23 = vunpack.i.h.bf16 %v11720_v48 }
 0x515   : > { %v11774_v61 = vpop.permute.xlu1 %7944  ;;  %v7751_v45 = vunpack.i.l.bf16 %v11720_v48  ;;  %v7757_v22 = vunpack.i.h.bf16 %v11730_v9  ;;  %v7942_v48 = vunpack.i.h.bf16 %v11750_v35 }
 0x516   : > { %v7775_v29 = vpop.permute.xlu0 %7774 }
 0x517   : > { %v7777_v34 = vunpack.i.h.bf16 %v7775_v29  ;;  %v7776_v52 = vunpack.i.l.bf16 %v7775_v29  ;;  %8134 = vrot.lane.b32.xlu1 %v11557_v15, %s8298_s19  ;;  %v7701_v15 = vunpack.i.l.bf16 %v11665_v28 }
 0x518   : > { %7979 = vrot.lane.b32.xlu0 %v11582_v20, %s8290_s11  ;;  %v7702_v20 = vunpack.i.h.bf16 %v11665_v28  ;;  %v11806_v28 = vld [vmem:[#allocation3 + $0x168] sm:$0xff] }
 0x519   : > { %v11794_v46 = vpop.permute.xlu1 %7949  ;;  %v5681_v43 = vsel %vm1910_vm7, %v5649_v56, %v7776_v52  ;;  %v5682_v58 = vsel %vm1910_vm7, %v5650_v7, %v7777_v34  ;;  %v8093_v57 = vpack.i.bf16 %v11796_v41, %v11806_v28  ;;  %v11813_v52 = vpack.i.bf16 %v4462_v25, %v4461_v51 }
 0x51a   : > { %v7780_v8 = vpop.permute.xlu0 %7779  ;;  %v5743_v34 = vsel %vm3827_vm13, %v5711_v19, %v7701_v15  ;;  %v7762_v51 = vunpack.i.h.bf16 %v11748_v36  ;;  %v7761_v25 = vunpack.i.l.bf16 %v11748_v36 }
 0x51b   : > { %v7782_v60 = vunpack.i.h.bf16 %v7780_v8  ;;  %v7781_v37 = vunpack.i.l.bf16 %v7780_v8  ;;  %8144 = vrot.lane.b32.xlu1 %v11706_v10, %s8294_s21 }
 0x51c   : > { %8024 = vrot.lane.b32.xlu0 %v11639_v4, %s8292_s13  ;;  %v5744_v4 = vsel %vm3827_vm13, %v5712_v39, %v7702_v20  ;;  %v7941_v20 = vunpack.i.l.bf16 %v11750_v35  ;;  %v7946_v35 = vunpack.i.l.bf16 %v11774_v61 }
 0x51d   : > { %v5713_v29 = vsel %vm1976_vm9, %v5681_v43, %v7781_v37  ;;  %v5714_v5 = vsel %vm1976_vm9, %v5682_v58, %v7782_v60  ;;  %v7955_v14 = vpop.permute.xlu1 %7954  ;;  %v7756_v60 = vunpack.i.l.bf16 %v11730_v9  ;;  %v7947_v9 = vunpack.i.h.bf16 %v11774_v61 }
 0x51e   : > { %v7785_v31 = vpop.permute.xlu0 %7784  ;;  %v7957_v8 = vunpack.i.h.bf16 %v7955_v14  ;;  %v7956_v15 = vunpack.i.l.bf16 %v7955_v14 }
 0x51f   : > { %v7787_v56 = vunpack.i.h.bf16 %v7785_v31  ;;  %v7786_v7 = vunpack.i.l.bf16 %v7785_v31  ;;  %8149 = vrot.lane.b32.xlu1 %v11714_v11, %s8295_s26 }
 0x520   : > { %8094 = vrot.lane.b32.xlu0 %v8093_v57, %s8292_s13  ;;  %v5632_v55 = vsel %vm1778_vm2, %v11722_v44, %v7957_v8 }
 0x521   : > { %v5745_v19 = vsel %vm3827_vm13, %v5713_v29, %v7786_v7  ;;  %v5746_v39 = vsel %vm3827_vm13, %v5714_v5, %v7787_v56  ;;  %v7960_v58 = vpop.permute.xlu1 %7959  ;;  %v5631_v29 = vsel %vm1778_vm2, %v11728_v17, %v7956_v15 }
 0x522   : > { %v5777_v37 = vsel %vm3860_vm14, %v5745_v19, %v7751_v45  ;;  %v5778_v36 = vsel %vm3860_vm14, %v5746_v39, %v7752_v23  ;;  %v7790_v43 = vpop.permute.xlu0 %7789  ;;  %v7962_v33 = vunpack.i.h.bf16 %v7960_v58  ;;  %v7961_v53 = vunpack.i.l.bf16 %v7960_v58  ;;  %v4558_v58 = vld [vmem:[#allocation3 + $0x6a] sm:$0xff] }
 0x523   : > { %v7792_v31 = vunpack.i.h.bf16 %v7790_v43  ;;  %v7791_v14 = vunpack.i.l.bf16 %v7790_v43  ;;  %8154 = vrot.lane.b32.xlu1 %v8093_v57, %s8296_s27  ;;  %v5809_v5 = vsel %vm3893_vm15, %v5777_v37, %v7756_v60  ;;  %v5810_v44 = vsel %vm3893_vm15, %v5778_v36, %v7757_v22  ;;  %v4557_v43 = vld [vmem:[#allocation3 + $0x62] sm:$0xff] }
 0x524   : > { %8099 = vrot.lane.b32.xlu0 %v11813_v52, %s8295_s26  ;;  %v7952_v23 = vunpack.i.h.bf16 %v11794_v46  ;;  %v7951_v45 = vunpack.i.l.bf16 %v11794_v46  ;;  %v5663_v56 = vsel %vm1844_vm5, %v5631_v29, %v7961_v53  ;;  %v5664_v61 = vsel %vm1844_vm5, %v5632_v55, %v7962_v33  ;;  %v4526_v33 = vld [vmem:[#allocation3 + $0x69] sm:$0xff] }
 0x525   : > { %v5695_v7 = vsel %vm1910_vm7, %v5663_v56, %v7941_v20  ;;  %v5696_v17 = vsel %vm1910_vm7, %v5664_v61, %v7942_v48  ;;  %v11849_v15 = vpop.permute.xlu1 %7969  ;;  %v11852_v57 = vsel %vm3926_vm0, %v5809_v5, %v7761_v25  ;;  %v11855_v22 = vsel %vm3926_vm0, %v5810_v44, %v7762_v51 }
 0x526   : > { %v7795_v8 = vpop.permute.xlu0 %7794  ;;  %v5775_v60 = vsel %vm3860_vm14, %v5743_v34, %v7791_v14  ;;  %v5776_v46 = vsel %vm3860_vm14, %v5744_v4, %v7792_v31  ;;  %v5727_v48 = vsel %vm1976_vm9, %v5695_v7, %v7946_v35  ;;  %v5728_v25 = vsel %vm1976_vm9, %v5696_v17, %v7947_v9  ;;  %v4525_v4 = vld [vmem:[#allocation3 + $0x61] sm:$0xff] }
 0x527   : > { %v7797_v53 = vunpack.i.h.bf16 %v7795_v8  ;;  %v7796_v19 = vunpack.i.l.bf16 %v7795_v8  ;;  %8159 = vrot.lane.b32.xlu1 %v11706_v10, %s8297_s16  ;;  %v11869_v39 = vsel %vm3827_vm13, %v5727_v48, %v7951_v45  ;;  %v8118_v36 = vpack.i.bf16 %v4526_v33, %v4525_v4  ;;  %v4459_v8 = vld [vmem:[#allocation3 + $0x32] sm:$0xff] }
 0x528   : > { %8109 = vrot.lane.b32.xlu0 %v8108_v32, %s8296_s27  ;;  %v11872_v32 = vsel %vm3827_vm13, %v5728_v25, %v7952_v23  ;;  %v8128_v5 = vpack.i.bf16 %v4558_v58, %v4557_v43  ;;  %v4428_v23 = vld [vmem:[#allocation3 + $0x39] sm:$0xff]  ;;  %v7772_v51 = vunpack.i.h.bf16 %v11685_v1 }
 0x529   : > { %v5807_v20 = vsel %vm3893_vm15, %v5775_v60, %v7796_v19  ;;  %v5808_v34 = vsel %vm3893_vm15, %v5776_v46, %v7797_v53  ;;  %v11874_v10 = vpop.permute.xlu1 %7984  ;;  %v7847_v60 = vunpack.i.h.bf16 %v11697_v59  ;;  %v7846_v46 = vunpack.i.l.bf16 %v11697_v59  ;;  %v4313_v53 = vld [vmem:[#allocation3 + $0xc0] sm:$0xff]  ;;  %v4314_v19 = vld [vmem:[#allocation3 + $0xc8] sm:$0xff] }
 0x52a   : > { %v7800_v37 = vpop.permute.xlu0 %7799  ;;  %v4460_v25 = vld [vmem:[#allocation3 + $0x3a] sm:$0xff] }
 0x52b   : > { %v7802_v55 = vunpack.i.h.bf16 %v7800_v37  ;;  %v7801_v9 = vunpack.i.l.bf16 %v7800_v37  ;;  %8164 = vrot.lane.b32.xlu1 %v11714_v11, %s8298_s19  ;;  %v4427_v11 = vld [vmem:[#allocation3 + $0x31] sm:$0xff]  ;;  %v5624_v43 = vsel %vm1778_vm2, %v11608_v54, %v7847_v60  ;;  %v5623_v58 = vsel %vm1778_vm2, %v11612_v63, %v7846_v46  ;;  %v4539_v63 = vld [vmem:[#allocation3 + $0x109] sm:$0xff] }
 0x52c   : > { %8119 = vrot.lane.b32.xlu0 %v8118_v36, %s8297_s16  ;;  %v11894_v17 = vpack.i.bf16 %v4428_v23, %v4427_v11  ;;  %v7816_v54 = vunpack.i.l.bf16 %v11691_v27 }
 0x52d   : > { %v11880_v31 = vsel %vm3926_vm0, %v5807_v20, %v7801_v9  ;;  %v11883_v14 = vsel %vm3926_vm0, %v5808_v34, %v7802_v55  ;;  %v11885_v29 = vpop.permute.xlu1 %7989  ;;  %v7852_v20 = vunpack.i.h.bf16 %v11704_v6  ;;  %v7851_v34 = vunpack.i.l.bf16 %v11704_v6 }
 0x52e   : > { %12867 = vst [vmem:[#allocation45_spill] sm:$0xff] %v11880_v31  ;;  %v7805_v35 = vpop.permute.xlu0 %7804  ;;  %v11914_v6 = vpack.i.bf16 %v4460_v25, %v4459_v8  ;;  %v4491_v8 = vld [vmem:[#allocation3 + $0x48] sm:$0xff]  ;;  %v7991_v31 = vunpack.i.l.bf16 %v11885_v29 }
 0x52f   : > { %v7807_v45 = vunpack.i.h.bf16 %v7805_v35  ;;  %v7806_v56 = vunpack.i.l.bf16 %v7805_v35  ;;  %8169 = vrot.lane.b32.xlu1 %v11669_v47, %s8294_s21  ;;  %v4492_v35 = vld [vmem:[#allocation3 + $0x50] sm:$0xff]  ;;  %v5655_v23 = vsel %vm1844_vm5, %v5623_v58, %v7851_v34 }
 0x530   : > { %8129 = vrot.lane.b32.xlu0 %v8128_v5, %s8298_s19  ;;  %v4540_v5 = vld [vmem:[#allocation3 + $0x111] sm:$0xff]  ;;  %v4523_v58 = vld [vmem:[#allocation3 + $0x49] sm:$0xff] }
 0x531   : > { %v11892_v7 = vpop.permute.xlu1 %7994  ;;  %v5626_v4 = vsel %vm1778_vm2, %v4314_v19, %v7807_v45  ;;  %v5625_v37 = vsel %vm1778_vm2, %v4313_v53, %v7806_v56  ;;  %v5656_v45 = vsel %vm1844_vm5, %v5624_v43, %v7852_v20  ;;  %v8183_v53 = vpack.i.bf16 %v4492_v35, %v4491_v8  ;;  %v4524_v34 = vld [vmem:[#allocation3 + $0x51] sm:$0xff] }
 0x532   : > { %v7810_v61 = vpop.permute.xlu0 %7809  ;;  %v8198_v19 = vpack.i.bf16 %v4540_v5, %v4539_v63 }
 0x533   : > { %v7812_v33 = vunpack.i.h.bf16 %v7810_v61  ;;  %v7811_v48 = vunpack.i.l.bf16 %v7810_v61  ;;  %8179 = vrot.lane.b32.xlu1 %v11678_v49, %s8295_s26  ;;  %v7817_v61 = vunpack.i.h.bf16 %v11691_v27 }
 0x534   : > { %8139 = vrot.lane.b32.xlu0 %v11894_v17, %s8294_s21 }
 0x535   : > { %v11907_v59 = vsel %vm1844_vm5, %v5625_v37, %v7811_v48  ;;  %v11910_v36 = vsel %vm1844_vm5, %v5626_v4, %v7812_v33  ;;  %v11912_v9 = vpop.permute.xlu1 %7999  ;;  %v5687_v33 = vsel %vm1910_vm7, %v5655_v23, %v7816_v54  ;;  %v5688_v48 = vsel %vm1910_vm7, %v5656_v45, %v7817_v61  ;;  %v4571_v4 = vld [vmem:[#allocation3 + $0x10a] sm:$0xff]  ;;  %v4426_v61 = vld [vmem:[#allocation3 + $0x21] sm:$0xff] }
 0x536   : > { %v7820_v55 = vpop.permute.xlu0 %7819  ;;  %v8193_v23 = vpack.i.bf16 %v4524_v34, %v4523_v58  ;;  %v4457_v54 = vld [vmem:[#allocation3 + $0x1a] sm:$0xff] }
 0x537   : > { %v7822_v56 = vunpack.i.h.bf16 %v7820_v55  ;;  %v7821_v11 = vunpack.i.l.bf16 %v7820_v55  ;;  %8189 = vrot.lane.b32.xlu1 %v11734_v12, %s8296_s27  ;;  %v4572_v12 = vld [vmem:[#allocation3 + $0x112] sm:$0xff] }
 0x538   : > { %8174 = vrot.lane.b32.xlu0 %v11914_v6, %s8295_s26  ;;  %v8208_v45 = vpack.i.bf16 %v4572_v12, %v4571_v4  ;;  %v4425_v4 = vld [vmem:[#allocation3 + $0x19] sm:$0xff]  ;;  %v11957_v12 = vld [vmem:[#allocation3 + $0xf0] sm:$0xff] }
 0x539   : > { %v11928_v46 = vpop.permute.xlu1 %8004  ;;  %v5719_v37 = vsel %vm1976_vm9, %v5687_v33, %v7821_v11  ;;  %v5720_v27 = vsel %vm1976_vm9, %v5688_v48, %v7822_v56  ;;  %v4442_v11 = vld [vmem:[#allocation3 + $0xe1] sm:$0xff]  ;;  %v4441_v56 = vld [vmem:[#allocation3 + $0xd9] sm:$0xff] }
 0x53a   : > { %v7825_v60 = vpop.permute.xlu0 %7824  ;;  %v11952_v33 = vld [vmem:[#allocation3 + $0x38] sm:$0xff] }
 0x53b   : > { %v7827_v25 = vunpack.i.h.bf16 %v7825_v60  ;;  %v7826_v20 = vunpack.i.l.bf16 %v7825_v60  ;;  %8199 = vrot.lane.b32.xlu1 %v8198_v19, %s8297_s16  ;;  %v8218_v60 = vpack.i.bf16 %v4442_v11, %v4441_v56  ;;  %v11950_v19 = vld [vmem:[#allocation3 + $0xf8] sm:$0xff]  ;;  %v7736_v11 = vunpack.i.l.bf16 %v11667_v62 }
 0x53c   : > { %8184 = vrot.lane.b32.xlu0 %v8183_v53, %s8296_s27  ;;  %v4458_v53 = vld [vmem:[#allocation3 + $0x22] sm:$0xff]  ;;  %v4473_v48 = vld [vmem:[#allocation3 + $0xda] sm:$0xff]  ;;  %v7767_v56 = vunpack.i.h.bf16 %v11676_v42 }
 0x53d   : > { %v11937_v55 = vsel %vm3827_vm13, %v5719_v37, %v7826_v20  ;;  %v11940_v43 = vsel %vm3827_vm13, %v5720_v27, %v7827_v25  ;;  %v11944_v5 = vpop.permute.xlu1 %8009  ;;  %v4474_v25 = vld [vmem:[#allocation3 + $0xe2] sm:$0xff]  ;;  %v4489_v37 = vld [vmem:[#allocation3 + $0x30] sm:$0xff]  ;;  %v8213_v27 = vpack.i.bf16 %v4426_v61, %v4425_v4  ;;  %v8223_v58 = vpack.i.bf16 %v4458_v53, %v4457_v54 }
 0x53e   : > { %v11942_v35 = vpop.permute.xlu0 %7829  ;;  %v8228_v44 = vpack.i.bf16 %v4474_v25, %v4473_v48  ;;  %v7771_v61 = vunpack.i.l.bf16 %v11685_v1  ;;  %v7987_v4 = vunpack.i.h.bf16 %v11874_v10  ;;  %v7727_v48 = vunpack.i.h.bf16 %v11689_v38 }
 0x53f   : > { %8209 = vrot.lane.b32.xlu1 %v8208_v45, %s8298_s19  ;;  %v8233_v45 = vpack.i.bf16 %v11952_v33, %v4489_v37  ;;  %v7986_v33 = vunpack.i.l.bf16 %v11874_v10  ;;  %v7726_v1 = vunpack.i.l.bf16 %v11689_v38  ;;  %v7992_v10 = vunpack.i.h.bf16 %v11885_v29 }
 0x540   : > { %8194 = vrot.lane.b32.xlu0 %v8193_v23, %s8297_s16  ;;  %v8238_v23 = vpack.i.bf16 %v11950_v19, %v11957_v12  ;;  %v7997_v38 = vunpack.i.h.bf16 %v11892_v7 }
 0x541   : > { %v8015_v63 = vpop.permute.xlu1 %8014 }
 0x542   : > { %v11948_v8 = vpop.permute.xlu0 %7834  ;;  %v8017_v20 = vunpack.i.h.bf16 %v8015_v63  ;;  %v8016_v34 = vunpack.i.l.bf16 %v8015_v63  ;;  %v7766_v63 = vunpack.i.l.bf16 %v11676_v42 }
 0x543   : > { %8219 = vrot.lane.b32.xlu1 %v8218_v60, %s8294_s21 }
 0x544   : > { %8204 = vrot.lane.b32.xlu0 %v11813_v52, %s8298_s19  ;;  %v5636_v37 = vsel %vm1778_vm2, %v11626_v50, %v8017_v20  ;;  %v5635_v42 = vsel %vm1778_vm2, %v11631_v18, %v8016_v34 }
 0x545   : > { %v8020_v60 = vpop.permute.xlu1 %8019 }
 0x546   : > { %v11965_v52 = vpop.permute.xlu0 %7839  ;;  %v8022_v54 = vunpack.i.h.bf16 %v8020_v60  ;;  %v8021_v53 = vunpack.i.l.bf16 %v8020_v60 }
 0x547   : > { %8229 = vrot.lane.b32.xlu1 %v8228_v44, %s8295_s26  ;;  %v7732_v44 = vunpack.i.h.bf16 %v11695_v16 }
 0x548   : > { %8214 = vrot.lane.b32.xlu0 %v8213_v27, %s8294_s21  ;;  %v5667_v25 = vsel %vm1844_vm5, %v5635_v42, %v8021_v53  ;;  %v5668_v60 = vsel %vm1844_vm5, %v5636_v37, %v8022_v54  ;;  %v7731_v27 = vunpack.i.l.bf16 %v11695_v16  ;;  %v7996_v53 = vunpack.i.l.bf16 %v11892_v7 }
 0x549   : > { %v5699_v50 = vsel %vm1910_vm7, %v5667_v25, %v7986_v33  ;;  %v5700_v18 = vsel %vm1910_vm7, %v5668_v60, %v7987_v4  ;;  %v11985_v34 = vpop.permute.xlu1 %8029  ;;  %v5620_v33 = vsel %vm1778_vm2, %v11543_v26, %v7767_v56  ;;  %v5619_v16 = vsel %vm1778_vm2, %v11548_v30, %v7766_v63  ;;  %v8272_v25 = vld [vmem:[#allocation3 + $0x98] sm:$0xff]  ;;  %v8273_v60 = vld [vmem:[#allocation3 + $0x90] sm:$0xff] }
 0x54a   : > { %v7855_v20 = vpop.permute.xlu0 %7854  ;;  %v5731_v29 = vsel %vm1976_vm9, %v5699_v50, %v7991_v31  ;;  %v5732_v4 = vsel %vm1976_vm9, %v5700_v18, %v7992_v10  ;;  %v5622_v31 = vsel %vm1778_vm2, %v8272_v25, %v7727_v48  ;;  %v5621_v10 = vsel %vm1778_vm2, %v8273_v60, %v7726_v1 }
 0x54b   : > { %v7857_v54 = vunpack.i.h.bf16 %v7855_v20  ;;  %v7856_v37 = vunpack.i.l.bf16 %v7855_v20  ;;  %8239 = vrot.lane.b32.xlu1 %v8238_v23, %s8296_s27  ;;  %v12000_v42 = vsel %vm3827_vm13, %v5731_v29, %v7996_v53  ;;  %v12003_v7 = vsel %vm3827_vm13, %v5732_v4, %v7997_v38 }
 0x54c   : > { %8224 = vrot.lane.b32.xlu0 %v8223_v58, %s8295_s26  ;;  %v5651_v58 = vsel %vm1844_vm5, %v5619_v16, %v7771_v61  ;;  %v5652_v23 = vsel %vm1844_vm5, %v5620_v33, %v7772_v51  ;;  %v5653_v30 = vsel %vm1844_vm5, %v5621_v10, %v7731_v27  ;;  %v5654_v63 = vsel %vm1844_vm5, %v5622_v31, %v7732_v44  ;;  %v12025_v44 = vld [vmem:[%s12425_s5] sm:$0xf] }
 0x54d   : > { %v12009_v56 = vpop.permute.xlu1 %8034  ;;  %v7737_v20 = vunpack.i.h.bf16 %v11667_v62  ;;  %v5685_v61 = vsel %vm1910_vm7, %v5653_v30, %v7856_v37  ;;  %v5686_v51 = vsel %vm1910_vm7, %v5654_v63, %v7857_v54  ;;  %v5683_v48 = vsel %vm1910_vm7, %v5651_v58, %v7736_v11  ;;  %6229 = vmatprep.mubr.msk.bf16.mxu0 %vm4018_vm1, %v12025_v44 }
 0x54e   : > { %v7860_v26 = vpop.permute.xlu0 %7859  ;;  %v7742_v62 = vunpack.i.h.bf16 %v11702_v40  ;;  %v7741_v38 = vunpack.i.l.bf16 %v11702_v40  ;;  %v7747_v53 = vunpack.i.h.bf16 %v11712_v2  ;;  %v7746_v33 = vunpack.i.l.bf16 %v11712_v2 }
 0x54f   : > { %v7862_v50 = vunpack.i.h.bf16 %v7860_v26  ;;  %v7861_v18 = vunpack.i.l.bf16 %v7860_v26  ;;  %8249 = vrot.lane.b32.xlu1 %v11669_v47, %s8297_s16  ;;  %v7832_v16 = vunpack.i.h.bf16 %v11942_v35  ;;  %v7831_v58 = vunpack.i.l.bf16 %v11942_v35 }
 0x550   : > { %8234 = vrot.lane.b32.xlu0 %v8233_v45, %s8296_s27  ;;  %v5684_v45 = vsel %vm1910_vm7, %v5652_v23, %v7737_v20  ;;  %v7837_v40 = vunpack.i.h.bf16 %v11948_v8  ;;  %v7836_v35 = vunpack.i.l.bf16 %v11948_v8  ;;  %v7842_v60 = vunpack.i.h.bf16 %v11965_v52 }
 0x551   : > { %v5717_v1 = vsel %vm1976_vm9, %v5685_v61, %v7861_v18  ;;  %v5718_v27 = vsel %vm1976_vm9, %v5686_v51, %v7862_v50  ;;  %v8040_v54 = vpop.permute.xlu1 %8039  ;;  %v7841_v30 = vunpack.i.l.bf16 %v11965_v52  ;;  %v5715_v8 = vsel %vm1976_vm9, %v5683_v48, %v7741_v38 }
 0x552   : > { %v7865_v47 = vpop.permute.xlu0 %7864  ;;  %v8042_v29 = vunpack.i.h.bf16 %v8040_v54  ;;  %v8041_v4 = vunpack.i.l.bf16 %v8040_v54  ;;  %v5716_v61 = vsel %vm1976_vm9, %v5684_v45, %v7742_v62  ;;  %v8299_v52 = vmov 0  }
 0x553   : > { %v7867_v11 = vunpack.i.h.bf16 %v7865_v47  ;;  %v7866_v37 = vunpack.i.l.bf16 %v7865_v47  ;;  %8259 = vrot.lane.b32.xlu1 %v11678_v49, %s8298_s19  ;;  %8263 = vset.pattern.permute.xlu0 %v8299_v52  ;;  %v5748_v47 = vsel %vm3827_vm13, %v5716_v61, %v7747_v53 }
 0x554   : > { %8244 = vrot.lane.b32.xlu0 %v11894_v17, %s8297_s16  ;;  %v5791_v31 = vsel %vm3860_vm14, %v11869_v39, %v8041_v4  ;;  %v5792_v2 = vsel %vm3860_vm14, %v11872_v32, %v8042_v29 }
 0x555   : > { %v5749_v23 = vsel %vm3827_vm13, %v5717_v1, %v7866_v37  ;;  %v5750_v25 = vsel %vm3827_vm13, %v5718_v27, %v7867_v11  ;;  %v8045_v49 = vpop.permute.xlu1 %8044  ;;  %v5881_v27 = vld [vmem:[%s12426_s6] sm:$0xff] }
 0x556   : > { %v5781_v10 = vsel %vm3860_vm14, %v5749_v23, %v7831_v58  ;;  %v5782_v17 = vsel %vm3860_vm14, %v5750_v25, %v7832_v16  ;;  %v7870_v26 = vpop.permute.xlu0 %7869  ;;  %v8047_v50 = vunpack.i.h.bf16 %v8045_v49  ;;  %v8046_v18 = vunpack.i.l.bf16 %v8045_v49 }
 0x557   : > { %v7872_v63 = vunpack.i.h.bf16 %v7870_v26  ;;  %v7871_v20 = vunpack.i.l.bf16 %v7870_v26  ;;  %v5813_v39 = vsel %vm3893_vm15, %v5781_v10, %v7836_v35  ;;  %v5814_v32 = vsel %vm3893_vm15, %v5782_v17, %v7837_v40 }
 0x558   : > { %8254 = vrot.lane.b32.xlu0 %v11914_v6, %s8298_s19  ;;  %v5823_v51 = vsel %vm3893_vm15, %v5791_v31, %v8046_v18  ;;  %v5824_v1 = vsel %vm3893_vm15, %v5792_v2, %v8047_v50  ;;  %v5747_v6 = vsel %vm3827_vm13, %v5715_v8, %v7746_v33  ;;  %v12066_v48 = vsel %vm3926_vm0, %v5813_v39, %v7841_v30 }
 0x559   : > { %v8050_v11 = vpop.permute.xlu1 %8049  ;;  %v12069_v62 = vsel %vm3926_vm0, %v5814_v32, %v7842_v60  ;;  %v5779_v4 = vsel %vm3860_vm14, %v5747_v6, %v7871_v20  ;;  %v5780_v16 = vsel %vm3860_vm14, %v5748_v47, %v7872_v63 }
 0x55a   : > { %v7875_v54 = vpop.permute.xlu0 %7874  ;;  %v8052_v37 = vunpack.i.h.bf16 %v8050_v11  ;;  %v8051_v29 = vunpack.i.l.bf16 %v8050_v11  ;;  %v5871_v33 = vpack.c.bf16 %v12069_v62, %v12066_v48 }
 0x55b   : > { %v7877_v38 = vunpack.i.h.bf16 %v7875_v54  ;;  %v7876_v45 = vunpack.i.l.bf16 %v7875_v54 }
 0x55c   : > { %5884 = vperm.xlu0 %8263, %v5881_v27   ;;  %v12078_v40 = vsel %vm3926_vm0, %v5823_v51, %v8051_v29  ;;  %v12081_v23 = vsel %vm3926_vm0, %v5824_v1, %v8052_v37 }
 0x55d   : > { %v5811_v53 = vsel %vm3893_vm15, %v5779_v4, %v7876_v45  ;;  %v5812_v58 = vsel %vm3893_vm15, %v5780_v16, %v7877_v38  ;;  %v5876_v25 = vpack.c.bf16 %v12081_v23, %v12078_v40  ;;  %v8055_v2 = vpop.permute.xlu1 %8054 }
 0x55e   : > { %v7880_v31 = vpop.permute.xlu0 %7879 }
 0x55f   : > { %v7882_v35 = vunpack.i.h.bf16 %v7880_v31  ;;  %v7881_v60 = vunpack.i.l.bf16 %v7880_v31 }
 0x561   : > { %v12086_v10 = vsel %vm3926_vm0, %v5811_v53, %v7881_v60  ;;  %v12089_v17 = vsel %vm3926_vm0, %v5812_v58, %v7882_v35  ;;  %v8060_v49 = vpop.permute.xlu1 %8059 }
 0x562   : > { %v7885_v26 = vpop.permute.xlu0 %7884  ;;  %v5870_v30 = vpack.c.bf16 %v12089_v17, %v12086_v10  ;;  %v8275_v17 = vld [vmem:[#allocation3 + $0x38] sm:$0xff] }
 0x563   : > { %v7887_v63 = vunpack.i.h.bf16 %v7885_v26  ;;  %v7886_v50 = vunpack.i.l.bf16 %v7885_v26 }
 0x565   : > { %v8065_v20 = vpop.permute.xlu1 %8064  ;;  %v5630_v8 = vsel %vm1778_vm2, %v11950_v19, %v7887_v63  ;;  %v5629_v61 = vsel %vm1778_vm2, %v11957_v12, %v7886_v50 }
 0x566   : > { %v7890_v18 = vpop.permute.xlu0 %7889 }
 0x567   : > { %v7892_v39 = vunpack.i.h.bf16 %v7890_v18  ;;  %v7891_v32 = vunpack.i.l.bf16 %v7890_v18 }
 0x569   : > { %v12098_v51 = vsel %vm1844_vm5, %v5629_v61, %v7891_v32  ;;  %v12101_v1 = vsel %vm1844_vm5, %v5630_v8, %v7892_v39  ;;  %v12103_v27 = vpop.permute.xlu1 %8069 }
 0x56a   : > { %v7910_v52 = vpop.permute.xlu0 %7909 }
 0x56b   : > { %v7912_v6 = vunpack.i.h.bf16 %v7910_v52  ;;  %v7911_v47 = vunpack.i.l.bf16 %v7910_v52 }
 0x56d   : > { %v12107_v54 = vsel %vm1910_vm7, %v11907_v59, %v7911_v47  ;;  %v12111_v19 = vsel %vm1910_vm7, %v11910_v36, %v7912_v6  ;;  %v12113_v11 = vpop.permute.xlu1 %8074  ;;  %v8057_v6 = vunpack.i.h.bf16 %v8055_v2 }
 0x56e   : > { %v7915_v12 = vpop.permute.xlu0 %7914 }
 0x56f   : > { %v7917_v37 = vunpack.i.h.bf16 %v7915_v12  ;;  %v7916_v29 = vunpack.i.l.bf16 %v7915_v12 }
 0x571   : > { %v12115_v45 = vpop.permute.xlu1 %8079  ;;  %v5783_v59 = vsel %vm3860_vm14, %v11937_v55, %v7916_v29  ;;  %v5784_v31 = vsel %vm3860_vm14, %v11940_v43, %v7917_v37  ;;  %v8056_v43 = vunpack.i.l.bf16 %v8055_v2  ;;  %v8061_v37 = vunpack.i.l.bf16 %v8060_v49 }
 0x572   : > { %v7920_v38 = vpop.permute.xlu0 %7919 }
 0x573   : > { %v7922_v4 = vunpack.i.h.bf16 %v7920_v38  ;;  %v7921_v16 = vunpack.i.l.bf16 %v7920_v38  ;;  %v8062_v38 = vunpack.i.h.bf16 %v8060_v49 }
 0x575   : > { %v8085_v58 = vpop.permute.xlu1 %8084  ;;  %v5815_v60 = vsel %vm3893_vm15, %v5783_v59, %v7921_v16  ;;  %v5816_v26 = vsel %vm3893_vm15, %v5784_v31, %v7922_v4  ;;  %v8067_v16 = vunpack.i.h.bf16 %v8065_v20 }
 0x576   : > { %v7925_v53 = vpop.permute.xlu0 %7924  ;;  %v8087_v63 = vunpack.i.h.bf16 %v8085_v58  ;;  %v8086_v50 = vunpack.i.l.bf16 %v8085_v58 }
 0x577   : > { %v7927_v36 = vunpack.i.h.bf16 %v7925_v53  ;;  %v7926_v35 = vunpack.i.l.bf16 %v7925_v53  ;;  %v8066_v53 = vunpack.i.l.bf16 %v8065_v20 }
 0x578   : > { %v5640_v47 = vsel %vm1778_vm2, %v11796_v41, %v8087_v63  ;;  %v5639_v12 = vsel %vm1778_vm2, %v11806_v28, %v8086_v50  ;;  %v7637_v41 = vunpack.i.h.bf16 %v11589_v0  ;;  %v7647_v63 = vunpack.i.h.bf16 %v11604_v21 }
 0x579   : > { %v5847_v18 = vsel %vm3926_vm0, %v5815_v60, %v7926_v35  ;;  %v5848_v39 = vsel %vm3926_vm0, %v5816_v26, %v7927_v36  ;;  %v8090_v8 = vpop.permute.xlu1 %8089  ;;  %v7636_v36 = vunpack.i.l.bf16 %v11589_v0  ;;  %v7642_v35 = vunpack.i.h.bf16 %v11594_v3 }
 0x57a   : > { %v12125_v32 = vpop.permute.xlu0 %7929  ;;  %v5872_v61 = vpack.c.bf16 %v5848_v39, %v5847_v18  ;;  %v8092_v55 = vunpack.i.h.bf16 %v8090_v8  ;;  %v8091_v52 = vunpack.i.l.bf16 %v8090_v8  ;;  %v7641_v60 = vunpack.i.l.bf16 %v11594_v3 }
 0x57b   : > { %v7646_v0 = vunpack.i.l.bf16 %v11604_v21  ;;  %v7972_v39 = vunpack.i.h.bf16 %v11849_v15 }
 0x57c   : > { %v5671_v29 = vsel %vm1844_vm5, %v5639_v12, %v8091_v52  ;;  %v5672_v4 = vsel %vm1844_vm5, %v5640_v47, %v8092_v55 }
 0x57d   : > { %v5703_v58 = vsel %vm1910_vm7, %v5671_v29, %v8056_v43  ;;  %v5704_v59 = vsel %vm1910_vm7, %v5672_v4, %v8057_v6  ;;  %v8105_v2 = vpop.permute.xlu1 %8104  ;;  %v7971_v6 = vunpack.i.l.bf16 %v11849_v15  ;;  %v8002_v43 = vunpack.i.h.bf16 %v11912_v9 }
 0x57e   : > { %v12135_v31 = vpop.permute.xlu0 %7934  ;;  %v5735_v28 = vsel %vm1976_vm9, %v5703_v58, %v8061_v37  ;;  %v5736_v49 = vsel %vm1976_vm9, %v5704_v59, %v8062_v38  ;;  %v8001_v38 = vunpack.i.l.bf16 %v11912_v9  ;;  %v8107_v37 = vunpack.i.h.bf16 %v8105_v2 }
 0x57f   : > { %v5767_v20 = vsel %vm3827_vm13, %v5735_v28, %v8066_v53  ;;  %v5768_v26 = vsel %vm3827_vm13, %v5736_v49, %v8067_v16  ;;  %v8106_v4 = vunpack.i.l.bf16 %v8105_v2  ;;  %v8007_v15 = vunpack.i.h.bf16 %v11928_v46 }
 0x580   : > { %v5799_v50 = vsel %vm3860_vm14, %v5767_v20, %v7636_v36  ;;  %v5800_v18 = vsel %vm3860_vm14, %v5768_v26, %v7637_v41  ;;  %v5912_v49 = vsel %vm4018_vm1, %v5872_v61, 0  ;;  %v8012_v20 = vunpack.i.h.bf16 %v11944_v5 }
 0x581   : > { %v8115_v55 = vpop.permute.xlu1 %8114  ;;  %v5831_v52 = vsel %vm3893_vm15, %v5799_v50, %v7641_v60  ;;  %v5832_v3 = vsel %vm3893_vm15, %v5800_v18, %v7642_v35  ;;  %v8011_v50 = vunpack.i.l.bf16 %v11944_v5  ;;  %v8032_v18 = vunpack.i.h.bf16 %v11985_v34 }
 0x582   : > { %v7965_v8 = vpop.permute.xlu0 %7964  ;;  %v5863_v29 = vsel %vm3926_vm0, %v5831_v52, %v7646_v0  ;;  %v5864_v21 = vsel %vm3926_vm0, %v5832_v3, %v7647_v63  ;;  %v8117_v35 = vunpack.i.h.bf16 %v8115_v55  ;;  %v8116_v60 = vunpack.i.l.bf16 %v8115_v55 }
 0x583   : > { %v7967_v47 = vunpack.i.h.bf16 %v7965_v8  ;;  %v7966_v12 = vunpack.i.l.bf16 %v7965_v8  ;;  %v5880_v58 = vpack.c.bf16 %v5864_v21, %v5863_v29  ;;  %v8037_v8 = vunpack.i.h.bf16 %v12009_v56 }
 0x584   : > { %v7932_v55 = vunpack.i.h.bf16 %v12125_v32  ;;  %v7931_v52 = vunpack.i.l.bf16 %v12125_v32 }
 0x585   : > { %v5693_v16 = vsel %vm1910_vm7, %v12098_v51, %v7966_v12  ;;  %v5694_v53 = vsel %vm1910_vm7, %v12101_v1, %v7967_v47  ;;  %v8125_v28 = vpop.permute.xlu1 %8124  ;;  %6313 = vmatprep.subr.msk.bf16.mxu0 %vm4018_vm1, %v5880_v58  ;;  %v8006_v1 = vunpack.i.l.bf16 %v11928_v46  ;;  %v7937_v47 = vunpack.i.h.bf16 %v12135_v31 }
 0x586   : > { %v5725_v59 = vsel %vm1976_vm9, %v5693_v16, %v7971_v6  ;;  %v5726_v41 = vsel %vm1976_vm9, %v5694_v53, %v7972_v39  ;;  %v7975_v36 = vpop.permute.xlu0 %7974  ;;  %v8127_v26 = vunpack.i.h.bf16 %v8125_v28  ;;  %v8126_v63 = vunpack.i.l.bf16 %v8125_v28  ;;  %6214 = vmatpush3.bf16.xpose.msra.mxu0 %v5912_v49  ;;  %v4321_v49 = vld [vmem:[#allocation3 + $0x120] sm:$0xff] }
 0x587   : > { %v5757_v2 = vsel %vm3827_vm13, %v5725_v59, %v8106_v4  ;;  %v5758_v51 = vsel %vm3827_vm13, %v5726_v41, %v8107_v37  ;;  %v8031_v39 = vunpack.i.l.bf16 %v11985_v34  ;;  %v7936_v12 = vunpack.i.l.bf16 %v12135_v31 }
 0x588   : > { %v5789_v61 = vsel %vm3860_vm14, %v5757_v2, %v8116_v60  ;;  %v5790_v0 = vsel %vm3860_vm14, %v5758_v51, %v8117_v35  ;;  %v7977_v21 = vunpack.i.h.bf16 %v7975_v36  ;;  %v7976_v4 = vunpack.i.l.bf16 %v7975_v36  ;;  %v4322_v36 = vld [vmem:[#allocation3 + $0x128] sm:$0xff] }
 0x589   : > { %v8135_v6 = vpop.permute.xlu1 %8134  ;;  %v5821_v16 = vsel %vm3893_vm15, %v5789_v61, %v8126_v63  ;;  %v5822_v34 = vsel %vm3893_vm15, %v5790_v0, %v8127_v26  ;;  %v8036_v41 = vunpack.i.l.bf16 %v12009_v56  ;;  %v8072_v31 = vunpack.i.h.bf16 %v12103_v27  ;;  %v4325_v63 = vld [vmem:[#allocation3 + $0x150] sm:$0xff]  ;;  %v4326_v61 = vld [vmem:[#allocation3 + $0x158] sm:$0xff] }
 0x58a   : > { %v7980_v3 = vpop.permute.xlu0 %7979  ;;  %v8137_v37 = vunpack.i.h.bf16 %v8135_v6  ;;  %v8136_v29 = vunpack.i.l.bf16 %v8135_v6  ;;  %v8071_v28 = vunpack.i.l.bf16 %v12103_v27  ;;  %v5634_v51 = vsel %vm1778_vm2, %v4322_v36, %v7932_v55 }
 0x58b   : > { %v7982_v53 = vunpack.i.h.bf16 %v7980_v3  ;;  %v7981_v58 = vunpack.i.l.bf16 %v7980_v3  ;;  %v5633_v26 = vsel %vm1778_vm2, %v4321_v49, %v7931_v52  ;;  %v5666_v6 = vsel %vm1844_vm5, %v5634_v51, %v7937_v47 }
 0x58c   : > { %v12183_v59 = vsel %vm3926_vm0, %v5821_v16, %v8136_v29  ;;  %v12186_v32 = vsel %vm3926_vm0, %v5822_v34, %v8137_v37  ;;  %v5665_v56 = vsel %vm1844_vm5, %v5633_v26, %v7936_v12  ;;  %v5638_v27 = vsel %vm1778_vm2, %v4326_v61, %v7977_v21 }
 0x58d   : > { %v5875_v35 = vpack.c.bf16 %v12186_v32, %v12183_v59  ;;  %v8145_v2 = vpop.permute.xlu1 %8144  ;;  %v5637_v37 = vsel %vm1778_vm2, %v4325_v63, %v7976_v4  ;;  %v5670_v16 = vsel %vm1844_vm5, %v5638_v27, %v7982_v53  ;;  %v8076_v46 = vunpack.i.l.bf16 %v12113_v11 }
 0x58e   : > { %v8025_v60 = vpop.permute.xlu0 %8024  ;;  %v5669_v29 = vsel %vm1844_vm5, %v5637_v37, %v7981_v58  ;;  %v8147_v36 = vunpack.i.h.bf16 %v8145_v2  ;;  %v8146_v12 = vunpack.i.l.bf16 %v8145_v2  ;;  %v8081_v27 = vunpack.i.l.bf16 %v12115_v45 }
 0x58f   : > { %v8027_v0 = vunpack.i.h.bf16 %v8025_v60  ;;  %v8026_v3 = vunpack.i.l.bf16 %v8025_v60 }
 0x591   : > { %v5697_v55 = vsel %vm1910_vm7, %v5665_v56, %v8026_v3  ;;  %v5698_v52 = vsel %vm1910_vm7, %v5666_v6, %v8027_v0  ;;  %v8150_v47 = vpop.permute.xlu1 %8149  ;;  %v8082_v6 = vunpack.i.h.bf16 %v12115_v45 }
 0x592   : > { %v5729_v34 = vsel %vm1976_vm9, %v5697_v55, %v8031_v39  ;;  %v5730_v49 = vsel %vm1976_vm9, %v5698_v52, %v8032_v18  ;;  %v8095_v60 = vpop.permute.xlu0 %8094  ;;  %v8152_v26 = vunpack.i.h.bf16 %v8150_v47  ;;  %v8151_v53 = vunpack.i.l.bf16 %v8150_v47 }
 0x593   : > { %v5761_v21 = vsel %vm3827_vm13, %v5729_v34, %v8036_v41  ;;  %v5762_v4 = vsel %vm3827_vm13, %v5730_v49, %v8037_v8  ;;  %v8097_v51 = vunpack.i.h.bf16 %v8095_v60  ;;  %v8096_v58 = vunpack.i.l.bf16 %v8095_v60 }
 0x594   : > { %v5793_v63 = vsel %vm3860_vm14, %v5761_v21, %v8001_v38  ;;  %v5794_v18 = vsel %vm3860_vm14, %v5762_v4, %v8002_v43  ;;  %v5909_v60 = vsel %vm4018_vm1, %v5871_v33, 0 }
 0x595   : > { %v5701_v39 = vsel %vm1910_vm7, %v5669_v29, %v8096_v58  ;;  %v5702_v2 = vsel %vm1910_vm7, %v5670_v16, %v8097_v51  ;;  %v5825_v8 = vsel %vm3893_vm15, %v5793_v63, %v8006_v1  ;;  %v5826_v41 = vsel %vm3893_vm15, %v5794_v18, %v8007_v15  ;;  %v8155_v9 = vpop.permute.xlu1 %8154 }
 0x596   : > { %v5733_v61 = vsel %vm1976_vm9, %v5701_v39, %v8146_v12  ;;  %v5734_v38 = vsel %vm1976_vm9, %v5702_v2, %v8147_v36  ;;  %v12223_v0 = vpop.permute.xlu0 %8099  ;;  %v5857_v43 = vsel %vm3926_vm0, %v5825_v8, %v8011_v50  ;;  %v5858_v3 = vsel %vm3926_vm0, %v5826_v41, %v8012_v20  ;;  %v12868_v2 = vld [vmem:[#allocation15_spill] sm:$0xff] }
 0x597   : > { %v8077_v1 = vunpack.i.h.bf16 %v12113_v11  ;;  %v5765_v15 = vsel %vm3827_vm13, %v5733_v61, %v8151_v53  ;;  %v5766_v56 = vsel %vm3827_vm13, %v5734_v38, %v8152_v26  ;;  %v8157_v52 = vunpack.i.h.bf16 %v8155_v9 }
 0x598   : > { %v5797_v37 = vsel %vm3860_vm14, %v5765_v15, %v8071_v28  ;;  %v5798_v50 = vsel %vm3860_vm14, %v5766_v56, %v8072_v31  ;;  %v8156_v34 = vunpack.i.l.bf16 %v8155_v9  ;;  %v5877_v12 = vpack.c.bf16 %v5858_v3, %v5857_v43  ;;  %v12869_v43 = vld [vmem:[#allocation27_spill] sm:$0xff]  ;;  %v12871_v15 = vld [vmem:[#allocation26_spill] sm:$0xff] }
 0x599   : > { %v5829_v5 = vsel %vm3893_vm15, %v5797_v37, %v8076_v46  ;;  %v5830_v20 = vsel %vm3893_vm15, %v5798_v50, %v8077_v1  ;;  %v8160_v16 = vpop.permute.xlu1 %8159  ;;  %v5796_v21 = vsel %vm3860_vm14, %v12003_v7, %v8157_v52  ;;  %v7651_v7 = vunpack.i.l.bf16 %v11616_v24  ;;  %v12872_v37 = vld [vmem:[#allocation11_spill] sm:$0xff] }
 0x59a   : > { %v12241_v29 = vpop.permute.xlu0 %8109  ;;  %v5861_v11 = vsel %vm3926_vm0, %v5829_v5, %v8081_v27  ;;  %v5862_v55 = vsel %vm3926_vm0, %v5830_v20, %v8082_v6  ;;  %v8162_v49 = vunpack.i.h.bf16 %v8160_v16  ;;  %v8161_v36 = vunpack.i.l.bf16 %v8160_v16  ;;  %v8274_v6 = vld [vmem:[#allocation3 + $0x30] sm:$0xff]  ;;  %v8276_v16 = vld [vmem:[#allocation3 + $0x18] sm:$0xff] }
 0x59b   : > { %v5879_v45 = vpack.c.bf16 %v5862_v55, %v5861_v11  ;;  %v5795_v47 = vsel %vm3860_vm14, %v12000_v42, %v8156_v34  ;;  %v7652_v42 = vunpack.i.h.bf16 %v11616_v24  ;;  %v7657_v18 = vunpack.i.h.bf16 %v11622_v13  ;;  %v12870_v24 = vld [vmem:[#allocation25_spill] sm:$0xff]  ;;  %v8277_v34 = vld [vmem:[#allocation3 + $0x20] sm:$0xff] }
 0x59c   : > { %v5827_v58 = vsel %vm3893_vm15, %v5795_v47, %v8161_v36  ;;  %v5828_v26 = vsel %vm3893_vm15, %v5796_v21, %v8162_v49  ;;  %v7656_v39 = vunpack.i.l.bf16 %v11622_v13  ;;  %v7666_v8 = vunpack.i.l.bf16 %v12868_v2 }
 0x59d   : > { %6314 = vmatprep.subr.msk.bf16.mxu0 %vm4018_vm1, %v5879_v45  ;;  %v8165_v28 = vpop.permute.xlu1 %8164  ;;  %v5906_v38 = vsel %vm4018_vm1, %v5870_v30, 0  ;;  %v7667_v9 = vunpack.i.h.bf16 %v12868_v2  ;;  %v7716_v3 = vunpack.i.l.bf16 %v12869_v43  ;;  %v7672_v1 = vunpack.i.h.bf16 %v12870_v24 }
 0x59e   : > { %v12246_v31 = vpop.permute.xlu0 %8119  ;;  %v8167_v4 = vunpack.i.h.bf16 %v8165_v28  ;;  %v8166_v51 = vunpack.i.l.bf16 %v8165_v28  ;;  %6216 = vmatpush3.bf16.xpose.msra.mxu0 %v5909_v60  ;;  %v7671_v46 = vunpack.i.l.bf16 %v12870_v24  ;;  %v7717_v13 = vunpack.i.h.bf16 %v12869_v43  ;;  %v12876_v24 = vld [vmem:[#allocation44_spill] sm:$0xff] }
 0x59f   : > { %v7721_v56 = vunpack.i.l.bf16 %v12871_v15  ;;  %v5613_v10 = vsel %vm1778_vm2, %v8274_v6, %v7651_v7  ;;  %v5614_v30 = vsel %vm1778_vm2, %v8275_v17, %v7652_v42  ;;  %v7722_v27 = vunpack.i.h.bf16 %v12871_v15 }
 0x5a0   : > { %v5859_v53 = vsel %vm3926_vm0, %v5827_v58, %v8166_v51  ;;  %v5860_v63 = vsel %vm3926_vm0, %v5828_v26, %v8167_v4  ;;  %v7661_v50 = vunpack.i.l.bf16 %v12872_v37  ;;  %v5645_v5 = vsel %vm1844_vm5, %v5613_v10, %v7656_v39 }
 0x5a1   : > { %v5878_v48 = vpack.c.bf16 %v5860_v63, %v5859_v53  ;;  %v12262_v33 = vpop.permute.xlu1 %8169  ;;  %v5646_v20 = vsel %vm1844_vm5, %v5614_v30, %v7657_v18  ;;  %v5611_v11 = vsel %vm1778_vm2, %v8276_v16, %v7666_v8  ;;  %v5612_v49 = vsel %vm1778_vm2, %v8277_v34, %v7667_v9  ;;  %v12874_v18 = vld [vmem:[#allocation45_spill] sm:$0xff] }
 0x5a2   : > { %v12260_v62 = vpop.permute.xlu0 %8129  ;;  %v5677_v36 = vsel %vm1910_vm7, %v5645_v5, %v7716_v3  ;;  %v8102_v45 = vunpack.i.h.bf16 %v12223_v0  ;;  %v5643_v28 = vsel %vm1844_vm5, %v5611_v11, %v7671_v46  ;;  %v5644_v60 = vsel %vm1844_vm5, %v5612_v49, %v7672_v1  ;;  %v12877_v46 = vld [vmem:[#allocation43_spill] sm:$0xff] }
 0x5a3   : > { %6315 = vmatprep.subr.msk.bf16.mxu0 %vm4018_vm1, %v5878_v48  ;;  %v5678_v47 = vsel %vm1910_vm7, %v5646_v20, %v7717_v13  ;;  %v5709_v21 = vsel %vm1976_vm9, %v5677_v36, %v7721_v56  ;;  %v8172_v51 = vunpack.i.h.bf16 %v12262_v33  ;;  %v8171_v58 = vunpack.i.l.bf16 %v12262_v33 }
 0x5a4   : > { %v5710_v4 = vsel %vm1976_vm9, %v5678_v47, %v7722_v27  ;;  %v12873_v26 = vpack.c.bf16 %v11855_v22, %v11852_v57  ;;  %v12875_v39 = vpack.c.bf16 %v11883_v14, %v12874_v18  ;;  %v8112_v22 = vunpack.i.h.bf16 %v12241_v29  ;;  %v4298_v18 = vld [vmem:[#allocation3 + $0x8] sm:$0xff] }
 0x5a5   : > { %v8180_v61 = vpop.permute.xlu1 %8179  ;;  %v5742_v33 = vsel %vm3827_vm13, %v5710_v4, %v8102_v45  ;;  %v8121_v9 = vunpack.i.l.bf16 %v12246_v31  ;;  %v8122_v14 = vunpack.i.h.bf16 %v12246_v31  ;;  %v8131_v3 = vunpack.i.l.bf16 %v12260_v62 }
 0x5a6   : > { %v12270_v41 = vpop.permute.xlu0 %8139  ;;  %6218 = vmatpush3.bf16.xpose.msra.mxu0 %v5906_v38  ;;  %v5903_v53 = vsel %vm4018_vm1, %v12873_v26, 0  ;;  %v8182_v63 = vunpack.i.h.bf16 %v8180_v61  ;;  %v8181_v48 = vunpack.i.l.bf16 %v8180_v61  ;;  %v5900_v2 = vsel %vm4018_vm1, %v12875_v39, 0 }
 0x5a7   : > { %6316 = vmatprep.subr.msk.bf16.mxu0 %vm4018_vm1, %v5877_v12  ;;  %v8101_v12 = vunpack.i.l.bf16 %v12223_v0  ;;  %v8111_v0 = vunpack.i.l.bf16 %v12241_v29  ;;  %v5723_v1 = vsel %vm1976_vm9, %v12876_v24, %v8171_v58  ;;  %v5724_v13 = vsel %vm1976_vm9, %v12877_v46, %v8172_v51  ;;  %v12878_v58 = vld [vmem:[#allocation35_spill] sm:$0xff] }
 0x5a8   : > { %v8132_v15 = vunpack.i.h.bf16 %v12260_v62  ;;  %v5755_v56 = vsel %vm3827_vm13, %v5723_v1, %v8181_v48  ;;  %v5756_v40 = vsel %vm3827_vm13, %v5724_v13, %v8182_v63  ;;  %v5774_v30 = vsel %vm3860_vm14, %v5742_v33, %v8112_v22 }
 0x5a9   : > { %v8190_v52 = vpop.permute.xlu1 %8189  ;;  %v5741_v8 = vsel %vm3827_vm13, %v5709_v21, %v8101_v12  ;;  %v5806_v20 = vsel %vm3893_vm15, %v5774_v30, %v8122_v14  ;;  %v8142_v49 = vunpack.i.h.bf16 %v12270_v41  ;;  %v8141_v36 = vunpack.i.l.bf16 %v12270_v41 }
 0x5aa   : > { %v12290_v55 = vpop.permute.xlu0 %8174  ;;  %v8192_v38 = vunpack.i.h.bf16 %v8190_v52  ;;  %v8191_v57 = vunpack.i.l.bf16 %v8190_v52  ;;  %v5773_v29 = vsel %vm3860_vm14, %v5741_v8, %v8111_v0  ;;  %v5838_v34 = vsel %vm3926_vm0, %v5806_v20, %v8132_v15 }
 0x5ab   : > { %v5805_v27 = vsel %vm3893_vm15, %v5773_v29, %v8121_v9  ;;  %v7662_v21 = vunpack.i.h.bf16 %v12872_v37  ;;  %v8177_v4 = vunpack.i.h.bf16 %v12290_v55  ;;  %v8176_v51 = vunpack.i.l.bf16 %v12290_v55  ;;  %v12880_v29 = vld [vmem:[#allocation51_spill] sm:$0xff] }
 0x5ac   : > { %v5787_v31 = vsel %vm3860_vm14, %v5755_v56, %v8191_v57  ;;  %v5788_v6 = vsel %vm3860_vm14, %v5756_v40, %v8192_v38  ;;  %v5837_v16 = vsel %vm3926_vm0, %v5805_v27, %v8131_v3  ;;  %v7627_v26 = vunpack.i.h.bf16 %v12878_v58  ;;  %v12879_v57 = vld [vmem:[#allocation14_spill] sm:$0xff] }
 0x5ad   : > { %v8200_v7 = vpop.permute.xlu1 %8199  ;;  %v5676_v63 = vsel %vm1910_vm7, %v5644_v60, %v7662_v21  ;;  %v7626_v8 = vunpack.i.l.bf16 %v12878_v58  ;;  %v7632_v22 = vunpack.i.h.bf16 %v12879_v57  ;;  %v7677_v15 = vunpack.i.h.bf16 %v12880_v29 }
 0x5ae   : > { %v12308_v42 = vpop.permute.xlu0 %8184  ;;  %6220 = vmatpush3.bf16.xpose.msra.mxu0 %v5903_v53  ;;  %v8202_v61 = vunpack.i.h.bf16 %v8200_v7  ;;  %v8201_v43 = vunpack.i.l.bf16 %v8200_v7  ;;  %v5675_v53 = vsel %vm1910_vm7, %v5643_v28, %v7661_v50  ;;  %v5867_v7 = vpack.c.bf16 %v5838_v34, %v5837_v16 }
 0x5af   : > { %6317 = vmatprep.subr.msk.bf16.mxu0 %vm4018_vm1, %v5876_v25  ;;  %v8187_v0 = vunpack.i.h.bf16 %v12308_v42  ;;  %v8186_v41 = vunpack.i.l.bf16 %v12308_v42  ;;  %v5707_v39 = vsel %vm1976_vm9, %v5675_v53, %v8141_v36  ;;  %v5708_v37 = vsel %vm1976_vm9, %v5676_v63, %v8142_v49 }
 0x5b0   : > { %v5819_v5 = vsel %vm3893_vm15, %v5787_v31, %v8201_v43  ;;  %v5820_v62 = vsel %vm3893_vm15, %v5788_v6, %v8202_v61  ;;  %v5739_v59 = vsel %vm3827_vm13, %v5707_v39, %v8176_v51  ;;  %v5740_v32 = vsel %vm3827_vm13, %v5708_v37, %v8177_v4 }
 0x5b1   : > { %v8210_v25 = vpop.permute.xlu1 %8209  ;;  %v5771_v60 = vsel %vm3860_vm14, %v5739_v59, %v8186_v41  ;;  %v5772_v33 = vsel %vm3860_vm14, %v5740_v32, %v8187_v0  ;;  %v5610_v38 = vsel %vm1778_vm2, %v4298_v18, %v7627_v26  ;;  %v7631_v43 = vunpack.i.l.bf16 %v12879_v57 }
 0x5b2   : > { %v8195_v23 = vpop.permute.xlu0 %8194  ;;  %v8212_v10 = vunpack.i.h.bf16 %v8210_v25  ;;  %v8211_v17 = vunpack.i.l.bf16 %v8210_v25  ;;  %v5897_v46 = vsel %vm4018_vm1, %v5867_v7, 0  ;;  %v7676_v56 = vunpack.i.l.bf16 %v12880_v29 }
 0x5b3   : > { %v8197_v48 = vunpack.i.h.bf16 %v8195_v23  ;;  %v8196_v55 = vunpack.i.l.bf16 %v8195_v23 }
 0x5b4   : > { %v5851_v11 = vsel %vm3926_vm0, %v5819_v5, %v8211_v17  ;;  %v5852_v52 = vsel %vm3926_vm0, %v5820_v62, %v8212_v10  ;;  %v5642_v17 = vsel %vm1844_vm5, %v5610_v38, %v7632_v22 }
 0x5b5   : > { %v5874_v45 = vpack.c.bf16 %v5852_v52, %v5851_v11  ;;  %v8220_v47 = vpop.permute.xlu1 %8219  ;;  %v5803_v9 = vsel %vm3893_vm15, %v5771_v60, %v8196_v55  ;;  %v5804_v61 = vsel %vm3893_vm15, %v5772_v33, %v8197_v48  ;;  %v5674_v20 = vsel %vm1910_vm7, %v5642_v17, %v7677_v15 }
 0x5b6   : > { %v8205_v12 = vpop.permute.xlu0 %8204  ;;  %6222 = vmatpush3.bf16.xpose.msra.mxu0 %v5900_v2  ;;  %v8222_v40 = vunpack.i.h.bf16 %v8220_v47  ;;  %v8221_v23 = vunpack.i.l.bf16 %v8220_v47 }
 0x5b7   : > { %6318 = vmatprep.subr.msk.bf16.mxu0 %vm4018_vm1, %v5875_v35  ;;  %v8207_v50 = vunpack.i.h.bf16 %v8205_v12  ;;  %v8206_v28 = vunpack.i.l.bf16 %v8205_v12  ;;  %v4297_v35 = vld [vmem:[#allocation3] sm:$0xff] }
 0x5b8   : > { %v5609_v13 = vsel %vm1778_vm2, %v4297_v35, %v7626_v8  ;;  %v5722_v11 = vsel %vm1976_vm9, %v12111_v19, %v8222_v40  ;;  %v5721_v52 = vsel %vm1976_vm9, %v12107_v54, %v8221_v23 }
 0x5b9   : > { %v8230_v42 = vpop.permute.xlu1 %8229  ;;  %v5835_v14 = vsel %vm3926_vm0, %v5803_v9, %v8206_v28  ;;  %v5836_v3 = vsel %vm3926_vm0, %v5804_v61, %v8207_v50  ;;  %v5641_v10 = vsel %vm1844_vm5, %v5609_v13, %v7631_v43 }
 0x5ba   : > { %v12361_v2 = vpop.permute.xlu0 %8214  ;;  %v8232_v25 = vunpack.i.h.bf16 %v8230_v42  ;;  %v8231_v31 = vunpack.i.l.bf16 %v8230_v42  ;;  %v5866_v6 = vpack.c.bf16 %v5836_v3, %v5835_v14  ;;  %v5673_v16 = vsel %vm1910_vm7, %v5641_v10, %v7676_v56 }
 0x5bb   : > { %v8217_v34 = vunpack.i.h.bf16 %v12361_v2 }
 0x5bc   : > { %v5753_v12 = vsel %vm3827_vm13, %v5721_v52, %v8231_v31  ;;  %v5754_v47 = vsel %vm3827_vm13, %v5722_v11, %v8232_v25  ;;  %v5894_v21 = vsel %vm4018_vm1, %v5866_v6, 0 }
 0x5bd   : > { %v8240_v1 = vpop.permute.xlu1 %8239  ;;  %v5706_v37 = vsel %vm1976_vm9, %v5674_v20, %v8217_v34 }
 0x5be   : > { %v8225_v24 = vpop.permute.xlu0 %8224  ;;  %6224 = vmatpush3.bf16.xpose.msra.mxu0 %v5897_v46  ;;  %v8242_v30 = vunpack.i.h.bf16 %v8240_v1  ;;  %v8241_v27 = vunpack.i.l.bf16 %v8240_v1 }
 0x5bf   : > { %6319 = vmatprep.subr.msk.bf16.mxu0 %vm4018_vm1, %v5874_v45  ;;  %v8216_v45 = vunpack.i.l.bf16 %v12361_v2  ;;  %v8227_v4 = vunpack.i.h.bf16 %v8225_v24  ;;  %v8226_v51 = vunpack.i.l.bf16 %v8225_v24 }
 0x5c0   : > { %v5785_v58 = vsel %vm3860_vm14, %v5753_v12, %v8241_v27  ;;  %v5786_v19 = vsel %vm3860_vm14, %v5754_v47, %v8242_v30 }
 0x5c1   : > { %v8250_v62 = vpop.permute.xlu1 %8249  ;;  %v5705_v39 = vsel %vm1976_vm9, %v5673_v16, %v8216_v45  ;;  %v5738_v42 = vsel %vm3827_vm13, %v5706_v37, %v8227_v4 }
 0x5c2   : > { %v8235_v5 = vpop.permute.xlu0 %8234  ;;  %v8252_v49 = vunpack.i.h.bf16 %v8250_v62  ;;  %v8251_v36 = vunpack.i.l.bf16 %v8250_v62  ;;  %v5737_v2 = vsel %vm3827_vm13, %v5705_v39, %v8226_v51 }
 0x5c3   : > { %v8237_v53 = vunpack.i.h.bf16 %v8235_v5  ;;  %v8236_v0 = vunpack.i.l.bf16 %v8235_v5 }
 0x5c4   : > { %v5817_v48 = vsel %vm3893_vm15, %v5785_v58, %v8251_v36  ;;  %v5818_v55 = vsel %vm3893_vm15, %v5786_v19, %v8252_v49 }
 0x5c5   : > { %v8260_v54 = vpop.permute.xlu1 %8259  ;;  %v5769_v32 = vsel %vm3860_vm14, %v5737_v2, %v8236_v0  ;;  %v5770_v35 = vsel %vm3860_vm14, %v5738_v42, %v8237_v53 }
 0x5c6   : > { %v8245_v26 = vpop.permute.xlu0 %8244  ;;  %v8262_v41 = vunpack.i.h.bf16 %v8260_v54  ;;  %v8261_v63 = vunpack.i.l.bf16 %v8260_v54  ;;  %6226 = vmatpush3.bf16.xpose.msra.mxu0 %v5894_v21 }
 0x5c7   : > { %v8247_v7 = vunpack.i.h.bf16 %v8245_v26  ;;  %v8246_v18 = vunpack.i.l.bf16 %v8245_v26 }
 0x5c8   : > { %v5849_v50 = vsel %vm3926_vm0, %v5817_v48, %v8261_v63  ;;  %v5850_v28 = vsel %vm3926_vm0, %v5818_v55, %v8262_v41 }
 0x5c9   : > { %v5873_v8 = vpack.c.bf16 %v5850_v28, %v5849_v50  ;;  %v5801_v38 = vsel %vm3893_vm15, %v5769_v32, %v8246_v18  ;;  %v5802_v57 = vsel %vm3893_vm15, %v5770_v35, %v8247_v7 }
 0x5ca   : > { %v8255_v59 = vpop.permute.xlu0 %8254 }
 0x5cb   : > { %v8257_v60 = vunpack.i.h.bf16 %v8255_v59  ;;  %v8256_v33 = vunpack.i.l.bf16 %v8255_v59  ;;  %6320 = vmatprep.subr.msk.bf16.mxu0 %vm4018_vm1, %v5873_v8 }
 0x5cd   : > { %v5833_v22 = vsel %vm3926_vm0, %v5801_v38, %v8256_v33  ;;  %v5834_v9 = vsel %vm3926_vm0, %v5802_v57, %v8257_v60 }
 0x5ce   : > { %v5865_v61 = vpack.c.bf16 %v5834_v9, %v5833_v22 }
 0x5d0   : > { %v5891_v43 = vsel %vm4018_vm1, %v5865_v61, 0 }
 0x5d1   : > { %6228 = vmatpush3.bf16.xpose.msra.mxu0 %v5891_v43 }
 0x5d7   : > { %v5885_v14 = vpop.permute.xlu0 %5884 }
 0x5d8   : > { %6230 = vmatmul.mubr.msk.bf16.vlgmr.msra.gmra.mxu0 %vm4018_vm1, %v12025_v44 }
 0x698   : > { %v5972_v3 = vpop.f32.mrf.mxu0 }
 0x699   : > { %v5973_v24 = vadd.f32 %v5972_v3, %v5885_v14 }
 0x69a   : > { %v5974_v1 = vpop.f32.mrf.mxu0 }
 0x69b   : > { %v5979_v46 = vmax.f32 %v5973_v24, 0.0  ;;  %v5975_v13 = vadd.f32 %v5974_v1, %v5885_v14 }
 0x69c   : > { %v5976_v29 = vpop.f32.mrf.mxu0 }
 0x69d   : > { %5981 = vst [vmem:[%s278_s28] sm:$0xff] %v5979_v46  ;;  %v5980_v15 = vmax.f32 %v5975_v13, 0.0 }
 0x69e   : > { %v5977_v56 = vpop.f32.mrf.mxu0 }
 0x69f   : > { %5982 = vst [vmem:[%s278_s28 + $0x8] sm:$0xff] %v5980_v15 }
 0x6a0 PF: > { %s17_s24 = sadd.s32 1, %s8284_s24  }
 0x6a1   : > { %p14_p4 = scmp.ge.s32.totalorder %s17_s24, 4  }
 0x6a3   :  { %16 = sbr.rel (!%p14_p4) target bundleno = 1 (0x1), region = 82 }

</bundles_post_ra>
